<compile_context>
chip_gen: v7x
topology: tpu7x:2x2x1
jax: 0.10.0
libtpu: 0.0.40
codegen_flags: <defaults>
</compile_context>

<pallas_src>
import math
import functools

import jax
import jax.numpy as jnp
from jax.experimental import pallas as pl
from jax.experimental.pallas import tpu as pltpu


def _layernorm(y, w, b, eps):
    mu = jnp.mean(y, axis=-1, keepdims=True)
    var = jnp.mean((y - mu) ** 2, axis=-1, keepdims=True)
    return (y - mu) * jax.lax.rsqrt(var + eps) * w + b


def _gelu_exact(y):
    # nn.GELU() default = exact erf-based GELU
    return 0.5 * y * (1.0 + jax.lax.erf(y * (1.0 / math.sqrt(2.0))))


def chessformer_layer_kernel(
    x_ref,
    wqkv_ref, bqkv_ref, ow_ref, ob_ref,
    ln1w_ref, ln1b_ref,
    f1w_ref, f1b_ref, f2w_ref, f2b_ref,
    ln2w_ref, ln2b_ref,
    o_ref,
    *, heads, dim_head, alpha, eps,
):
    tb, n, dim = x_ref.shape          # (TB, 64, dim) block of positions
    t = tb * n                        # total tokens this grid step
    inner = heads * dim_head
    scale = dim_head ** -0.5

    # Flatten positions: (TB, 64, dim) -> (TB*64, dim). Leading-dim merge only,
    # lane axis untouched, so this is layout-free.
    x = x_ref[...].reshape(t, dim)

    # --- fused Q/K/V projection: one tall matmul ---
    qkv = jnp.dot(x, wqkv_ref[...], preferred_element_type=jnp.float32) + bqkv_ref[...]
    qkv3 = qkv.reshape(tb, n, 3 * inner)   # split tokens back into (TB, 64, .)

    ow = ow_ref[...]                       # (inner, dim)

    # --- per-head attention (static unroll; heads is small) ---
    # Head outputs are folded directly into the output projection: no concat.
    attn_out = jnp.zeros((t, dim), jnp.float32)
    for h in range(heads):
        base = h * dim_head
        qh = qkv3[:, :, base:base + dim_head]                       # (TB, 64, dh)
        kh = qkv3[:, :, inner + base:inner + base + dim_head]       # (TB, 64, dh)
        vh = qkv3[:, :, 2 * inner + base:2 * inner + base + dim_head]

        # q . k^T without an explicit transpose: contract last dims directly.
        logits = jnp.einsum("bqd,bkd->bqk", qh, kh,
                            preferred_element_type=jnp.float32) * scale  # (TB,64,64)
        logits = logits - jnp.max(logits, axis=-1, keepdims=True)
        p = jnp.exp(logits)
        attn = p / jnp.sum(p, axis=-1, keepdims=True)

        oh = jnp.einsum("bqk,bkd->bqd", attn, vh,
                        preferred_element_type=jnp.float32)             # (TB,64,dh)

        # Accumulate this head's contribution to the output projection.
        attn_out = attn_out + jnp.dot(
            oh.reshape(t, dim_head), ow[base:base + dim_head, :],
            preferred_element_type=jnp.float32)

    attn_out = attn_out + ob_ref[...]

    # --- residual + LayerNorm 1 ---
    x1 = _layernorm(x + attn_out * alpha, ln1w_ref[...], ln1b_ref[...], eps)

    # --- FFN ---
    h1 = jnp.dot(x1, f1w_ref[...], preferred_element_type=jnp.float32) + f1b_ref[...]
    h1 = _gelu_exact(h1)
    h2 = jnp.dot(h1, f2w_ref[...], preferred_element_type=jnp.float32) + f2b_ref[...]

    # --- residual + LayerNorm 2 ---
    x2 = _layernorm(x1 + h2 * alpha, ln2w_ref[...], ln2b_ref[...], eps)

    o_ref[...] = x2.reshape(tb, n, dim)


def chessformer_layer(x, params, *, heads, dim_head, alpha=1.0, eps=1e-5, block_b=32):
    b, n, dim = x.shape
    assert n == 64, "Chessformer expects 64 squares."
    inner = heads * dim_head
    mlp_dim = params["f1w"].shape[1]

    # Fuse Q/K/V weights & biases in the wrapper (done once, outside the kernel).
    wqkv = jnp.concatenate([params["qw"], params["kw"], params["vw"]], axis=1)  # (dim, 3*inner)
    bqkv = jnp.concatenate([params["qb"], params["kb"], params["vb"]], axis=1)  # (1, 3*inner)

    param_arrays = [
        wqkv, bqkv, params["ow"], params["ob"],
        params["ln1w"], params["ln1b"],
        params["f1w"], params["f1b"], params["f2w"], params["f2b"],
        params["ln2w"], params["ln2b"],
    ]

    # Batch-block size: process TB positions per grid step (amortizes the ~0.35us
    # per-step overhead). Pad the batch so it divides evenly; padded rows are
    # zeros (LayerNorm eps keeps them finite) and are sliced off afterwards.
    tb = max(1, min(block_b, b))
    num_blocks = pl.cdiv(b, tb)
    bp = num_blocks * tb
    xp = x if bp == b else jnp.pad(x, ((0, bp - b), (0, 0), (0, 0)))

    def full_spec(arr):
        # whole (small) parameter array resident in VMEM for every grid step
        return pl.BlockSpec(arr.shape, lambda i: (0,) * arr.ndim)

    in_specs = [pl.BlockSpec((tb, 64, dim), lambda i: (i, 0, 0))]
    in_specs += [full_spec(a) for a in param_arrays]

    kernel = functools.partial(
        chessformer_layer_kernel,
        heads=heads, dim_head=dim_head, alpha=float(alpha), eps=float(eps),
    )

    # Advisory cost estimate so XLA schedules this call well inside a full model.
    tokens = bp * 64
    flops = tokens * (2 * dim * 3 * inner          # QKV projection
                      + 2 * 64 * inner * 2         # attn logits + attn@V
                      + 2 * inner * dim            # output projection
                      + 4 * dim * mlp_dim)         # FFN
    transcendentals = tokens * (heads * 64 + mlp_dim)
    param_bytes = sum(a.size * a.dtype.itemsize for a in param_arrays)
    bytes_accessed = 2 * tokens * dim * 4 + param_bytes
    cost = pl.CostEstimate(flops=flops, transcendentals=transcendentals,
                           bytes_accessed=bytes_accessed)

    out = pl.pallas_call(
        kernel,
        out_shape=jax.ShapeDtypeStruct((bp, 64, dim), jnp.float32),
        grid=(num_blocks,),
        in_specs=in_specs,
        out_specs=pl.BlockSpec((tb, 64, dim), lambda i: (i, 0, 0)),
        compiler_params=pltpu.CompilerParams(dimension_semantics=("parallel",)),
        cost_estimate=cost,
    )(xp, *param_arrays)

    return out[:b]


def chessformer_layer_ref(x, p, *, heads, dim_head, alpha=1.0, eps=1e-5):
    b, n, dim = x.shape
    scale = dim_head ** -0.5
    q = (x @ p["qw"] + p["qb"]).reshape(b, n, heads, dim_head)
    k = (x @ p["kw"] + p["kb"]).reshape(b, n, heads, dim_head)
    v = (x @ p["vw"] + p["vb"]).reshape(b, n, heads, dim_head)
    logits = jnp.einsum("bnhd,bmhd->bhnm", q, k) * scale
    attn = jax.nn.softmax(logits, axis=-1)
    vals = jnp.einsum("bhnm,bmhd->bnhd", attn, v).reshape(b, n, heads * dim_head)
    attn_out = vals @ p["ow"] + p["ob"]

    def ln(y, w, bb):
        mu = y.mean(-1, keepdims=True)
        var = ((y - mu) ** 2).mean(-1, keepdims=True)
        return (y - mu) / jnp.sqrt(var + eps) * w + bb

    x1 = ln(x + attn_out * alpha, p["ln1w"], p["ln1b"])
    h = jax.nn.gelu(x1 @ p["f1w"] + p["f1b"], approximate=False)
    h2 = h @ p["f2w"] + p["f2b"]
    return ln(x1 + h2 * alpha, p["ln2w"], p["ln2b"])


def init_params(key, dim, heads, dim_head, mlp_dim, beta=1.0):
    inner = heads * dim_head
    ks = jax.random.split(key, 16)

    def xavier(k, fan_in, fan_out, gain):
        std = gain * math.sqrt(2.0 / (fan_in + fan_out))
        # stored as (in, out) = W^T of PyTorch's (out, in)
        return std * jax.random.normal(k, (fan_in, fan_out), jnp.float32)

    def bias(k, nn_):
        return 0.01 * jax.random.normal(k, (1, nn_), jnp.float32)

    return {
        # MHA (q, k use a generic init; v, out use xavier_normal gain=beta as in __init__)
        "qw": xavier(ks[0], dim, inner, 1.0), "qb": bias(ks[1], inner),
        "kw": xavier(ks[2], dim, inner, 1.0), "kb": bias(ks[3], inner),
        "vw": xavier(ks[4], dim, inner, beta), "vb": bias(ks[5], inner),
        "ow": xavier(ks[6], inner, dim, beta), "ob": bias(ks[7], dim),
        # LayerNorm 1 (PyTorch default init: weight=1, bias=0)
        "ln1w": jnp.ones((1, dim), jnp.float32), "ln1b": jnp.zeros((1, dim), jnp.float32),
        # FFN (xavier_normal gain=beta)
        "f1w": xavier(ks[8], dim, mlp_dim, beta), "f1b": bias(ks[9], mlp_dim),
        "f2w": xavier(ks[10], mlp_dim, dim, beta), "f2b": bias(ks[11], dim),
        # LayerNorm 2
        "ln2w": jnp.ones((1, dim), jnp.float32), "ln2b": jnp.zeros((1, dim), jnp.float32),
    }


if __name__ == "__main__":
    # Small shapes consistent with the module: (batch, 64 squares, dim).
    # batch=6 with block_b=4 also exercises the batch-block padding path.
    batch, dim, heads, dim_head, mlp_dim = 6, 32, 4, 8, 64
    alpha = 1.0

    key = jax.random.PRNGKey(0)
    kx, kp = jax.random.split(key)
    x = jax.random.normal(kx, (batch, 64, dim), jnp.float32)
    params = init_params(kp, dim, heads, dim_head, mlp_dim, beta=1.0)

    out = chessformer_layer(x, params, heads=heads, dim_head=dim_head,
                            alpha=alpha, block_b=4)
    out = jax.block_until_ready(out)

    ref = chessformer_layer_ref(x, params, heads=heads, dim_head=dim_head, alpha=alpha)
    assert out.shape == (batch, 64, dim)
    assert jnp.allclose(out, ref, atol=1e-4, rtol=1e-4), "mismatch vs pure-JAX reference"

    # TODO(synk): nn.Dropout layers are inference no-ops (dropout=0.0) and are omitted.
    print("KERNEL_OK")
</pallas_src>

<mosaic_0001>
module attributes {stable_mosaic.version = 11 : i64} {
  func.func @chessformer_layer_kernel(%arg0: i32, %arg1: memref<4x64x32xf32, #tpu.memory_space<vmem>>, %arg2: memref<32x96xf32, #tpu.memory_space<vmem>>, %arg3: memref<1x96xf32, #tpu.memory_space<vmem>>, %arg4: memref<32x32xf32, #tpu.memory_space<vmem>>, %arg5: memref<1x32xf32, #tpu.memory_space<vmem>>, %arg6: memref<1x32xf32, #tpu.memory_space<vmem>>, %arg7: memref<1x32xf32, #tpu.memory_space<vmem>>, %arg8: memref<32x64xf32, #tpu.memory_space<vmem>>, %arg9: memref<1x64xf32, #tpu.memory_space<vmem>>, %arg10: memref<64x32xf32, #tpu.memory_space<vmem>>, %arg11: memref<1x32xf32, #tpu.memory_space<vmem>>, %arg12: memref<1x32xf32, #tpu.memory_space<vmem>>, %arg13: memref<1x32xf32, #tpu.memory_space<vmem>>, %arg14: memref<4x64x32xf32, #tpu.memory_space<vmem>>) attributes {dimension_semantics = [#tpu.dimension_semantics<parallel>], iteration_bounds = array<i64: 2>, scalar_prefetch = 0 : i64, scratch_operands = 0 : i64, tpu.core_type = #tpu.core_type<tc>, window_params = [{transform_indices = @transform_0, window_bounds = array<i64: 4, 64, 32>}, {pipeline_mode = #tpu.pipeline_mode<synchronous>, transform_indices = @transform_1, window_bounds = array<i64: 32, 96>}, {pipeline_mode = #tpu.pipeline_mode<synchronous>, transform_indices = @transform_2, window_bounds = array<i64: 1, 96>}, {pipeline_mode = #tpu.pipeline_mode<synchronous>, transform_indices = @transform_3, window_bounds = array<i64: 32, 32>}, {pipeline_mode = #tpu.pipeline_mode<synchronous>, transform_indices = @transform_4, window_bounds = array<i64: 1, 32>}, {pipeline_mode = #tpu.pipeline_mode<synchronous>, transform_indices = @transform_5, window_bounds = array<i64: 1, 32>}, {pipeline_mode = #tpu.pipeline_mode<synchronous>, transform_indices = @transform_6, window_bounds = array<i64: 1, 32>}, {pipeline_mode = #tpu.pipeline_mode<synchronous>, transform_indices = @transform_7, window_bounds = array<i64: 32, 64>}, {pipeline_mode = #tpu.pipeline_mode<synchronous>, transform_indices = @transform_8, window_bounds = array<i64: 1, 64>}, {pipeline_mode = #tpu.pipeline_mode<synchronous>, transform_indices = @transform_9, window_bounds = array<i64: 64, 32>}, {pipeline_mode = #tpu.pipeline_mode<synchronous>, transform_indices = @transform_10, window_bounds = array<i64: 1, 32>}, {pipeline_mode = #tpu.pipeline_mode<synchronous>, transform_indices = @transform_11, window_bounds = array<i64: 1, 32>}, {pipeline_mode = #tpu.pipeline_mode<synchronous>, transform_indices = @transform_12, window_bounds = array<i64: 1, 32>}, {transform_indices = @transform_13, window_bounds = array<i64: 4, 64, 32>}]} {
    %c0 = arith.constant 0 : index
    %c0_0 = arith.constant 0 : index
    %c0_1 = arith.constant 0 : index
    %0 = vector.load %arg1[%c0, %c0_0, %c0_1] : memref<4x64x32xf32, #tpu.memory_space<vmem>>, vector<4x64x32xf32>
    %1 = vector.shape_cast %0 : vector<4x64x32xf32> to vector<256x32xf32>
    %c0_2 = arith.constant 0 : index
    %c0_3 = arith.constant 0 : index
    %2 = vector.load %arg2[%c0_2, %c0_3] : memref<32x96xf32, #tpu.memory_space<vmem>>, vector<32x96xf32>
    %cst = arith.constant dense<0.000000e+00> : vector<256x96xf32>
    %3 = tpu.matmul %1, %2, %cst {dimension_numbers = #tpu.dot_dimension_numbers<[1], [0], [0], [1], [0, 0, 1, 1], [], []>} : vector<256x32xf32>, vector<32x96xf32>, vector<256x96xf32> -> vector<256x96xf32>
    %c0_4 = arith.constant 0 : index
    %c0_5 = arith.constant 0 : index
    %4 = vector.load %arg3[%c0_4, %c0_5] : memref<1x96xf32, #tpu.memory_space<vmem>>, vector<1x96xf32>
    %5 = vector.broadcast %4 : vector<1x96xf32> to vector<256x96xf32>
    %6 = arith.addf %3, %5 : vector<256x96xf32>
    %7 = vector.shape_cast %6 : vector<256x96xf32> to vector<4x64x96xf32>
    %c0_6 = arith.constant 0 : index
    %c0_7 = arith.constant 0 : index
    %8 = vector.load %arg4[%c0_6, %c0_7] : memref<32x32xf32, #tpu.memory_space<vmem>>, vector<32x32xf32>
    %cst_8 = arith.constant 0.000000e+00 : f32
    %9 = vector.broadcast %cst_8 : f32 to vector<256x32xf32>
    %10 = vector.extract_strided_slice %7 {offsets = [0, 0, 0], sizes = [4, 64, 8], strides = [1, 1, 1]} : vector<4x64x96xf32> to vector<4x64x8xf32>
    %11 = vector.extract_strided_slice %7 {offsets = [0, 0, 32], sizes = [4, 64, 8], strides = [1, 1, 1]} : vector<4x64x96xf32> to vector<4x64x8xf32>
    %12 = vector.extract_strided_slice %7 {offsets = [0, 0, 64], sizes = [4, 64, 8], strides = [1, 1, 1]} : vector<4x64x96xf32> to vector<4x64x8xf32>
    "tpu.trace_start"() <{level = 10 : i32, message = "bqd,bkd->bqk"}> : () -> ()
    %cst_9 = arith.constant dense<0.000000e+00> : vector<4x64x64xf32>
    %13 = tpu.matmul %10, %11, %cst_9 {dimension_numbers = #tpu.dot_dimension_numbers<[2], [2], [1], [1], [0, 0, 0, 1, 1, 1], [0], [0]>} : vector<4x64x8xf32>, vector<4x64x8xf32>, vector<4x64x64xf32> -> vector<4x64x64xf32>
    "tpu.trace_stop"() : () -> ()
    %cst_10 = arith.constant 0.353553385 : f32
    %14 = vector.broadcast %cst_10 : f32 to vector<4x64x64xf32>
    %15 = arith.mulf %13, %14 : vector<4x64x64xf32>
    %cst_11 = arith.constant dense<0xFF800000> : vector<4x64xf32>
    %16 = vector.multi_reduction <maximumf>, %15, %cst_11 [2] : vector<4x64x64xf32> to vector<4x64xf32>
    %17 = vector.shape_cast %16 : vector<4x64xf32> to vector<4x64x1xf32>
    %18 = vector.broadcast %17 : vector<4x64x1xf32> to vector<4x64x64xf32>
    %19 = arith.subf %15, %18 : vector<4x64x64xf32>
    %20 = math.exp %19 : vector<4x64x64xf32>
    %cst_12 = arith.constant dense<0.000000e+00> : vector<4x64xf32>
    %21 = vector.multi_reduction <add>, %20, %cst_12 [2] : vector<4x64x64xf32> to vector<4x64xf32>
    %22 = vector.shape_cast %21 : vector<4x64xf32> to vector<4x64x1xf32>
    %23 = vector.broadcast %22 : vector<4x64x1xf32> to vector<4x64x64xf32>
    %24 = arith.divf %20, %23 : vector<4x64x64xf32>
    "tpu.trace_start"() <{level = 10 : i32, message = "bqk,bkd->bqd"}> : () -> ()
    %cst_13 = arith.constant dense<0.000000e+00> : vector<4x64x8xf32>
    %25 = tpu.matmul %24, %12, %cst_13 {dimension_numbers = #tpu.dot_dimension_numbers<[2], [1], [1], [2], [0, 0, 0, 1, 1, 2], [0], [0]>} : vector<4x64x64xf32>, vector<4x64x8xf32>, vector<4x64x8xf32> -> vector<4x64x8xf32>
    "tpu.trace_stop"() : () -> ()
    %26 = vector.shape_cast %25 : vector<4x64x8xf32> to vector<256x8xf32>
    %27 = vector.extract_strided_slice %8 {offsets = [0, 0], sizes = [8, 32], strides = [1, 1]} : vector<32x32xf32> to vector<8x32xf32>
    %cst_14 = arith.constant dense<0.000000e+00> : vector<256x32xf32>
    %28 = tpu.matmul %26, %27, %cst_14 {dimension_numbers = #tpu.dot_dimension_numbers<[1], [0], [0], [1], [0, 0, 1, 1], [], []>} : vector<256x8xf32>, vector<8x32xf32>, vector<256x32xf32> -> vector<256x32xf32>
    %29 = arith.addf %9, %28 : vector<256x32xf32>
    %30 = vector.extract_strided_slice %7 {offsets = [0, 0, 8], sizes = [4, 64, 8], strides = [1, 1, 1]} : vector<4x64x96xf32> to vector<4x64x8xf32>
    %31 = vector.extract_strided_slice %7 {offsets = [0, 0, 40], sizes = [4, 64, 8], strides = [1, 1, 1]} : vector<4x64x96xf32> to vector<4x64x8xf32>
    %32 = vector.extract_strided_slice %7 {offsets = [0, 0, 72], sizes = [4, 64, 8], strides = [1, 1, 1]} : vector<4x64x96xf32> to vector<4x64x8xf32>
    "tpu.trace_start"() <{level = 10 : i32, message = "bqd,bkd->bqk"}> : () -> ()
    %cst_15 = arith.constant dense<0.000000e+00> : vector<4x64x64xf32>
    %33 = tpu.matmul %30, %31, %cst_15 {dimension_numbers = #tpu.dot_dimension_numbers<[2], [2], [1], [1], [0, 0, 0, 1, 1, 1], [0], [0]>} : vector<4x64x8xf32>, vector<4x64x8xf32>, vector<4x64x64xf32> -> vector<4x64x64xf32>
    "tpu.trace_stop"() : () -> ()
    %cst_16 = arith.constant 0.353553385 : f32
    %34 = vector.broadcast %cst_16 : f32 to vector<4x64x64xf32>
    %35 = arith.mulf %33, %34 : vector<4x64x64xf32>
    %cst_17 = arith.constant dense<0xFF800000> : vector<4x64xf32>
    %36 = vector.multi_reduction <maximumf>, %35, %cst_17 [2] : vector<4x64x64xf32> to vector<4x64xf32>
    %37 = vector.shape_cast %36 : vector<4x64xf32> to vector<4x64x1xf32>
    %38 = vector.broadcast %37 : vector<4x64x1xf32> to vector<4x64x64xf32>
    %39 = arith.subf %35, %38 : vector<4x64x64xf32>
    %40 = math.exp %39 : vector<4x64x64xf32>
    %cst_18 = arith.constant dense<0.000000e+00> : vector<4x64xf32>
    %41 = vector.multi_reduction <add>, %40, %cst_18 [2] : vector<4x64x64xf32> to vector<4x64xf32>
    %42 = vector.shape_cast %41 : vector<4x64xf32> to vector<4x64x1xf32>
    %43 = vector.broadcast %42 : vector<4x64x1xf32> to vector<4x64x64xf32>
    %44 = arith.divf %40, %43 : vector<4x64x64xf32>
    "tpu.trace_start"() <{level = 10 : i32, message = "bqk,bkd->bqd"}> : () -> ()
    %cst_19 = arith.constant dense<0.000000e+00> : vector<4x64x8xf32>
    %45 = tpu.matmul %44, %32, %cst_19 {dimension_numbers = #tpu.dot_dimension_numbers<[2], [1], [1], [2], [0, 0, 0, 1, 1, 2], [0], [0]>} : vector<4x64x64xf32>, vector<4x64x8xf32>, vector<4x64x8xf32> -> vector<4x64x8xf32>
    "tpu.trace_stop"() : () -> ()
    %46 = vector.shape_cast %45 : vector<4x64x8xf32> to vector<256x8xf32>
    %47 = vector.extract_strided_slice %8 {offsets = [8, 0], sizes = [8, 32], strides = [1, 1]} : vector<32x32xf32> to vector<8x32xf32>
    %cst_20 = arith.constant dense<0.000000e+00> : vector<256x32xf32>
    %48 = tpu.matmul %46, %47, %cst_20 {dimension_numbers = #tpu.dot_dimension_numbers<[1], [0], [0], [1], [0, 0, 1, 1], [], []>} : vector<256x8xf32>, vector<8x32xf32>, vector<256x32xf32> -> vector<256x32xf32>
    %49 = arith.addf %29, %48 : vector<256x32xf32>
    %50 = vector.extract_strided_slice %7 {offsets = [0, 0, 16], sizes = [4, 64, 8], strides = [1, 1, 1]} : vector<4x64x96xf32> to vector<4x64x8xf32>
    %51 = vector.extract_strided_slice %7 {offsets = [0, 0, 48], sizes = [4, 64, 8], strides = [1, 1, 1]} : vector<4x64x96xf32> to vector<4x64x8xf32>
    %52 = vector.extract_strided_slice %7 {offsets = [0, 0, 80], sizes = [4, 64, 8], strides = [1, 1, 1]} : vector<4x64x96xf32> to vector<4x64x8xf32>
    "tpu.trace_start"() <{level = 10 : i32, message = "bqd,bkd->bqk"}> : () -> ()
    %cst_21 = arith.constant dense<0.000000e+00> : vector<4x64x64xf32>
    %53 = tpu.matmul %50, %51, %cst_21 {dimension_numbers = #tpu.dot_dimension_numbers<[2], [2], [1], [1], [0, 0, 0, 1, 1, 1], [0], [0]>} : vector<4x64x8xf32>, vector<4x64x8xf32>, vector<4x64x64xf32> -> vector<4x64x64xf32>
    "tpu.trace_stop"() : () -> ()
    %cst_22 = arith.constant 0.353553385 : f32
    %54 = vector.broadcast %cst_22 : f32 to vector<4x64x64xf32>
    %55 = arith.mulf %53, %54 : vector<4x64x64xf32>
    %cst_23 = arith.constant dense<0xFF800000> : vector<4x64xf32>
    %56 = vector.multi_reduction <maximumf>, %55, %cst_23 [2] : vector<4x64x64xf32> to vector<4x64xf32>
    %57 = vector.shape_cast %56 : vector<4x64xf32> to vector<4x64x1xf32>
    %58 = vector.broadcast %57 : vector<4x64x1xf32> to vector<4x64x64xf32>
    %59 = arith.subf %55, %58 : vector<4x64x64xf32>
    %60 = math.exp %59 : vector<4x64x64xf32>
    %cst_24 = arith.constant dense<0.000000e+00> : vector<4x64xf32>
    %61 = vector.multi_reduction <add>, %60, %cst_24 [2] : vector<4x64x64xf32> to vector<4x64xf32>
    %62 = vector.shape_cast %61 : vector<4x64xf32> to vector<4x64x1xf32>
    %63 = vector.broadcast %62 : vector<4x64x1xf32> to vector<4x64x64xf32>
    %64 = arith.divf %60, %63 : vector<4x64x64xf32>
    "tpu.trace_start"() <{level = 10 : i32, message = "bqk,bkd->bqd"}> : () -> ()
    %cst_25 = arith.constant dense<0.000000e+00> : vector<4x64x8xf32>
    %65 = tpu.matmul %64, %52, %cst_25 {dimension_numbers = #tpu.dot_dimension_numbers<[2], [1], [1], [2], [0, 0, 0, 1, 1, 2], [0], [0]>} : vector<4x64x64xf32>, vector<4x64x8xf32>, vector<4x64x8xf32> -> vector<4x64x8xf32>
    "tpu.trace_stop"() : () -> ()
    %66 = vector.shape_cast %65 : vector<4x64x8xf32> to vector<256x8xf32>
    %67 = vector.extract_strided_slice %8 {offsets = [16, 0], sizes = [8, 32], strides = [1, 1]} : vector<32x32xf32> to vector<8x32xf32>
    %cst_26 = arith.constant dense<0.000000e+00> : vector<256x32xf32>
    %68 = tpu.matmul %66, %67, %cst_26 {dimension_numbers = #tpu.dot_dimension_numbers<[1], [0], [0], [1], [0, 0, 1, 1], [], []>} : vector<256x8xf32>, vector<8x32xf32>, vector<256x32xf32> -> vector<256x32xf32>
    %69 = arith.addf %49, %68 : vector<256x32xf32>
    %70 = vector.extract_strided_slice %7 {offsets = [0, 0, 24], sizes = [4, 64, 8], strides = [1, 1, 1]} : vector<4x64x96xf32> to vector<4x64x8xf32>
    %71 = vector.extract_strided_slice %7 {offsets = [0, 0, 56], sizes = [4, 64, 8], strides = [1, 1, 1]} : vector<4x64x96xf32> to vector<4x64x8xf32>
    %72 = vector.extract_strided_slice %7 {offsets = [0, 0, 88], sizes = [4, 64, 8], strides = [1, 1, 1]} : vector<4x64x96xf32> to vector<4x64x8xf32>
    "tpu.trace_start"() <{level = 10 : i32, message = "bqd,bkd->bqk"}> : () -> ()
    %cst_27 = arith.constant dense<0.000000e+00> : vector<4x64x64xf32>
    %73 = tpu.matmul %70, %71, %cst_27 {dimension_numbers = #tpu.dot_dimension_numbers<[2], [2], [1], [1], [0, 0, 0, 1, 1, 1], [0], [0]>} : vector<4x64x8xf32>, vector<4x64x8xf32>, vector<4x64x64xf32> -> vector<4x64x64xf32>
    "tpu.trace_stop"() : () -> ()
    %cst_28 = arith.constant 0.353553385 : f32
    %74 = vector.broadcast %cst_28 : f32 to vector<4x64x64xf32>
    %75 = arith.mulf %73, %74 : vector<4x64x64xf32>
    %cst_29 = arith.constant dense<0xFF800000> : vector<4x64xf32>
    %76 = vector.multi_reduction <maximumf>, %75, %cst_29 [2] : vector<4x64x64xf32> to vector<4x64xf32>
    %77 = vector.shape_cast %76 : vector<4x64xf32> to vector<4x64x1xf32>
    %78 = vector.broadcast %77 : vector<4x64x1xf32> to vector<4x64x64xf32>
    %79 = arith.subf %75, %78 : vector<4x64x64xf32>
    %80 = math.exp %79 : vector<4x64x64xf32>
    %cst_30 = arith.constant dense<0.000000e+00> : vector<4x64xf32>
    %81 = vector.multi_reduction <add>, %80, %cst_30 [2] : vector<4x64x64xf32> to vector<4x64xf32>
    %82 = vector.shape_cast %81 : vector<4x64xf32> to vector<4x64x1xf32>
    %83 = vector.broadcast %82 : vector<4x64x1xf32> to vector<4x64x64xf32>
    %84 = arith.divf %80, %83 : vector<4x64x64xf32>
    "tpu.trace_start"() <{level = 10 : i32, message = "bqk,bkd->bqd"}> : () -> ()
    %cst_31 = arith.constant dense<0.000000e+00> : vector<4x64x8xf32>
    %85 = tpu.matmul %84, %72, %cst_31 {dimension_numbers = #tpu.dot_dimension_numbers<[2], [1], [1], [2], [0, 0, 0, 1, 1, 2], [0], [0]>} : vector<4x64x64xf32>, vector<4x64x8xf32>, vector<4x64x8xf32> -> vector<4x64x8xf32>
    "tpu.trace_stop"() : () -> ()
    %86 = vector.shape_cast %85 : vector<4x64x8xf32> to vector<256x8xf32>
    %87 = vector.extract_strided_slice %8 {offsets = [24, 0], sizes = [8, 32], strides = [1, 1]} : vector<32x32xf32> to vector<8x32xf32>
    %cst_32 = arith.constant dense<0.000000e+00> : vector<256x32xf32>
    %88 = tpu.matmul %86, %87, %cst_32 {dimension_numbers = #tpu.dot_dimension_numbers<[1], [0], [0], [1], [0, 0, 1, 1], [], []>} : vector<256x8xf32>, vector<8x32xf32>, vector<256x32xf32> -> vector<256x32xf32>
    %89 = arith.addf %69, %88 : vector<256x32xf32>
    %c0_33 = arith.constant 0 : index
    %c0_34 = arith.constant 0 : index
    %90 = vector.load %arg5[%c0_33, %c0_34] : memref<1x32xf32, #tpu.memory_space<vmem>>, vector<1x32xf32>
    %91 = vector.broadcast %90 : vector<1x32xf32> to vector<256x32xf32>
    %92 = arith.addf %89, %91 : vector<256x32xf32>
    %cst_35 = arith.constant 1.000000e+00 : f32
    %93 = vector.broadcast %cst_35 : f32 to vector<256x32xf32>
    %94 = arith.mulf %92, %93 : vector<256x32xf32>
    %95 = arith.addf %1, %94 : vector<256x32xf32>
    %c0_36 = arith.constant 0 : index
    %c0_37 = arith.constant 0 : index
    %96 = vector.load %arg6[%c0_36, %c0_37] : memref<1x32xf32, #tpu.memory_space<vmem>>, vector<1x32xf32>
    %c0_38 = arith.constant 0 : index
    %c0_39 = arith.constant 0 : index
    %97 = vector.load %arg7[%c0_38, %c0_39] : memref<1x32xf32, #tpu.memory_space<vmem>>, vector<1x32xf32>
    %cst_40 = arith.constant dense<0.000000e+00> : vector<256xf32>
    %98 = vector.multi_reduction <add>, %95, %cst_40 [1] : vector<256x32xf32> to vector<256xf32>
    %99 = vector.shape_cast %98 : vector<256xf32> to vector<256x1xf32>
    %cst_41 = arith.constant 3.200000e+01 : f32
    %100 = vector.broadcast %cst_41 : f32 to vector<256x1xf32>
    %101 = arith.divf %99, %100 : vector<256x1xf32>
    %102 = vector.broadcast %101 : vector<256x1xf32> to vector<256x32xf32>
    %103 = arith.subf %95, %102 : vector<256x32xf32>
    %104 = arith.mulf %103, %103 : vector<256x32xf32>
    %cst_42 = arith.constant dense<0.000000e+00> : vector<256xf32>
    %105 = vector.multi_reduction <add>, %104, %cst_42 [1] : vector<256x32xf32> to vector<256xf32>
    %106 = vector.shape_cast %105 : vector<256xf32> to vector<256x1xf32>
    %cst_43 = arith.constant 3.200000e+01 : f32
    %107 = vector.broadcast %cst_43 : f32 to vector<256x1xf32>
    %108 = arith.divf %106, %107 : vector<256x1xf32>
    %109 = vector.broadcast %101 : vector<256x1xf32> to vector<256x32xf32>
    %110 = arith.subf %95, %109 : vector<256x32xf32>
    %cst_44 = arith.constant 9.99999974E-6 : f32
    %111 = vector.broadcast %cst_44 : f32 to vector<256x1xf32>
    %112 = arith.addf %108, %111 : vector<256x1xf32>
    %113 = math.rsqrt %112 : vector<256x1xf32>
    %114 = vector.broadcast %113 : vector<256x1xf32> to vector<256x32xf32>
    %115 = arith.mulf %110, %114 : vector<256x32xf32>
    %116 = vector.broadcast %96 : vector<1x32xf32> to vector<256x32xf32>
    %117 = arith.mulf %115, %116 : vector<256x32xf32>
    %118 = vector.broadcast %97 : vector<1x32xf32> to vector<256x32xf32>
    %119 = arith.addf %117, %118 : vector<256x32xf32>
    %c0_45 = arith.constant 0 : index
    %c0_46 = arith.constant 0 : index
    %120 = vector.load %arg8[%c0_45, %c0_46] : memref<32x64xf32, #tpu.memory_space<vmem>>, vector<32x64xf32>
    %cst_47 = arith.constant dense<0.000000e+00> : vector<256x64xf32>
    %121 = tpu.matmul %119, %120, %cst_47 {dimension_numbers = #tpu.dot_dimension_numbers<[1], [0], [0], [1], [0, 0, 1, 1], [], []>} : vector<256x32xf32>, vector<32x64xf32>, vector<256x64xf32> -> vector<256x64xf32>
    %c0_48 = arith.constant 0 : index
    %c0_49 = arith.constant 0 : index
    %122 = vector.load %arg9[%c0_48, %c0_49] : memref<1x64xf32, #tpu.memory_space<vmem>>, vector<1x64xf32>
    %123 = vector.broadcast %122 : vector<1x64xf32> to vector<256x64xf32>
    %124 = arith.addf %121, %123 : vector<256x64xf32>
    %cst_50 = arith.constant 5.000000e-01 : f32
    %125 = vector.broadcast %cst_50 : f32 to vector<256x64xf32>
    %126 = arith.mulf %125, %124 : vector<256x64xf32>
    %cst_51 = arith.constant 0.707106769 : f32
    %127 = vector.broadcast %cst_51 : f32 to vector<256x64xf32>
    %128 = arith.mulf %124, %127 : vector<256x64xf32>
    %129 = math.erf %128 : vector<256x64xf32>
    %cst_52 = arith.constant 1.000000e+00 : f32
    %130 = vector.broadcast %cst_52 : f32 to vector<256x64xf32>
    %131 = arith.addf %130, %129 : vector<256x64xf32>
    %132 = arith.mulf %126, %131 : vector<256x64xf32>
    %c0_53 = arith.constant 0 : index
    %c0_54 = arith.constant 0 : index
    %133 = vector.load %arg10[%c0_53, %c0_54] : memref<64x32xf32, #tpu.memory_space<vmem>>, vector<64x32xf32>
    %cst_55 = arith.constant dense<0.000000e+00> : vector<256x32xf32>
    %134 = tpu.matmul %132, %133, %cst_55 {dimension_numbers = #tpu.dot_dimension_numbers<[1], [0], [0], [1], [0, 0, 1, 1], [], []>} : vector<256x64xf32>, vector<64x32xf32>, vector<256x32xf32> -> vector<256x32xf32>
    %c0_56 = arith.constant 0 : index
    %c0_57 = arith.constant 0 : index
    %135 = vector.load %arg11[%c0_56, %c0_57] : memref<1x32xf32, #tpu.memory_space<vmem>>, vector<1x32xf32>
    %136 = vector.broadcast %135 : vector<1x32xf32> to vector<256x32xf32>
    %137 = arith.addf %134, %136 : vector<256x32xf32>
    %cst_58 = arith.constant 1.000000e+00 : f32
    %138 = vector.broadcast %cst_58 : f32 to vector<256x32xf32>
    %139 = arith.mulf %137, %138 : vector<256x32xf32>
    %140 = arith.addf %119, %139 : vector<256x32xf32>
    %c0_59 = arith.constant 0 : index
    %c0_60 = arith.constant 0 : index
    %141 = vector.load %arg12[%c0_59, %c0_60] : memref<1x32xf32, #tpu.memory_space<vmem>>, vector<1x32xf32>
    %c0_61 = arith.constant 0 : index
    %c0_62 = arith.constant 0 : index
    %142 = vector.load %arg13[%c0_61, %c0_62] : memref<1x32xf32, #tpu.memory_space<vmem>>, vector<1x32xf32>
    %cst_63 = arith.constant dense<0.000000e+00> : vector<256xf32>
    %143 = vector.multi_reduction <add>, %140, %cst_63 [1] : vector<256x32xf32> to vector<256xf32>
    %144 = vector.shape_cast %143 : vector<256xf32> to vector<256x1xf32>
    %cst_64 = arith.constant 3.200000e+01 : f32
    %145 = vector.broadcast %cst_64 : f32 to vector<256x1xf32>
    %146 = arith.divf %144, %145 : vector<256x1xf32>
    %147 = vector.broadcast %146 : vector<256x1xf32> to vector<256x32xf32>
    %148 = arith.subf %140, %147 : vector<256x32xf32>
    %149 = arith.mulf %148, %148 : vector<256x32xf32>
    %cst_65 = arith.constant dense<0.000000e+00> : vector<256xf32>
    %150 = vector.multi_reduction <add>, %149, %cst_65 [1] : vector<256x32xf32> to vector<256xf32>
    %151 = vector.shape_cast %150 : vector<256xf32> to vector<256x1xf32>
    %cst_66 = arith.constant 3.200000e+01 : f32
    %152 = vector.broadcast %cst_66 : f32 to vector<256x1xf32>
    %153 = arith.divf %151, %152 : vector<256x1xf32>
    %154 = vector.broadcast %146 : vector<256x1xf32> to vector<256x32xf32>
    %155 = arith.subf %140, %154 : vector<256x32xf32>
    %cst_67 = arith.constant 9.99999974E-6 : f32
    %156 = vector.broadcast %cst_67 : f32 to vector<256x1xf32>
    %157 = arith.addf %153, %156 : vector<256x1xf32>
    %158 = math.rsqrt %157 : vector<256x1xf32>
    %159 = vector.broadcast %158 : vector<256x1xf32> to vector<256x32xf32>
    %160 = arith.mulf %155, %159 : vector<256x32xf32>
    %161 = vector.broadcast %141 : vector<1x32xf32> to vector<256x32xf32>
    %162 = arith.mulf %160, %161 : vector<256x32xf32>
    %163 = vector.broadcast %142 : vector<1x32xf32> to vector<256x32xf32>
    %164 = arith.addf %162, %163 : vector<256x32xf32>
    %165 = vector.shape_cast %164 : vector<256x32xf32> to vector<4x64x32xf32>
    %c0_68 = arith.constant 0 : index
    %c0_69 = arith.constant 0 : index
    %c0_70 = arith.constant 0 : index
    %166 = vector.load %arg14[%c0_68, %c0_69, %c0_70] : memref<4x64x32xf32, #tpu.memory_space<vmem>>, vector<4x64x32xf32>
    tpu.vector_store %arg14[%c0_68, %c0_69, %c0_70], %165 {strides = array<i32>} : memref<4x64x32xf32, #tpu.memory_space<vmem>>, vector<4x64x32xf32>,
    return
  }
  func.func @transform_0(%arg0: i32) -> (i32, i32, i32) {
    %c0_i32 = arith.constant 0 : i32
    %c0_i32_0 = arith.constant 0 : i32
    %c0_i32_1 = arith.constant 0 : i32
    return %arg0, %c0_i32, %c0_i32_0 : i32, i32, i32
  }
  func.func @transform_1(%arg0: i32) -> (i32, i32) {
    %c0_i32 = arith.constant 0 : i32
    %c0_i32_0 = arith.constant 0 : i32
    %c0_i32_1 = arith.constant 0 : i32
    return %c0_i32, %c0_i32_0 : i32, i32
  }
  func.func @transform_2(%arg0: i32) -> (i32, i32) {
    %c0_i32 = arith.constant 0 : i32
    %c0_i32_0 = arith.constant 0 : i32
    %c0_i32_1 = arith.constant 0 : i32
    return %c0_i32, %c0_i32_0 : i32, i32
  }
  func.func @transform_3(%arg0: i32) -> (i32, i32) {
    %c0_i32 = arith.constant 0 : i32
    %c0_i32_0 = arith.constant 0 : i32
    %c0_i32_1 = arith.constant 0 : i32
    return %c0_i32, %c0_i32_0 : i32, i32
  }
  func.func @transform_4(%arg0: i32) -> (i32, i32) {
    %c0_i32 = arith.constant 0 : i32
    %c0_i32_0 = arith.constant 0 : i32
    %c0_i32_1 = arith.constant 0 : i32
    return %c0_i32, %c0_i32_0 : i32, i32
  }
  func.func @transform_5(%arg0: i32) -> (i32, i32) {
    %c0_i32 = arith.constant 0 : i32
    %c0_i32_0 = arith.constant 0 : i32
    %c0_i32_1 = arith.constant 0 : i32
    return %c0_i32, %c0_i32_0 : i32, i32
  }
  func.func @transform_6(%arg0: i32) -> (i32, i32) {
    %c0_i32 = arith.constant 0 : i32
    %c0_i32_0 = arith.constant 0 : i32
    %c0_i32_1 = arith.constant 0 : i32
    return %c0_i32, %c0_i32_0 : i32, i32
  }
  func.func @transform_7(%arg0: i32) -> (i32, i32) {
    %c0_i32 = arith.constant 0 : i32
    %c0_i32_0 = arith.constant 0 : i32
    %c0_i32_1 = arith.constant 0 : i32
    return %c0_i32, %c0_i32_0 : i32, i32
  }
  func.func @transform_8(%arg0: i32) -> (i32, i32) {
    %c0_i32 = arith.constant 0 : i32
    %c0_i32_0 = arith.constant 0 : i32
    %c0_i32_1 = arith.constant 0 : i32
    return %c0_i32, %c0_i32_0 : i32, i32
  }
  func.func @transform_9(%arg0: i32) -> (i32, i32) {
    %c0_i32 = arith.constant 0 : i32
    %c0_i32_0 = arith.constant 0 : i32
    %c0_i32_1 = arith.constant 0 : i32
    return %c0_i32, %c0_i32_0 : i32, i32
  }
  func.func @transform_10(%arg0: i32) -> (i32, i32) {
    %c0_i32 = arith.constant 0 : i32
    %c0_i32_0 = arith.constant 0 : i32
    %c0_i32_1 = arith.constant 0 : i32
    return %c0_i32, %c0_i32_0 : i32, i32
  }
  func.func @transform_11(%arg0: i32) -> (i32, i32) {
    %c0_i32 = arith.constant 0 : i32
    %c0_i32_0 = arith.constant 0 : i32
    %c0_i32_1 = arith.constant 0 : i32
    return %c0_i32, %c0_i32_0 : i32, i32
  }
  func.func @transform_12(%arg0: i32) -> (i32, i32) {
    %c0_i32 = arith.constant 0 : i32
    %c0_i32_0 = arith.constant 0 : i32
    %c0_i32_1 = arith.constant 0 : i32
    return %c0_i32, %c0_i32_0 : i32, i32
  }
  func.func @transform_13(%arg0: i32) -> (i32, i32, i32) {
    %c0_i32 = arith.constant 0 : i32
    %c0_i32_0 = arith.constant 0 : i32
    %c0_i32_1 = arith.constant 0 : i32
    return %arg0, %c0_i32, %c0_i32_0 : i32, i32, i32
  }
}

</mosaic_0001>

<bundles_post_ra>
// kernel: tpu_custom_call.1
= control target key start
LH: loop header
LB: loop body
LE: loop exit
PB: predicated region body
PF: predicated region fallthrough
CT: control target
= control target key end

     0   :  { %s15753_s25 = smov 0   ;;  %s20523_s0 = inlined_call_operand.vmem [shape: f32[8,64,32], index: 0, kind: input, shape index: {}]   ;;  %s20524_s1 = inlined_call_operand.vmem [shape: f32[32,96], index: 1, kind: input, shape index: {}]   ;;  %s20525_s2 = inlined_call_operand.vmem [shape: f32[1,96], index: 2, kind: input, shape index: {}]   ;;  %s20526_s3 = inlined_call_operand.vmem [shape: f32[32,32], index: 3, kind: input, shape index: {}]   ;;  %s20527_s4 = inlined_call_operand.vmem [shape: f32[1,32], index: 4, kind: input, shape index: {}]   ;;  %s20528_s5 = inlined_call_operand.vmem [shape: f32[1,32], index: 5, kind: input, shape index: {}]   ;;  %s20529_s6 = inlined_call_operand.vmem [shape: f32[1,32], index: 6, kind: input, shape index: {}]   ;;  %s20530_s7 = inlined_call_operand.vmem [shape: f32[32,64], index: 7, kind: input, shape index: {}]   ;;  %s20531_s8 = inlined_call_operand.vmem [shape: f32[1,64], index: 8, kind: input, shape index: {}]   ;;  %s20532_s9 = inlined_call_operand.vmem [shape: f32[64,32], index: 9, kind: input, shape index: {}]   ;;  %s20533_s10 = inlined_call_operand.vmem [shape: f32[1,32], index: 10, kind: input, shape index: {}]   ;;  %s20534_s11 = inlined_call_operand.vmem [shape: f32[1,32], index: 11, kind: input, shape index: {}]   ;;  %s20535_s12 = inlined_call_operand.vmem [shape: f32[1,32], index: 12, kind: input, shape index: {}]   ;;  %s20536_s13 = inlined_call_operand.vmem [shape: f32[8,64,32], index: 13, kind: output, shape index: {}]  }
   0x1 LB: > { %s10834_s26 = sadd.s32 4294967295, %s15670_s25   ;;  %p10838_p0 = scmp.ge.s32.totalorder %s15670_s25, 1  ;;  %s15670_s25 = sphi %s15753_s25, %s23_s25  }
   0x2   : > { %p389_p1 = scmp.lt.s32.totalorder %s15670_s25, 3 }
   0x4   : > { %p390_p2 = pnand %p10838_p0, %p389_p1 }
   0x6   : > { %393 = sbr.rel (%p390_p2) target bundleno = 4864 (0x1300), region = 72 }
   0xd   : > { %v481_v0 = vld [vmem:[%s20524_s1] sm:$0xff]  ;;  %v482_v1 = vld [vmem:[%s20524_s1 + $0x8] sm:$0xff]  ;;  %v483_v2 = vld [vmem:[%s20524_s1 + $0x10] sm:$0xff]  ;;  %s10839_s16 = sshll.u32 %s10834_s26, 2  ;;  %vm492_vm0 = vcmask 261120   ;;  %vm842_vm1 = vcmask 64512  }
   0xe   : > { %v13493_v3 = vpack.c.bf16 %v482_v1, %v481_v0  ;;  %v484_v4 = vld [vmem:[%s20524_s1 + $0x18] sm:$0xff]  ;;  %p436_p3 = scmp.lt.s32.totalorder %s10839_s16, 7  ;;  %v15850_v38 = vld [vmem:[%s20525_s2] ss:$0 sm:$0xff]  ;;  %s15672_s26 = smov 96   ;;  %vm16127_vm2 = vmpackc.low %vm842_vm1, %vm842_vm1  ;;  %vm1495_vm3 = vcmask 523264  }
   0xf   : > { %v13497_v5 = vpack.c.bf16 %v484_v4, %v483_v2  ;;  %s15673_s27 = smov 64   ;;  %s15674_s28 = smov 88  }
  0x10   : > { %13494 = vmatprep.subr.bf16.mxu0 %v13493_v3  ;;  %14165 = vmatprep.subr.bf16.mxu1 %v13493_v3  ;;  %s21043_s16 = smov (!%p436_p3, %s10839_s16), 7  ;;  %s15675_s29 = smov 120  }
  0x11   : > { %13496 = vmatpush3.bf16.msra.mxu0 %v13493_v3  ;;  %14167 = vmatpush3.bf16.msra.mxu1 %v13493_v3  ;;  %s11463_s19 = sshll.u32 %s21043_s16, 6  ;;  %s15676_s30 = smov 56  }
  0x12   : > { %13498 = vmatprep.subr.bf16.mxu0 %v13497_v5  ;;  %14166 = vmatprep.subr.bf16.mxu1 %v13497_v5  ;;  %s15781_s22 = scalar_lea.vmem %s20523_s0, %s11463_s19  ;;  %s15677_s14 = smov 80  }
  0x13   : > { %v449_v6 = vld [vmem:[%s15781_s22] sm:$0xff]  ;;  %v450_v7 = vld [vmem:[%s15781_s22 + $0x8] sm:$0xff]  ;;  %v451_v9 = vld [vmem:[%s15781_s22 + $0x10] sm:$0xff]  ;;  %s15678_s15 = smov 112   ;;  %s15679_s17 = smov 48  }
  0x14   : > { %12229 = vmatprep.mubr.msk.f32.mxu0 %vm492_vm0, %v449_v6  ;;  %v465_v8 = vld [vmem:[%s15781_s22 + $0x80] sm:$0xff]  ;;  %v466_v10 = vld [vmem:[%s15781_s22 + $0x88] sm:$0xff]  ;;  %v467_v11 = vld [vmem:[%s15781_s22 + $0x90] sm:$0xff]  ;;  %s15680_s24 = smov 72  }
  0x15   : > { %13500 = vmatpush3.bf16.msra.mxu0 %v13497_v5  ;;  %14168 = vmatpush3.bf16.msra.mxu1 %v13497_v5  ;;  %v452_v12 = vld [vmem:[%s15781_s22 + $0x18] sm:$0xff]  ;;  %v453_v13 = vld [vmem:[%s15781_s22 + $0x20] sm:$0xff]  ;;  %v454_v16 = vld [vmem:[%s15781_s22 + $0x28] sm:$0xff] }
  0x16   : > { %12253 = vmatprep.mubr.msk.f32.mxu1 %vm492_vm0, %v465_v8  ;;  %v468_v14 = vld [vmem:[%s15781_s22 + $0x98] sm:$0xff]  ;;  %v469_v15 = vld [vmem:[%s15781_s22 + $0xa0] sm:$0xff]  ;;  %v455_v17 = vld [vmem:[%s15781_s22 + $0x30] sm:$0xff] }
  0x17   : > { %v470_v18 = vld [vmem:[%s15781_s22 + $0xa8] sm:$0xff]  ;;  %v471_v19 = vld [vmem:[%s15781_s22 + $0xb0] sm:$0xff]  ;;  %v456_v20 = vld [vmem:[%s15781_s22 + $0x38] sm:$0xff] }
  0x18   : > { %12230 = vmatmul.mubr.msk.f32.vlgmr.msra.gmra.mrb[0].mxu0 %vm492_vm0, %v450_v7  ;;  %12254 = vmatmul.mubr.msk.f32.vlgmr.msra.gmra.mrb[0].mxu1 %vm492_vm0, %v466_v10  ;;  %v457_v21 = vld [vmem:[%s15781_s22 + $0x40] sm:$0xff]  ;;  %v472_v22 = vld [vmem:[%s15781_s22 + $0xb8] sm:$0xff]  ;;  %v458_v24 = vld [vmem:[%s15781_s22 + $0x48] sm:$0xff] }
  0x19   : > { %12232 = vmatprep.mubr.msk.f32.mxu0 %vm492_vm0, %v451_v9  ;;  %12256 = vmatprep.mubr.msk.f32.mxu1 %vm492_vm0, %v467_v11  ;;  %v473_v23 = vld [vmem:[%s15781_s22 + $0xc0] sm:$0xff]  ;;  %v459_v25 = vld [vmem:[%s15781_s22 + $0x50] sm:$0xff]  ;;  %v474_v26 = vld [vmem:[%s15781_s22 + $0xc8] sm:$0xff] }
  0x1a   : > { %v475_v27 = vld [vmem:[%s15781_s22 + $0xd0] sm:$0xff]  ;;  %v460_v28 = vld [vmem:[%s15781_s22 + $0x58] sm:$0xff]  ;;  %v461_v29 = vld [vmem:[%s15781_s22 + $0x60] sm:$0xff] }
  0x1b   : > { %v476_v30 = vld [vmem:[%s15781_s22 + $0xd8] sm:$0xff]  ;;  %v477_v31 = vld [vmem:[%s15781_s22 + $0xe0] sm:$0xff]  ;;  %v462_v32 = vld [vmem:[%s15781_s22 + $0x68] sm:$0xff] }
  0x1c   : > { %12233 = vmatmul.mubr.msk.f32.gmra.mrb[2].mxu0 %vm492_vm0, %v452_v12  ;;  %12257 = vmatmul.mubr.msk.f32.gmra.mrb[2].mxu1 %vm492_vm0, %v468_v14  ;;  %v463_v33 = vld [vmem:[%s15781_s22 + $0x70] sm:$0xff]  ;;  %v478_v34 = vld [vmem:[%s15781_s22 + $0xe8] sm:$0xff]  ;;  %v464_v36 = vld [vmem:[%s15781_s22 + $0x78] sm:$0xff] }
  0x1d   : > { %12235 = vmatprep.mubr.msk.f32.mxu0 %vm492_vm0, %v453_v13  ;;  %12259 = vmatprep.mubr.msk.f32.mxu1 %vm492_vm0, %v469_v15  ;;  %v479_v35 = vld [vmem:[%s15781_s22 + $0xf0] sm:$0xff]  ;;  %v480_v37 = vld [vmem:[%s15781_s22 + $0xf8] sm:$0xff] }
  0x20   : > { %12236 = vmatmul.mubr.msk.f32.gmra.mrb[4].mxu0 %vm492_vm0, %v454_v16  ;;  %12260 = vmatmul.mubr.msk.f32.gmra.mrb[4].mxu1 %vm492_vm0, %v470_v18 }
  0x21   : > { %12238 = vmatprep.mubr.msk.f32.mxu0 %vm492_vm0, %v455_v17  ;;  %12262 = vmatprep.mubr.msk.f32.mxu1 %vm492_vm0, %v471_v19 }
  0x24   : > { %12239 = vmatmul.mubr.msk.f32.gmra.mrb[6].mxu0 %vm492_vm0, %v456_v20  ;;  %12263 = vmatmul.mubr.msk.f32.gmra.mrb[6].mxu1 %vm492_vm0, %v472_v22 }
  0x25   : > { %12241 = vmatprep.mubr.msk.f32.mxu0 %vm492_vm0, %v457_v21  ;;  %12265 = vmatprep.mubr.msk.f32.mxu1 %vm492_vm0, %v473_v23 }
  0x28   : > { %12242 = vmatmul.mubr.msk.f32.gmra.mrb[8].mxu0 %vm492_vm0, %v458_v24  ;;  %12266 = vmatmul.mubr.msk.f32.gmra.mrb[8].mxu1 %vm492_vm0, %v474_v26 }
  0x29   : > { %12244 = vmatprep.mubr.msk.f32.mxu0 %vm492_vm0, %v459_v25  ;;  %12268 = vmatprep.mubr.msk.f32.mxu1 %vm492_vm0, %v475_v27 }
  0x2c   : > { %12245 = vmatmul.mubr.msk.f32.gmra.mrb[10].mxu0 %vm492_vm0, %v460_v28  ;;  %12269 = vmatmul.mubr.msk.f32.gmra.mrb[10].mxu1 %vm492_vm0, %v476_v30 }
  0x2d   : > { %12247 = vmatprep.mubr.msk.f32.mxu0 %vm492_vm0, %v461_v29  ;;  %12271 = vmatprep.mubr.msk.f32.mxu1 %vm492_vm0, %v477_v31 }
  0x30   : > { %12248 = vmatmul.mubr.msk.f32.gmra.mrb[12].mxu0 %vm492_vm0, %v462_v32  ;;  %12272 = vmatmul.mubr.msk.f32.gmra.mrb[12].mxu1 %vm492_vm0, %v478_v34 }
  0x31   : > { %12250 = vmatprep.mubr.msk.f32.mxu0 %vm492_vm0, %v463_v33  ;;  %12274 = vmatprep.mubr.msk.f32.mxu1 %vm492_vm0, %v479_v35 }
  0x34   : > { %12251 = vmatmul.mubr.msk.f32.gmra.mrb[14].mxu0 %vm492_vm0, %v464_v36  ;;  %12275 = vmatmul.mubr.msk.f32.gmra.mrb[14].mxu1 %vm492_vm0, %v480_v37 }
  0xeb   : > { %v12231_v39 = vpop.f32.mrb[0].mxu0  ;;  %v15855_v42 = vpop.f32.mrb[0].mxu1 }
  0xec   : > { %v15853_v40 = vadd.f32 %v12231_v39, %v15850_v38  ;;  %v655_v41 = vpop.f32.mrb[1].mxu0  ;;  %v735_v44 = vpop.f32.mrb[1].mxu1 }
  0xed   : > { %v15858_v43 = vadd.f32 %v15850_v38, %v655_v41  ;;  %v15861_v45 = vadd.f32 %v15850_v38, %v735_v44 }
  0xee   : > { %20692 = vst [vmem:[#allocation2_spill] sm:$0xff] %v15853_v40 }
  0xef   : > { %20693 = vst [vmem:[#allocation3_spill] sm:$0xff] %v15858_v43  ;;  %20694 = vst [vmem:[#allocation4_spill] sm:$0xff] %v15861_v45  ;;  %v12234_v46 = vpop.f32.mrb[2].mxu0  ;;  %12293 = vmatprep.mubr.msk.f32.mxu1 %vm842_vm1, %v15858_v43  ;;  %v15867_v47 = vpack.i.bf16 %v15853_v40, %v15858_v43  ;;  %v15872_v50 = vpop.f32.mrb[2].mxu1  ;;  %12349 = vmatprep.mubr.msk.f32.mxu0 %vm842_vm1, %v15861_v45 }
  0xf0   : > { %v15870_v48 = vadd.f32 %v12234_v46, %v15850_v38  ;;  %v665_v49 = vpop.f32.mrb[3].mxu0  ;;  %v15881_v52 = vpop.f32.mrb[3].mxu1 }
  0xf1   : > { %20695 = vst [vmem:[#allocation5_spill] sm:$0xff] %v15867_v47  ;;  %v15877_v51 = vadd.f32 %v15850_v38, %v665_v49  ;;  %14289 = vrot.lane.b32.xlu0 %v15867_v47, %s15672_s26  ;;  %v16001_v49 = vadd.f32 %v15855_v42, %v15850_v38  ;;  %v16021_v42 = vadd.f32 %v15872_v50, %v15850_v38 }
  0xf2   : > { %20696 = vst [vmem:[#allocation6_spill] sm:$0xff] %v15870_v48 }
  0xf3   : > { %20697 = vst [vmem:[#allocation7_spill] sm:$0xff] %v15877_v51  ;;  %v12237_v53 = vpop.f32.mrb[4].mxu0  ;;  %v15885_v54 = vpack.i.bf16 %v15870_v48, %v15877_v51  ;;  %v15890_v57 = vpop.f32.mrb[4].mxu1  ;;  %20727 = vst [vmem:[#allocation37_spill] sm:$0xff] %v16001_v49 }
  0xf4   : > { %v15888_v55 = vadd.f32 %v12237_v53, %v15850_v38  ;;  %v675_v56 = vpop.f32.mrb[5].mxu0  ;;  %v15897_v59 = vpop.f32.mrb[5].mxu1  ;;  %20731 = vst [vmem:[#allocation41_spill] sm:$0xff] %v16021_v42 }
  0xf5   : > { %20698 = vst [vmem:[#allocation8_spill] sm:$0xff] %v15885_v54  ;;  %v15893_v58 = vadd.f32 %v15850_v38, %v675_v56  ;;  %14294 = vrot.lane.b32.xlu0 %v15885_v54, %s15672_s26 }
  0xf6   : > { %20699 = vst [vmem:[#allocation9_spill] sm:$0xff] %v15888_v55 }
  0xf7   : > { %20700 = vst [vmem:[#allocation10_spill] sm:$0xff] %v15893_v58  ;;  %v12240_v60 = vpop.f32.mrb[6].mxu0  ;;  %v15901_v61 = vpack.i.bf16 %v15888_v55, %v15893_v58  ;;  %v12264_v0 = vpop.f32.mrb[6].mxu1 }
  0xf8   : > { %v15904_v62 = vadd.f32 %v12240_v60, %v15850_v38  ;;  %v685_v63 = vpop.f32.mrb[7].mxu0  ;;  %v765_v2 = vpop.f32.mrb[7].mxu1  ;;  %v16017_v60 = vpack.i.bf16 %v16001_v49, %v15861_v45  ;;  %v16040_v50 = vadd.f32 %v12264_v0, %v15850_v38 }
  0xf9   : > { %20701 = vst [vmem:[#allocation11_spill] sm:$0xff] %v15901_v61  ;;  %v15907_v1 = vadd.f32 %v15850_v38, %v685_v63  ;;  %14299 = vrot.lane.b32.xlu1 %v15901_v61, %s15672_s26  ;;  %v16025_v63 = vadd.f32 %v15850_v38, %v15881_v52  ;;  %v16043_v52 = vadd.f32 %v15850_v38, %v765_v2 }
  0xfa   : > { %20702 = vst [vmem:[#allocation12_spill] sm:$0xff] %v15904_v62  ;;  %20730 = vst [vmem:[#allocation40_spill] sm:$0xff] %v16017_v60 }
  0xfb   : > { %20703 = vst [vmem:[#allocation13_spill] sm:$0xff] %v15907_v1  ;;  %v12243_v3 = vpop.f32.mrb[8].mxu0  ;;  %v15913_v4 = vpack.i.bf16 %v15904_v62, %v15907_v1  ;;  %v12267_v7 = vpop.f32.mrb[8].mxu1  ;;  %20732 = vst [vmem:[#allocation42_spill] sm:$0xff] %v16025_v63  ;;  %v16059_v0 = vpack.i.bf16 %v16040_v50, %v16043_v52 }
  0xfc   : > { %v15916_v5 = vadd.f32 %v12243_v3, %v15850_v38  ;;  %v695_v6 = vpop.f32.mrb[9].mxu0  ;;  %v775_v9 = vpop.f32.mrb[9].mxu1  ;;  %v15948_v24 = vadd.f32 %v12267_v7, %v15850_v38  ;;  %v16029_v3 = vadd.f32 %v15890_v57, %v15850_v38  ;;  %20735 = vst [vmem:[#allocation45_spill] sm:$0xff] %v16040_v50  ;;  %20736 = vst [vmem:[#allocation46_spill] sm:$0xff] %v16043_v52 }
  0xfd   : > { %20704 = vst [vmem:[#allocation14_spill] sm:$0xff] %v15913_v4  ;;  %v15919_v8 = vadd.f32 %v15850_v38, %v695_v6  ;;  %14304 = vrot.lane.b32.xlu1 %v15913_v4, %s15672_s26  ;;  %v15951_v25 = vadd.f32 %v15850_v38, %v775_v9  ;;  %v16033_v6 = vadd.f32 %v15850_v38, %v15897_v59  ;;  %20739 = vst [vmem:[#allocation49_spill] sm:$0xff] %v16059_v0  ;;  %v20740_v9 = vmov 0 }
  0xfe   : > { %20705 = vst [vmem:[#allocation15_spill] sm:$0xff] %v15916_v5  ;;  %20713 = vst [vmem:[#allocation23_spill] sm:$0xff] %v15948_v24  ;;  %v16047_v57 = vpack.i.bf16 %v16021_v42, %v16025_v63  ;;  %v20741_v9 = vsel %vm16127_vm2, 4294967295, %v20740_v9 }
  0xff   : > { %20706 = vst [vmem:[#allocation16_spill] sm:$0xff] %v15919_v8  ;;  %v12246_v10 = vpop.f32.mrb[10].mxu0  ;;  %v15925_v11 = vpack.i.bf16 %v15916_v5, %v15919_v8  ;;  %v12270_v14 = vpop.f32.mrb[10].mxu1  ;;  %20714 = vst [vmem:[#allocation24_spill] sm:$0xff] %v15951_v25  ;;  %v15983_v39 = vpack.i.bf16 %v15948_v24, %v15951_v25  ;;  %v16051_v59 = vpack.i.bf16 %v16029_v3, %v16033_v6 }
 0x100   : > { %v15928_v12 = vadd.f32 %v12246_v10, %v15850_v38  ;;  %v705_v13 = vpop.f32.mrb[11].mxu0  ;;  %v785_v16 = vpop.f32.mrb[11].mxu1  ;;  %v15972_v35 = vadd.f32 %v12270_v14, %v15850_v38  ;;  %20733 = vst [vmem:[#allocation43_spill] sm:$0xff] %v16029_v3  ;;  %20734 = vst [vmem:[#allocation44_spill] sm:$0xff] %v16033_v6 }
 0x101   : > { %20707 = vst [vmem:[#allocation17_spill] sm:$0xff] %v15925_v11  ;;  %v15931_v15 = vadd.f32 %v15850_v38, %v705_v13  ;;  %14309 = vrot.lane.b32.xlu0 %v15925_v11, %s15672_s26  ;;  %v15975_v36 = vadd.f32 %v15850_v38, %v785_v16  ;;  %20723 = vst [vmem:[#allocation33_spill] sm:$0xff] %v15983_v39 }
 0x102   : > { %20708 = vst [vmem:[#allocation18_spill] sm:$0xff] %v15928_v12  ;;  %20720 = vst [vmem:[#allocation30_spill] sm:$0xff] %v15972_v35 }
 0x103   : > { %20709 = vst [vmem:[#allocation19_spill] sm:$0xff] %v15931_v15  ;;  %v12249_v17 = vpop.f32.mrb[12].mxu0  ;;  %v15937_v18 = vpack.i.bf16 %v15928_v12, %v15931_v15  ;;  %v12273_v21 = vpop.f32.mrb[12].mxu1  ;;  %20721 = vst [vmem:[#allocation31_spill] sm:$0xff] %v15975_v36  ;;  %v16005_v53 = vpack.i.bf16 %v15972_v35, %v15975_v36 }
 0x104   : > { %v15940_v19 = vadd.f32 %v12249_v17, %v15850_v38  ;;  %v715_v20 = vpop.f32.mrb[13].mxu0  ;;  %v795_v23 = vpop.f32.mrb[13].mxu1  ;;  %v15966_v32 = vadd.f32 %v12273_v21, %v15850_v38  ;;  %20737 = vst [vmem:[#allocation47_spill] sm:$0xff] %v16047_v57  ;;  %20738 = vst [vmem:[#allocation48_spill] sm:$0xff] %v16051_v59 }
 0x105   : > { %20710 = vst [vmem:[#allocation20_spill] sm:$0xff] %v15937_v18  ;;  %v15943_v22 = vadd.f32 %v15850_v38, %v715_v20  ;;  %14314 = vrot.lane.b32.xlu1 %v15937_v18, %s15672_s26  ;;  %v15969_v33 = vadd.f32 %v15850_v38, %v795_v23  ;;  %20728 = vst [vmem:[#allocation38_spill] sm:$0xff] %v16005_v53 }
 0x106   : > { %20711 = vst [vmem:[#allocation21_spill] sm:$0xff] %v15940_v19  ;;  %20718 = vst [vmem:[#allocation28_spill] sm:$0xff] %v15966_v32 }
 0x107   : > { %20712 = vst [vmem:[#allocation22_spill] sm:$0xff] %v15943_v22  ;;  %v12252_v26 = vpop.f32.mrb[14].mxu0  ;;  %v15955_v27 = vpack.i.bf16 %v15940_v19, %v15943_v22  ;;  %v12276_v30 = vpop.f32.mrb[14].mxu1  ;;  %20719 = vst [vmem:[#allocation29_spill] sm:$0xff] %v15969_v33  ;;  %v15997_v46 = vpack.i.bf16 %v15966_v32, %v15969_v33 }
 0x108   : > { %v15958_v28 = vadd.f32 %v12252_v26, %v15850_v38  ;;  %v725_v29 = vpop.f32.mrb[15].mxu0  ;;  %v805_v34 = vpop.f32.mrb[15].mxu1  ;;  %v15990_v41 = vadd.f32 %v12276_v30, %v15850_v38  ;;  %20742 = vst [vmem:[#allocation50_spill] sm:$0xff] %v20741_v9 }
 0x109   : > { %20715 = vst [vmem:[#allocation25_spill] sm:$0xff] %v15955_v27  ;;  %v15961_v31 = vadd.f32 %v15850_v38, %v725_v29  ;;  %14319 = vrot.lane.b32.xlu0 %v15955_v27, %s15672_s26  ;;  %v15993_v44 = vadd.f32 %v15850_v38, %v805_v34  ;;  %20726 = vst [vmem:[#allocation36_spill] sm:$0xff] %v15997_v46 }
 0x10a   : > { %20716 = vst [vmem:[#allocation26_spill] sm:$0xff] %v15958_v28  ;;  %20724 = vst [vmem:[#allocation34_spill] sm:$0xff] %v15990_v41 }
 0x10b   : > { %20717 = vst [vmem:[#allocation27_spill] sm:$0xff] %v15961_v31  ;;  %v15979_v37 = vpack.i.bf16 %v15958_v28, %v15961_v31  ;;  %20725 = vst [vmem:[#allocation35_spill] sm:$0xff] %v15993_v44  ;;  %v16013_v56 = vpack.i.bf16 %v15990_v41, %v15993_v44 }
 0x10d   : > { %20722 = vst [vmem:[#allocation32_spill] sm:$0xff] %v15979_v37  ;;  %14324 = vrot.lane.b32.xlu1 %v15979_v37, %s15672_s26  ;;  %14329 = vrot.lane.b32.xlu0 %v15983_v39, %s15672_s26  ;;  %20729 = vst [vmem:[#allocation39_spill] sm:$0xff] %v16013_v56 }
 0x111   : > { %14334 = vrot.lane.b32.xlu1 %v16005_v53, %s15672_s26  ;;  %14339 = vrot.lane.b32.xlu0 %v15997_v46, %s15672_s26 }
 0x115   : > { %14344 = vrot.lane.b32.xlu1 %v16013_v56, %s15672_s26  ;;  %14349 = vrot.lane.b32.xlu0 %v16017_v60, %s15672_s26 }
 0x119   : > { %14354 = vrot.lane.b32.xlu1 %v16047_v57, %s15672_s26  ;;  %14359 = vrot.lane.b32.xlu0 %v16051_v59, %s15672_s26 }
 0x11d   : > { %14364 = vrot.lane.b32.xlu1 %v16059_v0, %s15672_s26  ;;  %14374 = vrot.lane.b32.xlu0 %v15885_v54, %s15673_s27  ;;  %s15681_s26 = smov 104  }
 0x121   : > { %14369 = vrot.lane.b32.xlu1 %v15867_v47, %s15673_s27  ;;  %14384 = vrot.lane.b32.xlu0 %v15913_v4, %s15673_s27 }
 0x125   : > { %14379 = vrot.lane.b32.xlu1 %v15901_v61, %s15673_s27  ;;  %14389 = vrot.lane.b32.xlu0 %v15925_v11, %s15673_s27 }
 0x129   : > { %14394 = vrot.lane.b32.xlu1 %v15937_v18, %s15673_s27  ;;  %14414 = vrot.lane.b32.xlu0 %v15997_v46, %s15673_s27 }
 0x12d   : > { %14399 = vrot.lane.b32.xlu1 %v15955_v27, %s15673_s27  ;;  %14424 = vrot.lane.b32.xlu0 %v15937_v18, %s15674_s28 }
 0x131   : > { %14404 = vrot.lane.b32.xlu1 %v15983_v39, %s15673_s27  ;;  %2631 = vrot.lane.b32.xlu0 %v15916_v5, %s15675_s29 }
 0x135   : > { %14409 = vrot.lane.b32.xlu1 %v16005_v53, %s15673_s27  ;;  %14444 = vrot.lane.b32.xlu0 %v15997_v46, %s15674_s28 }
 0x139   : > { %14419 = vrot.lane.b32.xlu1 %v15925_v11, %s15674_s28  ;;  %2635 = vrot.lane.b32.xlu0 %v15928_v12, %s15675_s29 }
 0x13d   : > { %14429 = vrot.lane.b32.xlu1 %v15955_v27, %s15674_s28  ;;  %2637 = vrot.lane.b32.xlu0 %v15943_v22, %s15675_s29 }
 0x141   : > { %14434 = vrot.lane.b32.xlu1 %v15983_v39, %s15674_s28  ;;  %2969 = vrot.lane.b32.xlu0 %v15948_v24, %s15675_s29 }
 0x145   : > { %2629 = vrot.lane.b32.xlu1 %v15919_v8, %s15675_s29  ;;  %2971 = vrot.lane.b32.xlu0 %v15975_v36, %s15675_s29 }
 0x149   : > { %14439 = vrot.lane.b32.xlu1 %v16005_v53, %s15674_s28  ;;  %14449 = vrot.lane.b32.xlu0 %v15979_v37, %s15673_s27 }
 0x14d   : > { %2633 = vrot.lane.b32.xlu1 %v15931_v15, %s15675_s29  ;;  %2641 = vrot.lane.b32.xlu0 %v15961_v31, %s15675_s29 }
 0x151   : > { %2639 = vrot.lane.b32.xlu1 %v15940_v19, %s15675_s29 }
 0x155   : > { %2643 = vrot.lane.b32.xlu1 %v15958_v28, %s15675_s29 }
 0x159   : > { %2967 = vrot.lane.b32.xlu1 %v15951_v25, %s15675_s29 }
 0x15d   : > { %14454 = vrot.lane.b32.xlu1 %v16013_v56, %s15673_s27 }
 0x161   : > { %14459 = vrot.lane.b32.xlu1 %v15979_v37, %s15674_s28 }
 0x163   : > { %v14290_v38 = vpop.permute.xlu0 %14289 }
 0x164   : > { %v14292_v2 = vunpack.i.h.bf16 %v14290_v38  ;;  %v14291_v7 = vunpack.i.l.bf16 %v14290_v38 }
 0x165   : > { %14464 = vrot.lane.b32.xlu1 %v16013_v56, %s15674_s28 }
 0x166   : > { %v13501_v10 = vpack.c.bf16 %v14292_v2, %v14291_v7 }
 0x167   : > { %v14295_v13 = vpop.permute.xlu0 %14294 }
 0x168   : > { %v14297_v14 = vunpack.i.h.bf16 %v14295_v13  ;;  %v14296_v16 = vunpack.i.l.bf16 %v14295_v13  ;;  %13503 = vmatprep.subr.msk.bf16.mxu1 %vm16127_vm2, %v13501_v10 }
 0x169   : > { %13506 = vmatpush3.bf16.xpose.msk.msra.mxu1 %vm16127_vm2, %v13501_v10 }
 0x16a   : > { %v13507_v17 = vpack.c.bf16 %v14297_v14, %v14296_v16 }
 0x16b   : > { %v14300_v20 = vpop.permute.xlu1 %14299 }
 0x16c   : > { %v14302_v21 = vunpack.i.h.bf16 %v14300_v20  ;;  %v14301_v23 = vunpack.i.l.bf16 %v14300_v20  ;;  %13509 = vmatprep.subr.msk.bf16.mxu1 %vm16127_vm2, %v13507_v17 }
 0x16e   : > { %v13513_v26 = vpack.c.bf16 %v14302_v21, %v14301_v23 }
 0x16f   : > { %v14305_v29 = vpop.permute.xlu1 %14304 }
 0x170   : > { %v14307_v30 = vunpack.i.h.bf16 %v14305_v29  ;;  %v14306_v34 = vunpack.i.l.bf16 %v14305_v29 }
 0x171   : > { %13512 = vmatpush3.bf16.xpose.msk.msra.mxu1 %vm16127_vm2, %v13507_v17 }
 0x172   : > { %13515 = vmatprep.subr.msk.bf16.mxu1 %vm16127_vm2, %v13513_v26  ;;  %v13519_v2 = vpack.c.bf16 %v14307_v30, %v14306_v34 }
 0x173   : > { %v14310_v38 = vpop.permute.xlu0 %14309 }
 0x174   : > { %v14312_v13 = vunpack.i.h.bf16 %v14310_v38  ;;  %v14311_v14 = vunpack.i.l.bf16 %v14310_v38 }
 0x176   : > { %v13525_v17 = vpack.c.bf16 %v14312_v13, %v14311_v14 }
 0x177   : > { %v14315_v7 = vpop.permute.xlu1 %14314 }
 0x178   : > { %v14316_v29 = vunpack.i.l.bf16 %v14315_v7 }
 0x179   : > { %13518 = vmatpush3.bf16.xpose.msk.msra.mxu1 %vm16127_vm2, %v13513_v26  ;;  %v14317_v26 = vunpack.i.h.bf16 %v14315_v7 }
 0x17a   : > { %13521 = vmatprep.subr.msk.bf16.mxu1 %vm16127_vm2, %v13519_v2 }
 0x17b   : > { %v14320_v10 = vpop.permute.xlu0 %14319  ;;  %v13531_v56 = vpack.c.bf16 %v14317_v26, %v14316_v29 }
 0x17c   : > { %v14322_v13 = vunpack.i.h.bf16 %v14320_v10  ;;  %v14321_v14 = vunpack.i.l.bf16 %v14320_v10 }
 0x17f   : > { %v14325_v16 = vpop.permute.xlu1 %14324  ;;  %v14330_v20 = vpop.permute.xlu0 %14329 }
 0x180   : > { %v14327_v10 = vunpack.i.h.bf16 %v14325_v16 }
 0x181   : > { %13524 = vmatpush3.bf16.xpose.msk.msra.mxu1 %vm16127_vm2, %v13519_v2 }
 0x182   : > { %13527 = vmatprep.subr.msk.bf16.mxu1 %vm16127_vm2, %v13525_v17 }
 0x183   : > { %v16149_v21 = vpop.permute.xlu1 %14334  ;;  %v16151_v23 = vpop.permute.xlu0 %14339 }
 0x187   : > { %v16153_v30 = vpop.permute.xlu1 %14344  ;;  %v14350_v34 = vpop.permute.xlu0 %14349 }
 0x188   : > { %v14352_v38 = vunpack.i.h.bf16 %v14350_v34  ;;  %v14351_v46 = vunpack.i.l.bf16 %v14350_v34  ;;  %12294 = vmatmul.mubr.msk.f32.vlgmr.msra.gmra.mrb[16].mxu1 %vm842_vm1, %v15853_v40 }
 0x189   : > { %12296 = vmatprep.mubr.msk.f32.mxu1 %vm842_vm1, %v15877_v51  ;;  %13530 = vmatpush3.bf16.xpose.msk.msra.mxu1 %vm16127_vm2, %v13525_v17  ;;  %v13537_v17 = vpack.c.bf16 %v14322_v13, %v14321_v14 }
 0x18a   : > { %v13549_v2 = vpack.c.bf16 %v14352_v38, %v14351_v46  ;;  %13533 = vmatprep.subr.msk.bf16.mxu1 %vm16127_vm2, %v13531_v56 }
 0x18b   : > { %v14355_v7 = vpop.permute.xlu1 %14354  ;;  %v14360_v29 = vpop.permute.xlu0 %14359 }
 0x18c   : > { %v14357_v53 = vunpack.i.h.bf16 %v14355_v7  ;;  %v14356_v26 = vunpack.i.l.bf16 %v14355_v7  ;;  %12297 = vmatmul.mubr.msk.f32.gmra.mrb[18].mxu1 %vm842_vm1, %v15870_v48  ;;  %13551 = vmatprep.subr.msk.bf16.mxu0 %vm16127_vm2, %v13549_v2  ;;  %v14362_v34 = vunpack.i.h.bf16 %v14360_v29  ;;  %v14361_v38 = vunpack.i.l.bf16 %v14360_v29 }
 0x18d   : > { %12299 = vmatprep.mubr.msk.f32.mxu1 %vm842_vm1, %v15893_v58  ;;  %13554 = vmatpush3.bf16.xpose.msk.msra.mxu0 %vm16127_vm2, %v13549_v2 }
 0x18e   : > { %v13555_v46 = vpack.c.bf16 %v14357_v53, %v14356_v26  ;;  %v14326_v53 = vunpack.i.l.bf16 %v14325_v16  ;;  %v13561_v2 = vpack.c.bf16 %v14362_v34, %v14361_v38  ;;  %v14332_v16 = vunpack.i.h.bf16 %v14330_v20 }
 0x18f   : > { %v14365_v7 = vpop.permute.xlu1 %14364  ;;  %v14331_v26 = vunpack.i.l.bf16 %v14330_v20  ;;  %v14336_v20 = vunpack.i.l.bf16 %v16149_v21 }
 0x190   : > { %12300 = vmatmul.mubr.msk.f32.gmra.mrb[20].mxu1 %vm842_vm1, %v15888_v55  ;;  %13557 = vmatprep.subr.msk.bf16.mxu0 %vm16127_vm2, %v13555_v46  ;;  %v14367_v13 = vunpack.i.h.bf16 %v14365_v7  ;;  %v14366_v14 = vunpack.i.l.bf16 %v14365_v7 }
 0x191   : > { %12302 = vmatprep.mubr.msk.f32.mxu1 %vm842_vm1, %v15907_v1  ;;  %13536 = vmatpush3.bf16.xpose.msk.msra.mxu1 %vm16127_vm2, %v13531_v56  ;;  %v13543_v56 = vpack.c.bf16 %v14327_v10, %v14326_v53 }
 0x192   : > { %13539 = vmatprep.subr.msk.bf16.mxu1 %vm16127_vm2, %v13537_v17  ;;  %v13567_v29 = vpack.c.bf16 %v14367_v13, %v14366_v14 }
 0x193   : > { %v14370_v34 = vpop.permute.xlu1 %14369 }
 0x194   : > { %12303 = vmatmul.mubr.msk.f32.gmra.mrb[22].mxu1 %vm842_vm1, %v15904_v62  ;;  %v14372_v38 = vunpack.i.h.bf16 %v14370_v34  ;;  %v14371_v10 = vunpack.i.l.bf16 %v14370_v34 }
 0x195   : > { %12321 = vmatprep.mubr.msk.f32.mxu1 %vm842_vm1, %v15919_v8  ;;  %13560 = vmatpush3.bf16.xpose.msk.msra.mxu0 %vm16127_vm2, %v13555_v46  ;;  %v13573_v46 = vpack.c.bf16 %v14332_v16, %v14331_v26  ;;  %v14341_v26 = vunpack.i.l.bf16 %v16151_v23 }
 0x196   : > { %13563 = vmatprep.subr.msk.bf16.mxu0 %vm16127_vm2, %v13561_v2  ;;  %v13597_v53 = vpack.c.bf16 %v14372_v38, %v14371_v10 }
 0x199   : > { %13542 = vmatpush3.bf16.xpose.msk.msra.mxu1 %vm16127_vm2, %v13537_v17  ;;  %v14337_v17 = vunpack.i.h.bf16 %v16149_v21  ;;  %v14342_v21 = vunpack.i.h.bf16 %v16151_v23 }
 0x19a   : > { %13545 = vmatprep.subr.msk.bf16.mxu1 %vm16127_vm2, %v13543_v56 }
 0x19b   : > { %v13579_v7 = vpack.c.bf16 %v14337_v17, %v14336_v20  ;;  %v13585_v38 = vpack.c.bf16 %v14342_v21, %v14341_v26 }
 0x19d   : > { %13566 = vmatpush3.bf16.xpose.msk.msra.mxu0 %vm16127_vm2, %v13561_v2  ;;  %v14375_v2 = vpop.permute.xlu0 %14374 }
 0x19e   : > { %13569 = vmatprep.subr.msk.bf16.mxu0 %vm16127_vm2, %v13567_v29  ;;  %v14377_v13 = vunpack.i.h.bf16 %v14375_v2  ;;  %v14376_v14 = vunpack.i.l.bf16 %v14375_v2  ;;  %v14346_v2 = vunpack.i.l.bf16 %v16153_v30 }
 0x1a1   : > { %13548 = vmatpush3.bf16.xpose.msk.msra.mxu1 %vm16127_vm2, %v13543_v56  ;;  %v14380_v56 = vpop.permute.xlu1 %14379  ;;  %v14385_v16 = vpop.permute.xlu0 %14384 }
 0x1a2   : > { %13575 = vmatprep.subr.msk.bf16.mxu1 %vm16127_vm2, %v13573_v46  ;;  %v14381_v34 = vunpack.i.l.bf16 %v14380_v56  ;;  %v14387_v10 = vunpack.i.h.bf16 %v14385_v16  ;;  %v14386_v23 = vunpack.i.l.bf16 %v14385_v16 }
 0x1a5   : > { %13572 = vmatpush3.bf16.xpose.msk.msra.mxu0 %vm16127_vm2, %v13567_v29  ;;  %v14382_v29 = vunpack.i.h.bf16 %v14380_v56  ;;  %v14390_v20 = vpop.permute.xlu0 %14389 }
 0x1a6   : > { %13598 = vmatprep.subr.bf16.mxu0 %v13597_v53 }
 0x1a7   : > { %v13605_v17 = vpack.c.bf16 %v14382_v29, %v14381_v34 }
 0x1a8   : > { %12322 = vmatmul.mubr.msk.f32.vlgmr.msra.gmra.mrb[24].mxu1 %vm842_vm1, %v15916_v5 }
 0x1a9   : > { %12324 = vmatprep.mubr.msk.f32.mxu1 %vm842_vm1, %v15931_v15  ;;  %13578 = vmatpush3.bf16.xpose.msk.msra.mxu1 %vm16127_vm2, %v13573_v46  ;;  %v13601_v46 = vpack.c.bf16 %v14377_v13, %v14376_v14  ;;  %v14392_v13 = vunpack.i.h.bf16 %v14390_v20  ;;  %v14391_v14 = vunpack.i.l.bf16 %v14390_v20 }
 0x1aa   : > { %13581 = vmatprep.subr.msk.bf16.mxu1 %vm16127_vm2, %v13579_v7 }
 0x1ab   : > { %v16247_v21 = vpack.c.bf16 %v14392_v13, %v14391_v14 }
 0x1ac   : > { %12325 = vmatmul.mubr.msk.f32.gmra.mrb[26].mxu1 %vm842_vm1, %v15928_v12  ;;  %12350 = vmatmul.mubr.msk.f32.vlgmr.msra.gmra.mrb[16].mxu0 %vm842_vm1, %v16001_v49 }
 0x1ad   : > { %12327 = vmatprep.mubr.msk.f32.mxu1 %vm842_vm1, %v15943_v22  ;;  %12352 = vmatprep.mubr.msk.f32.mxu0 %vm842_vm1, %v16025_v63 }
 0x1ae   : > { %13600 = vmatpush3.bf16.msra.mxu0 %v13597_v53  ;;  %v14347_v53 = vunpack.i.h.bf16 %v16153_v30 }
 0x1af   : > { %13602 = vmatprep.subr.bf16.mxu0 %v13601_v46 }
 0x1b0   : > { %12328 = vmatmul.mubr.msk.f32.gmra.mrb[28].mxu1 %vm842_vm1, %v15940_v19  ;;  %12353 = vmatmul.mubr.msk.f32.gmra.mrb[18].mxu0 %vm842_vm1, %v16021_v42  ;;  %v13591_v56 = vpack.c.bf16 %v14347_v53, %v14346_v2 }
 0x1b1   : > { %12330 = vmatprep.mubr.msk.f32.mxu1 %vm842_vm1, %v15961_v31  ;;  %12355 = vmatprep.mubr.msk.f32.mxu0 %vm842_vm1, %v16033_v6 }
 0x1b2   : > { %13584 = vmatpush3.bf16.xpose.msk.msra.mxu1 %vm16127_vm2, %v13579_v7  ;;  %13604 = vmatpush3.bf16.msra.mxu0 %v13601_v46  ;;  %v13609_v7 = vpack.c.bf16 %v14387_v10, %v14386_v23 }
 0x1b3   : > { %13587 = vmatprep.subr.msk.bf16.mxu1 %vm16127_vm2, %v13585_v38  ;;  %13606 = vmatprep.subr.bf16.mxu0 %v13605_v17 }
 0x1b4   : > { %12331 = vmatmul.mubr.msk.f32.gmra.mrb[30].mxu1 %vm842_vm1, %v15958_v28  ;;  %12356 = vmatmul.mubr.msk.f32.gmra.mrb[20].mxu0 %vm842_vm1, %v16029_v3 }
 0x1b5   : > { %12358 = vmatprep.mubr.msk.f32.mxu0 %vm842_vm1, %v16043_v52  ;;  %12377 = vmatprep.mubr.msk.f32.mxu1 %vm842_vm1, %v15951_v25 }
 0x1b6   : > { %13608 = vmatpush3.bf16.msra.mxu0 %v13605_v17 }
 0x1b7   : > { %13610 = vmatprep.subr.bf16.mxu0 %v13609_v7 }
 0x1b8   : > { %12359 = vmatmul.mubr.msk.f32.gmra.mrb[22].mxu0 %vm842_vm1, %v16040_v50 }
 0x1ba   : > { %13590 = vmatpush3.bf16.xpose.msk.msra.mxu1 %vm16127_vm2, %v13585_v38  ;;  %13612 = vmatpush3.bf16.msra.mxu0 %v13609_v7 }
 0x1bb   : > { %13593 = vmatprep.subr.msk.bf16.mxu1 %vm16127_vm2, %v13591_v56  ;;  %13614 = vmatprep.subr.bf16.mxu0 %v16247_v21 }
 0x1c2   : > { %13596 = vmatpush3.bf16.xpose.msk.msra.mxu1 %vm16127_vm2, %v13591_v56 }
 0x1c9   : > { %12378 = vmatmul.mubr.msk.f32.vlgmr.msra.gmra.mrb[32].mxu1 %vm842_vm1, %v15948_v24 }
 0x1ca   : > { %12380 = vmatprep.mubr.msk.f32.mxu1 %vm842_vm1, %v15975_v36 }
 0x1cd   : > { %12381 = vmatmul.mubr.msk.f32.gmra.mrb[34].mxu1 %vm842_vm1, %v15972_v35 }
 0x1ce   : > { %12383 = vmatprep.mubr.msk.f32.mxu1 %vm842_vm1, %v15969_v33 }
 0x1d1   : > { %12384 = vmatmul.mubr.msk.f32.gmra.mrb[36].mxu1 %vm842_vm1, %v15966_v32 }
 0x1d2   : > { %12386 = vmatprep.mubr.msk.f32.mxu1 %vm842_vm1, %v15993_v44 }
 0x1d5   : > { %12387 = vmatmul.mubr.msk.f32.gmra.mrb[38].mxu1 %vm842_vm1, %v15990_v41 }
 0x25b   : > { %v12295_v30 = vpop.f32.mrb[16].mxu1 }
 0x25c   : > { %v16270_v16 = vmul.f32 0.35355338, %v12295_v30  ;;  %v941_v26 = vpop.f32.mrb[17].mxu1 }
 0x25d   : > { %v16272_v29 = vmul.f32 0.35355338, %v941_v26 }
 0x25e   : > { %v1499_v34 = vsel %vm1495_vm3, %v16270_v16, -inf }
 0x25f   : > { %1500 = vmax.xlane.f32.xlu1 %v1499_v34  ;;  %v12298_v46 = vpop.f32.mrb[18].mxu1  ;;  %v1496_v38 = vsel %vm1495_vm3, %v16272_v29, -inf }
 0x260   : > { %1497 = vmax.xlane.f32.xlu0 %v1496_v38  ;;  %v951_v10 = vpop.f32.mrb[19].mxu1  ;;  %v16288_v36 = vmul.f32 0.35355338, %v12298_v46 }
 0x261   : > { %v16300_v31 = vmul.f32 0.35355338, %v951_v10 }
 0x263   : > { %v12301_v23 = vpop.f32.mrb[20].mxu1 }
 0x264   : > { %v961_v17 = vpop.f32.mrb[21].mxu1 }
 0x267   : > { %v12304_v20 = vpop.f32.mrb[22].mxu1 }
 0x268   : > { %v971_v53 = vpop.f32.mrb[23].mxu1 }
 0x27b   : > { %v12323_v2 = vpop.f32.mrb[24].mxu1 }
 0x27c   : > { %v1102_v13 = vpop.f32.mrb[25].mxu1 }
 0x27d   : > { %v16354_v49 = vmul.f32 0.35355338, %v1102_v13 }
 0x27f   : > { %v16278_v14 = vpop.f32.mrb[26].mxu1  ;;  %v12351_v7 = vpop.f32.mrb[16].mxu0  ;;  %v1520_v27 = vsel %vm1495_vm3, %v16354_v49, -inf }
 0x280   : > { %v16280_v56 = vmul.f32 0.35355338, %v12351_v7  ;;  %v16282_v30 = vpop.f32.mrb[27].mxu1  ;;  %v1263_v26 = vpop.f32.mrb[17].mxu0 }
 0x281   : > { %v16284_v34 = vmul.f32 0.35355338, %v1263_v26 }
 0x282   : > { %v1547_v38 = vsel %vm1495_vm3, %v16280_v56, -inf }
 0x283   : > { %v12354_v24 = vpop.f32.mrb[18].mxu0  ;;  %1548 = vmax.xlane.f32.xlu1 %v1547_v38  ;;  %v16290_v25 = vpop.f32.mrb[28].mxu1  ;;  %v1544_v28 = vsel %vm1495_vm3, %v16284_v34, -inf  ;;  %v1505_v38 = vsel %vm1495_vm3, %v16288_v36, -inf }
 0x284   : > { %v16294_v19 = vmul.f32 0.35355338, %v12354_v24  ;;  %v1273_v7 = vpop.f32.mrb[19].mxu0  ;;  %1545 = vmax.xlane.f32.xlu0 %v1544_v28  ;;  %v16296_v15 = vpop.f32.mrb[29].mxu1  ;;  %v16310_v28 = vmul.f32 0.35355338, %v961_v17 }
 0x285   : > { %v16314_v10 = vmul.f32 0.35355338, %v1273_v7 }
 0x286   : > { %v1553_v26 = vsel %vm1495_vm3, %v16294_v19, -inf  ;;  %v1508_v17 = vsel %vm1495_vm3, %v16310_v28, -inf }
 0x287   : > { %v12357_v46 = vpop.f32.mrb[20].mxu0  ;;  %1554 = vmax.xlane.f32.xlu1 %v1553_v26  ;;  %v16302_v22 = vpop.f32.mrb[30].mxu1  ;;  %v1502_v26 = vsel %vm1495_vm3, %v16300_v31, -inf  ;;  %v1550_v7 = vsel %vm1495_vm3, %v16314_v10, -inf }
 0x288   : > { %v16306_v12 = vmul.f32 0.35355338, %v12357_v46  ;;  %v1283_v24 = vpop.f32.mrb[21].mxu0  ;;  %1506 = vmax.xlane.f32.xlu0 %v1505_v38  ;;  %v16308_v5 = vpop.f32.mrb[31].mxu1  ;;  %v16324_v38 = vmul.f32 0.35355338, %v12301_v23 }
 0x289   : > { %v16318_v46 = vpop.permute.xlu1 %14394  ;;  %v16320_v18 = vmul.f32 0.35355338, %v1283_v24  ;;  %v16338_v23 = vmul.f32 0.35355338, %v971_v53 }
 0x28a   : > { %v1559_v8 = vsel %vm1495_vm3, %v16306_v12, -inf  ;;  %v1511_v24 = vsel %vm1495_vm3, %v16324_v38, -inf }
 0x28b   : > { %v12360_v39 = vpop.f32.mrb[22].mxu0  ;;  %1560 = vmax.xlane.f32.xlu1 %v1559_v8  ;;  %v1556_v50 = vsel %vm1495_vm3, %v16320_v18, -inf  ;;  %v1514_v42 = vsel %vm1495_vm3, %v16338_v23, -inf }
 0x28c   : > { %v1293_v37 = vpop.f32.mrb[23].mxu0  ;;  %1503 = vmax.xlane.f32.xlu0 %v1502_v26  ;;  %v16328_v8 = vmul.f32 0.35355338, %v12360_v39  ;;  %v16332_v26 = vmul.f32 0.35355338, %v12304_v20 }
 0x28d   : > { %v16336_v3 = vpop.permute.xlu1 %14399 }
 0x28e   : > { %v1517_v39 = vsel %vm1495_vm3, %v16332_v26, -inf }
 0x28f   : > { %1509 = vmax.xlane.f32.xlu1 %v1508_v17  ;;  %v1565_v17 = vsel %vm1495_vm3, %v16328_v8, -inf }
 0x290   : > { %1551 = vmax.xlane.f32.xlu0 %v1550_v7  ;;  %v16342_v7 = vmul.f32 0.35355338, %v12323_v2 }
 0x291   : > { %v16346_v20 = vpop.permute.xlu1 %14404 }
 0x292   : > { %v1523_v53 = vsel %vm1495_vm3, %v16342_v7, -inf }
 0x293   : > { %1557 = vmax.xlane.f32.xlu1 %v1556_v50  ;;  %v16348_v50 = vmul.f32 0.35355338, %v1293_v37 }
 0x294   : > { %1512 = vmax.xlane.f32.xlu0 %v1511_v24 }
 0x297   : > { %1566 = vmax.xlane.f32.xlu1 %v1565_v17  ;;  %v1562_v17 = vsel %vm1495_vm3, %v16348_v50, -inf }
 0x298   : > { %1518 = vmax.xlane.f32.xlu0 %v1517_v39  ;;  %v16358_v39 = vpop.permute.xlu1 %14409 }
 0x29b   : > { %1515 = vmax.xlane.f32.xlu1 %v1514_v42 }
 0x29c   : > { %v12379_v24 = vpop.f32.mrb[32].mxu1  ;;  %1524 = vmax.xlane.f32.xlu0 %v1523_v53  ;;  %v16364_v11 = vpop.permute.xlu1 %14419 }
 0x29d   : > { %v1424_v2 = vpop.f32.mrb[33].mxu1 }
 0x29f   : > { %1563 = vmax.xlane.f32.xlu1 %v1562_v17 }
 0x2a0   : > { %v12382_v37 = vpop.f32.mrb[34].mxu1  ;;  %v16368_v52 = vpop.permute.xlu1 %14429 }
 0x2a1   : > { %v1434_v62 = vpop.f32.mrb[35].mxu1  ;;  %20743 = vst [vmem:[#allocation51_spill] sm:$0xff] %v16368_v52 }
 0x2a3   : > { %1521 = vmax.xlane.f32.xlu1 %v1520_v27 }
 0x2a4   : > { %v16362_v42 = vpop.f32.mrb[36].mxu1  ;;  %v16370_v51 = vpop.permute.xlu1 %14434 }
 0x2a5   : > { %v1444_v55 = vpop.f32.mrb[37].mxu1  ;;  %20744 = vst [vmem:[#allocation52_spill] sm:$0xff] %v16370_v51 }
 0x2a8   : > { %v16366_v53 = vpop.f32.mrb[38].mxu1  ;;  %v16378_v27 = vpop.permute.xlu1 %2629 }
 0x2a9   : > { %v1454_v13 = vpop.f32.mrb[39].mxu1  ;;  %20745 = vst [vmem:[#allocation53_spill] sm:$0xff] %v16378_v27  ;;  %v16397_v27 = vmul.f32 0.35355338, %v16282_v30  ;;  %v16416_v30 = vmul.f32 0.35355338, %v16278_v14 }
 0x2aa   : > { %v16431_v14 = vmul.f32 0.35355338, %v1434_v62 }
 0x2ac   : > { %v16382_v17 = vpop.permute.xlu1 %14439 }
 0x2ad   : > { %20746 = vst [vmem:[#allocation54_spill] sm:$0xff] %v16382_v17  ;;  %v16402_v17 = vmul.f32 0.35355338, %v16296_v15 }
 0x2b2   : > { %2975 = vrot.lane.b32.xlu0 %v15969_v33, %s15675_s29  ;;  %v16388_v33 = vpop.permute.xlu1 %2633 }
 0x2b3   : > { %20747 = vst [vmem:[#allocation55_spill] sm:$0xff] %v16388_v33 }
 0x2b4   : > { %2973 = vrot.lane.b32.xlu1 %v15972_v35, %s15675_s29 }
 0x2b6   : > { %2977 = vrot.lane.b32.xlu0 %v15966_v32, %s15675_s29  ;;  %v16390_v51 = vpop.permute.xlu1 %2639  ;;  %v16394_v32 = vpop.permute.xlu0 %14414 }
 0x2b7   : > { %20748 = vst [vmem:[#allocation56_spill] sm:$0xff] %v16390_v51  ;;  %v16409_v51 = vmul.f32 0.35355338, %v16308_v5  ;;  %v1529_v5 = vsel %vm1495_vm3, %v16416_v30, -inf }
 0x2ba   : > { %2979 = vrot.lane.b32.xlu0 %v15993_v44, %s15675_s29  ;;  %v16392_v35 = vpop.permute.xlu1 %2643  ;;  %v16406_v52 = vpop.permute.xlu0 %14424 }
 0x2bb   : > { %20749 = vst [vmem:[#allocation57_spill] sm:$0xff] %v16392_v35  ;;  %20751 = vst [vmem:[#allocation59_spill] sm:$0xff] %v16406_v52  ;;  %v1532_v35 = vsel %vm1495_vm3, %v16402_v17, -inf  ;;  %v1538_v52 = vsel %vm1495_vm3, %v16409_v51, -inf }
 0x2be   : > { %2981 = vrot.lane.b32.xlu0 %v15990_v41, %s15675_s29  ;;  %v16399_v44 = vpop.permute.xlu1 %2967  ;;  %v1526_v41 = vsel %vm1495_vm3, %v16397_v27, -inf  ;;  %v16418_v15 = vpop.permute.xlu0 %2631 }
 0x2bf   : > { %20750 = vst [vmem:[#allocation58_spill] sm:$0xff] %v16399_v44  ;;  %20752 = vst [vmem:[#allocation60_spill] sm:$0xff] %v16418_v15  ;;  %v16420_v44 = vmul.f32 0.35355338, %v1424_v2  ;;  %v16438_v15 = vmul.f32 0.35355338, %v16302_v22 }
 0x2c2   : > { %14469 = vrot.lane.b32.xlu0 %v16017_v60, %s15673_s27  ;;  %v16413_v33 = vpop.permute.xlu1 %14454  ;;  %v16435_v2 = vpop.permute.xlu0 %14444 }
 0x2c3   : > { %20754 = vst [vmem:[#allocation62_spill] sm:$0xff] %v16435_v2  ;;  %v1541_v2 = vsel %vm1495_vm3, %v16438_v15, -inf }
 0x2c6   : > { %v16429_v6 = vpop.permute.xlu1 %14459  ;;  %v16452_v22 = vpop.permute.xlu0 %2635 }
 0x2c7   : > { %20753 = vst [vmem:[#allocation61_spill] sm:$0xff] %v16429_v6  ;;  %v16448_v6 = vmul.f32 0.35355338, %v12379_v24  ;;  %20756 = vst [vmem:[#allocation64_spill] sm:$0xff] %v16452_v22 }
 0x2c9   : > { %v1571_v24 = vsel %vm1495_vm3, %v16448_v6, -inf }
 0x2ca   : > { %v16446_v62 = vpop.permute.xlu1 %14464  ;;  %v16465_v22 = vpop.permute.xlu0 %2637 }
 0x2cb   : > { %20755 = vst [vmem:[#allocation63_spill] sm:$0xff] %v16446_v62  ;;  %20757 = vst [vmem:[#allocation65_spill] sm:$0xff] %v16465_v22 }
 0x2d8   : > { %1527 = vmax.xlane.f32.xlu1 %v1526_v41  ;;  %v16425_v41 = vmul.f32 0.35355338, %v16290_v25 }
 0x2da   : > { %v1535_v25 = vsel %vm1495_vm3, %v16425_v41, -inf }
 0x2dc   : > { %1533 = vmax.xlane.f32.xlu1 %v1532_v35  ;;  %v1568_v35 = vsel %vm1495_vm3, %v16420_v44, -inf }
 0x2e0   : > { %1539 = vmax.xlane.f32.xlu1 %v1538_v52  ;;  %v16442_v52 = vmul.f32 0.35355338, %v1444_v55 }
 0x2e1   : > { %1530 = vmax.xlane.f32.xlu0 %v1529_v5  ;;  %v1574_v5 = vsel %vm1495_vm3, %v16431_v14, -inf }
 0x2e2   : > { %v1580_v55 = vsel %vm1495_vm3, %v16442_v52, -inf }
 0x2e4   : > { %1569 = vmax.xlane.f32.xlu1 %v1568_v35  ;;  %v16454_v35 = vmul.f32 0.35355338, %v1454_v13  ;;  %v16468_v13 = vmul.f32 0.35355338, %v16362_v42 }
 0x2e5   : > { %1536 = vmax.xlane.f32.xlu0 %v1535_v25  ;;  %v16458_v25 = vmul.f32 0.35355338, %v12382_v37 }
 0x2e7   : > { %v1577_v37 = vsel %vm1495_vm3, %v16458_v25, -inf }
 0x2e8   : > { %1575 = vmax.xlane.f32.xlu1 %v1574_v5 }
 0x2e9   : > { %1542 = vmax.xlane.f32.xlu0 %v1541_v2  ;;  %v1586_v2 = vsel %vm1495_vm3, %v16454_v35, -inf }
 0x2ec   : > { %v1501_v43 = vpop.xlane.xlu1 %1500  ;;  %1581 = vmax.xlane.f32.xlu1 %v1580_v55  ;;  %v16473_v55 = vmul.f32 0.35355338, %v16366_v53 }
 0x2ed   : > { %v1593_v5 = vsub.f32 %v16270_v16, %v1501_v43  ;;  %1572 = vmax.xlane.f32.xlu0 %v1571_v24  ;;  %v1583_v43 = vsel %vm1495_vm3, %v16468_v13, -inf  ;;  %v16477_v16 = vpop.permute.xlu0 %2969 }
 0x2ee   : > { %20758 = vst [vmem:[#allocation66_spill] sm:$0xff] %v16477_v16  ;;  %v1589_v24 = vsel %vm1495_vm3, %v16473_v55, -inf }
 0x2ef   : > { %v1626_v62 = vmul.f32 1.442695, %v1593_v5 }
 0x2f0   : > { %1587 = vmax.xlane.f32.xlu1 %v1586_v2 }
 0x2f1   : > { %14928 = vpow2.f32 %v1626_v62  ;;  %1578 = vmax.xlane.f32.xlu0 %v1577_v37  ;;  %v16483_v5 = vpop.permute.xlu0 %2971 }
 0x2f2   : > { %20759 = vst [vmem:[#allocation67_spill] sm:$0xff] %v16483_v5 }
 0x2f5   : > { %1584 = vmax.xlane.f32.xlu0 %v1583_v43  ;;  %v16487_v53 = vpop.permute.xlu0 %14449 }
 0x2f9   : > { %1590 = vmax.xlane.f32.xlu0 %v1589_v24  ;;  %v16489_v2 = vpop.permute.xlu0 %2641 }
 0x2fa   : > { %20760 = vst [vmem:[#allocation68_spill] sm:$0xff] %v16489_v2 }
 0x2fb   : > { %v16481_v42 = vpop.eup %14928 }
 0x2fc   : > { %v1691_v62 = vsel %vm1495_vm3, %v16481_v42, 0.0 }
 0x2fd   : > { %1692 = vadd.xlane.f32.xlu0 %v1691_v62  ;;  %v1498_v37 = vpop.xlane.xlu0 %1497 }
 0x2fe   : > { %v1592_v43 = vsub.f32 %v16272_v29, %v1498_v37 }
 0x300   : > { %v1624_v60 = vmul.f32 1.442695, %v1592_v43 }
 0x310   : > { %v1549_v16 = vpop.xlane.xlu1 %1548 }
 0x311   : > { %v1609_v22 = vsub.f32 %v16280_v56, %v1549_v16  ;;  %v1546_v63 = vpop.xlane.xlu0 %1545 }
 0x312   : > { %v1608_v24 = vsub.f32 %v16284_v34, %v1546_v63 }
 0x313   : > { %v1658_v45 = vmul.f32 1.442695, %v1609_v22 }
 0x314   : > { %v1656_v5 = vmul.f32 1.442695, %v1608_v24  ;;  %v16494_v4 = vpop.xlane.xlu1 %1554 }
 0x315   : > { %14930 = vpow2.f32 %v1658_v45  ;;  %v1507_v62 = vpop.xlane.xlu0 %1506 }
 0x316   : > { %14932 = vpow2.f32 %v1656_v5  ;;  %v1595_v61 = vsub.f32 %v16288_v36, %v1507_v62 }
 0x317   : > { %14934 = vpow2.f32 %v1624_v60 }
 0x318   : > { %v1630_v2 = vmul.f32 1.442695, %v1595_v61  ;;  %v16497_v1 = vpop.xlane.xlu1 %1560 }
 0x319   : > { %v1504_v29 = vpop.xlane.xlu0 %1503 }
 0x31a   : > { %14936 = vpow2.f32 %v1630_v2  ;;  %v1594_v56 = vsub.f32 %v16300_v31, %v1504_v29 }
 0x31c   : > { %v1628_v16 = vmul.f32 1.442695, %v1594_v56  ;;  %v1510_v63 = vpop.xlane.xlu1 %1509 }
 0x31d   : > { %v1596_v34 = vsub.f32 %v16310_v28, %v1510_v63  ;;  %v16501_v22 = vpop.xlane.xlu0 %1551 }
 0x31e   : > { %14938 = vpow2.f32 %v1628_v16 }
 0x31f   : > { %v16503_v45 = vpop.eup %14930  ;;  %v1632_v5 = vmul.f32 1.442695, %v1596_v34 }
 0x320   : > { %20761 = vst [vmem:[#allocation69_spill] sm:$0xff] %v16503_v45  ;;  %v16505_v37 = vpop.eup %14932  ;;  %v16507_v36 = vpop.xlane.xlu1 %1557  ;;  %v1739_v61 = vsel %vm1495_vm3, %v16503_v45, 0.0 }
 0x321   : > { %v16511_v60 = vpop.eup %14934  ;;  %14940 = vpow2.f32 %v1632_v5  ;;  %v1513_v31 = vpop.xlane.xlu0 %1512  ;;  %1740 = vadd.xlane.f32.xlu1 %v1739_v61  ;;  %v1736_v28 = vsel %vm1495_vm3, %v16505_v37, 0.0 }
 0x322   : > { %v1597_v2 = vsub.f32 %v16324_v38, %v1513_v31  ;;  %1737 = vadd.xlane.f32.xlu0 %v1736_v28  ;;  %v1688_v29 = vsel %vm1495_vm3, %v16511_v60, 0.0 }
 0x324   : > { %v16516_v43 = vpop.eup %14936  ;;  %v1634_v24 = vmul.f32 1.442695, %v1597_v2  ;;  %v16518_v62 = vpop.xlane.xlu1 %1566 }
 0x325   : > { %v1519_v56 = vpop.xlane.xlu0 %1518  ;;  %1689 = vadd.xlane.f32.xlu1 %v1688_v29  ;;  %v1697_v16 = vsel %vm1495_vm3, %v16516_v43, 0.0 }
 0x326   : > { %14942 = vpow2.f32 %v1634_v24  ;;  %v1599_v63 = vsub.f32 %v16332_v26, %v1519_v56  ;;  %1698 = vadd.xlane.f32.xlu0 %v1697_v16 }
 0x328   : > { %v16525_v34 = vpop.eup %14938  ;;  %v1638_v38 = vmul.f32 1.442695, %v1599_v63  ;;  %v1516_v5 = vpop.xlane.xlu1 %1515 }
 0x329   : > { %v1598_v61 = vsub.f32 %v16338_v23, %v1516_v5  ;;  %v1525_v31 = vpop.xlane.xlu0 %1524  ;;  %v1694_v28 = vsel %vm1495_vm3, %v16525_v34, 0.0 }
 0x32a   : > { %14944 = vpow2.f32 %v1638_v38  ;;  %v1601_v2 = vsub.f32 %v16342_v7, %v1525_v31  ;;  %1695 = vadd.xlane.f32.xlu1 %v1694_v28 }
 0x32b   : > { %v16531_v29 = vpop.eup %14940  ;;  %v1636_v24 = vmul.f32 1.442695, %v1598_v61 }
 0x32c   : > { %v1642_v45 = vmul.f32 1.442695, %v1601_v2  ;;  %v16533_v26 = vpop.xlane.xlu1 %1563  ;;  %v1700_v56 = vsel %vm1495_vm3, %v16531_v29, 0.0 }
 0x32d   : > { %14946 = vpow2.f32 %v1636_v24  ;;  %v16537_v16 = vpop.permute.xlu0 %2975 }
 0x32e   : > { %20762 = vst [vmem:[#allocation70_spill] sm:$0xff] %v16537_v16  ;;  %1701 = vadd.xlane.f32.xlu1 %v1700_v56  ;;  %14948 = vpow2.f32 %v1642_v45 }
 0x330   : > { %v16539_v23 = vpop.eup %14942  ;;  %v1522_v63 = vpop.xlane.xlu1 %1521 }
 0x331   : > { %v1600_v7 = vsub.f32 %v16354_v49, %v1522_v63  ;;  %v16542_v38 = vpop.permute.xlu0 %2977  ;;  %v1703_v5 = vsel %vm1495_vm3, %v16539_v23, 0.0 }
 0x332   : > { %20763 = vst [vmem:[#allocation71_spill] sm:$0xff] %v16542_v38  ;;  %1704 = vadd.xlane.f32.xlu0 %v1703_v5 }
 0x333   : > { %v1640_v61 = vmul.f32 1.442695, %v1600_v7 }
 0x334   : > { %v16546_v31 = vpop.eup %14944 }
 0x335   : > { %14950 = vpow2.f32 %v1640_v61  ;;  %v16548_v28 = vpop.permute.xlu0 %2979  ;;  %v1709_v2 = vsel %vm1495_vm3, %v16546_v31, 0.0 }
 0x336   : > { %20764 = vst [vmem:[#allocation72_spill] sm:$0xff] %v16548_v28  ;;  %1710 = vadd.xlane.f32.xlu0 %v1709_v2 }
 0x337   : > { %v16552_v45 = vpop.eup %14946 }
 0x338   : > { %v1706_v49 = vsel %vm1495_vm3, %v16552_v45, 0.0  ;;  %v16558_v56 = vpop.eup %14948 }
 0x339   : > { %v16556_v24 = vpop.permute.xlu0 %2981  ;;  %v1715_v7 = vsel %vm1495_vm3, %v16558_v56, 0.0 }
 0x33a   : > { %20765 = vst [vmem:[#allocation73_spill] sm:$0xff] %v16556_v24  ;;  %1707 = vadd.xlane.f32.xlu0 %v1706_v49  ;;  %v16566_v24 = vpop.permute.xlu1 %2973 }
 0x33b   : > { %20766 = vst [vmem:[#allocation74_spill] sm:$0xff] %v16566_v24 }
 0x33d   : > { %v14470_v63 = vpop.permute.xlu0 %14469 }
 0x33e   : > { %v14472_v5 = vunpack.i.h.bf16 %v14470_v63  ;;  %v14471_v61 = vunpack.i.l.bf16 %v14470_v63  ;;  %1716 = vadd.xlane.f32.xlu0 %v1715_v7 }
 0x33f   : > { %v16562_v28 = vpop.eup %14950 }
 0x340   : > { %v1712_v2 = vsel %vm1495_vm3, %v16562_v28, 0.0  ;;  %v13629_v38 = vpack.c.bf16 %v14472_v5, %v14471_v61 }
 0x341   : > { %1713 = vadd.xlane.f32.xlu1 %v1712_v2 }
 0x342   : > { %13630 = vmatprep.subr.bf16.mxu1 %v13629_v38 }
 0x343   : > { %13632 = vmatpush3.bf16.msra.mxu1 %v13629_v38 }
 0x365   : > { %v1528_v16 = vpop.xlane.xlu1 %1527 }
 0x366   : > { %v1602_v49 = vsub.f32 %v16397_v27, %v1528_v16 }
 0x368   : > { %v1644_v47 = vmul.f32 1.442695, %v1602_v49 }
 0x369   : > { %v1534_v58 = vpop.xlane.xlu1 %1533 }
 0x36a   : > { %14952 = vpow2.f32 %v1644_v47  ;;  %v1604_v63 = vsub.f32 %v16402_v17, %v1534_v58 }
 0x36c   : > { %v1648_v7 = vmul.f32 1.442695, %v1604_v63 }
 0x36d   : > { %v1540_v48 = vpop.xlane.xlu1 %1539 }
 0x36e   : > { %14954 = vpow2.f32 %v1648_v7  ;;  %v1531_v40 = vpop.xlane.xlu0 %1530  ;;  %v1606_v47 = vsub.f32 %v16409_v51, %v1540_v48 }
 0x36f   : > { %v1603_v54 = vsub.f32 %v16416_v30, %v1531_v40 }
 0x371   : > { %v1646_v5 = vmul.f32 1.442695, %v1603_v54  ;;  %v1570_v61 = vpop.xlane.xlu1 %1569 }
 0x372   : > { %v1616_v38 = vsub.f32 %v16420_v44, %v1570_v61  ;;  %v1537_v2 = vpop.xlane.xlu0 %1536  ;;  %v1652_v44 = vmul.f32 1.442695, %v1606_v47 }
 0x373   : > { %14956 = vpow2.f32 %v1646_v5  ;;  %v1605_v24 = vsub.f32 %v16425_v41, %v1537_v2 }
 0x374   : > { %v16573_v27 = vpop.eup %14952  ;;  %v1672_v16 = vmul.f32 1.442695, %v1616_v38 }
 0x375   : > { %v1650_v58 = vmul.f32 1.442695, %v1605_v24  ;;  %v1718_v17 = vsel %vm1495_vm3, %v16573_v27, 0.0 }
 0x376   : > { %14958 = vpow2.f32 %v1672_v16  ;;  %v1543_v49 = vpop.xlane.xlu0 %1542  ;;  %1719 = vadd.xlane.f32.xlu1 %v1718_v17 }
 0x377   : > { %14960 = vpow2.f32 %v1650_v58  ;;  %v1607_v40 = vsub.f32 %v16438_v15, %v1543_v49 }
 0x378   : > { %v16579_v54 = vpop.eup %14954 }
 0x379   : > { %v1654_v30 = vmul.f32 1.442695, %v1607_v40  ;;  %v1724_v41 = vsel %vm1495_vm3, %v16579_v54, 0.0  ;;  %v1576_v40 = vpop.xlane.xlu1 %1575 }
 0x37a   : > { %v1573_v63 = vpop.xlane.xlu0 %1572  ;;  %1725 = vadd.xlane.f32.xlu1 %v1724_v41 }
 0x37b   : > { %14962 = vpow2.f32 %v1654_v30  ;;  %v1617_v48 = vsub.f32 %v16448_v6, %v1573_v63  ;;  %v1618_v30 = vsub.f32 %v16431_v14, %v1576_v40 }
 0x37c   : > { %14964 = vpow2.f32 %v1652_v44 }
 0x37d   : > { %v16584_v51 = vpop.eup %14956  ;;  %v1674_v24 = vmul.f32 1.442695, %v1617_v48  ;;  %v1582_v41 = vpop.xlane.xlu1 %1581  ;;  %v1676_v63 = vmul.f32 1.442695, %v1618_v30 }
 0x37e   : > { %v1721_v7 = vsel %vm1495_vm3, %v16584_v51, 0.0  ;;  %v1579_v49 = vpop.xlane.xlu0 %1578 }
 0x37f   : > { %1722 = vadd.xlane.f32.xlu0 %v1721_v7  ;;  %14966 = vpow2.f32 %v1674_v24  ;;  %v1620_v7 = vsub.f32 %v16442_v52, %v1582_v41  ;;  %v1619_v14 = vsub.f32 %v16458_v25, %v1579_v49 }
 0x380   : > { %v16588_v15 = vpop.eup %14958  ;;  %14968 = vpow2.f32 %v1676_v63 }
 0x381   : > { %v16590_v5 = vpop.eup %14960  ;;  %v1760_v61 = vsel %vm1495_vm3, %v16588_v15, 0.0 }
 0x382   : > { %1761 = vadd.xlane.f32.xlu1 %v1760_v61  ;;  %v1727_v6 = vsel %vm1495_vm3, %v16590_v5, 0.0  ;;  %v1585_v44 = vpop.xlane.xlu0 %1584 }
 0x383   : > { %1728 = vadd.xlane.f32.xlu0 %v1727_v6  ;;  %v1621_v48 = vsub.f32 %v16468_v13, %v1585_v44  ;;  %v16617_v6 = vpop.xlane.xlu1 %1587  ;;  %v1610_v13 = vsub.f32 %v16314_v10, %v16501_v22  ;;  %v1678_v44 = vmul.f32 1.442695, %v1619_v14  ;;  %v1613_v22 = vsub.f32 %v16306_v12, %v16497_v1 }
 0x384   : > { %v1614_v12 = vsub.f32 %v16348_v50, %v16533_v26 }
 0x385   : > { %v16596_v38 = vpop.eup %14962  ;;  %v1682_v61 = vmul.f32 1.442695, %v1621_v48  ;;  %v1660_v63 = vmul.f32 1.442695, %v1610_v13  ;;  %v1612_v48 = vsub.f32 %v16320_v18, %v16507_v36  ;;  %v14397_v13 = vunpack.i.h.bf16 %v16318_v46 }
 0x386   : > { %v1733_v2 = vsel %vm1495_vm3, %v16596_v38, 0.0  ;;  %v16600_v16 = vpop.eup %14964  ;;  %v16612_v24 = vpop.xlane.xlu0 %1590  ;;  %v1666_v1 = vmul.f32 1.442695, %v1613_v22 }
 0x387   : > { %1734 = vadd.xlane.f32.xlu0 %v1733_v2  ;;  %v1730_v47 = vsel %vm1495_vm3, %v16600_v16, 0.0  ;;  %14970 = vpow2.f32 %v1682_v61  ;;  %v1664_v61 = vmul.f32 1.442695, %v1612_v48 }
 0x389   : > { %v16604_v58 = vpop.eup %14966 }
 0x38a   : > { %v1763_v17 = vsel %vm1495_vm3, %v16604_v58, 0.0  ;;  %v1693_v2 = vpop.xlane.xlu0 %1692  ;;  %v16624_v52 = vpop.eup %14968 }
 0x38b   : > { %1731 = vadd.xlane.f32.xlu0 %v1730_v47  ;;  %v1680_v47 = vmul.f32 1.442695, %v1620_v7  ;;  %v1766_v25 = vsel %vm1495_vm3, %v16624_v52, 0.0 }
 0x38f   : > { %1764 = vadd.xlane.f32.xlu0 %v1763_v17 }
 0x391   : > { %v16630_v49 = vpop.eup %14970 }
 0x393   : > { %14474 = vrot.lane.b32.xlu1 %v16047_v57, %s15673_s27 }
 0x3a5   : > { %14479 = vrot.lane.b32.xlu0 %v16051_v59, %s15673_s27 }
 0x3ae   : > { %v16620_v17 = vpop.xlane.xlu1 %1740 }
 0x3af   : > { %v1738_v40 = vpop.xlane.xlu0 %1737 }
 0x3b0   : > { %14972 = vrcp.f32 %v1738_v40 }
 0x3b1   : > { %14974 = vpow2.f32 %v1680_v47 }
 0x3b2   : > { %14976 = vrcp.f32 %v1693_v2  ;;  %v1690_v30 = vpop.xlane.xlu1 %1689  ;;  %v1775_v2 = vsel %vm1495_vm3, %v16630_v49, 0.0 }
 0x3b3   : > { %14978 = vrcp.f32 %v1690_v30  ;;  %v1699_v41 = vpop.xlane.xlu0 %1698 }
 0x3b4   : > { %14980 = vpow2.f32 %v1678_v44  ;;  %v14396_v44 = vunpack.i.l.bf16 %v16318_v46  ;;  %v14402_v46 = vunpack.i.h.bf16 %v16336_v3 }
 0x3b5   : > { %14982 = vrcp.f32 %v1699_v41 }
 0x3b6   : > { %v13617_v50 = vpack.c.bf16 %v14397_v13, %v14396_v44 }
 0x3b7   : > { %1767 = vadd.xlane.f32.xlu1 %v1766_v25  ;;  %v1696_v10 = vpop.xlane.xlu1 %1695  ;;  %v14401_v25 = vunpack.i.l.bf16 %v16336_v3 }
 0x3b8   : > { %14984 = vrcp.f32 %v1696_v10 }
 0x3b9   : > { %14986 = vpow2.f32 %v1660_v63 }
 0x3ba   : > { %v14973_v7 = vpop.eup %14972 }
 0x3bb   : > { %v16636_v18 = vpop.eup %14974  ;;  %1776 = vadd.xlane.f32.xlu1 %v1775_v2  ;;  %v1702_v36 = vpop.xlane.xlu1 %1701  ;;  %v1817_v47 = vmul.f32 %v14973_v7, %v16505_v37  ;;  %v13621_v2 = vpack.c.bf16 %v14402_v46, %v14401_v25 }
 0x3bc   : > { %v14977_v14 = vpop.eup %14976  ;;  %14988 = vrcp.f32 %v1702_v36  ;;  %v1772_v30 = vsel %vm1495_vm3, %v16636_v18, 0.0  ;;  %v14452_v36 = vunpack.i.h.bf16 %v16487_v53 }
 0x3bd   : > { %v14979_v40 = vpop.eup %14978  ;;  %12461 = vmatprep.mubr.msk.f32.mxu1 %vm1495_vm3, %v1817_v47  ;;  %14990 = vpow2.f32 %v1664_v61  ;;  %v1787_v37 = vmul.f32 %v14977_v14, %v16481_v42  ;;  %v1623_v42 = vsub.f32 %v16473_v55, %v16612_v24  ;;  %v14451_v47 = vunpack.i.l.bf16 %v16487_v53 }
 0x3be   : > { %v1785_v41 = vmul.f32 %v14979_v40, %v16511_v60  ;;  %v16648_v48 = vpop.eup %14980  ;;  %v1668_v60 = vmul.f32 1.442695, %v1614_v12  ;;  %v1622_v55 = vsub.f32 %v16454_v35, %v16617_v6  ;;  %v14407_v35 = vunpack.i.h.bf16 %v16346_v20 }
 0x3bf   : > { %v1705_v63 = vpop.xlane.xlu0 %1704  ;;  %1773 = vadd.xlane.f32.xlu1 %v1772_v30  ;;  %v14983_v10 = vpop.eup %14982  ;;  %v1769_v3 = vsel %vm1495_vm3, %v16648_v48, 0.0  ;;  %v1686_v14 = vmul.f32 1.442695, %v1623_v42  ;;  %v13625_v44 = vpack.c.bf16 %v14452_v36, %v14451_v47  ;;  %v1615_v12 = vsub.f32 %v16328_v8, %v16518_v62 }
 0x3c0   : > { %14992 = vrcp.f32 %v1705_v63  ;;  %12405 = vmatprep.mubr.msk.f32.mxu0 %vm1495_vm3, %v1785_v41  ;;  %v1684_v6 = vmul.f32 1.442695, %v1622_v55 }
 0x3c1   : > { %12406 = vmatmul.mubr.msk.f32.vlgmr.msra.gmra.mrb[24].mxu0 %vm1495_vm3, %v1787_v37  ;;  %14994 = vpow2.f32 %v1666_v1  ;;  %v1670_v63 = vmul.f32 1.442695, %v1615_v12 }
 0x3c2   : > { %v14985_v26 = vpop.eup %14984  ;;  %13616 = vmatpush3.bf16.msra.mxu0 %v16247_v21  ;;  %v1791_v21 = vmul.f32 %v14983_v10, %v16516_v43  ;;  %14996 = vpow2.f32 %v1668_v60  ;;  %v14406_v43 = vunpack.i.l.bf16 %v16346_v20 }
 0x3c3   : > { %13618 = vmatprep.subr.bf16.mxu0 %v13617_v50  ;;  %v1711_v22 = vpop.xlane.xlu0 %1710  ;;  %v1789_v7 = vmul.f32 %v14985_v26, %v16525_v34  ;;  %v16660_v61 = vpop.eup %14986 }
 0x3c4   : > { %1770 = vadd.xlane.f32.xlu0 %v1769_v3  ;;  %14998 = vrcp.f32 %v1711_v22  ;;  %v1742_v40 = vsel %vm1495_vm3, %v16660_v61, 0.0  ;;  %v13645_v20 = vpack.c.bf16 %v14407_v35, %v14406_v43  ;;  %v14421_v35 = vunpack.i.l.bf16 %v16364_v11 }
 0x3c5   : > { %12408 = vmatprep.mubr.msk.f32.mxu0 %vm1495_vm3, %v1789_v7 }
 0x3c6   : > { %v14989_v24 = vpop.eup %14988  ;;  %13620 = vmatpush3.bf16.msra.mxu0 %v13617_v50 }
 0x3c7   : > { %12409 = vmatmul.mubr.msk.f32.gmra.mrb[26].mxu0 %vm1495_vm3, %v1791_v21  ;;  %13622 = vmatprep.subr.bf16.mxu0 %v13621_v2  ;;  %v1708_v34 = vpop.xlane.xlu0 %1707  ;;  %v1793_v53 = vmul.f32 %v14989_v24, %v16531_v29  ;;  %v16672_v13 = vpop.eup %14990  ;;  %v14417_v21 = vunpack.i.h.bf16 %v16394_v32  ;;  %v14416_v24 = vunpack.i.l.bf16 %v16394_v32  ;;  %v14422_v32 = vunpack.i.h.bf16 %v16364_v11  ;;  %v20768_v11 = vld [vmem:[#allocation2_spill] sm:$0xff] }
 0x3c8   : > { %15000 = vrcp.f32 %v1708_v34  ;;  %1743 = vadd.xlane.f32.xlu0 %v1742_v40  ;;  %v1748_v30 = vsel %vm1495_vm3, %v16672_v13, 0.0  ;;  %v14456_v34 = vunpack.i.l.bf16 %v16413_v33 }
 0x3c9   : > { %12411 = vmatprep.mubr.msk.f32.mxu0 %vm1495_vm3, %v1793_v53  ;;  %15002 = vpow2.f32 %v1686_v14  ;;  %v13653_v40 = vpack.c.bf16 %v14417_v21, %v14416_v24 }
 0x3ca   : > { %v14993_v1 = vpop.eup %14992  ;;  %13624 = vmatpush3.bf16.msra.mxu0 %v13621_v2  ;;  %15004 = vpow2.f32 %v1684_v6  ;;  %v14412_v2 = vunpack.i.h.bf16 %v16358_v39  ;;  %v20767_v6 = vld [vmem:[#allocation8_spill] sm:$0xff] }
 0x3cb   : > { %13626 = vmatprep.subr.bf16.mxu0 %v13625_v44  ;;  %v1717_v29 = vpop.xlane.xlu0 %1716  ;;  %v1795_v41 = vmul.f32 %v14993_v1, %v16539_v23  ;;  %v16682_v37 = vpop.eup %14994  ;;  %v20770_v1 = vld [vmem:[#allocation10_spill] sm:$0xff] }
 0x3cc   : > { %1749 = vadd.xlane.f32.xlu0 %v1748_v30  ;;  %15006 = vrcp.f32 %v1717_v29  ;;  %v1751_v62 = vsel %vm1495_vm3, %v16682_v37, 0.0  ;;  %v16687_v46 = vpop.eup %14996  ;;  %v20771_v29 = vld [vmem:[#allocation5_spill] sm:$0xff] }
 0x3cd   : > { %12412 = vmatmul.mubr.msk.f32.gmra.mrb[28].mxu0 %vm1495_vm3, %v1795_v41  ;;  %v1754_v10 = vsel %vm1495_vm3, %v16687_v46, 0.0  ;;  %v20772_v30 = vld [vmem:[#allocation13_spill] sm:$0xff] }
 0x3ce   : > { %13628 = vmatpush3.bf16.msra.mxu0 %v13625_v44  ;;  %v1714_v8 = vpop.xlane.xlu1 %1713  ;;  %v14999_v23 = vpop.eup %14998  ;;  %v20769_v44 = vld [vmem:[#allocation6_spill] sm:$0xff] }
 0x3cf   : > { %13646 = vmatprep.subr.bf16.mxu0 %v13645_v20  ;;  %15008 = vrcp.f32 %v1714_v8  ;;  %v1799_v60 = vmul.f32 %v14999_v23, %v16546_v31  ;;  %v20774_v8 = vld [vmem:[#allocation14_spill] sm:$0xff]  ;;  %v20775_v23 = vld [vmem:[#allocation4_spill] sm:$0xff] }
 0x3d0   : > { %1752 = vadd.xlane.f32.xlu0 %v1751_v62  ;;  %14484 = vrot.lane.b32.xlu1 %v16059_v0, %s15673_s27  ;;  %15010 = vpow2.f32 %v1670_v63 }
 0x3d2   : > { %v15001_v25 = vpop.eup %15000 }
 0x3d3   : > { %v1797_v50 = vmul.f32 %v15001_v25, %v16552_v45  ;;  %v16694_v26 = vpop.eup %15002  ;;  %v14411_v45 = vunpack.i.l.bf16 %v16358_v39  ;;  %v1611_v39 = vsub.f32 %v16294_v19, %v16494_v4  ;;  %v16723_v4 = vpack.c.bf16 %v14422_v32, %v14421_v35 }
 0x3d4   : > { %1755 = vadd.xlane.f32.xlu0 %v1754_v10  ;;  %v16699_v42 = vpop.eup %15004  ;;  %v1781_v22 = vsel %vm1495_vm3, %v16694_v26, 0.0 }
 0x3d5   : > { %12414 = vmatprep.mubr.msk.f32.mxu0 %vm1495_vm3, %v1797_v50  ;;  %v1778_v47 = vsel %vm1495_vm3, %v16699_v42, 0.0  ;;  %v13649_v14 = vpack.c.bf16 %v14412_v2, %v14411_v45  ;;  %v1662_v53 = vmul.f32 1.442695, %v1611_v39  ;;  %v20780_v39 = vld [vmem:[#allocation7_spill] sm:$0xff] }
 0x3d6   : > { %12415 = vmatmul.mubr.msk.f32.gmra.mrb[30].mxu0 %vm1495_vm3, %v1799_v60  ;;  %v15007_v3 = vpop.eup %15006  ;;  %v20776_v60 = vld [vmem:[#allocation40_spill] sm:$0xff] }
 0x3d7   : > { %v1803_v31 = vmul.f32 %v15007_v3, %v16558_v56  ;;  %v14457_v56 = vunpack.i.h.bf16 %v16413_v33  ;;  %15012 = vpow2.f32 %v1662_v53 }
 0x3d8   : > { %1782 = vadd.xlane.f32.xlu0 %v1781_v22  ;;  %v20777_v22 = vld [vmem:[#allocation42_spill] sm:$0xff] }
 0x3d9   : > { %v15009_v7 = vpop.eup %15008  ;;  %v13657_v43 = vpack.c.bf16 %v14457_v56, %v14456_v34  ;;  %v20781_v56 = vld [vmem:[#allocation46_spill] sm:$0xff] }
 0x3da   : > { %v1801_v36 = vmul.f32 %v15009_v7, %v16562_v28  ;;  %v16709_v55 = vpop.eup %15010 }
 0x3db   : > { %v1757_v28 = vsel %vm1495_vm3, %v16709_v55, 0.0 }
 0x3dc   : > { %1779 = vadd.xlane.f32.xlu0 %v1778_v47  ;;  %12433 = vmatprep.mubr.msk.f32.mxu0 %vm1495_vm3, %v1801_v36  ;;  %v20778_v36 = vld [vmem:[#allocation3_spill] sm:$0xff] }
 0x3dd   : > { %12434 = vmatmul.mubr.msk.f32.vlgmr.msra.gmra.mrb[32].mxu0 %vm1495_vm3, %v1803_v31 }
 0x3de   : > { %13648 = vmatpush3.bf16.msra.mxu0 %v13645_v20  ;;  %v20773_v20 = vld [vmem:[#allocation11_spill] sm:$0xff] }
 0x3df   : > { %13650 = vmatprep.subr.bf16.mxu0 %v13649_v14 }
 0x3e0   : > { %1758 = vadd.xlane.f32.xlu0 %v1757_v28 }
 0x3e1   : > { %v16728_v19 = vpop.eup %15012 }
 0x3e2   : > { %13652 = vmatpush3.bf16.msra.mxu0 %v13649_v14  ;;  %v1745_v33 = vsel %vm1495_vm3, %v16728_v19, 0.0 }
 0x3e3   : > { %13654 = vmatprep.subr.bf16.mxu0 %v13653_v40 }
 0x3e6   : > { %13656 = vmatpush3.bf16.msra.mxu0 %v13653_v40 }
 0x3e7   : > { %13658 = vmatprep.subr.bf16.mxu0 %v13657_v43 }
 0x3ea   : > { %13660 = vmatpush3.bf16.msra.mxu0 %v13657_v43 }
 0x3eb   : > { %13687 = vmatprep.subr.msk.bf16.mxu0 %vm16127_vm2, %v16723_v4 }
 0x3f4   : > { %1746 = vadd.xlane.f32.xlu1 %v1745_v33  ;;  %v20783_v33 = vld [vmem:[#allocation9_spill] sm:$0xff] }
 0x3f6   : > { %14494 = vrot.lane.b32.xlu0 %v20767_v6, %s15674_s28 }
 0x3fa   : > { %2462 = vrot.lane.b32.xlu0 %v20768_v11, %s15675_s29 }
 0x3fe   : > { %2466 = vrot.lane.b32.xlu0 %v20769_v44, %s15675_s29 }
 0x402   : > { %2468 = vrot.lane.b32.xlu0 %v20770_v1, %s15675_s29 }
 0x403   : > { %v1720_v12 = vpop.xlane.xlu1 %1719 }
 0x404   : > { %15014 = vrcp.f32 %v1720_v12 }
 0x405   : > { %14489 = vrot.lane.b32.xlu1 %v20771_v29, %s15674_s28 }
 0x406   : > { %2472 = vrot.lane.b32.xlu0 %v20772_v30, %s15675_s29 }
 0x407   : > { %v1726_v41 = vpop.xlane.xlu1 %1725 }
 0x408   : > { %15016 = vrcp.f32 %v1726_v41 }
 0x409   : > { %14499 = vrot.lane.b32.xlu1 %v20773_v20, %s15674_s28 }
 0x40a   : > { %14519 = vrot.lane.b32.xlu0 %v16051_v59, %s15674_s28 }
 0x40c   : > { %v1723_v63 = vpop.xlane.xlu0 %1722 }
 0x40d   : > { %15018 = vrcp.f32 %v1723_v63  ;;  %14504 = vrot.lane.b32.xlu1 %v20774_v8, %s15674_s28 }
 0x40e   : > { %v15015_v62 = vpop.eup %15014  ;;  %2798 = vrot.lane.b32.xlu0 %v20775_v23, %s15675_s29 }
 0x40f   : > { %v1762_v25 = vpop.xlane.xlu1 %1761  ;;  %v1805_v10 = vmul.f32 %v15015_v62, %v16573_v27  ;;  %v20779_v27 = vld [vmem:[#allocation44_spill] sm:$0xff] }
 0x410   : > { %v1729_v50 = vpop.xlane.xlu0 %1728 }
 0x411   : > { %15020 = vrcp.f32 %v1729_v50  ;;  %14509 = vrot.lane.b32.xlu1 %v20776_v60, %s15674_s28  ;;  %12436 = vmatprep.mubr.msk.f32.mxu0 %vm1495_vm3, %v1805_v10 }
 0x412   : > { %2802 = vrot.lane.b32.xlu0 %v20777_v22, %s15675_s29  ;;  %v15017_v31 = vpop.eup %15016  ;;  %15022 = vrcp.f32 %v1762_v25  ;;  %v20785_v25 = vld [vmem:[#allocation12_spill] sm:$0xff] }
 0x413   : > { %v14475_v3 = vpop.permute.xlu1 %14474  ;;  %v1809_v28 = vmul.f32 %v15017_v31, %v16579_v54 }
 0x414   : > { %v14477_v7 = vunpack.i.h.bf16 %v14475_v3  ;;  %v14476_v2 = vunpack.i.l.bf16 %v14475_v3  ;;  %v1735_v45 = vpop.xlane.xlu0 %1734 }
 0x415   : > { %2460 = vrot.lane.b32.xlu1 %v20778_v36, %s15675_s29  ;;  %15024 = vrcp.f32 %v1735_v45 }
 0x416   : > { %2806 = vrot.lane.b32.xlu0 %v20779_v27, %s15675_s29  ;;  %v13633_v47 = vpack.c.bf16 %v14477_v7, %v14476_v2  ;;  %v20786_v7 = vld [vmem:[#allocation59_spill] sm:$0xff] }
 0x417   : > { %v15019_v21 = vpop.eup %15018  ;;  %v14427_v2 = vunpack.i.h.bf16 %v20786_v7  ;;  %v14426_v45 = vunpack.i.l.bf16 %v20786_v7  ;;  %v20798_v7 = vld [vmem:[#allocation36_spill] sm:$0xff] }
 0x418   : > { %v1732_v24 = vpop.xlane.xlu0 %1731  ;;  %13634 = vmatprep.subr.bf16.mxu1 %v13633_v47  ;;  %v1807_v14 = vmul.f32 %v15019_v21, %v16584_v51  ;;  %v20782_v51 = vld [vmem:[#allocation17_spill] sm:$0xff] }
 0x419   : > { %15026 = vrcp.f32 %v1732_v24  ;;  %2464 = vrot.lane.b32.xlu1 %v20780_v39, %s15675_s29  ;;  %13636 = vmatpush3.bf16.msra.mxu1 %v13633_v47  ;;  %v20789_v21 = vld [vmem:[#allocation41_spill] sm:$0xff]  ;;  %v20790_v24 = vld [vmem:[#allocation43_spill] sm:$0xff] }
 0x41a   : > { %2810 = vrot.lane.b32.xlu0 %v20781_v56, %s15675_s29  ;;  %12437 = vmatmul.mubr.msk.f32.gmra.mrb[34].mxu0 %vm1495_vm3, %v1807_v14  ;;  %v20791_v14 = vld [vmem:[#allocation61_spill] sm:$0xff] }
 0x41b   : > { %v15021_v34 = vpop.eup %15020  ;;  %12439 = vmatprep.mubr.msk.f32.mxu0 %vm1495_vm3, %v1809_v28  ;;  %v14462_v28 = vunpack.i.h.bf16 %v20791_v14 }
 0x41c   : > { %v1765_v40 = vpop.xlane.xlu0 %1764  ;;  %v1811_v53 = vmul.f32 %v15021_v34, %v16590_v5  ;;  %v15023_v32 = vpop.eup %15022  ;;  %v20784_v5 = vld [vmem:[#allocation25_spill] sm:$0xff]  ;;  %v14461_v34 = vunpack.i.l.bf16 %v20791_v14 }
 0x41d   : > { %15028 = vrcp.f32 %v1765_v40  ;;  %14514 = vrot.lane.b32.xlu1 %v16047_v57, %s15674_s28  ;;  %v1833_v50 = vmul.f32 %v15023_v32, %v16588_v15  ;;  %v20787_v15 = vld [vmem:[#allocation37_spill] sm:$0xff]  ;;  %v20794_v32 = vld [vmem:[#allocation52_spill] sm:$0xff] }
 0x41e   : > { %14529 = vrot.lane.b32.xlu0 %v20782_v51, %s15676_s30  ;;  %12440 = vmatmul.mubr.msk.f32.gmra.mrb[36].mxu0 %vm1495_vm3, %v1811_v53  ;;  %v20792_v40 = vld [vmem:[#allocation45_spill] sm:$0xff]  ;;  %v13703_v53 = vpack.c.bf16 %v14462_v28, %v14461_v34 }
 0x41f   : > { %v15025_v12 = vpop.eup %15024  ;;  %v20802_v34 = vld [vmem:[#allocation69_spill] sm:$0xff] }
 0x420   : > { %v14480_v54 = vpop.permute.xlu0 %14479  ;;  %v1815_v10 = vmul.f32 %v15025_v12, %v16596_v38  ;;  %v13691_v38 = vpack.c.bf16 %v14427_v2, %v14426_v45  ;;  %v20795_v12 = vld [vmem:[#allocation32_spill] sm:$0xff] }
 0x421   : > { %v14482_v35 = vunpack.i.h.bf16 %v14480_v54  ;;  %v14481_v43 = vunpack.i.l.bf16 %v14480_v54  ;;  %2470 = vrot.lane.b32.xlu1 %v20783_v33, %s15675_s29  ;;  %v20793_v54 = vld [vmem:[#allocation20_spill] sm:$0xff] }
 0x422   : > { %14539 = vrot.lane.b32.xlu0 %v20784_v5, %s15676_s30 }
 0x423   : > { %v15027_v41 = vpop.eup %15026  ;;  %v13637_v63 = vpack.c.bf16 %v14482_v35, %v14481_v43  ;;  %v14437_v35 = vunpack.i.h.bf16 %v20794_v32  ;;  %v14436_v43 = vunpack.i.l.bf16 %v20794_v32 }
 0x424   : > { %v1813_v62 = vmul.f32 %v15027_v41, %v16600_v16 }
 0x425   : > { %2474 = vrot.lane.b32.xlu1 %v20785_v25, %s15675_s29  ;;  %13638 = vmatprep.subr.bf16.mxu1 %v13637_v63  ;;  %v16841_v41 = vpack.c.bf16 %v14437_v35, %v14436_v43 }
 0x426   : > { %14569 = vrot.lane.b32.xlu0 %v20771_v29, %s15677_s14  ;;  %12442 = vmatprep.mubr.msk.f32.mxu0 %vm1495_vm3, %v1813_v62  ;;  %v20796_v62 = vld [vmem:[#allocation33_spill] sm:$0xff] }
 0x427   : > { %v15029_v3 = vpop.eup %15028  ;;  %13640 = vmatpush3.bf16.msra.mxu1 %v13637_v63  ;;  %12443 = vmatmul.mubr.msk.f32.gmra.mrb[38].mxu0 %vm1495_vm3, %v1815_v10 }
 0x428   : > { %v1835_v16 = vmul.f32 %v15029_v3, %v16604_v58  ;;  %12489 = vmatprep.mubr.msk.f32.mxu0 %vm1495_vm3, %v1833_v50  ;;  %v20788_v58 = vld [vmem:[#allocation51_spill] sm:$0xff]  ;;  %v20797_v50 = vld [vmem:[#allocation38_spill] sm:$0xff] }
 0x429   : > { %14524 = vrot.lane.b32.xlu1 %v16059_v0, %s15674_s28  ;;  %v14432_v31 = vunpack.i.h.bf16 %v20788_v58  ;;  %v14431_v47 = vunpack.i.l.bf16 %v20788_v58 }
 0x42a   : > { %14579 = vrot.lane.b32.xlu0 %v20773_v20, %s15677_s14 }
 0x42b   : > { %12490 = vmatmul.mubr.msk.f32.vlgmr.msra.gmra.mrb[40].mxu0 %vm1495_vm3, %v1835_v16 }
 0x42c   : > { %13690 = vmatpush3.bf16.xpose.msk.msra.mxu0 %vm16127_vm2, %v16723_v4  ;;  %v13697_v4 = vpack.c.bf16 %v14432_v31, %v14431_v47  ;;  %v20800_v47 = vld [vmem:[#allocation16_spill] sm:$0xff] }
 0x42d   : > { %13693 = vmatprep.subr.msk.bf16.mxu0 %vm16127_vm2, %v13691_v38  ;;  %2800 = vrot.lane.b32.xlu1 %v20787_v15, %s15675_s29 }
 0x42e   : > { %14589 = vrot.lane.b32.xlu0 %v20782_v51, %s15677_s14 }
 0x431   : > { %2804 = vrot.lane.b32.xlu1 %v20789_v21, %s15675_s29 }
 0x432   : > { %4774 = vrot.lane.b32.xlu0 %v20778_v36, %s15678_s15 }
 0x434   : > { %13696 = vmatpush3.bf16.xpose.msk.msra.mxu0 %vm16127_vm2, %v13691_v38 }
 0x435   : > { %13699 = vmatprep.subr.msk.bf16.mxu0 %vm16127_vm2, %v13697_v4  ;;  %2808 = vrot.lane.b32.xlu1 %v20790_v24, %s15675_s29 }
 0x436   : > { %4776 = vrot.lane.b32.xlu0 %v20768_v11, %s15678_s15 }
 0x439   : > { %2812 = vrot.lane.b32.xlu1 %v20792_v40, %s15675_s29  ;;  %s15682_s29 = smov 40  }
 0x43a   : > { %14599 = vrot.lane.b32.xlu0 %v20784_v5, %s15677_s14 }
 0x43c   : > { %13702 = vmatpush3.bf16.xpose.msk.msra.mxu0 %vm16127_vm2, %v13697_v4 }
 0x43d   : > { %13705 = vmatprep.subr.msk.bf16.mxu0 %vm16127_vm2, %v13703_v53  ;;  %14534 = vrot.lane.b32.xlu1 %v20793_v54, %s15676_s30 }
 0x43e   : > { %4780 = vrot.lane.b32.xlu0 %v20769_v44, %s15678_s15 }
 0x441   : > { %14544 = vrot.lane.b32.xlu1 %v20795_v12, %s15676_s30 }
 0x442   : > { %14604 = vrot.lane.b32.xlu0 %v20795_v12, %s15677_s14 }
 0x444   : > { %13708 = vmatpush3.bf16.xpose.msk.msra.mxu0 %vm16127_vm2, %v13703_v53  ;;  %v1768_v63 = vpop.xlane.xlu1 %1767 }
 0x445   : > { %13735 = vmatprep.subr.msk.bf16.mxu0 %vm16127_vm2, %v16841_v41  ;;  %15030 = vrcp.f32 %v1768_v63  ;;  %14549 = vrot.lane.b32.xlu1 %v20796_v62, %s15676_s30 }
 0x446   : > { %4784 = vrot.lane.b32.xlu0 %v20783_v33, %s15678_s15  ;;  %15032 = vrcp.f32 %v16620_v17  ;;  %v20799_v17 = vld [vmem:[#allocation39_spill] sm:$0xff] }
 0x448   : > { %v1777_v10 = vpop.xlane.xlu1 %1776 }
 0x449   : > { %14554 = vrot.lane.b32.xlu1 %v20797_v50, %s15676_s30 }
 0x44a   : > { %4786 = vrot.lane.b32.xlu0 %v20772_v30, %s15678_s15 }
 0x44c   : > { %v1774_v3 = vpop.xlane.xlu1 %1773 }
 0x44d   : > { %14559 = vrot.lane.b32.xlu1 %v20798_v7, %s15676_s30  ;;  %15034 = vrcp.f32 %v1774_v3 }
 0x44e   : > { %14609 = vrot.lane.b32.xlu0 %v20776_v60, %s15677_s14 }
 0x44f   : > { %v15031_v2 = vpop.eup %15030 }
 0x450   : > { %v14485_v45 = vpop.permute.xlu1 %14484  ;;  %v1837_v16 = vmul.f32 %v15031_v2, %v16624_v52  ;;  %v15033_v14 = vpop.eup %15032  ;;  %v20801_v52 = vld [vmem:[#allocation15_spill] sm:$0xff] }
 0x451   : > { %v14487_v38 = vunpack.i.h.bf16 %v14485_v45  ;;  %v14486_v58 = vunpack.i.l.bf16 %v14485_v45  ;;  %v1771_v31 = vpop.xlane.xlu0 %1770  ;;  %14564 = vrot.lane.b32.xlu1 %v20799_v17, %s15676_s30  ;;  %v1819_v53 = vmul.f32 %v15033_v14, %v20802_v34 }
 0x452   : > { %15036 = vrcp.f32 %v1771_v31  ;;  %4943 = vrot.lane.b32.xlu0 %v20800_v47, %s15678_s15  ;;  %12492 = vmatprep.mubr.msk.f32.mxu0 %vm1495_vm3, %v1837_v16  ;;  %v20804_v31 = vld [vmem:[#allocation22_spill] sm:$0xff] }
 0x453   : > { %v13641_v4 = vpack.c.bf16 %v14487_v38, %v14486_v58  ;;  %15038 = vrcp.f32 %v1777_v10 }
 0x455   : > { %v1744_v28 = vpop.xlane.xlu0 %1743  ;;  %14574 = vrot.lane.b32.xlu1 %v20767_v6, %s15677_s14  ;;  %13642 = vmatprep.subr.bf16.mxu1 %v13641_v4 }
 0x456   : > { %15040 = vrcp.f32 %v1744_v28  ;;  %4945 = vrot.lane.b32.xlu0 %v20801_v52, %s15678_s15  ;;  %13644 = vmatpush3.bf16.msra.mxu1 %v13641_v4  ;;  %v20806_v4 = vld [vmem:[#allocation19_spill] sm:$0xff] }
 0x457   : > { %v15035_v35 = vpop.eup %15034 }
 0x458   : > { %v1841_v2 = vmul.f32 %v15035_v35, %v16636_v18  ;;  %v20807_v35 = vld [vmem:[#allocation21_spill] sm:$0xff] }
 0x459   : > { %v1750_v32 = vpop.xlane.xlu0 %1749  ;;  %14584 = vrot.lane.b32.xlu1 %v20774_v8, %s15677_s14  ;;  %12462 = vmatmul.mubr.msk.f32.vlgmr.msra.gmra.mrb[40].mxu1 %vm1495_vm3, %v1819_v53 }
 0x45a   : > { %14614 = vrot.lane.b32.xlu0 %v16047_v57, %s15677_s14 }
 0x45c   : > { %v15037_v43 = vpop.eup %15036 }
 0x45d   : > { %v16877_v63 = vpop.xlane.xlu0 %1752  ;;  %14594 = vrot.lane.b32.xlu1 %v20793_v54, %s15677_s14  ;;  %v1839_v10 = vmul.f32 %v15037_v43, %v16648_v48  ;;  %v15039_v3 = vpop.eup %15038  ;;  %v20803_v48 = vld [vmem:[#allocation18_spill] sm:$0xff] }
 0x45e   : > { %14619 = vrot.lane.b32.xlu0 %v16051_v59, %s15677_s14  ;;  %v1843_v58 = vmul.f32 %v15039_v3, %v16630_v49  ;;  %v20805_v49 = vld [vmem:[#allocation27_spill] sm:$0xff] }
 0x45f   : > { %12493 = vmatmul.mubr.msk.f32.gmra.mrb[42].mxu0 %vm1495_vm3, %v1839_v10 }
 0x460   : > { %v15041_v45 = vpop.eup %15040  ;;  %12495 = vmatprep.mubr.msk.f32.mxu0 %vm1495_vm3, %v1841_v2  ;;  %v20808_v2 = vld [vmem:[#allocation54_spill] sm:$0xff] }
 0x461   : > { %v1756_v16 = vpop.xlane.xlu0 %1755  ;;  %4778 = vrot.lane.b32.xlu1 %v20780_v39, %s15678_s15  ;;  %v1821_v38 = vmul.f32 %v15041_v45, %v16660_v61  ;;  %v14442_v45 = vunpack.i.h.bf16 %v20808_v2 }
 0x462   : > { %4949 = vrot.lane.b32.xlu0 %v20803_v48, %s15678_s15 }
 0x463   : > { %12464 = vmatprep.mubr.msk.f32.mxu1 %vm1495_vm3, %v1821_v38  ;;  %12496 = vmatmul.mubr.msk.f32.gmra.mrb[44].mxu0 %vm1495_vm3, %v1843_v58  ;;  %v14441_v38 = vunpack.i.l.bf16 %v20808_v2  ;;  %v20809_v58 = vld [vmem:[#allocation26_spill] sm:$0xff] }
 0x465   : > { %v1783_v18 = vpop.xlane.xlu0 %1782  ;;  %4782 = vrot.lane.b32.xlu1 %v20770_v1, %s15678_s15 }
 0x466   : > { %4951 = vrot.lane.b32.xlu0 %v20804_v31, %s15678_s15  ;;  %15042 = vrcp.f32 %v1783_v18 }
 0x469   : > { %4788 = vrot.lane.b32.xlu1 %v20785_v25, %s15678_s15  ;;  %v1780_v61 = vpop.xlane.xlu0 %1779 }
 0x46a   : > { %15044 = vrcp.f32 %v1780_v61  ;;  %4955 = vrot.lane.b32.xlu0 %v20805_v49, %s15678_s15  ;;  %v20810_v61 = vld [vmem:[#allocation53_spill] sm:$0xff] }
 0x46b   : > { %15046 = vrcp.f32 %v1750_v32 }
 0x46d   : > { %4947 = vrot.lane.b32.xlu1 %v20806_v4, %s15678_s15  ;;  %v1759_v14 = vpop.xlane.xlu0 %1758 }
 0x46e   : > { %14629 = vrot.lane.b32.xlu0 %v20796_v62, %s15677_s14 }
 0x470   : > { %v15043_v34 = vpop.eup %15042 }
 0x471   : > { %14624 = vrot.lane.b32.xlu1 %v16059_v0, %s15677_s14  ;;  %v14495_v28 = vpop.permute.xlu0 %14494  ;;  %v1847_v3 = vmul.f32 %v15043_v34, %v16694_v26  ;;  %v13739_v26 = vpack.c.bf16 %v14442_v45, %v14441_v38  ;;  %v20814_v45 = vld [vmem:[#allocation64_spill] sm:$0xff]  ;;  %v20815_v38 = vld [vmem:[#allocation65_spill] sm:$0xff] }
 0x472   : > { %5114 = vrot.lane.b32.xlu0 %v20787_v15, %s15678_s15  ;;  %v20833_v15 = vld [vmem:[#allocation73_spill] sm:$0xff] }
 0x474   : > { %v15045_v53 = vpop.eup %15044 }
 0x475   : > { %4953 = vrot.lane.b32.xlu1 %v20807_v35, %s15678_s15  ;;  %v16913_v43 = vpop.permute.xlu0 %2462  ;;  %v1845_v10 = vmul.f32 %v15045_v53, %v16699_v42  ;;  %v20811_v42 = vld [vmem:[#allocation60_spill] sm:$0xff]  ;;  %v20812_v53 = vld [vmem:[#allocation55_spill] sm:$0xff] }
 0x476   : > { %14634 = vrot.lane.b32.xlu0 %v20797_v50, %s15677_s14 }
 0x477   : > { %12498 = vmatprep.mubr.msk.f32.mxu0 %vm1495_vm3, %v1845_v10  ;;  %v20813_v10 = vld [vmem:[#allocation62_spill] sm:$0xff] }
 0x478   : > { %12499 = vmatmul.mubr.msk.f32.gmra.mrb[46].mxu0 %vm1495_vm3, %v1847_v3  ;;  %v14447_v3 = vunpack.i.h.bf16 %v20813_v10  ;;  %v14446_v2 = vunpack.i.l.bf16 %v20813_v10 }
 0x479   : > { %4957 = vrot.lane.b32.xlu1 %v20809_v58, %s15678_s15  ;;  %v16925_v18 = vpop.permute.xlu0 %2466  ;;  %12545 = vmatprep.mubr.msk.f32.mxu0 %vm842_vm1, %v20810_v61 }
 0x47a   : > { %14644 = vrot.lane.b32.xlu0 %v20798_v7, %s15677_s14 }
 0x47c   : > { %12546 = vmatmul.mubr.msk.f32.vlgmr.msra.gmra.mrb[48].mxu0 %vm842_vm1, %v20811_v42  ;;  %v13745_v42 = vpack.c.bf16 %v14447_v3, %v14446_v2 }
 0x47d   : > { %13738 = vmatpush3.bf16.xpose.msk.msra.mxu0 %vm16127_vm2, %v16841_v41  ;;  %5112 = vrot.lane.b32.xlu1 %v20775_v23, %s15678_s15  ;;  %v16938_v34 = vpop.permute.xlu0 %2468 }
 0x47e   : > { %12548 = vmatprep.mubr.msk.f32.mxu0 %vm842_vm1, %v20812_v53  ;;  %13741 = vmatprep.subr.msk.bf16.mxu0 %vm16127_vm2, %v13739_v26  ;;  %v20816_v53 = vld [vmem:[#allocation56_spill] sm:$0xff] }
 0x47f   : > { %14649 = vrot.lane.b32.xlu0 %v20767_v6, %s15676_s30 }
 0x480   : > { %12549 = vmatmul.mubr.msk.f32.gmra.mrb[50].mxu0 %vm842_vm1, %v20814_v45  ;;  %v14497_v45 = vunpack.i.h.bf16 %v14495_v28 }
 0x481   : > { %14639 = vrot.lane.b32.xlu1 %v20771_v29, %s15676_s30  ;;  %v16952_v41 = vpop.permute.xlu0 %2472  ;;  %12551 = vmatprep.mubr.msk.f32.mxu0 %vm842_vm1, %v20815_v38  ;;  %v1747_v61 = vpop.xlane.xlu1 %1746  ;;  %v14496_v38 = vunpack.i.l.bf16 %v14495_v28 }
 0x482   : > { %15048 = vrcp.f32 %v1747_v61  ;;  %v20817_v61 = vld [vmem:[#allocation68_spill] sm:$0xff] }
 0x483   : > { %5118 = vrot.lane.b32.xlu0 %v20789_v21, %s15678_s15  ;;  %15050 = vrcp.f32 %v16877_v63  ;;  %v13667_v23 = vpack.c.bf16 %v14497_v45, %v14496_v38  ;;  %v15047_v21 = vpop.eup %15046 }
 0x484   : > { %12552 = vmatmul.mubr.msk.f32.gmra.mrb[52].mxu0 %vm842_vm1, %v20816_v53  ;;  %15052 = vrcp.f32 %v1756_v16  ;;  %v20818_v16 = vld [vmem:[#allocation63_spill] sm:$0xff] }
 0x485   : > { %13744 = vmatpush3.bf16.xpose.msk.msra.mxu0 %vm16127_vm2, %v13739_v26  ;;  %5116 = vrot.lane.b32.xlu1 %v20777_v22, %s15678_s15  ;;  %v16965_v32 = vpop.permute.xlu0 %14519  ;;  %v14490_v10 = vpop.permute.xlu1 %14489  ;;  %v14467_v26 = vunpack.i.h.bf16 %v20818_v16  ;;  %v14466_v2 = vunpack.i.l.bf16 %v20818_v16  ;;  %15054 = vrcp.f32 %v1759_v14  ;;  %v20819_v22 = vld [vmem:[#allocation57_spill] sm:$0xff]  ;;  %v1825_v16 = vmul.f32 %v15047_v21, %v16672_v13 }
 0x486   : > { %12554 = vmatprep.mubr.msk.f32.mxu0 %vm842_vm1, %v20817_v61  ;;  %13747 = vmatprep.subr.msk.bf16.mxu0 %vm16127_vm2, %v13745_v42  ;;  %v14492_v63 = vunpack.i.h.bf16 %v14490_v10  ;;  %v14491_v3 = vunpack.i.l.bf16 %v14490_v10  ;;  %v20820_v61 = vld [vmem:[#allocation58_spill] sm:$0xff]  ;;  %v14521_v49 = vunpack.i.l.bf16 %v16965_v32 }
 0x487   : > { %14654 = vrot.lane.b32.xlu0 %v20773_v20, %s15676_s30  ;;  %v13751_v14 = vpack.c.bf16 %v14467_v26, %v14466_v2 }
 0x488   : > { %v13661_v53 = vpack.c.bf16 %v14492_v63, %v14491_v3  ;;  %12555 = vmatmul.mubr.msk.f32.gmra.mrb[54].mxu0 %vm842_vm1, %v20819_v22 }
 0x489   : > { %5120 = vrot.lane.b32.xlu1 %v20779_v27, %s15678_s15  ;;  %v16979_v28 = vpop.permute.xlu0 %2798  ;;  %12601 = vmatprep.mubr.msk.f32.mxu0 %vm842_vm1, %v20820_v61  ;;  %v14500_v10 = vpop.permute.xlu1 %14499 }
 0x48a   : > { %13663 = vmatprep.subr.msk.bf16.mxu1 %vm16127_vm2, %v13661_v53  ;;  %v14502_v2 = vunpack.i.h.bf16 %v14500_v10 }
 0x48b   : > { %14659 = vrot.lane.b32.xlu0 %v20799_v17, %s15677_s14  ;;  %13666 = vmatpush3.bf16.xpose.msk.msra.mxu1 %vm16127_vm2, %v13661_v53  ;;  %v14501_v53 = vunpack.i.l.bf16 %v14500_v10 }
 0x48c   : > { %v15049_v22 = vpop.eup %15048  ;;  %13669 = vmatprep.subr.msk.bf16.mxu1 %vm16127_vm2, %v13667_v23 }
 0x48d   : > { %13750 = vmatpush3.bf16.xpose.msk.msra.mxu0 %vm16127_vm2, %v13745_v42  ;;  %v16993_v63 = vpop.permute.xlu0 %2802  ;;  %14664 = vrot.lane.b32.xlu1 %v20774_v8, %s15676_s30  ;;  %v14505_v45 = vpop.permute.xlu1 %14504  ;;  %v1823_v38 = vmul.f32 %v15049_v22, %v16728_v19  ;;  %v13673_v58 = vpack.c.bf16 %v14502_v2, %v14501_v53 }
 0x48e   : > { %v15051_v3 = vpop.eup %15050  ;;  %13753 = vmatprep.subr.msk.bf16.mxu0 %vm16127_vm2, %v13751_v14 }
 0x48f   : > { %v15053_v26 = vpop.eup %15052  ;;  %5122 = vrot.lane.b32.xlu0 %v20790_v24, %s15678_s15  ;;  %12465 = vmatmul.mubr.msk.f32.gmra.mrb[42].mxu1 %vm1495_vm3, %v1823_v38  ;;  %v1827_v19 = vmul.f32 %v15051_v3, %v16682_v37  ;;  %v14507_v38 = vunpack.i.h.bf16 %v14505_v45  ;;  %v14506_v3 = vunpack.i.l.bf16 %v14505_v45  ;;  %v20831_v24 = vld [vmem:[#allocation71_spill] sm:$0xff] }
 0x490   : > { %12467 = vmatprep.mubr.msk.f32.mxu1 %vm1495_vm3, %v1825_v16  ;;  %v15055_v22 = vpop.eup %15054  ;;  %v1829_v27 = vmul.f32 %v15053_v26, %v16687_v46 }
 0x491   : > { %v17005_v42 = vpop.permute.xlu0 %2806  ;;  %v14510_v61 = vpop.permute.xlu1 %14509  ;;  %v1831_v21 = vmul.f32 %v15055_v22, %v16709_v55  ;;  %v20825_v55 = vld [vmem:[#allocation66_spill] sm:$0xff] }
 0x493   : > { %5124 = vrot.lane.b32.xlu0 %v20781_v56, %s15678_s15  ;;  %12468 = vmatmul.mubr.msk.f32.gmra.mrb[44].mxu1 %vm1495_vm3, %v1827_v19  ;;  %v20826_v19 = vld [vmem:[#allocation67_spill] sm:$0xff] }
 0x494   : > { %13672 = vmatpush3.bf16.xpose.msk.msra.mxu1 %vm16127_vm2, %v13667_v23  ;;  %v17014_v13 = vpop.f32.mrb[24].mxu0  ;;  %12470 = vmatprep.mubr.msk.f32.mxu1 %vm1495_vm3, %v1829_v27 }
 0x495   : > { %20821 = vst [vmem:[#allocation59_spill] sm:$0xff] %v17014_v13  ;;  %13675 = vmatprep.subr.msk.bf16.mxu1 %vm16127_vm2, %v13673_v58  ;;  %13756 = vmatpush3.bf16.xpose.msk.msra.mxu0 %vm16127_vm2, %v13751_v14  ;;  %v17021_v37 = vpop.permute.xlu0 %2810  ;;  %v17023_v46 = vpop.f32.mrb[25].mxu0  ;;  %v13679_v14 = vpack.c.bf16 %v14507_v38, %v14506_v3  ;;  %v14511_v38 = vunpack.i.l.bf16 %v14510_v61  ;;  %v20827_v3 = vld [vmem:[#allocation74_spill] sm:$0xff] }
 0x496   : > { %20822 = vst [vmem:[#allocation51_spill] sm:$0xff] %v17023_v46  ;;  %v2461_v10 = vpop.permute.xlu1 %2460 }
 0x497   : > { %12471 = vmatmul.mubr.msk.f32.gmra.mrb[46].mxu1 %vm1495_vm3, %v1831_v21 }
 0x498   : > { %12517 = vmatprep.mubr.msk.f32.mxu1 %vm842_vm1, %v2461_v10  ;;  %v14512_v10 = vunpack.i.h.bf16 %v14510_v61  ;;  %v20832_v61 = vld [vmem:[#allocation72_spill] sm:$0xff] }
 0x499   : > { %v14530_v23 = vpop.permute.xlu0 %14529 }
 0x49a   : > { %v14532_v27 = vunpack.i.h.bf16 %v14530_v23  ;;  %v14531_v16 = vunpack.i.l.bf16 %v14530_v23  ;;  %v17028_v26 = vpop.f32.mrb[26].mxu0  ;;  %v2465_v2 = vpop.permute.xlu1 %2464  ;;  %v20829_v23 = vld [vmem:[#allocation70_spill] sm:$0xff] }
 0x49b   : > { %20823 = vst [vmem:[#allocation61_spill] sm:$0xff] %v17028_v26  ;;  %v17030_v53 = vpop.f32.mrb[27].mxu0 }
 0x49c   : > { %20824 = vst [vmem:[#allocation52_spill] sm:$0xff] %v17030_v53  ;;  %13678 = vmatpush3.bf16.xpose.msk.msra.mxu1 %vm16127_vm2, %v13673_v58  ;;  %12602 = vmatmul.mubr.msk.f32.vlgmr.msra.gmra.mrb[56].mxu0 %vm842_vm1, %v20825_v55  ;;  %v13773_v45 = vpack.c.bf16 %v14532_v27, %v14531_v16 }
 0x49d   : > { %13681 = vmatprep.subr.msk.bf16.mxu1 %vm16127_vm2, %v13679_v14  ;;  %12604 = vmatprep.mubr.msk.f32.mxu0 %vm842_vm1, %v20826_v19  ;;  %v17040_v22 = vpop.permute.xlu0 %14539  ;;  %v13709_v19 = vpack.c.bf16 %v14512_v10, %v14511_v38 }
 0x49e   : > { %v14515_v21 = vpop.permute.xlu1 %14514  ;;  %13774 = vmatprep.subr.bf16.mxu0 %v13773_v45 }
 0x49f   : > { %13776 = vmatpush3.bf16.msra.mxu0 %v13773_v45  ;;  %v14516_v56 = vunpack.i.l.bf16 %v14515_v21 }
 0x4a0   : > { %12605 = vmatmul.mubr.msk.f32.gmra.mrb[58].mxu0 %vm842_vm1, %v20827_v3  ;;  %v17044_v58 = vpop.f32.mrb[28].mxu0 }
 0x4a1   : > { %20828 = vst [vmem:[#allocation69_spill] sm:$0xff] %v17044_v58  ;;  %12607 = vmatprep.mubr.msk.f32.mxu0 %vm842_vm1, %v20829_v23  ;;  %v17048_v27 = vpop.permute.xlu0 %14569  ;;  %v17050_v16 = vpop.f32.mrb[29].mxu0  ;;  %v14517_v23 = vunpack.i.h.bf16 %v14515_v21 }
 0x4a2   : > { %20830 = vst [vmem:[#allocation54_spill] sm:$0xff] %v17050_v16  ;;  %v2471_v55 = vpop.permute.xlu1 %2470 }
 0x4a3   : > { %v13715_v35 = vpack.c.bf16 %v14517_v23, %v14516_v56 }
 0x4a4   : > { %13684 = vmatpush3.bf16.xpose.msk.msra.mxu1 %vm16127_vm2, %v13679_v14  ;;  %12608 = vmatmul.mubr.msk.f32.gmra.mrb[60].mxu0 %vm842_vm1, %v20831_v24 }
 0x4a5   : > { %13711 = vmatprep.subr.msk.bf16.mxu1 %vm16127_vm2, %v13709_v19  ;;  %12610 = vmatprep.mubr.msk.f32.mxu0 %vm842_vm1, %v20832_v61  ;;  %v17060_v45 = vpop.permute.xlu0 %14579  ;;  %v14522_v61 = vunpack.i.h.bf16 %v16965_v32 }
 0x4a6   : > { %v2475_v3 = vpop.permute.xlu1 %2474 }
 0x4a7   : > { %v13721_v23 = vpack.c.bf16 %v14522_v61, %v14521_v49 }
 0x4a8   : > { %12611 = vmatmul.mubr.msk.f32.gmra.mrb[62].mxu0 %vm842_vm1, %v20833_v15 }
 0x4a9   : > { %v17064_v10 = vpop.permute.xlu0 %14589  ;;  %v17066_v14 = vpop.f32.mrb[30].mxu0 }
 0x4aa   : > { %20834 = vst [vmem:[#allocation53_spill] sm:$0xff] %v17066_v14  ;;  %v14525_v38 = vpop.permute.xlu1 %14524  ;;  %v17068_v24 = vpop.f32.mrb[31].mxu0 }
 0x4ab   : > { %20835 = vst [vmem:[#allocation60_spill] sm:$0xff] %v17068_v24  ;;  %12518 = vmatmul.mubr.msk.f32.vlgmr.msra.gmra.mrb[48].mxu1 %vm842_vm1, %v16913_v43  ;;  %v14527_v32 = vunpack.i.h.bf16 %v14525_v38  ;;  %v14526_v48 = vunpack.i.l.bf16 %v14525_v38  ;;  %v14542_v38 = vunpack.i.h.bf16 %v17040_v22 }
 0x4ac   : > { %12520 = vmatprep.mubr.msk.f32.mxu1 %vm842_vm1, %v2465_v2  ;;  %13714 = vmatpush3.bf16.xpose.msk.msra.mxu1 %vm16127_vm2, %v13709_v19 }
 0x4ad   : > { %13717 = vmatprep.subr.msk.bf16.mxu1 %vm16127_vm2, %v13715_v35  ;;  %v17077_v15 = vpop.permute.xlu0 %4774 }
 0x4ae   : > { %20836 = vst [vmem:[#allocation55_spill] sm:$0xff] %v17077_v15  ;;  %v2801_v21 = vpop.permute.xlu1 %2800 }
 0x4af   : > { %12521 = vmatmul.mubr.msk.f32.gmra.mrb[50].mxu1 %vm842_vm1, %v16925_v18 }
 0x4b0   : > { %12523 = vmatprep.mubr.msk.f32.mxu1 %vm842_vm1, %v16938_v34  ;;  %v17085_v56 = vpop.f32.mrb[32].mxu0 }
 0x4b1   : > { %20837 = vst [vmem:[#allocation62_spill] sm:$0xff] %v17085_v56  ;;  %v17087_v43 = vpop.permute.xlu0 %4776  ;;  %v17089_v2 = vpop.f32.mrb[33].mxu0 }
 0x4b2   : > { %20838 = vst [vmem:[#allocation64_spill] sm:$0xff] %v17087_v43  ;;  %20839 = vst [vmem:[#allocation65_spill] sm:$0xff] %v17089_v2  ;;  %v2805_v19 = vpop.permute.xlu1 %2804 }
 0x4b3   : > { %12524 = vmatmul.mubr.msk.f32.gmra.mrb[52].mxu1 %vm842_vm1, %v2471_v55 }
 0x4b4   : > { %12526 = vmatprep.mubr.msk.f32.mxu1 %vm842_vm1, %v16952_v41  ;;  %13720 = vmatpush3.bf16.xpose.msk.msra.mxu1 %vm16127_vm2, %v13715_v35  ;;  %v13727_v41 = vpack.c.bf16 %v14527_v32, %v14526_v48 }
 0x4b5   : > { %13723 = vmatprep.subr.msk.bf16.mxu1 %vm16127_vm2, %v13721_v23  ;;  %v17098_v18 = vpop.permute.xlu0 %14599 }
 0x4b6   : > { %20840 = vst [vmem:[#allocation56_spill] sm:$0xff] %v17098_v18  ;;  %v2809_v34 = vpop.permute.xlu1 %2808 }
 0x4b7   : > { %12527 = vmatmul.mubr.msk.f32.gmra.mrb[54].mxu1 %vm842_vm1, %v2475_v3  ;;  %v14541_v3 = vunpack.i.l.bf16 %v17040_v22 }
 0x4b8   : > { %12573 = vmatprep.mubr.msk.f32.mxu1 %vm842_vm1, %v16979_v28 }
 0x4b9   : > { %v17103_v49 = vpop.permute.xlu0 %4780 }
 0x4ba   : > { %20841 = vst [vmem:[#allocation68_spill] sm:$0xff] %v17103_v49  ;;  %v2813_v55 = vpop.permute.xlu1 %2812 }
 0x4bc   : > { %13726 = vmatpush3.bf16.xpose.msk.msra.mxu1 %vm16127_vm2, %v13721_v23  ;;  %v13781_v23 = vpack.c.bf16 %v14542_v38, %v14541_v3 }
 0x4bd   : > { %13729 = vmatprep.subr.msk.bf16.mxu1 %vm16127_vm2, %v13727_v41  ;;  %v17109_v35 = vpop.permute.xlu0 %14604 }
 0x4be   : > { %20842 = vst [vmem:[#allocation63_spill] sm:$0xff] %v17109_v35  ;;  %v14535_v61 = vpop.permute.xlu1 %14534 }
 0x4bf   : > { %v14537_v31 = vunpack.i.h.bf16 %v14535_v61  ;;  %v14536_v52 = vunpack.i.l.bf16 %v14535_v61 }
 0x4c1   : > { %v17113_v28 = vpop.permute.xlu0 %4784  ;;  %v13777_v4 = vpack.c.bf16 %v14537_v31, %v14536_v52 }
 0x4c2   : > { %20843 = vst [vmem:[#allocation57_spill] sm:$0xff] %v17113_v28  ;;  %v14545_v25 = vpop.permute.xlu1 %14544 }
 0x4c3   : > { %v14547_v48 = vunpack.i.h.bf16 %v14545_v25  ;;  %v14546_v32 = vunpack.i.l.bf16 %v14545_v25  ;;  %13778 = vmatprep.subr.bf16.mxu0 %v13777_v4 }
 0x4c4   : > { %13732 = vmatpush3.bf16.xpose.msk.msra.mxu1 %vm16127_vm2, %v13727_v41  ;;  %13780 = vmatpush3.bf16.msra.mxu0 %v13777_v4 }
 0x4c5   : > { %13782 = vmatprep.subr.bf16.mxu0 %v13781_v23  ;;  %v17117_v47 = vpop.permute.xlu0 %4786  ;;  %v13785_v44 = vpack.c.bf16 %v14547_v48, %v14546_v32 }
 0x4c6   : > { %20844 = vst [vmem:[#allocation58_spill] sm:$0xff] %v17117_v47  ;;  %v14550_v33 = vpop.permute.xlu1 %14549 }
 0x4c7   : > { %v14552_v30 = vunpack.i.h.bf16 %v14550_v33  ;;  %v14551_v22 = vunpack.i.l.bf16 %v14550_v33 }
 0x4c8   : > { %13784 = vmatpush3.bf16.msra.mxu0 %v13781_v23 }
 0x4c9   : > { %13786 = vmatprep.subr.bf16.mxu0 %v13785_v44  ;;  %v17119_v61 = vpop.permute.xlu0 %14609  ;;  %v17124_v25 = vpack.c.bf16 %v14552_v30, %v14551_v22 }
 0x4ca   : > { %20845 = vst [vmem:[#allocation66_spill] sm:$0xff] %v17119_v61  ;;  %v17121_v52 = vpop.permute.xlu1 %14554 }
 0x4cb   : > { %12574 = vmatmul.mubr.msk.f32.vlgmr.msra.gmra.mrb[56].mxu1 %vm842_vm1, %v2801_v21 }
 0x4cc   : > { %12576 = vmatprep.mubr.msk.f32.mxu1 %vm842_vm1, %v16993_v63  ;;  %13788 = vmatpush3.bf16.msra.mxu0 %v13785_v44 }
 0x4cd   : > { %13806 = vmatprep.subr.bf16.mxu0 %v17124_v25  ;;  %v17129_v31 = vpop.permute.xlu0 %4943 }
 0x4ce   : > { %20846 = vst [vmem:[#allocation67_spill] sm:$0xff] %v17129_v31  ;;  %v17131_v33 = vpop.permute.xlu1 %14559 }
 0x4cf   : > { %12577 = vmatmul.mubr.msk.f32.gmra.mrb[58].mxu1 %vm842_vm1, %v2805_v19 }
 0x4d0   : > { %12579 = vmatprep.mubr.msk.f32.mxu1 %vm842_vm1, %v17005_v42 }
 0x4d1   : > { %v17136_v4 = vpop.permute.xlu0 %4945 }
 0x4d2   : > { %20847 = vst [vmem:[#allocation74_spill] sm:$0xff] %v17136_v4  ;;  %v17138_v21 = vpop.permute.xlu1 %14564 }
 0x4d3   : > { %12580 = vmatmul.mubr.msk.f32.gmra.mrb[60].mxu1 %vm842_vm1, %v2809_v34 }
 0x4d4   : > { %12582 = vmatprep.mubr.msk.f32.mxu1 %vm842_vm1, %v17021_v37 }
 0x4d5   : > { %v17143_v44 = vpop.permute.xlu0 %14614 }
 0x4d6   : > { %20848 = vst [vmem:[#allocation70_spill] sm:$0xff] %v17143_v44  ;;  %v17145_v30 = vpop.permute.xlu1 %14574 }
 0x4d7   : > { %12583 = vmatmul.mubr.msk.f32.gmra.mrb[62].mxu1 %vm842_vm1, %v2813_v55 }
 0x4d9   : > { %v17148_v63 = vpop.permute.xlu0 %14619 }
 0x4da   : > { %20849 = vst [vmem:[#allocation71_spill] sm:$0xff] %v17148_v63  ;;  %v17150_v19 = vpop.permute.xlu1 %14584 }
 0x4dd   : > { %v17152_v42 = vpop.permute.xlu0 %4949 }
 0x4de   : > { %20850 = vst [vmem:[#allocation72_spill] sm:$0xff] %v17152_v42  ;;  %v17154_v41 = vpop.permute.xlu1 %14594 }
 0x4df   : > { %20851 = vst [vmem:[#allocation73_spill] sm:$0xff] %v17154_v41 }
 0x4e1   : > { %v17156_v38 = vpop.permute.xlu0 %4951 }
 0x4e2   : > { %20852 = vst [vmem:[#allocation75_spill] sm:$0xff] %v17156_v38  ;;  %v17158_v34 = vpop.permute.xlu1 %4778 }
 0x4e3   : > { %20853 = vst [vmem:[#allocation76_spill] sm:$0xff] %v17158_v34 }
 0x4e5   : > { %v17160_v3 = vpop.permute.xlu0 %4955 }
 0x4e6   : > { %20854 = vst [vmem:[#allocation77_spill] sm:$0xff] %v17160_v3  ;;  %v17162_v37 = vpop.permute.xlu1 %4782 }
 0x4e7   : > { %20855 = vst [vmem:[#allocation78_spill] sm:$0xff] %v17162_v37 }
 0x4e9   : > { %v17164_v48 = vpop.permute.xlu0 %14629 }
 0x4ea   : > { %20856 = vst [vmem:[#allocation79_spill] sm:$0xff] %v17164_v48  ;;  %v17166_v32 = vpop.permute.xlu1 %4788 }
 0x4eb   : > { %20857 = vst [vmem:[#allocation80_spill] sm:$0xff] %v17166_v32 }
 0x4ed   : > { %v17168_v55 = vpop.permute.xlu0 %5114  ;;  %v17170_v23 = vpop.f32.mrb[34].mxu0 }
 0x4ee   : > { %20858 = vst [vmem:[#allocation81_spill] sm:$0xff] %v17168_v55  ;;  %20859 = vst [vmem:[#allocation82_spill] sm:$0xff] %v17170_v23  ;;  %v17172_v22 = vpop.permute.xlu1 %4947  ;;  %v17174_v1 = vpop.f32.mrb[35].mxu0 }
 0x4ef   : > { %20860 = vst [vmem:[#allocation83_spill] sm:$0xff] %v17172_v22  ;;  %20861 = vst [vmem:[#allocation84_spill] sm:$0xff] %v17174_v1 }
 0x4f1   : > { %v17176_v39 = vpop.permute.xlu0 %14634  ;;  %v17178_v36 = vpop.f32.mrb[36].mxu0 }
 0x4f2   : > { %20862 = vst [vmem:[#allocation85_spill] sm:$0xff] %v17176_v39  ;;  %20863 = vst [vmem:[#allocation86_spill] sm:$0xff] %v17178_v36  ;;  %v17180_v11 = vpop.permute.xlu1 %14624  ;;  %v17182_v7 = vpop.f32.mrb[37].mxu0 }
 0x4f3   : > { %20864 = vst [vmem:[#allocation87_spill] sm:$0xff] %v17180_v11  ;;  %20865 = vst [vmem:[#allocation88_spill] sm:$0xff] %v17182_v7 }
 0x4f5   : > { %v17184_v17 = vpop.permute.xlu0 %14644 }
 0x4f6   : > { %20866 = vst [vmem:[#allocation89_spill] sm:$0xff] %v17184_v17  ;;  %v17186_v56 = vpop.permute.xlu1 %4953 }
 0x4f7   : > { %20867 = vst [vmem:[#allocation90_spill] sm:$0xff] %v17186_v56 }
 0x4f9   : > { %v14650_v2 = vpop.permute.xlu0 %14649 }
 0x4fa   : > { %v17188_v14 = vpop.permute.xlu1 %4957  ;;  %v17190_v23 = vpop.f32.mrb[38].mxu0  ;;  %v14652_v26 = vunpack.i.h.bf16 %v14650_v2  ;;  %v14651_v53 = vunpack.i.l.bf16 %v14650_v2 }
 0x4fb   : > { %20868 = vst [vmem:[#allocation91_spill] sm:$0xff] %v17188_v14  ;;  %20869 = vst [vmem:[#allocation92_spill] sm:$0xff] %v17190_v23  ;;  %v17192_v24 = vpop.f32.mrb[39].mxu0 }
 0x4fc   : > { %20870 = vst [vmem:[#allocation93_spill] sm:$0xff] %v17192_v24  ;;  %v13761_v24 = vpack.c.bf16 %v14652_v26, %v14651_v53 }
 0x4fd   : > { %v17194_v1 = vpop.permute.xlu0 %5118 }
 0x4fe   : > { %20871 = vst [vmem:[#allocation94_spill] sm:$0xff] %v17194_v1  ;;  %v17196_v58 = vpop.permute.xlu1 %5112  ;;  %v17198_v36 = vpop.f32.mrb[40].mxu0 }
 0x4ff   : > { %20872 = vst [vmem:[#allocation95_spill] sm:$0xff] %v17196_v58  ;;  %20873 = vst [vmem:[#allocation96_spill] sm:$0xff] %v17198_v36  ;;  %v17200_v16 = vpop.f32.mrb[41].mxu0 }
 0x500   : > { %20874 = vst [vmem:[#allocation97_spill] sm:$0xff] %v17200_v16 }
 0x501   : > { %v14655_v50 = vpop.permute.xlu0 %14654 }
 0x502   : > { %v14640_v7 = vpop.permute.xlu1 %14639  ;;  %v14657_v23 = vunpack.i.h.bf16 %v14655_v50  ;;  %v14656_v39 = vunpack.i.l.bf16 %v14655_v50 }
 0x503   : > { %v14642_v13 = vunpack.i.h.bf16 %v14640_v7  ;;  %v14641_v46 = vunpack.i.l.bf16 %v14640_v7 }
 0x504   : > { %v13765_v36 = vpack.c.bf16 %v14657_v23, %v14656_v39 }
 0x505   : > { %v13757_v17 = vpack.c.bf16 %v14642_v13, %v14641_v46 }
 0x506   : > { %v17202_v55 = vpop.permute.xlu1 %5116 }
 0x507   : > { %20875 = vst [vmem:[#allocation98_spill] sm:$0xff] %v17202_v55  ;;  %13758 = vmatprep.subr.bf16.mxu1 %v13757_v17 }
 0x508   : > { %13760 = vmatpush3.bf16.msra.mxu1 %v13757_v17 }
 0x509   : > { %13762 = vmatprep.subr.bf16.mxu1 %v13761_v24 }
 0x50a   : > { %v17204_v1 = vpop.permute.xlu1 %5120 }
 0x50b   : > { %20876 = vst [vmem:[#allocation99_spill] sm:$0xff] %v17204_v1 }
 0x50c   : > { %13764 = vmatpush3.bf16.msra.mxu1 %v13761_v24 }
 0x50d   : > { %13766 = vmatprep.subr.bf16.mxu1 %v13765_v36 }
 0x50e   : > { %v14665_v16 = vpop.permute.xlu1 %14664 }
 0x50f   : > { %v14667_v62 = vunpack.i.h.bf16 %v14665_v16  ;;  %v14666_v2 = vunpack.i.l.bf16 %v14665_v16 }
 0x510   : > { %13768 = vmatpush3.bf16.msra.mxu1 %v13765_v36 }
 0x511   : > { %v13769_v7 = vpack.c.bf16 %v14667_v62, %v14666_v2 }
 0x513   : > { %13770 = vmatprep.subr.bf16.mxu1 %v13769_v7 }
 0x514   : > { %13772 = vmatpush3.bf16.msra.mxu1 %v13769_v7 }
 0x52c   : > { %v17206_v13 = vpop.f32.mrb[40].mxu1 }
 0x52d   : > { %20877 = vst [vmem:[#allocation100_spill] sm:$0xff] %v17206_v13  ;;  %v17208_v46 = vpop.f32.mrb[41].mxu1 }
 0x52e   : > { %20878 = vst [vmem:[#allocation101_spill] sm:$0xff] %v17208_v46 }
 0x532   : > { %v17210_v50 = vpop.f32.mrb[42].mxu0 }
 0x533   : > { %20879 = vst [vmem:[#allocation102_spill] sm:$0xff] %v17210_v50  ;;  %v17212_v17 = vpop.f32.mrb[43].mxu0 }
 0x534   : > { %20880 = vst [vmem:[#allocation103_spill] sm:$0xff] %v17212_v17 }
 0x536   : > { %v17214_v26 = vpop.f32.mrb[44].mxu0 }
 0x537   : > { %20881 = vst [vmem:[#allocation104_spill] sm:$0xff] %v17214_v26  ;;  %v17216_v39 = vpop.f32.mrb[45].mxu0 }
 0x538   : > { %20882 = vst [vmem:[#allocation105_spill] sm:$0xff] %v17216_v39 }
 0x54b   : > { %v17218_v53 = vpop.f32.mrb[46].mxu0 }
 0x54c   : > { %20883 = vst [vmem:[#allocation106_spill] sm:$0xff] %v17218_v53  ;;  %v17220_v24 = vpop.f32.mrb[47].mxu0 }
 0x54d   : > { %20884 = vst [vmem:[#allocation107_spill] sm:$0xff] %v17220_v24 }
 0x54f   : > { %v17222_v36 = vpop.f32.mrb[48].mxu0 }
 0x550   : > { %v17224_v62 = vpop.f32.mrb[49].mxu0 }
 0x553   : > { %v17226_v16 = vpop.f32.mrb[50].mxu0 }
 0x554   : > { %v17228_v23 = vpop.f32.mrb[51].mxu0 }
 0x557   : > { %v17230_v2 = vpop.f32.mrb[52].mxu0 }
 0x558   : > { %v17232_v7 = vpop.f32.mrb[53].mxu0 }
 0x55b   : > { %v17234_v50 = vpop.f32.mrb[54].mxu0 }
 0x55c   : > { %v17236_v26 = vpop.f32.mrb[55].mxu0 }
 0x562   : > { %v17238_v39 = vpop.f32.mrb[42].mxu1 }
 0x563   : > { %20885 = vst [vmem:[#allocation108_spill] sm:$0xff] %v17238_v39  ;;  %v17240_v53 = vpop.f32.mrb[43].mxu1 }
 0x564   : > { %20886 = vst [vmem:[#allocation109_spill] sm:$0xff] %v17240_v53 }
 0x566   : > { %v17242_v24 = vpop.f32.mrb[44].mxu1 }
 0x567   : > { %20887 = vst [vmem:[#allocation110_spill] sm:$0xff] %v17242_v24  ;;  %v17244_v17 = vpop.f32.mrb[45].mxu1 }
 0x568   : > { %20888 = vst [vmem:[#allocation111_spill] sm:$0xff] %v17244_v17 }
 0x56a   : > { %v17246_v13 = vpop.f32.mrb[46].mxu1 }
 0x56b   : > { %20889 = vst [vmem:[#allocation112_spill] sm:$0xff] %v17246_v13  ;;  %v17248_v46 = vpop.f32.mrb[47].mxu1 }
 0x56c   : > { %20890 = vst [vmem:[#allocation113_spill] sm:$0xff] %v17248_v46 }
 0x56f   : > { %v17250_v1 = vpop.f32.mrb[56].mxu0 }
 0x570   : > { %v17252_v55 = vpop.f32.mrb[57].mxu0 }
 0x573   : > { %v17254_v48 = vpop.f32.mrb[58].mxu0 }
 0x574   : > { %v17256_v58 = vpop.f32.mrb[59].mxu0 }
 0x577   : > { %v17258_v5 = vpop.f32.mrb[60].mxu0 }
 0x578   : > { %v17260_v39 = vpop.f32.mrb[61].mxu0 }
 0x57b   : > { %v17262_v53 = vpop.f32.mrb[62].mxu0 }
 0x57c   : > { %v17264_v24 = vpop.f32.mrb[63].mxu0 }
 0x57e   : > { %v12519_v17 = vpop.f32.mrb[48].mxu1 }
 0x57f   : > { %v17266_v13 = vmul.f32 0.35355338, %v12519_v17  ;;  %v2590_v46 = vpop.f32.mrb[49].mxu1 }
 0x580   : > { %v17268_v14 = vmul.f32 0.35355338, %v2590_v46 }
 0x581   : > { %v3171_v11 = vsel %vm1495_vm3, %v17266_v13, -inf }
 0x582   : > { %3172 = vmax.xlane.f32.xlu0 %v3171_v11  ;;  %v12522_v3 = vpop.f32.mrb[50].mxu1  ;;  %v3168_v51 = vsel %vm1495_vm3, %v17268_v14, -inf }
 0x583   : > { %v17274_v56 = vmul.f32 0.35355338, %v12522_v3  ;;  %3169 = vmax.xlane.f32.xlu1 %v3168_v51  ;;  %v2600_v38 = vpop.f32.mrb[51].mxu1 }
 0x584   : > { %v17276_v6 = vmul.f32 0.35355338, %v2600_v38 }
 0x585   : > { %v3177_v17 = vsel %vm1495_vm3, %v17274_v56, -inf }
 0x586   : > { %3178 = vmax.xlane.f32.xlu0 %v3177_v17  ;;  %v12525_v46 = vpop.f32.mrb[52].mxu1  ;;  %v3174_v42 = vsel %vm1495_vm3, %v17276_v6, -inf }
 0x587   : > { %v17282_v63 = vmul.f32 0.35355338, %v12525_v46  ;;  %3175 = vmax.xlane.f32.xlu1 %v3174_v42  ;;  %v2610_v11 = vpop.f32.mrb[53].mxu1 }
 0x588   : > { %v17286_v22 = vmul.f32 0.35355338, %v2610_v11 }
 0x589   : > { %v3183_v3 = vsel %vm1495_vm3, %v17282_v63, -inf }
 0x58a   : > { %v12528_v51 = vpop.f32.mrb[54].mxu1  ;;  %v3180_v42 = vsel %vm1495_vm3, %v17286_v22, -inf }
 0x58b   : > { %v17288_v38 = vmul.f32 0.35355338, %v12528_v51  ;;  %3184 = vmax.xlane.f32.xlu1 %v3183_v3  ;;  %v2620_v59 = vpop.f32.mrb[55].mxu1 }
 0x58c   : > { %v17292_v4 = vmul.f32 0.35355338, %v2620_v59 }
 0x58d   : > { %v3189_v17 = vsel %vm1495_vm3, %v17288_v38, -inf }
 0x58e   : > { %3190 = vmax.xlane.f32.xlu0 %v3189_v17  ;;  %v3186_v46 = vsel %vm1495_vm3, %v17292_v4, -inf }
 0x58f   : > { %3181 = vmax.xlane.f32.xlu1 %v3180_v42 }
 0x593   : > { %3187 = vmax.xlane.f32.xlu1 %v3186_v46 }
 0x59e   : > { %v12575_v11 = vpop.f32.mrb[56].mxu1 }
 0x59f   : > { %v17298_v44 = vmul.f32 0.35355338, %v12575_v11  ;;  %v2928_v51 = vpop.f32.mrb[57].mxu1 }
 0x5a0   : > { %v17300_v3 = vmul.f32 0.35355338, %v2928_v51 }
 0x5a1   : > { %v3219_v61 = vsel %vm1495_vm3, %v17298_v44, -inf }
 0x5a2   : > { %3220 = vmax.xlane.f32.xlu1 %v3219_v61  ;;  %v12578_v59 = vpop.f32.mrb[58].mxu1  ;;  %v3216_v17 = vsel %vm1495_vm3, %v17300_v3, -inf }
 0x5a3   : > { %v17306_v31 = vmul.f32 0.35355338, %v12578_v59  ;;  %3217 = vmax.xlane.f32.xlu0 %v3216_v17  ;;  %v2938_v42 = vpop.f32.mrb[59].mxu1 }
 0x5a4   : > { %v17308_v32 = vmul.f32 0.35355338, %v2938_v42 }
 0x5a5   : > { %v3225_v46 = vsel %vm1495_vm3, %v17306_v31, -inf }
 0x5a6   : > { %v12581_v11 = vpop.f32.mrb[60].mxu1  ;;  %v3222_v51 = vsel %vm1495_vm3, %v17308_v32, -inf }
 0x5a7   : > { %v17314_v35 = vmul.f32 0.35355338, %v12581_v11  ;;  %3226 = vmax.xlane.f32.xlu0 %v3225_v46  ;;  %3223 = vmax.xlane.f32.xlu1 %v3222_v51  ;;  %v2948_v61 = vpop.f32.mrb[61].mxu1  ;;  %v17329_v11 = vmul.f32 0.35355338, %v17222_v36 }
 0x5a8   : > { %v17318_v47 = vmul.f32 0.35355338, %v2948_v61  ;;  %v17343_v36 = vmul.f32 0.35355338, %v17226_v16  ;;  %v17359_v16 = vmul.f32 0.35355338, %v17236_v26 }
 0x5a9   : > { %v3231_v59 = vsel %vm1495_vm3, %v17314_v35, -inf  ;;  %v3195_v61 = vsel %vm1495_vm3, %v17329_v11, -inf }
 0x5aa   : > { %v12584_v17 = vpop.f32.mrb[62].mxu1  ;;  %v3228_v49 = vsel %vm1495_vm3, %v17318_v47, -inf }
 0x5ab   : > { %3232 = vmax.xlane.f32.xlu1 %v3231_v59  ;;  %v2958_v42 = vpop.f32.mrb[63].mxu1  ;;  %v17322_v37 = vmul.f32 0.35355338, %v12584_v17  ;;  %v20892_v59 = vld [vmem:[#allocation24_spill] sm:$0xff] }
 0x5ac   : > { %v17320_v28 = vmul.f32 0.35355338, %v2958_v42  ;;  %v17348_v42 = vmul.f32 0.35355338, %v17228_v23 }
 0x5ad   : > { %20891 = vst [vmem:[#allocation114_spill] sm:$0xff] %v17322_v37  ;;  %v3237_v51 = vsel %vm1495_vm3, %v17322_v37, -inf }
 0x5ae   : > { %v3234_v46 = vsel %vm1495_vm3, %v17320_v28, -inf  ;;  %v3198_v23 = vsel %vm1495_vm3, %v17348_v42, -inf }
 0x5af   : > { %3229 = vmax.xlane.f32.xlu1 %v3228_v49  ;;  %3235 = vmax.xlane.f32.xlu0 %v3234_v46  ;;  %v17340_v49 = vmul.f32 0.35355338, %v17224_v62  ;;  %v17351_v46 = vmul.f32 0.35355338, %v17232_v7  ;;  %v17356_v62 = vmul.f32 0.35355338, %v17230_v2 }
 0x5b0   : > { %v17366_v7 = vmul.f32 0.35355338, %v17234_v50  ;;  %v3210_v2 = vsel %vm1495_vm3, %v17359_v16, -inf }
 0x5b1   : > { %v3192_v17 = vsel %vm1495_vm3, %v17340_v49, -inf  ;;  %v3207_v26 = vsel %vm1495_vm3, %v17356_v62, -inf }
 0x5b3   : > { %3238 = vmax.xlane.f32.xlu1 %v3237_v51  ;;  %v3201_v51 = vsel %vm1495_vm3, %v17343_v36, -inf }
 0x5b7   : > { %3196 = vmax.xlane.f32.xlu1 %v3195_v61  ;;  %v3204_v61 = vsel %vm1495_vm3, %v17351_v46, -inf }
 0x5c5   : > { %5281 = vrot.lane.b32.xlu0 %v20892_v59, %s15678_s15 }
 0x5c8   : > { %5126 = vrot.lane.b32.xlu1 %v20792_v40, %s15678_s15  ;;  %v17408_v40 = vmul.f32 0.35355338, %v17262_v53 }
 0x5e4   : > { %3193 = vmax.xlane.f32.xlu0 %v3192_v17  ;;  %v17369_v17 = vmul.f32 0.35355338, %v17252_v55  ;;  %v3213_v55 = vsel %vm1495_vm3, %v17366_v7, -inf }
 0x5e6   : > { %v3240_v50 = vsel %vm1495_vm3, %v17369_v17, -inf }
 0x5e8   : > { %3202 = vmax.xlane.f32.xlu0 %v3201_v51  ;;  %v17376_v51 = vmul.f32 0.35355338, %v17250_v1 }
 0x5ec   : > { %3205 = vmax.xlane.f32.xlu1 %v3204_v61  ;;  %3199 = vmax.xlane.f32.xlu0 %v3198_v23  ;;  %v17379_v61 = vmul.f32 0.35355338, %v17256_v58  ;;  %v17386_v23 = vmul.f32 0.35355338, %v17254_v48  ;;  %v3243_v58 = vsel %vm1495_vm3, %v17376_v51, -inf }
 0x5ee   : > { %v3246_v1 = vsel %vm1495_vm3, %v17379_v61, -inf }
 0x5f0   : > { %3211 = vmax.xlane.f32.xlu1 %v3210_v2  ;;  %3208 = vmax.xlane.f32.xlu0 %v3207_v26  ;;  %v17389_v2 = vmul.f32 0.35355338, %v17260_v39  ;;  %v17396_v26 = vmul.f32 0.35355338, %v17258_v5  ;;  %v3249_v39 = vsel %vm1495_vm3, %v17386_v23, -inf }
 0x5f2   : > { %v3252_v48 = vsel %vm1495_vm3, %v17389_v2, -inf }
 0x5f4   : > { %3241 = vmax.xlane.f32.xlu1 %v3240_v50  ;;  %3214 = vmax.xlane.f32.xlu0 %v3213_v55  ;;  %v17399_v50 = vmul.f32 0.35355338, %v17264_v24  ;;  %v17405_v55 = vpop.permute.xlu0 %14659  ;;  %v3255_v24 = vsel %vm1495_vm3, %v17396_v26, -inf }
 0x5f5   : > { %20893 = vst [vmem:[#allocation115_spill] sm:$0xff] %v17405_v55 }
 0x5f6   : > { %v3258_v5 = vsel %vm1495_vm3, %v17399_v50, -inf }
 0x5f8   : > { %3247 = vmax.xlane.f32.xlu1 %v3246_v1  ;;  %3244 = vmax.xlane.f32.xlu0 %v3243_v58  ;;  %v3261_v1 = vsel %vm1495_vm3, %v17408_v40, -inf  ;;  %v17416_v58 = vpop.permute.xlu0 %5122 }
 0x5f9   : > { %20894 = vst [vmem:[#allocation116_spill] sm:$0xff] %v17416_v58 }
 0x5fc   : > { %3253 = vmax.xlane.f32.xlu1 %v3252_v48  ;;  %3250 = vmax.xlane.f32.xlu0 %v3249_v39  ;;  %v17418_v48 = vpop.permute.xlu0 %5124 }
 0x5fd   : > { %20895 = vst [vmem:[#allocation117_spill] sm:$0xff] %v17418_v48 }
 0x600   : > { %3259 = vmax.xlane.f32.xlu1 %v3258_v5  ;;  %3256 = vmax.xlane.f32.xlu0 %v3255_v24 }
 0x604   : > { %3262 = vmax.xlane.f32.xlu0 %v3261_v1 }
 0x60f   : > { %v3173_v39 = vpop.xlane.xlu0 %3172 }
 0x610   : > { %v3265_v53 = vsub.f32 %v17266_v13, %v3173_v39  ;;  %v3170_v59 = vpop.xlane.xlu1 %3169 }
 0x611   : > { %v3264_v55 = vsub.f32 %v17268_v14, %v3170_v59 }
 0x612   : > { %v3298_v18 = vmul.f32 1.442695, %v3265_v53 }
 0x613   : > { %v3296_v34 = vmul.f32 1.442695, %v3264_v55  ;;  %v3179_v43 = vpop.xlane.xlu0 %3178 }
 0x614   : > { %15056 = vpow2.f32 %v3298_v18  ;;  %v3267_v5 = vsub.f32 %v17274_v56, %v3179_v43  ;;  %v3176_v24 = vpop.xlane.xlu1 %3175 }
 0x615   : > { %15058 = vpow2.f32 %v3296_v34  ;;  %v3266_v1 = vsub.f32 %v17276_v6, %v3176_v24 }
 0x616   : > { %v3302_v15 = vmul.f32 1.442695, %v3267_v5 }
 0x617   : > { %v3300_v58 = vmul.f32 1.442695, %v3266_v1 }
 0x618   : > { %15060 = vpow2.f32 %v3302_v15  ;;  %v3185_v48 = vpop.xlane.xlu1 %3184 }
 0x619   : > { %v3269_v41 = vsub.f32 %v17282_v63, %v3185_v48  ;;  %15062 = vpow2.f32 %v3300_v58 }
 0x61b   : > { %v3306_v13 = vmul.f32 1.442695, %v3269_v41  ;;  %v3191_v39 = vpop.xlane.xlu0 %3190 }
 0x61c   : > { %v3182_v14 = vpop.xlane.xlu1 %3181  ;;  %v3271_v56 = vsub.f32 %v17288_v38, %v3191_v39 }
 0x61d   : > { %v3268_v59 = vsub.f32 %v17286_v22, %v3182_v14  ;;  %15064 = vpow2.f32 %v3306_v13 }
 0x61e   : > { %v17426_v55 = vpop.eup %15056  ;;  %v3310_v22 = vmul.f32 1.442695, %v3271_v56 }
 0x61f   : > { %v17428_v18 = vpop.eup %15058  ;;  %v3304_v6 = vmul.f32 1.442695, %v3268_v59  ;;  %v3363_v15 = vsel %vm1495_vm3, %v17426_v55, 0.0 }
 0x620   : > { %v3188_v43 = vpop.xlane.xlu1 %3187  ;;  %3364 = vadd.xlane.f32.xlu0 %v3363_v15  ;;  %v3360_v63 = vsel %vm1495_vm3, %v17428_v18, 0.0 }
 0x621   : > { %v3270_v41 = vsub.f32 %v17292_v4, %v3188_v43  ;;  %3361 = vadd.xlane.f32.xlu1 %v3360_v63  ;;  %15066 = vpow2.f32 %v3304_v6 }
 0x622   : > { %v17436_v34 = vpop.eup %15060 }
 0x623   : > { %v3308_v58 = vmul.f32 1.442695, %v3270_v41  ;;  %v3369_v38 = vsel %vm1495_vm3, %v17436_v34, 0.0  ;;  %v17440_v48 = vpop.eup %15062 }
 0x624   : > { %v3366_v53 = vsel %vm1495_vm3, %v17440_v48, 0.0 }
 0x625   : > { %15068 = vpow2.f32 %v3308_v58  ;;  %3370 = vadd.xlane.f32.xlu1 %v3369_v38 }
 0x626   : > { %15070 = vpow2.f32 %v3310_v22 }
 0x627   : > { %v17444_v5 = vpop.eup %15064 }
 0x628   : > { %v3375_v4 = vsel %vm1495_vm3, %v17444_v5, 0.0 }
 0x629   : > { %3367 = vadd.xlane.f32.xlu1 %v3366_v53 }
 0x62b   : > { %v17448_v24 = vpop.eup %15066 }
 0x62c   : > { %v3372_v39 = vsel %vm1495_vm3, %v17448_v24, 0.0 }
 0x62d   : > { %3376 = vadd.xlane.f32.xlu1 %v3375_v4 }
 0x62f   : > { %v17450_v1 = vpop.eup %15068  ;;  %v17452_v13 = vpop.xlane.xlu1 %3220 }
 0x630   : > { %v3378_v14 = vsel %vm1495_vm3, %v17450_v1, 0.0  ;;  %v17458_v59 = vpop.eup %15070  ;;  %v17475_v4 = vpop.xlane.xlu0 %3217 }
 0x631   : > { %3373 = vadd.xlane.f32.xlu1 %v3372_v39  ;;  %3379 = vadd.xlane.f32.xlu0 %v3378_v14  ;;  %v3381_v6 = vsel %vm1495_vm3, %v17458_v59, 0.0 }
 0x634   : > { %v17460_v56 = vpop.xlane.xlu1 %3223  ;;  %v17477_v39 = vpop.xlane.xlu0 %3226 }
 0x635   : > { %3382 = vadd.xlane.f32.xlu1 %v3381_v6 }
 0x638   : > { %v17464_v15 = vpop.xlane.xlu1 %3232 }
 0x63c   : > { %v17466_v43 = vpop.xlane.xlu1 %3229  ;;  %v17479_v14 = vpop.xlane.xlu0 %3235 }
 0x640   : > { %v17468_v63 = vpop.xlane.xlu1 %3238  ;;  %v17481_v6 = vpop.permute.xlu0 %5281 }
 0x641   : > { %20896 = vst [vmem:[#allocation118_spill] sm:$0xff] %v17468_v63  ;;  %20897 = vst [vmem:[#allocation119_spill] sm:$0xff] %v17481_v6 }
 0x644   : > { %v3197_v41 = vpop.xlane.xlu1 %3196 }
 0x645   : > { %v3273_v22 = vsub.f32 %v17329_v11, %v3197_v41 }
 0x647   : > { %v3314_v58 = vmul.f32 1.442695, %v3273_v22 }
 0x648   : > { %v17484_v41 = vpop.permute.xlu1 %5126 }
 0x649   : > { %15072 = vpow2.f32 %v3314_v58  ;;  %20898 = vst [vmem:[#allocation120_spill] sm:$0xff] %v17484_v41 }
 0x653   : > { %v17471_v38 = vpop.eup %15072 }
 0x654   : > { %v3387_v53 = vsel %vm1495_vm3, %v17471_v38, 0.0 }
 0x655   : > { %3388 = vadd.xlane.f32.xlu0 %v3387_v53 }
 0x671   : > { %v3194_v37 = vpop.xlane.xlu0 %3193 }
 0x672   : > { %v3272_v63 = vsub.f32 %v17340_v49, %v3194_v37 }
 0x674   : > { %v3312_v11 = vmul.f32 1.442695, %v3272_v63 }
 0x675   : > { %v3203_v22 = vpop.xlane.xlu0 %3202 }
 0x676   : > { %15074 = vpow2.f32 %v3312_v11  ;;  %v3275_v58 = vsub.f32 %v17343_v36, %v3203_v22 }
 0x678   : > { %v3318_v12 = vmul.f32 1.442695, %v3275_v58 }
 0x679   : > { %v3206_v53 = vpop.xlane.xlu1 %3205  ;;  %v3200_v54 = vpop.xlane.xlu0 %3199 }
 0x67a   : > { %15076 = vpow2.f32 %v3318_v12  ;;  %v3276_v60 = vsub.f32 %v17351_v46, %v3206_v53  ;;  %v3274_v8 = vsub.f32 %v17348_v42, %v3200_v54 }
 0x67c   : > { %v3316_v20 = vmul.f32 1.442695, %v3274_v8  ;;  %v3320_v6 = vmul.f32 1.442695, %v3276_v60 }
 0x67d   : > { %v3212_v29 = vpop.xlane.xlu1 %3211  ;;  %v3209_v0 = vpop.xlane.xlu0 %3208 }
 0x67e   : > { %v3277_v37 = vsub.f32 %v17356_v62, %v3209_v0  ;;  %15078 = vpow2.f32 %v3316_v20  ;;  %v3278_v36 = vsub.f32 %v17359_v16, %v3212_v29 }
 0x67f   : > { %15080 = vpow2.f32 %v3320_v6 }
 0x680   : > { %v17490_v49 = vpop.eup %15074  ;;  %v3322_v63 = vmul.f32 1.442695, %v3277_v37  ;;  %v3324_v0 = vmul.f32 1.442695, %v3278_v36 }
 0x681   : > { %v3242_v11 = vpop.xlane.xlu1 %3241  ;;  %v3215_v22 = vpop.xlane.xlu0 %3214  ;;  %v3384_v12 = vsel %vm1495_vm3, %v17490_v49, 0.0 }
 0x682   : > { %v3279_v54 = vsub.f32 %v17366_v7, %v3215_v22  ;;  %3385 = vadd.xlane.f32.xlu1 %v3384_v12  ;;  %15082 = vpow2.f32 %v3322_v63  ;;  %v3288_v20 = vsub.f32 %v17369_v17, %v3242_v11 }
 0x684   : > { %v17496_v8 = vpop.eup %15076  ;;  %v3326_v60 = vmul.f32 1.442695, %v3279_v54  ;;  %v3344_v7 = vmul.f32 1.442695, %v3288_v20 }
 0x685   : > { %v3245_v42 = vpop.xlane.xlu0 %3244  ;;  %v3393_v46 = vsel %vm1495_vm3, %v17496_v8, 0.0  ;;  %v3248_v29 = vpop.xlane.xlu1 %3247 }
 0x686   : > { %v3289_v62 = vsub.f32 %v17376_v51, %v3245_v42  ;;  %3394 = vadd.xlane.f32.xlu1 %v3393_v46  ;;  %15084 = vpow2.f32 %v3326_v60  ;;  %v3290_v58 = vsub.f32 %v17379_v61, %v3248_v29 }
 0x687   : > { %15086 = vpow2.f32 %v3324_v0 }
 0x688   : > { %v3346_v16 = vmul.f32 1.442695, %v3289_v62  ;;  %v17502_v6 = vpop.eup %15078  ;;  %v3348_v11 = vmul.f32 1.442695, %v3290_v58 }
 0x689   : > { %v3251_v53 = vpop.xlane.xlu0 %3250  ;;  %v3390_v17 = vsel %vm1495_vm3, %v17502_v6, 0.0  ;;  %v17508_v63 = vpop.eup %15080 }
 0x68a   : > { %v3291_v37 = vsub.f32 %v17386_v23, %v3251_v53  ;;  %15088 = vpow2.f32 %v3346_v16  ;;  %3391 = vadd.xlane.f32.xlu1 %v3390_v17  ;;  %v3396_v22 = vsel %vm1495_vm3, %v17508_v63, 0.0  ;;  %v3254_v53 = vpop.xlane.xlu1 %3253 }
 0x68b   : > { %15090 = vpow2.f32 %v3344_v7 }
 0x68c   : > { %v3350_v51 = vmul.f32 1.442695, %v3291_v37  ;;  %v17510_v36 = vpop.eup %15082 }
 0x68d   : > { %v3399_v61 = vsel %vm1495_vm3, %v17510_v36, 0.0  ;;  %v3257_v58 = vpop.xlane.xlu0 %3256 }
 0x68e   : > { %15092 = vpow2.f32 %v3350_v51  ;;  %3397 = vadd.xlane.f32.xlu1 %v3396_v22  ;;  %3400 = vadd.xlane.f32.xlu0 %v3399_v61  ;;  %v3260_v17 = vpop.xlane.xlu1 %3259  ;;  %v20899_v22 = vld [vmem:[#allocation23_spill] sm:$0xff] }
 0x68f   : > { %15094 = vpow2.f32 %v3348_v11  ;;  %v20900_v61 = vld [vmem:[#allocation31_spill] sm:$0xff] }
 0x690   : > { %v17516_v23 = vpop.eup %15084 }
 0x691   : > { %v3405_v12 = vsel %vm1495_vm3, %v17516_v23, 0.0  ;;  %v17520_v54 = vpop.eup %15086  ;;  %v3263_v37 = vpop.xlane.xlu0 %3262 }
 0x692   : > { %3406 = vadd.xlane.f32.xlu1 %v3405_v12  ;;  %v3402_v0 = vsel %vm1495_vm3, %v17520_v54, 0.0 }
 0x694   : > { %v17522_v60 = vpop.eup %15088 }
 0x695   : > { %v3435_v20 = vsel %vm1495_vm3, %v17522_v60, 0.0  ;;  %v17528_v42 = vpop.eup %15090 }
 0x696   : > { %3403 = vadd.xlane.f32.xlu1 %v3402_v0  ;;  %3436 = vadd.xlane.f32.xlu0 %v3435_v20  ;;  %v3432_v29 = vsel %vm1495_vm3, %v17528_v42, 0.0 }
 0x698   : > { %v17530_v46 = vpop.eup %15092 }
 0x699   : > { %v3441_v62 = vsel %vm1495_vm3, %v17530_v46, 0.0  ;;  %v17536_v16 = vpop.eup %15094 }
 0x69a   : > { %3433 = vadd.xlane.f32.xlu1 %v3432_v29  ;;  %3442 = vadd.xlane.f32.xlu0 %v3441_v62  ;;  %v3438_v7 = vsel %vm1495_vm3, %v17536_v16, 0.0  ;;  %v3293_v62 = vsub.f32 %v17396_v26, %v3257_v58 }
 0x69e   : > { %3439 = vadd.xlane.f32.xlu1 %v3438_v7 }
 0x6ad   : > { %v3365_v51 = vpop.xlane.xlu0 %3364 }
 0x6ae   : > { %15096 = vrcp.f32 %v3365_v51  ;;  %v3362_v11 = vpop.xlane.xlu1 %3361 }
 0x6af   : > { %15098 = vrcp.f32 %v3362_v11  ;;  %5283 = vrot.lane.b32.xlu1 %v20899_v22, %s15678_s15  ;;  %v3292_v11 = vsub.f32 %v17389_v2, %v3254_v53  ;;  %v3294_v22 = vsub.f32 %v17399_v50, %v3260_v17  ;;  %v3295_v2 = vsub.f32 %v17408_v40, %v3263_v37 }
 0x6b0   : > { %5285 = vrot.lane.b32.xlu0 %v20900_v61, %s15678_s15 }
 0x6b1   : > { %v3356_v58 = vmul.f32 1.442695, %v3294_v22 }
 0x6b2   : > { %v3371_v12 = vpop.xlane.xlu1 %3370 }
 0x6b3   : > { %15100 = vrcp.f32 %v3371_v12  ;;  %v3354_v12 = vmul.f32 1.442695, %v3293_v62 }
 0x6b6   : > { %v3368_v0 = vpop.xlane.xlu1 %3367 }
 0x6b7   : > { %15102 = vrcp.f32 %v3368_v0 }
 0x6b8   : > { %v15097_v20 = vpop.eup %15096 }
 0x6b9   : > { %v15099_v29 = vpop.eup %15098  ;;  %v3459_v51 = vmul.f32 %v15097_v20, %v17426_v55  ;;  %v3352_v55 = vmul.f32 1.442695, %v3292_v11 }
 0x6ba   : > { %v3377_v7 = vpop.xlane.xlu1 %3376  ;;  %v3457_v41 = vmul.f32 %v15099_v29, %v17428_v18  ;;  %v3280_v18 = vsub.f32 %v17300_v3, %v17475_v4 }
 0x6bb   : > { %15104 = vrcp.f32 %v3377_v7 }
 0x6bc   : > { %12629 = vmatprep.mubr.msk.f32.mxu1 %vm1495_vm3, %v3457_v41  ;;  %v3328_v17 = vmul.f32 1.442695, %v3280_v18  ;;  %v3283_v18 = vsub.f32 %v17306_v31, %v17477_v39 }
 0x6bd   : > { %12630 = vmatmul.mubr.msk.f32.vlgmr.msra.gmra.mrb[64].mxu1 %vm1495_vm3, %v3459_v51  ;;  %v15101_v57 = vpop.eup %15100 }
 0x6be   : > { %v3374_v0 = vpop.xlane.xlu1 %3373  ;;  %v3380_v61 = vpop.xlane.xlu0 %3379  ;;  %v3463_v50 = vmul.f32 %v15101_v57, %v17436_v34 }
 0x6bf   : > { %15106 = vrcp.f32 %v3374_v0  ;;  %v20902_v0 = vld [vmem:[#allocation30_spill] sm:$0xff] }
 0x6c0   : > { %15108 = vrcp.f32 %v3380_v61  ;;  %v3358_v61 = vmul.f32 1.442695, %v3295_v2  ;;  %v3282_v2 = vsub.f32 %v17308_v32, %v17460_v56 }
 0x6c1   : > { %v15103_v26 = vpop.eup %15102  ;;  %15110 = vpow2.f32 %v3354_v12  ;;  %v20901_v12 = vld [vmem:[#allocation29_spill] sm:$0xff] }
 0x6c2   : > { %v3383_v41 = vpop.xlane.xlu1 %3382  ;;  %v3461_v53 = vmul.f32 %v15103_v26, %v17440_v48  ;;  %v3281_v26 = vsub.f32 %v17298_v44, %v17452_v13 }
 0x6c3   : > { %15112 = vrcp.f32 %v3383_v41  ;;  %v3332_v41 = vmul.f32 1.442695, %v3282_v2 }
 0x6c4   : > { %12632 = vmatprep.mubr.msk.f32.mxu1 %vm1495_vm3, %v3461_v53  ;;  %15114 = vpow2.f32 %v3352_v55  ;;  %v3330_v55 = vmul.f32 1.442695, %v3281_v26  ;;  %v14567_v26 = vunpack.i.h.bf16 %v17138_v21 }
 0x6c5   : > { %12633 = vmatmul.mubr.msk.f32.gmra.mrb[66].mxu1 %vm1495_vm3, %v3463_v50  ;;  %15116 = vpow2.f32 %v3356_v58  ;;  %v15105_v3 = vpop.eup %15104  ;;  %v3334_v58 = vmul.f32 1.442695, %v3283_v18  ;;  %v14566_v18 = vunpack.i.l.bf16 %v17138_v21 }
 0x6c6   : > { %15118 = vpow2.f32 %v3328_v17  ;;  %v3467_v48 = vmul.f32 %v15105_v3, %v17444_v5 }
 0x6c7   : > { %15120 = vpow2.f32 %v3358_v61  ;;  %v13817_v21 = vpack.c.bf16 %v14567_v26, %v14566_v18  ;;  %v14592_v18 = vunpack.i.h.bf16 %v17064_v10 }
 0x6c8   : > { %15122 = vpow2.f32 %v3330_v55 }
 0x6c9   : > { %v15107_v4 = vpop.eup %15106  ;;  %15124 = vpow2.f32 %v3334_v58 }
 0x6ca   : > { %v15109_v22 = vpop.eup %15108  ;;  %v3465_v40 = vmul.f32 %v15107_v4, %v17448_v24  ;;  %15126 = vpow2.f32 %v3332_v41  ;;  %v14572_v41 = vunpack.i.h.bf16 %v17048_v27 }
 0x6cb   : > { %v17560_v37 = vpop.eup %15110  ;;  %v3469_v57 = vmul.f32 %v15109_v22, %v17450_v1  ;;  %v14557_v22 = vunpack.i.h.bf16 %v17121_v52 }
 0x6cc   : > { %12635 = vmatprep.mubr.msk.f32.mxu1 %vm1495_vm3, %v3465_v40  ;;  %v3447_v24 = vsel %vm1495_vm3, %v17560_v37, 0.0  ;;  %v14556_v40 = vunpack.i.l.bf16 %v17121_v52 }
 0x6cd   : > { %v15113_v34 = vpop.eup %15112  ;;  %12636 = vmatmul.mubr.msk.f32.gmra.mrb[68].mxu1 %vm1495_vm3, %v3467_v48 }
 0x6ce   : > { %12638 = vmatprep.mubr.msk.f32.mxu1 %vm1495_vm3, %v3469_v57  ;;  %v3471_v20 = vmul.f32 %v15113_v34, %v17458_v59  ;;  %v17567_v29 = vpop.eup %15114  ;;  %v13809_v52 = vpack.c.bf16 %v14557_v22, %v14556_v40 }
 0x6cf   : > { %v17571_v62 = vpop.eup %15116  ;;  %3448 = vadd.xlane.f32.xlu0 %v3447_v24  ;;  %v3444_v7 = vsel %vm1495_vm3, %v17567_v29, 0.0  ;;  %v14562_v24 = vunpack.i.h.bf16 %v17131_v33 }
 0x6d0   : > { %v17574_v5 = vpop.eup %15118  ;;  %v3450_v1 = vsel %vm1495_vm3, %v17571_v62, 0.0 }
 0x6d1   : > { %12639 = vmatmul.mubr.msk.f32.gmra.mrb[70].mxu1 %vm1495_vm3, %v3471_v20  ;;  %v17580_v51 = vpop.eup %15120  ;;  %v3408_v59 = vsel %vm1495_vm3, %v17574_v5, 0.0 }
 0x6d2   : > { %v3453_v11 = vsel %vm1495_vm3, %v17580_v51, 0.0  ;;  %v17596_v53 = vpop.eup %15122 }
 0x6d3   : > { %3451 = vadd.xlane.f32.xlu1 %v3450_v1  ;;  %3445 = vadd.xlane.f32.xlu0 %v3444_v7  ;;  %v17598_v50 = vpop.eup %15124  ;;  %v3411_v31 = vsel %vm1495_vm3, %v17596_v53, 0.0  ;;  %v14561_v1 = vunpack.i.l.bf16 %v17131_v33  ;;  %v20903_v7 = vld [vmem:[#allocation34_spill] sm:$0xff] }
 0x6d4   : > { %v3417_v44 = vsel %vm1495_vm3, %v17598_v50, 0.0  ;;  %v17604_v13 = vpop.eup %15126 }
 0x6d5   : > { %v3414_v56 = vsel %vm1495_vm3, %v17604_v13, 0.0 }
 0x6d7   : > { %3409 = vadd.xlane.f32.xlu1 %v3408_v59  ;;  %3454 = vadd.xlane.f32.xlu0 %v3453_v11  ;;  %v13813_v59 = vpack.c.bf16 %v14562_v24, %v14561_v1 }
 0x6e2   : > { %v3389_v17 = vpop.xlane.xlu0 %3388 }
 0x6e3   : > { %15128 = vrcp.f32 %v3389_v17  ;;  %v14571_v17 = vunpack.i.l.bf16 %v17048_v27 }
 0x6e5   : > { %v13821_v27 = vpack.c.bf16 %v14572_v41, %v14571_v17 }
 0x6e8   : > { %5289 = vrot.lane.b32.xlu1 %v20901_v12, %s15678_s15 }
 0x6ed   : > { %5287 = vrot.lane.b32.xlu0 %v20902_v0, %s15678_s15  ;;  %v15129_v3 = vpop.eup %15128 }
 0x6ee   : > { %v3475_v57 = vmul.f32 %v15129_v3, %v17471_v38 }
 0x70c   : > { %3418 = vadd.xlane.f32.xlu1 %v3417_v44  ;;  %3412 = vadd.xlane.f32.xlu0 %v3411_v31  ;;  %v20904_v44 = vld [vmem:[#allocation28_spill] sm:$0xff] }
 0x70f   : > { %v3386_v32 = vpop.xlane.xlu1 %3385 }
 0x710   : > { %15130 = vrcp.f32 %v3386_v32  ;;  %3415 = vadd.xlane.f32.xlu0 %v3414_v56 }
 0x713   : > { %v3395_v39 = vpop.xlane.xlu1 %3394 }
 0x714   : > { %15132 = vrcp.f32 %v3395_v39  ;;  %v20905_v39 = vld [vmem:[#allocation35_spill] sm:$0xff] }
 0x717   : > { %v3392_v61 = vpop.xlane.xlu1 %3391 }
 0x718   : > { %15134 = vrcp.f32 %v3392_v61  ;;  %v3286_v61 = vsub.f32 %v17320_v28, %v17479_v14  ;;  %v14577_v28 = vunpack.i.h.bf16 %v17145_v30  ;;  %v14576_v14 = vunpack.i.l.bf16 %v17145_v30 }
 0x719   : > { %v3285_v30 = vsub.f32 %v17314_v35, %v17464_v15 }
 0x71a   : > { %v15131_v4 = vpop.eup %15130  ;;  %v13827_v1 = vpack.c.bf16 %v14577_v28, %v14576_v14 }
 0x71b   : > { %v3473_v48 = vmul.f32 %v15131_v4, %v17490_v49  ;;  %v3398_v34 = vpop.xlane.xlu1 %3397  ;;  %v3401_v20 = vpop.xlane.xlu0 %3400  ;;  %v3340_v4 = vmul.f32 1.442695, %v3286_v61  ;;  %v3338_v35 = vmul.f32 1.442695, %v3285_v30  ;;  %v20912_v61 = vld [vmem:[#allocation20_spill] sm:$0xff] }
 0x71c   : > { %15136 = vrcp.f32 %v3398_v34  ;;  %v3284_v34 = vsub.f32 %v17318_v47, %v17466_v43  ;;  %v20918_v30 = vld [vmem:[#allocation64_spill] sm:$0xff] }
 0x71d   : > { %12657 = vmatprep.mubr.msk.f32.mxu0 %vm1495_vm3, %v3473_v48  ;;  %15138 = vrcp.f32 %v3401_v20  ;;  %5295 = vrot.lane.b32.xlu1 %v20903_v7, %s15678_s15 }
 0x71e   : > { %12658 = vmatmul.mubr.msk.f32.vlgmr.msra.gmra.mrb[64].mxu0 %vm1495_vm3, %v3475_v57  ;;  %v15133_v38 = vpop.eup %15132 }
 0x71f   : > { %13808 = vmatpush3.bf16.msra.mxu0 %v17124_v25  ;;  %v3407_v49 = vpop.xlane.xlu1 %3406  ;;  %v3479_v2 = vmul.f32 %v15133_v38, %v17496_v8 }
 0x720   : > { %13810 = vmatprep.subr.bf16.mxu0 %v13809_v52  ;;  %15140 = vrcp.f32 %v3407_v49 }
 0x722   : > { %v15135_v11 = vpop.eup %15134 }
 0x723   : > { %13812 = vmatpush3.bf16.msra.mxu0 %v13809_v52  ;;  %v3404_v33 = vpop.xlane.xlu1 %3403  ;;  %v3437_v55 = vpop.xlane.xlu0 %3436  ;;  %v3477_v58 = vmul.f32 %v15135_v11, %v17502_v6  ;;  %v3336_v52 = vmul.f32 1.442695, %v3284_v34 }
 0x724   : > { %13814 = vmatprep.subr.bf16.mxu0 %v13813_v59  ;;  %15142 = vrcp.f32 %v3404_v33  ;;  %v14591_v33 = vunpack.i.l.bf16 %v17064_v10  ;;  %v20908_v10 = vld [vmem:[#allocation5_spill] sm:$0xff] }
 0x725   : > { %12660 = vmatprep.mubr.msk.f32.mxu0 %vm1495_vm3, %v3477_v58  ;;  %15144 = vrcp.f32 %v3437_v55  ;;  %v20906_v58 = vld [vmem:[#allocation47_spill] sm:$0xff] }
 0x726   : > { %v15137_v25 = vpop.eup %15136  ;;  %5291 = vrot.lane.b32.xlu0 %v20904_v44, %s15678_s15  ;;  %12661 = vmatmul.mubr.msk.f32.gmra.mrb[66].mxu0 %vm1495_vm3, %v3479_v2  ;;  %v13845_v55 = vpack.c.bf16 %v14592_v18, %v14591_v33  ;;  %v20907_v2 = vld [vmem:[#allocation49_spill] sm:$0xff]  ;;  %v20926_v33 = vld [vmem:[#allocation80_spill] sm:$0xff] }
 0x727   : > { %v15139_v31 = vpop.eup %15138  ;;  %13816 = vmatpush3.bf16.msra.mxu0 %v13813_v59  ;;  %v3434_v6 = vpop.xlane.xlu1 %3433  ;;  %v3481_v32 = vmul.f32 %v15137_v25, %v17508_v63 }
 0x728   : > { %15146 = vrcp.f32 %v3434_v6  ;;  %13818 = vmatprep.subr.bf16.mxu0 %v13817_v21  ;;  %v3443_v8 = vpop.xlane.xlu0 %3442  ;;  %v3483_v56 = vmul.f32 %v15139_v31, %v17510_v36 }
 0x729   : > { %12663 = vmatprep.mubr.msk.f32.mxu0 %vm1495_vm3, %v3481_v32  ;;  %15148 = vrcp.f32 %v3443_v8  ;;  %v20910_v32 = vld [vmem:[#allocation14_spill] sm:$0xff]  ;;  %v20911_v8 = vld [vmem:[#allocation40_spill] sm:$0xff] }
 0x72a   : > { %5293 = vrot.lane.b32.xlu0 %v20905_v39, %s15678_s15  ;;  %12664 = vmatmul.mubr.msk.f32.gmra.mrb[68].mxu0 %vm1495_vm3, %v3483_v56  ;;  %v15141_v63 = vpop.eup %15140 }
 0x72b   : > { %13820 = vmatpush3.bf16.msra.mxu0 %v13817_v21  ;;  %v3440_v3 = vpop.xlane.xlu1 %3439  ;;  %v3487_v40 = vmul.f32 %v15141_v63, %v17516_v23  ;;  %v20909_v21 = vld [vmem:[#allocation11_spill] sm:$0xff]  ;;  %v20913_v63 = vld [vmem:[#allocation32_spill] sm:$0xff] }
 0x72c   : > { %15150 = vrcp.f32 %v3440_v3  ;;  %13823 = vmatprep.subr.msk.bf16.mxu0 %vm16127_vm2, %v13821_v27  ;;  %v17695_v25 = vpop.permute.xlu0 %5285 }
 0x72d   : > { %15152 = vpow2.f32 %v3340_v4 }
 0x72e   : > { %v15143_v36 = vpop.eup %15142  ;;  %15154 = vpow2.f32 %v3336_v52  ;;  %v20920_v52 = vld [vmem:[#allocation56_spill] sm:$0xff] }
 0x72f   : > { %v3485_v22 = vmul.f32 %v15143_v36, %v17520_v54  ;;  %v15145_v48 = vpop.eup %15144  ;;  %15156 = vpow2.f32 %v3338_v35  ;;  %v17699_v41 = vpop.permute.xlu1 %5283 }
 0x730   : > { %v3507_v54 = vmul.f32 %v15145_v48, %v17522_v60  ;;  %v14582_v60 = vunpack.i.h.bf16 %v17060_v45 }
 0x731   : > { %12666 = vmatprep.mubr.msk.f32.mxu0 %vm1495_vm3, %v3485_v22  ;;  %v20914_v22 = vld [vmem:[#allocation118_spill] sm:$0xff] }
 0x732   : > { %v15147_v57 = vpop.eup %15146  ;;  %12667 = vmatmul.mubr.msk.f32.gmra.mrb[70].mxu0 %vm1495_vm3, %v3487_v40  ;;  %v20915_v40 = vld [vmem:[#allocation114_spill] sm:$0xff] }
 0x733   : > { %v3505_v20 = vmul.f32 %v15147_v57, %v17528_v42  ;;  %v15149_v24 = vpop.eup %15148  ;;  %v14581_v42 = vunpack.i.l.bf16 %v17060_v45  ;;  %v14587_v45 = vunpack.i.h.bf16 %v17150_v19  ;;  %v3287_v48 = vsub.f32 %v20915_v40, %v20914_v22 }
 0x734   : > { %v3511_v43 = vmul.f32 %v15149_v24, %v17530_v46 }
 0x735   : > { %12713 = vmatprep.mubr.msk.f32.mxu0 %vm1495_vm3, %v3505_v20  ;;  %v13833_v49 = vpack.c.bf16 %v14582_v60, %v14581_v42  ;;  %v20921_v60 = vld [vmem:[#allocation68_spill] sm:$0xff]  ;;  %v20922_v42 = vld [vmem:[#allocation78_spill] sm:$0xff] }
 0x736   : > { %v15151_v23 = vpop.eup %15150  ;;  %12714 = vmatmul.mubr.msk.f32.vlgmr.msra.gmra.mrb[72].mxu0 %vm1495_vm3, %v3507_v54  ;;  %v3342_v54 = vmul.f32 1.442695, %v3287_v48 }
 0x737   : > { %13826 = vmatpush3.bf16.xpose.msk.msra.mxu0 %vm16127_vm2, %v13821_v27  ;;  %v3509_v47 = vmul.f32 %v15151_v23, %v17536_v16  ;;  %v17663_v15 = vpop.eup %15152  ;;  %v14586_v16 = vunpack.i.l.bf16 %v17150_v19 }
 0x738   : > { %13829 = vmatprep.subr.msk.bf16.mxu0 %vm16127_vm2, %v13827_v1  ;;  %v3426_v46 = vsel %vm1495_vm3, %v17663_v15, 0.0  ;;  %v17673_v38 = vpop.eup %15154 }
 0x739   : > { %12716 = vmatprep.mubr.msk.f32.mxu0 %vm1495_vm3, %v3509_v47  ;;  %v13839_v59 = vpack.c.bf16 %v14587_v45, %v14586_v16  ;;  %v3420_v11 = vsel %vm1495_vm3, %v17673_v38, 0.0  ;;  %v17681_v26 = vpop.eup %15156  ;;  %v14602_v47 = vunpack.i.h.bf16 %v20920_v52  ;;  %v20924_v45 = vld [vmem:[#allocation58_spill] sm:$0xff] }
 0x73a   : > { %12717 = vmatmul.mubr.msk.f32.gmra.mrb[74].mxu0 %vm1495_vm3, %v3511_v43  ;;  %v3423_v19 = vsel %vm1495_vm3, %v17681_v26, 0.0  ;;  %v14601_v43 = vunpack.i.l.bf16 %v20920_v52  ;;  %v20939_v52 = vld [vmem:[#allocation77_spill] sm:$0xff] }
 0x73f   : > { %13832 = vmatpush3.bf16.xpose.msk.msra.mxu0 %vm16127_vm2, %v13827_v1 }
 0x740   : > { %13835 = vmatprep.subr.msk.bf16.mxu0 %vm16127_vm2, %v13833_v49 }
 0x741   : > { %3427 = vadd.xlane.f32.xlu1 %v3426_v46  ;;  %v20923_v46 = vld [vmem:[#allocation57_spill] sm:$0xff] }
 0x747   : > { %13838 = vmatpush3.bf16.xpose.msk.msra.mxu0 %vm16127_vm2, %v13833_v49  ;;  %v13857_v49 = vpack.c.bf16 %v14602_v47, %v14601_v43  ;;  %v20940_v43 = vld [vmem:[#allocation87_spill] sm:$0xff] }
 0x748   : > { %13841 = vmatprep.subr.msk.bf16.mxu0 %vm16127_vm2, %v13839_v59 }
 0x749   : > { %3421 = vadd.xlane.f32.xlu0 %v3420_v11 }
 0x74d   : > { %3424 = vadd.xlane.f32.xlu0 %v3423_v19  ;;  %v20927_v19 = vld [vmem:[#allocation67_spill] sm:$0xff] }
 0x74f   : > { %13844 = vmatpush3.bf16.xpose.msk.msra.mxu0 %vm16127_vm2, %v13839_v59  ;;  %v20925_v59 = vld [vmem:[#allocation63_spill] sm:$0xff] }
 0x750   : > { %13847 = vmatprep.subr.msk.bf16.mxu0 %vm16127_vm2, %v13845_v55  ;;  %v14607_v11 = vunpack.i.h.bf16 %v20925_v59  ;;  %v14606_v18 = vunpack.i.l.bf16 %v20925_v59 }
 0x752   : > { %14674 = vrot.lane.b32.xlu1 %v20906_v58, %s15676_s30 }
 0x756   : > { %14684 = vrot.lane.b32.xlu1 %v20907_v2, %s15676_s30 }
 0x75a   : > { %14689 = vrot.lane.b32.xlu1 %v20908_v10, %s15679_s17 }
 0x75c   : > { %v3449_v17 = vpop.xlane.xlu0 %3448 }
 0x75d   : > { %15158 = vrcp.f32 %v3449_v17  ;;  %v20928_v17 = vld [vmem:[#allocation66_spill] sm:$0xff] }
 0x75e   : > { %14699 = vrot.lane.b32.xlu1 %v20909_v21, %s15679_s17 }
 0x760   : > { %v3452_v31 = vpop.xlane.xlu1 %3451  ;;  %v3446_v6 = vpop.xlane.xlu0 %3445 }
 0x761   : > { %15160 = vrcp.f32 %v3452_v31  ;;  %v14612_v31 = vunpack.i.h.bf16 %v20928_v17 }
 0x762   : > { %15162 = vrcp.f32 %v3446_v6  ;;  %14704 = vrot.lane.b32.xlu1 %v20910_v32, %s15679_s17  ;;  %v14611_v6 = vunpack.i.l.bf16 %v20928_v17  ;;  %v20946_v17 = vld [vmem:[#allocation85_spill] sm:$0xff] }
 0x763   : > { %14669 = vrot.lane.b32.xlu0 %v20911_v8, %s15676_s30 }
 0x764   : > { %v3410_v56 = vpop.xlane.xlu1 %3409  ;;  %v3455_v27 = vpop.xlane.xlu0 %3454 }
 0x765   : > { %15164 = vrcp.f32 %v3410_v56 }
 0x766   : > { %15166 = vrcp.f32 %v3455_v27  ;;  %14714 = vrot.lane.b32.xlu1 %v20912_v61, %s15679_s17  ;;  %v13869_v27 = vpack.c.bf16 %v14612_v31, %v14611_v6  ;;  %v14637_v31 = vunpack.i.h.bf16 %v20946_v17  ;;  %v14636_v6 = vunpack.i.l.bf16 %v20946_v17 }
 0x767   : > { %v15159_v3 = vpop.eup %15158  ;;  %15168 = vpow2.f32 %v3342_v54 }
 0x768   : > { %v3515_v28 = vmul.f32 %v15159_v3, %v17560_v37  ;;  %v20916_v37 = vld [vmem:[#allocation73_spill] sm:$0xff] }
 0x769   : > { %v14597_v23 = vunpack.i.h.bf16 %v20916_v37  ;;  %v14596_v1 = vunpack.i.l.bf16 %v20916_v37  ;;  %v20935_v37 = vld [vmem:[#allocation8_spill] sm:$0xff] }
 0x76a   : > { %14724 = vrot.lane.b32.xlu1 %v20913_v63, %s15679_s17 }
 0x76b   : > { %v15161_v36 = vpop.eup %15160 }
 0x76c   : > { %v15163_v4 = vpop.eup %15162  ;;  %v3517_v34 = vmul.f32 %v15161_v36, %v17571_v62  ;;  %v20917_v62 = vld [vmem:[#allocation55_spill] sm:$0xff]  ;;  %v20929_v36 = vld [vmem:[#allocation70_spill] sm:$0xff] }
 0x76d   : > { %v3513_v57 = vmul.f32 %v15163_v4, %v17567_v29  ;;  %v14617_v4 = vunpack.i.h.bf16 %v20929_v36  ;;  %v14616_v22 = vunpack.i.l.bf16 %v20929_v36  ;;  %v20947_v36 = vld [vmem:[#allocation81_spill] sm:$0xff] }
 0x76e   : > { %14734 = vrot.lane.b32.xlu1 %v20906_v58, %s15679_s17 }
 0x76f   : > { %v15165_v14 = vpop.eup %15164  ;;  %12719 = vmatprep.mubr.msk.f32.mxu0 %vm1495_vm3, %v3513_v57  ;;  %v13875_v48 = vpack.c.bf16 %v14617_v4, %v14616_v22  ;;  %v20930_v57 = vld [vmem:[#allocation74_spill] sm:$0xff]  ;;  %v20949_v22 = vld [vmem:[#allocation89_spill] sm:$0xff] }
 0x770   : > { %v15167_v20 = vpop.eup %15166  ;;  %12720 = vmatmul.mubr.msk.f32.gmra.mrb[76].mxu0 %vm1495_vm3, %v3515_v28  ;;  %v3489_v24 = vmul.f32 %v15165_v14, %v17574_v5  ;;  %v13851_v5 = vpack.c.bf16 %v14597_v23, %v14596_v1  ;;  %v20931_v28 = vld [vmem:[#allocation48_spill] sm:$0xff]  ;;  %v20936_v23 = vld [vmem:[#allocation75_spill] sm:$0xff]  ;;  %v20948_v4 = vld [vmem:[#allocation98_spill] sm:$0xff] }
 0x771   : > { %12722 = vmatprep.mubr.msk.f32.mxu0 %vm1495_vm3, %v3517_v34  ;;  %v3519_v29 = vmul.f32 %v15167_v20, %v17580_v51  ;;  %v20919_v51 = vld [vmem:[#allocation76_spill] sm:$0xff]  ;;  %v17745_v35 = vpop.eup %15168  ;;  %v20932_v34 = vld [vmem:[#allocation83_spill] sm:$0xff] }
 0x772   : > { %14744 = vrot.lane.b32.xlu1 %v20907_v2, %s15679_s17  ;;  %12685 = vmatprep.mubr.msk.f32.mxu1 %vm1495_vm3, %v3489_v24  ;;  %v3429_v16 = vsel %vm1495_vm3, %v17745_v35, 0.0  ;;  %v20933_v20 = vld [vmem:[#allocation71_spill] sm:$0xff] }
 0x773   : > { %v14622_v54 = vunpack.i.h.bf16 %v20933_v20  ;;  %v14621_v24 = vunpack.i.l.bf16 %v20933_v20  ;;  %v20950_v20 = vld [vmem:[#allocation94_spill] sm:$0xff] }
 0x774   : > { %12723 = vmatmul.mubr.msk.f32.gmra.mrb[78].mxu0 %vm1495_vm3, %v3519_v29  ;;  %v20934_v29 = vld [vmem:[#allocation72_spill] sm:$0xff] }
 0x775   : > { %12841 = vmatprep.mubr.msk.f32.mxu0 %vm842_vm1, %v20917_v62  ;;  %v13881_v62 = vpack.c.bf16 %v14622_v54, %v14621_v24  ;;  %v20951_v54 = vld [vmem:[#allocation99_spill] sm:$0xff] }
 0x778   : > { %12842 = vmatmul.mubr.msk.f32.vlgmr.msra.gmra.mrb[80].mxu0 %vm842_vm1, %v20918_v30  ;;  %v20938_v30 = vld [vmem:[#allocation17_spill] sm:$0xff] }
 0x779   : > { %13850 = vmatpush3.bf16.xpose.msk.msra.mxu0 %vm16127_vm2, %v13845_v55  ;;  %12844 = vmatprep.mubr.msk.f32.mxu0 %vm842_vm1, %v20919_v51  ;;  %v13863_v55 = vpack.c.bf16 %v14607_v11, %v14606_v18  ;;  %v20944_v11 = vld [vmem:[#allocation79_spill] sm:$0xff] }
 0x77a   : > { %13853 = vmatprep.subr.msk.bf16.mxu0 %vm16127_vm2, %v13851_v5  ;;  %v14632_v18 = vunpack.i.h.bf16 %v20944_v11 }
 0x77c   : > { %12845 = vmatmul.mubr.msk.f32.gmra.mrb[82].mxu0 %vm842_vm1, %v20921_v60  ;;  %v14627_v60 = vunpack.i.h.bf16 %v20940_v43 }
 0x77d   : > { %12847 = vmatprep.mubr.msk.f32.mxu0 %vm842_vm1, %v20922_v42  ;;  %v14626_v42 = vunpack.i.l.bf16 %v20940_v43 }
 0x77f   : > { %v13887_v59 = vpack.c.bf16 %v14627_v60, %v14626_v42  ;;  %v20955_v60 = vld [vmem:[#allocation120_spill] sm:$0xff]  ;;  %v20956_v42 = vld [vmem:[#allocation119_spill] sm:$0xff] }
 0x780   : > { %12848 = vmatmul.mubr.msk.f32.gmra.mrb[84].mxu0 %vm842_vm1, %v20923_v46  ;;  %v20942_v46 = vld [vmem:[#allocation25_spill] sm:$0xff] }
 0x781   : > { %13856 = vmatpush3.bf16.xpose.msk.msra.mxu0 %vm16127_vm2, %v13851_v5  ;;  %12850 = vmatprep.mubr.msk.f32.mxu0 %vm842_vm1, %v20924_v45  ;;  %v20937_v5 = vld [vmem:[#allocation90_spill] sm:$0xff] }
 0x782   : > { %13859 = vmatprep.subr.msk.bf16.mxu0 %vm16127_vm2, %v13857_v49  ;;  %3430 = vadd.xlane.f32.xlu0 %v3429_v16  ;;  %v20943_v16 = vld [vmem:[#allocation95_spill] sm:$0xff] }
 0x784   : > { %12851 = vmatmul.mubr.msk.f32.gmra.mrb[86].mxu0 %vm842_vm1, %v20926_v33  ;;  %v14631_v33 = vunpack.i.l.bf16 %v20944_v11 }
 0x785   : > { %12869 = vmatprep.mubr.msk.f32.mxu0 %vm842_vm1, %v20927_v19 }
 0x786   : > { %v13893_v19 = vpack.c.bf16 %v14632_v18, %v14631_v33 }
 0x789   : > { %13862 = vmatpush3.bf16.xpose.msk.msra.mxu0 %vm16127_vm2, %v13857_v49  ;;  %v20941_v49 = vld [vmem:[#allocation91_spill] sm:$0xff] }
 0x78a   : > { %13865 = vmatprep.subr.msk.bf16.mxu0 %vm16127_vm2, %v13863_v55 }
 0x790   : > { %v17769_v56 = vpop.f32.mrb[64].mxu1 }
 0x791   : > { %v17771_v3 = vpop.f32.mrb[65].mxu1  ;;  %13868 = vmatpush3.bf16.xpose.msk.msra.mxu0 %vm16127_vm2, %v13863_v55  ;;  %v20945_v55 = vld [vmem:[#allocation33_spill] sm:$0xff] }
 0x792   : > { %13871 = vmatprep.subr.msk.bf16.mxu0 %vm16127_vm2, %v13869_v27 }
 0x798   : > { %v17779_v40 = vpop.f32.mrb[66].mxu1  ;;  %12870 = vmatmul.mubr.msk.f32.vlgmr.msra.gmra.mrb[88].mxu0 %vm842_vm1, %v20930_v57  ;;  %14679 = vrot.lane.b32.xlu0 %v20931_v28, %s15676_s30  ;;  %v14646_v57 = vunpack.i.l.bf16 %v20949_v22  ;;  %s20361_s30 = scalar_lea.vmem %s20536_s13, %s11463_s19 }
 0x799   : > { %v17785_v14 = vpop.f32.mrb[67].mxu1  ;;  %12872 = vmatprep.mubr.msk.f32.mxu0 %vm842_vm1, %v20932_v34  ;;  %13874 = vmatpush3.bf16.xpose.msk.msra.mxu0 %vm16127_vm2, %v13869_v27  ;;  %v13899_v27 = vpack.c.bf16 %v14637_v31, %v14636_v6  ;;  %v5288_v34 = vpop.permute.xlu0 %5287 }
 0x79a   : > { %13877 = vmatprep.subr.msk.bf16.mxu0 %vm16127_vm2, %v13875_v48 }
 0x79c   : > { %12873 = vmatmul.mubr.msk.f32.gmra.mrb[90].mxu0 %vm842_vm1, %v20934_v29  ;;  %14694 = vrot.lane.b32.xlu0 %v20935_v37, %s15679_s17 }
 0x79d   : > { %12875 = vmatprep.mubr.msk.f32.mxu0 %vm842_vm1, %v20936_v23  ;;  %v3413_v29 = vpop.xlane.xlu0 %3412  ;;  %v20952_v23 = vld [vmem:[#allocation116_spill] sm:$0xff] }
 0x79e   : > { %15170 = vrcp.f32 %v3413_v29 }
 0x7a0   : > { %v17801_v1 = vpop.f32.mrb[68].mxu1  ;;  %12876 = vmatmul.mubr.msk.f32.gmra.mrb[92].mxu0 %vm842_vm1, %v20937_v5  ;;  %14709 = vrot.lane.b32.xlu0 %v20938_v30, %s15679_s17  ;;  %v20954_v5 = vld [vmem:[#allocation115_spill] sm:$0xff] }
 0x7a1   : > { %v17807_v51 = vpop.f32.mrb[69].mxu1  ;;  %12878 = vmatprep.mubr.msk.f32.mxu0 %vm842_vm1, %v20939_v52  ;;  %13880 = vmatpush3.bf16.xpose.msk.msra.mxu0 %vm16127_vm2, %v13875_v48  ;;  %v14647_v48 = vunpack.i.h.bf16 %v20949_v22  ;;  %v14662_v52 = vunpack.i.h.bf16 %v20954_v5  ;;  %v14661_v43 = vunpack.i.l.bf16 %v20954_v5 }
 0x7a2   : > { %13883 = vmatprep.subr.msk.bf16.mxu0 %vm16127_vm2, %v13881_v62 }
 0x7a3   : > { %v13905_v24 = vpack.c.bf16 %v14647_v48, %v14646_v57 }
 0x7a4   : > { %v17815_v47 = vpop.f32.mrb[70].mxu1  ;;  %12879 = vmatmul.mubr.msk.f32.gmra.mrb[94].mxu0 %vm842_vm1, %v20941_v49  ;;  %14719 = vrot.lane.b32.xlu0 %v20942_v46, %s15679_s17  ;;  %v3416_v49 = vpop.xlane.xlu0 %3415 }
 0x7a5   : > { %v17823_v45 = vpop.f32.mrb[71].mxu1  ;;  %12897 = vmatprep.mubr.msk.f32.mxu0 %vm842_vm1, %v20943_v16  ;;  %v13911_v16 = vpack.c.bf16 %v14662_v52, %v14661_v43  ;;  %15172 = vrcp.f32 %v3416_v49 }
 0x7a8   : > { %14729 = vrot.lane.b32.xlu0 %v20911_v8, %s15679_s17  ;;  %v5292_v18 = vpop.permute.xlu0 %5291  ;;  %v15171_v29 = vpop.eup %15170 }
 0x7a9   : > { %13886 = vmatpush3.bf16.xpose.msk.msra.mxu0 %vm16127_vm2, %v13881_v62  ;;  %v20953_v62 = vld [vmem:[#allocation117_spill] sm:$0xff] }
 0x7aa   : > { %13889 = vmatprep.subr.msk.bf16.mxu0 %vm16127_vm2, %v13887_v59 }
 0x7ac   : > { %14739 = vrot.lane.b32.xlu0 %v20931_v28, %s15679_s17 }
 0x7af   : > { %v15173_v44 = vpop.eup %15172 }
 0x7b0   : > { %14749 = vrot.lane.b32.xlu0 %v20945_v55, %s15679_s17 }
 0x7b1   : > { %13892 = vmatpush3.bf16.xpose.msk.msra.mxu0 %vm16127_vm2, %v13887_v59  ;;  %v5290_v59 = vpop.permute.xlu1 %5289 }
 0x7b2   : > { %13895 = vmatprep.subr.msk.bf16.mxu0 %vm16127_vm2, %v13893_v19 }
 0x7b5   : > { %v3419_v11 = vpop.xlane.xlu1 %3418 }
 0x7b6   : > { %15174 = vrcp.f32 %v3419_v11 }
 0x7b8   : > { %12898 = vmatmul.mubr.msk.f32.vlgmr.msra.gmra.mrb[96].mxu0 %vm842_vm1, %v20947_v36 }
 0x7b9   : > { %12900 = vmatprep.mubr.msk.f32.mxu0 %vm842_vm1, %v20948_v4  ;;  %13898 = vmatpush3.bf16.xpose.msk.msra.mxu0 %vm16127_vm2, %v13893_v19  ;;  %v5296_v33 = vpop.permute.xlu1 %5295  ;;  %v5294_v19 = vpop.permute.xlu0 %5293 }
 0x7ba   : > { %13901 = vmatprep.subr.msk.bf16.mxu0 %vm16127_vm2, %v13899_v27 }
 0x7bc   : > { %12901 = vmatmul.mubr.msk.f32.gmra.mrb[98].mxu0 %vm842_vm1, %v20950_v20 }
 0x7bd   : > { %12903 = vmatprep.mubr.msk.f32.mxu0 %vm842_vm1, %v20951_v54 }
 0x7c0   : > { %12904 = vmatmul.mubr.msk.f32.gmra.mrb[100].mxu0 %vm842_vm1, %v20952_v23 }
 0x7c1   : > { %12906 = vmatprep.mubr.msk.f32.mxu0 %vm842_vm1, %v20953_v62  ;;  %13904 = vmatpush3.bf16.xpose.msk.msra.mxu0 %vm16127_vm2, %v13899_v27 }
 0x7c2   : > { %13907 = vmatprep.subr.msk.bf16.mxu0 %vm16127_vm2, %v13905_v24 }
 0x7c4   : > { %12907 = vmatmul.mubr.msk.f32.gmra.mrb[102].mxu0 %vm842_vm1, %v20955_v60 }
 0x7c5   : > { %12925 = vmatprep.mubr.msk.f32.mxu0 %vm842_vm1, %v20956_v42 }
 0x7c9   : > { %13910 = vmatpush3.bf16.xpose.msk.msra.mxu0 %vm16127_vm2, %v13905_v24 }
 0x7ca   : > { %13913 = vmatprep.subr.msk.bf16.mxu0 %vm16127_vm2, %v13911_v16 }
 0x7ce   : > { %v3428_v17 = vpop.xlane.xlu1 %3427 }
 0x7d1   : > { %13916 = vmatpush3.bf16.xpose.msk.msra.mxu0 %vm16127_vm2, %v13911_v16 }
 0x7d2   : > { %v14675_v27 = vpop.permute.xlu1 %14674 }
 0x7d3   : > { %v14677_v4 = vunpack.i.h.bf16 %v14675_v27  ;;  %v14676_v22 = vunpack.i.l.bf16 %v14675_v27 }
 0x7d6   : > { %v3422_v31 = vpop.xlane.xlu0 %3421  ;;  %v14685_v5 = vpop.permute.xlu1 %14684 }
 0x7d7   : > { %15176 = vrcp.f32 %v3422_v31 }
 0x7d8   : > { %12926 = vmatmul.mubr.msk.f32.vlgmr.msra.gmra.mrb[104].mxu0 %vm842_vm1, %v17699_v41  ;;  %v13793_v41 = vpack.c.bf16 %v14677_v4, %v14676_v22  ;;  %v14687_v4 = vunpack.i.h.bf16 %v14685_v5  ;;  %v14686_v22 = vunpack.i.l.bf16 %v14685_v5  ;;  %v815_v5 = vld [vmem:[%s20526_s3 + $0x8] sm:$0xff] }
 0x7d9   : > { %12928 = vmatprep.mubr.msk.f32.mxu0 %vm842_vm1, %v17695_v25 }
 0x7da   : > { %v3425_v6 = vpop.xlane.xlu0 %3424  ;;  %v17904_v60 = vpop.permute.xlu1 %14689  ;;  %v13801_v9 = vpack.c.bf16 %v14687_v4, %v14686_v22  ;;  %v3491_v4 = vmul.f32 %v15171_v29, %v17596_v53 }
 0x7db   : > { %15178 = vrcp.f32 %v3425_v6  ;;  %v15175_v22 = vpop.eup %15174 }
 0x7dc   : > { %12929 = vmatmul.mubr.msk.f32.gmra.mrb[106].mxu0 %vm842_vm1, %v5288_v34  ;;  %15180 = vrcp.f32 %v3428_v17  ;;  %v3495_v53 = vmul.f32 %v15175_v22, %v17598_v50 }
 0x7dd   : > { %12931 = vmatprep.mubr.msk.f32.mxu0 %vm842_vm1, %v5290_v59 }
 0x7de   : > { %v14670_v36 = vpop.permute.xlu0 %14669  ;;  %v17910_v59 = vpop.permute.xlu1 %14699 }
 0x7df   : > { %v14672_v48 = vunpack.i.h.bf16 %v14670_v36  ;;  %v14671_v57 = vunpack.i.l.bf16 %v14670_v36 }
 0x7e0   : > { %12932 = vmatmul.mubr.msk.f32.gmra.mrb[108].mxu0 %vm842_vm1, %v5292_v18 }
 0x7e1   : > { %12934 = vmatprep.mubr.msk.f32.mxu0 %vm842_vm1, %v5294_v19  ;;  %v13789_v20 = vpack.c.bf16 %v14672_v48, %v14671_v57 }
 0x7e2   : > { %v17916_v27 = vpop.permute.xlu1 %14704 }
 0x7e3   : > { %13790 = vmatprep.subr.bf16.mxu1 %v13789_v20 }
 0x7e4   : > { %12935 = vmatmul.mubr.msk.f32.gmra.mrb[110].mxu0 %vm842_vm1, %v5296_v33  ;;  %13792 = vmatpush3.bf16.msra.mxu1 %v13789_v20 }
 0x7e5   : > { %13794 = vmatprep.subr.bf16.mxu1 %v13793_v41 }
 0x7e6   : > { %v14715_v7 = vpop.permute.xlu1 %14714 }
 0x7e7   : > { %v14716_v11 = vunpack.i.l.bf16 %v14715_v7 }
 0x7e8   : > { %13796 = vmatpush3.bf16.msra.mxu1 %v13793_v41 }
 0x7f1   : > { %v17888_v25 = vpop.f32.mrb[64].mxu0 }
 0x7f2   : > { %v17890_v34 = vpop.f32.mrb[65].mxu0 }
 0x7f9   : > { %v17892_v54 = vpop.f32.mrb[66].mxu0 }
 0x7fa   : > { %v17894_v24 = vpop.f32.mrb[67].mxu0 }
 0x7fd   : > { %v17896_v23 = vpop.f32.mrb[68].mxu0 }
 0x7fe   : > { %v17898_v62 = vpop.f32.mrb[69].mxu0 }
 0x805   : > { %v17900_v52 = vpop.f32.mrb[70].mxu0 }
 0x806   : > { %v17902_v43 = vpop.f32.mrb[71].mxu0 }
 0x809   : > { %v17906_v42 = vpop.f32.mrb[72].mxu0 }
 0x80a   : > { %v17908_v16 = vpop.f32.mrb[73].mxu0 }
 0x80d   : > { %v17912_v18 = vpop.f32.mrb[74].mxu0 }
 0x80e   : > { %v17914_v33 = vpop.f32.mrb[75].mxu0 }
 0x80f   : > { %v3431_v19 = vpop.xlane.xlu0 %3430 }
 0x810   : > { %15182 = vrcp.f32 %v3431_v19 }
 0x813   : > { %v14680_v36 = vpop.permute.xlu0 %14679 }
 0x814   : > { %v14682_v48 = vunpack.i.h.bf16 %v14680_v36  ;;  %v14681_v57 = vunpack.i.l.bf16 %v14680_v36  ;;  %v14717_v36 = vunpack.i.h.bf16 %v14715_v7  ;;  %v814_v7 = vld [vmem:[%s20526_s3] sm:$0xff] }
 0x816   : > { %v13797_v20 = vpack.c.bf16 %v14682_v48, %v14681_v57  ;;  %v3493_v57 = vmul.f32 %v15173_v44, %v17604_v13  ;;  %v13937_v12 = vpack.c.bf16 %v14717_v36, %v14716_v11 }
 0x817   : > { %v17918_v41 = vpop.permute.xlu0 %14694 }
 0x818   : > { %13798 = vmatprep.subr.bf16.mxu1 %v13797_v20 }
 0x819   : > { %13800 = vmatpush3.bf16.msra.mxu1 %v13797_v20  ;;  %v15177_v20 = vpop.eup %15176 }
 0x81a   : > { %13802 = vmatprep.subr.bf16.mxu1 %v13801_v9  ;;  %v15179_v13 = vpop.eup %15178  ;;  %v3497_v19 = vmul.f32 %v15177_v20, %v17673_v38 }
 0x81b   : > { %v14710_v49 = vpop.permute.xlu0 %14709  ;;  %v15181_v29 = vpop.eup %15180 }
 0x81c   : > { %v14712_v31 = vunpack.i.h.bf16 %v14710_v49  ;;  %v14711_v48 = vunpack.i.l.bf16 %v14710_v49  ;;  %v15183_v50 = vpop.eup %15182 }
 0x81d   : > { %13804 = vmatpush3.bf16.msra.mxu1 %v13801_v9  ;;  %v14725_v9 = vpop.permute.xlu1 %14724 }
 0x81e   : > { %v13933_v6 = vpack.c.bf16 %v14712_v31, %v14711_v48  ;;  %12725 = vmatprep.subr.mxu1 %v815_v5  ;;  %v14727_v49 = vunpack.i.h.bf16 %v14725_v9  ;;  %v14726_v36 = vunpack.i.l.bf16 %v14725_v9  ;;  %v3499_v31 = vmul.f32 %v15179_v13, %v17681_v26 }
 0x81f   : > { %v14720_v17 = vpop.permute.xlu0 %14719  ;;  %v3501_v48 = vmul.f32 %v15181_v29, %v17663_v15 }
 0x820   : > { %v14722_v0 = vunpack.i.h.bf16 %v14720_v17  ;;  %v14721_v39 = vunpack.i.l.bf16 %v14720_v17  ;;  %12686 = vmatmul.mubr.msk.f32.vlgmr.msra.gmra.mrb[72].mxu1 %vm1495_vm3, %v3491_v4  ;;  %13934 = vmatprep.subr.bf16.mxu0 %v13933_v6  ;;  %v13945_v38 = vpack.c.bf16 %v14727_v49, %v14726_v36  ;;  %v14691_v4 = vunpack.i.l.bf16 %v17904_v60 }
 0x821   : > { %12688 = vmatprep.mubr.msk.f32.mxu1 %vm1495_vm3, %v3493_v57  ;;  %13936 = vmatpush3.bf16.msra.mxu0 %v13933_v6 }
 0x822   : > { %13938 = vmatprep.subr.bf16.mxu0 %v13937_v12  ;;  %12726 = vmatpush3.msra.mxu1 %v815_v5  ;;  %v13941_v11 = vpack.c.bf16 %v14722_v0, %v14721_v39  ;;  %v3503_v0 = vmul.f32 %v15183_v50, %v17745_v35 }
 0x823   : > { %v17931_v44 = vpop.permute.xlu0 %14729  ;;  %12775 = vmatprep.subr.mxu1 %v814_v7 }
 0x824   : > { %12689 = vmatmul.mubr.msk.f32.gmra.mrb[74].mxu1 %vm1495_vm3, %v3495_v53 }
 0x825   : > { %12691 = vmatprep.mubr.msk.f32.mxu1 %vm1495_vm3, %v3497_v19  ;;  %13940 = vmatpush3.bf16.msra.mxu0 %v13937_v12  ;;  %v14692_v12 = vunpack.i.h.bf16 %v17904_v60 }
 0x826   : > { %13942 = vmatprep.subr.bf16.mxu0 %v13941_v11 }
 0x827   : > { %v17937_v5 = vpop.permute.xlu0 %14739  ;;  %v17953_v35 = vpack.c.bf16 %v14692_v12, %v14691_v4 }
 0x828   : > { %20957 = vst [vmem:[#allocation5_spill] sm:$0xff] %v17937_v5  ;;  %12692 = vmatmul.mubr.msk.f32.gmra.mrb[76].mxu1 %vm1495_vm3, %v3499_v31 }
 0x829   : > { %12694 = vmatprep.mubr.msk.f32.mxu1 %vm1495_vm3, %v3501_v48  ;;  %13944 = vmatpush3.bf16.msra.mxu0 %v13941_v11 }
 0x82a   : > { %13946 = vmatprep.subr.bf16.mxu0 %v13945_v38 }
 0x82b   : > { %v14750_v39 = vpop.permute.xlu0 %14749 }
 0x82c   : > { %v14752_v26 = vunpack.i.h.bf16 %v14750_v39  ;;  %v14751_v6 = vunpack.i.l.bf16 %v14750_v39  ;;  %12695 = vmatmul.mubr.msk.f32.gmra.mrb[78].mxu1 %vm1495_vm3, %v3503_v0 }
 0x82d   : > { %12727 = vmatprep.mubr.msk.f32.mxu1 %vm842_vm1, %v17771_v3  ;;  %13948 = vmatpush3.bf16.msra.mxu0 %v13945_v38 }
 0x82e   : > { %v17948_v15 = vpack.c.bf16 %v14752_v26, %v14751_v6 }
 0x830   : > { %20958 = vst [vmem:[#allocation11_spill] sm:$0xff] %v17948_v15  ;;  %12728 = vmatmul.mubr.msk.f32.vlgmr.msra.gmra.mrb[80].mxu1 %vm842_vm1, %v17769_v56  ;;  %13966 = vmatprep.subr.bf16.mxu0 %v17948_v15 }
 0x831   : > { %12776 = vmatpush3.msra.mxu1 %v814_v7  ;;  %12730 = vmatprep.mubr.msk.f32.mxu1 %vm842_vm1, %v17785_v14 }
 0x832   : > { %13918 = vmatprep.subr.bf16.mxu1 %v17953_v35 }
 0x834   : > { %12731 = vmatmul.mubr.msk.f32.gmra.mrb[82].mxu1 %vm842_vm1, %v17779_v40 }
 0x835   : > { %12733 = vmatprep.mubr.msk.f32.mxu1 %vm842_vm1, %v17807_v51 }
 0x838   : > { %12734 = vmatmul.mubr.msk.f32.gmra.mrb[84].mxu1 %vm842_vm1, %v17801_v1 }
 0x839   : > { %12736 = vmatprep.mubr.msk.f32.mxu1 %vm842_vm1, %v17823_v45 }
 0x83c   : > { %12737 = vmatmul.mubr.msk.f32.gmra.mrb[86].mxu1 %vm842_vm1, %v17815_v47 }
 0x83d   : > { %12739 = vmatprep.mubr.msk.f32.mxu1 %vm842_vm1, %v17890_v34 }
 0x840   : > { %12740 = vmatmul.mubr.msk.f32.gmra.mrb[88].mxu1 %vm842_vm1, %v17888_v25 }
 0x841   : > { %12742 = vmatprep.mubr.msk.f32.mxu1 %vm842_vm1, %v17894_v24 }
 0x843   : > { %v17974_v56 = vpop.f32.mrb[76].mxu0 }
 0x844   : > { %v17976_v3 = vpop.f32.mrb[77].mxu0  ;;  %12743 = vmatmul.mubr.msk.f32.gmra.mrb[90].mxu1 %vm842_vm1, %v17892_v54 }
 0x845   : > { %12745 = vmatprep.mubr.msk.f32.mxu1 %vm842_vm1, %v17898_v62 }
 0x847   : > { %v17982_v40 = vpop.f32.mrb[78].mxu0 }
 0x848   : > { %v17984_v14 = vpop.f32.mrb[79].mxu0  ;;  %12746 = vmatmul.mubr.msk.f32.gmra.mrb[92].mxu1 %vm842_vm1, %v17896_v23 }
 0x849   : > { %12748 = vmatprep.mubr.msk.f32.mxu1 %vm842_vm1, %v17902_v43 }
 0x84b   : > { %v12843_v1 = vpop.f32.mrb[80].mxu0 }
 0x84c   : > { %v17990_v51 = vmul.f32 0.35355338, %v12843_v1  ;;  %v4904_v47 = vpop.f32.mrb[81].mxu0  ;;  %12749 = vmatmul.mubr.msk.f32.gmra.mrb[94].mxu1 %vm842_vm1, %v17900_v52 }
 0x84d   : > { %v17994_v45 = vmul.f32 0.35355338, %v4904_v47 }
 0x84e   : > { %v5485_v25 = vsel %vm1495_vm3, %v17990_v51, -inf }
 0x84f   : > { %5486 = vmax.xlane.f32.xlu0 %v5485_v25  ;;  %v12846_v34 = vpop.f32.mrb[82].mxu0  ;;  %v5482_v54 = vsel %vm1495_vm3, %v17994_v45, -inf }
 0x850   : > { %v18000_v24 = vmul.f32 0.35355338, %v12846_v34  ;;  %5483 = vmax.xlane.f32.xlu1 %v5482_v54  ;;  %v4914_v23 = vpop.f32.mrb[83].mxu0 }
 0x851   : > { %v18004_v43 = vmul.f32 0.35355338, %v4914_v23 }
 0x852   : > { %v5491_v62 = vsel %vm1495_vm3, %v18000_v24, -inf }
 0x853   : > { %v12849_v52 = vpop.f32.mrb[84].mxu0  ;;  %v5488_v7 = vsel %vm1495_vm3, %v18004_v43, -inf }
 0x854   : > { %v18006_v60 = vmul.f32 0.35355338, %v12849_v52  ;;  %5492 = vmax.xlane.f32.xlu1 %v5491_v62  ;;  %v4924_v22 = vpop.f32.mrb[85].mxu0 }
 0x855   : > { %v18010_v57 = vmul.f32 0.35355338, %v4924_v22 }
 0x856   : > { %v5497_v17 = vsel %vm1495_vm3, %v18006_v60, -inf }
 0x857   : > { %5498 = vmax.xlane.f32.xlu0 %v5497_v17  ;;  %v12852_v20 = vpop.f32.mrb[86].mxu0  ;;  %v5494_v29 = vsel %vm1495_vm3, %v18010_v57, -inf }
 0x858   : > { %v18014_v9 = vmul.f32 0.35355338, %v12852_v20  ;;  %5489 = vmax.xlane.f32.xlu1 %v5488_v7  ;;  %v4934_v53 = vpop.f32.mrb[87].mxu0 }
 0x859   : > { %v18018_v19 = vmul.f32 0.35355338, %v4934_v53 }
 0x85a   : > { %v5503_v13 = vsel %vm1495_vm3, %v18014_v9, -inf }
 0x85b   : > { %5504 = vmax.xlane.f32.xlu0 %v5503_v13  ;;  %v5500_v49 = vsel %vm1495_vm3, %v18018_v19, -inf }
 0x85c   : > { %5495 = vmax.xlane.f32.xlu1 %v5494_v29 }
 0x860   : > { %5501 = vmax.xlane.f32.xlu1 %v5500_v49 }
 0x86b   : > { %v12871_v36 = vpop.f32.mrb[88].mxu0 }
 0x86c   : > { %v18024_v11 = vmul.f32 0.35355338, %v12871_v36  ;;  %v5073_v31 = vpop.f32.mrb[89].mxu0 }
 0x86d   : > { %v18026_v50 = vmul.f32 0.35355338, %v5073_v31 }
 0x86e   : > { %v5509_v48 = vsel %vm1495_vm3, %v18024_v11, -inf }
 0x86f   : > { %5510 = vmax.xlane.f32.xlu0 %v5509_v48  ;;  %v12874_v38 = vpop.f32.mrb[90].mxu0  ;;  %v5506_v0 = vsel %vm1495_vm3, %v18026_v50, -inf }
 0x870   : > { %v18032_v39 = vmul.f32 0.35355338, %v12874_v38  ;;  %5507 = vmax.xlane.f32.xlu1 %v5506_v0  ;;  %v5083_v12 = vpop.f32.mrb[91].mxu0 }
 0x871   : > { %v18034_v4 = vmul.f32 0.35355338, %v5083_v12 }
 0x872   : > { %v5515_v26 = vsel %vm1495_vm3, %v18032_v39, -inf }
 0x873   : > { %5516 = vmax.xlane.f32.xlu0 %v5515_v26  ;;  %v12877_v6 = vpop.f32.mrb[92].mxu0  ;;  %v5512_v1 = vsel %vm1495_vm3, %v18034_v4, -inf }
 0x874   : > { %v18040_v47 = vmul.f32 0.35355338, %v12877_v6  ;;  %5513 = vmax.xlane.f32.xlu1 %v5512_v1  ;;  %v5093_v25 = vpop.f32.mrb[93].mxu0 }
 0x875   : > { %v18042_v34 = vmul.f32 0.35355338, %v5093_v25 }
 0x876   : > { %v5521_v54 = vsel %vm1495_vm3, %v18040_v47, -inf }
 0x877   : > { %5522 = vmax.xlane.f32.xlu0 %v5521_v54  ;;  %v12880_v23 = vpop.f32.mrb[94].mxu0  ;;  %v5518_v62 = vsel %vm1495_vm3, %v18042_v34, -inf }
 0x878   : > { %v18048_v52 = vmul.f32 0.35355338, %v12880_v23  ;;  %5519 = vmax.xlane.f32.xlu1 %v5518_v62  ;;  %v5103_v22 = vpop.f32.mrb[95].mxu0 }
 0x879   : > { %v18050_v17 = vmul.f32 0.35355338, %v5103_v22 }
 0x87a   : > { %v5527_v20 = vsel %vm1495_vm3, %v18048_v52, -inf }
 0x87b   : > { %5528 = vmax.xlane.f32.xlu0 %v5527_v20  ;;  %v5524_v7 = vsel %vm1495_vm3, %v18050_v17, -inf }
 0x87c   : > { %5525 = vmax.xlane.f32.xlu1 %v5524_v7 }
 0x88b   : > { %v12899_v53 = vpop.f32.mrb[96].mxu0 }
 0x88c   : > { %v18056_v13 = vmul.f32 0.35355338, %v12899_v53  ;;  %v5242_v29 = vpop.f32.mrb[97].mxu0 }
 0x88d   : > { %v18058_v49 = vmul.f32 0.35355338, %v5242_v29 }
 0x88e   : > { %v5533_v36 = vsel %vm1495_vm3, %v18056_v13, -inf }
 0x88f   : > { %5534 = vmax.xlane.f32.xlu0 %v5533_v36  ;;  %v12902_v31 = vpop.f32.mrb[98].mxu0  ;;  %v5530_v48 = vsel %vm1495_vm3, %v18058_v49, -inf }
 0x890   : > { %v18064_v38 = vmul.f32 0.35355338, %v12902_v31  ;;  %5531 = vmax.xlane.f32.xlu1 %v5530_v48  ;;  %v5252_v0 = vpop.f32.mrb[99].mxu0 }
 0x891   : > { %v18066_v12 = vmul.f32 0.35355338, %v5252_v0 }
 0x892   : > { %v5539_v26 = vsel %vm1495_vm3, %v18064_v38, -inf }
 0x893   : > { %5540 = vmax.xlane.f32.xlu0 %v5539_v26  ;;  %v12905_v6 = vpop.f32.mrb[100].mxu0  ;;  %v5536_v1 = vsel %vm1495_vm3, %v18066_v12, -inf }
 0x894   : > { %v18072_v25 = vmul.f32 0.35355338, %v12905_v6  ;;  %5537 = vmax.xlane.f32.xlu1 %v5536_v1  ;;  %v5262_v54 = vpop.f32.mrb[101].mxu0 }
 0x895   : > { %v18074_v23 = vmul.f32 0.35355338, %v5262_v54 }
 0x896   : > { %v5545_v62 = vsel %vm1495_vm3, %v18072_v25, -inf }
 0x897   : > { %5546 = vmax.xlane.f32.xlu0 %v5545_v62  ;;  %v12908_v22 = vpop.f32.mrb[102].mxu0  ;;  %v5542_v20 = vsel %vm1495_vm3, %v18074_v23, -inf }
 0x898   : > { %v18080_v7 = vmul.f32 0.35355338, %v12908_v22  ;;  %5543 = vmax.xlane.f32.xlu1 %v5542_v20  ;;  %v5272_v53 = vpop.f32.mrb[103].mxu0 }
 0x899   : > { %v18082_v29 = vmul.f32 0.35355338, %v5272_v53 }
 0x89a   : > { %v5551_v36 = vsel %vm1495_vm3, %v18080_v7, -inf }
 0x89b   : > { %5552 = vmax.xlane.f32.xlu0 %v5551_v36  ;;  %v5548_v31 = vsel %vm1495_vm3, %v18082_v29, -inf }
 0x89c   : > { %5549 = vmax.xlane.f32.xlu1 %v5548_v31 }
 0x8ab   : > { %v12927_v48 = vpop.f32.mrb[104].mxu0 }
 0x8ac   : > { %v18088_v0 = vmul.f32 0.35355338, %v12927_v48  ;;  %v5411_v26 = vpop.f32.mrb[105].mxu0 }
 0x8ad   : > { %v18090_v6 = vmul.f32 0.35355338, %v5411_v26 }
 0x8ae   : > { %v5557_v1 = vsel %vm1495_vm3, %v18088_v0, -inf }
 0x8af   : > { %5558 = vmax.xlane.f32.xlu0 %v5557_v1  ;;  %v12930_v54 = vpop.f32.mrb[106].mxu0  ;;  %v5554_v62 = vsel %vm1495_vm3, %v18090_v6, -inf }
 0x8b0   : > { %v18096_v22 = vmul.f32 0.35355338, %v12930_v54  ;;  %5555 = vmax.xlane.f32.xlu1 %v5554_v62  ;;  %v5421_v20 = vpop.f32.mrb[107].mxu0 }
 0x8b1   : > { %v18098_v53 = vmul.f32 0.35355338, %v5421_v20 }
 0x8b2   : > { %v5563_v36 = vsel %vm1495_vm3, %v18096_v22, -inf }
 0x8b3   : > { %5564 = vmax.xlane.f32.xlu0 %v5563_v36  ;;  %v12933_v31 = vpop.f32.mrb[108].mxu0  ;;  %v5560_v48 = vsel %vm1495_vm3, %v18098_v53, -inf }
 0x8b4   : > { %v18104_v26 = vmul.f32 0.35355338, %v12933_v31  ;;  %5561 = vmax.xlane.f32.xlu1 %v5560_v48  ;;  %v5431_v1 = vpop.f32.mrb[109].mxu0 }
 0x8b5   : > { %v18106_v15 = vmul.f32 0.35355338, %v5431_v1  ;;  %v20959_v1 = vld [vmem:[#allocation38_spill] sm:$0xff] }
 0x8b6   : > { %v5569_v54 = vsel %vm1495_vm3, %v18104_v26, -inf }
 0x8b7   : > { %5570 = vmax.xlane.f32.xlu0 %v5569_v54  ;;  %v12936_v62 = vpop.f32.mrb[110].mxu0  ;;  %v5566_v20 = vsel %vm1495_vm3, %v18106_v15, -inf  ;;  %v18122_v54 = vpop.permute.xlu1 %14734 }
 0x8b8   : > { %v18112_v2 = vmul.f32 0.35355338, %v12936_v62  ;;  %5567 = vmax.xlane.f32.xlu1 %v5566_v20  ;;  %v5441_v36 = vpop.f32.mrb[111].mxu0  ;;  %20960 = vst [vmem:[#allocation14_spill] sm:$0xff] %v18122_v54 }
 0x8b9   : > { %v18114_v55 = vmul.f32 0.35355338, %v5441_v36 }
 0x8ba   : > { %v5575_v31 = vsel %vm1495_vm3, %v18112_v2, -inf }
 0x8bb   : > { %5576 = vmax.xlane.f32.xlu0 %v5575_v31  ;;  %v5572_v48 = vsel %vm1495_vm3, %v18114_v55, -inf  ;;  %v18124_v28 = vpop.permute.xlu1 %14744 }
 0x8bc   : > { %5573 = vmax.xlane.f32.xlu1 %v5572_v48  ;;  %20961 = vst [vmem:[#allocation118_spill] sm:$0xff] %v18124_v28 }
 0x8cd   : > { %14754 = vrot.lane.b32.xlu1 %v20959_v1, %s15679_s17 }
 0x8dc   : > { %v5487_v62 = vpop.xlane.xlu0 %5486 }
 0x8dd   : > { %v5579_v20 = vsub.f32 %v17990_v51, %v5487_v62  ;;  %v5484_v36 = vpop.xlane.xlu1 %5483 }
 0x8de   : > { %v5578_v58 = vsub.f32 %v17994_v45, %v5484_v36 }
 0x8df   : > { %v5612_v5 = vmul.f32 1.442695, %v5579_v20 }
 0x8e0   : > { %v5610_v8 = vmul.f32 1.442695, %v5578_v58 }
 0x8e1   : > { %15184 = vpow2.f32 %v5612_v5  ;;  %v5493_v31 = vpop.xlane.xlu1 %5492 }
 0x8e2   : > { %v5581_v63 = vsub.f32 %v18000_v24, %v5493_v31  ;;  %15186 = vpow2.f32 %v5610_v8 }
 0x8e4   : > { %v5616_v48 = vmul.f32 1.442695, %v5581_v63  ;;  %v5499_v61 = vpop.xlane.xlu0 %5498 }
 0x8e5   : > { %v5583_v1 = vsub.f32 %v18006_v60, %v5499_v61  ;;  %v5490_v54 = vpop.xlane.xlu1 %5489 }
 0x8e6   : > { %15188 = vpow2.f32 %v5616_v48  ;;  %v5580_v28 = vsub.f32 %v18004_v43, %v5490_v54 }
 0x8e7   : > { %v5620_v46 = vmul.f32 1.442695, %v5583_v1 }
 0x8e8   : > { %v5614_v51 = vmul.f32 1.442695, %v5580_v28  ;;  %v5505_v62 = vpop.xlane.xlu0 %5504 }
 0x8e9   : > { %15190 = vpow2.f32 %v5620_v46  ;;  %v5585_v45 = vsub.f32 %v18014_v9, %v5505_v62  ;;  %v5496_v58 = vpop.xlane.xlu1 %5495 }
 0x8ea   : > { %15192 = vpow2.f32 %v5614_v51  ;;  %v5582_v5 = vsub.f32 %v18010_v57, %v5496_v58 }
 0x8eb   : > { %v18133_v24 = vpop.eup %15184  ;;  %v5624_v8 = vmul.f32 1.442695, %v5585_v45 }
 0x8ec   : > { %v5618_v63 = vmul.f32 1.442695, %v5582_v5  ;;  %v5677_v61 = vsel %vm1495_vm3, %v18133_v24, 0.0  ;;  %v18137_v60 = vpop.eup %15186 }
 0x8ed   : > { %15194 = vpow2.f32 %v5624_v8  ;;  %v5502_v43 = vpop.xlane.xlu1 %5501  ;;  %5678 = vadd.xlane.f32.xlu0 %v5677_v61  ;;  %v5674_v57 = vsel %vm1495_vm3, %v18137_v60, 0.0 }
 0x8ee   : > { %15196 = vpow2.f32 %v5618_v63  ;;  %v5584_v28 = vsub.f32 %v18018_v19, %v5502_v43 }
 0x8f0   : > { %v18140_v46 = vpop.eup %15188  ;;  %v5622_v9 = vmul.f32 1.442695, %v5584_v28 }
 0x8f1   : > { %5675 = vadd.xlane.f32.xlu1 %v5674_v57  ;;  %v5683_v1 = vsel %vm1495_vm3, %v18140_v46, 0.0 }
 0x8f2   : > { %15198 = vpow2.f32 %v5622_v9  ;;  %5684 = vadd.xlane.f32.xlu0 %v5683_v1 }
 0x8f3   : > { %v18146_v54 = vpop.eup %15190  ;;  %v12687_v20 = vpop.f32.mrb[72].mxu1 }
 0x8f4   : > { %v18148_v36 = vpop.eup %15192  ;;  %v3940_v31 = vpop.f32.mrb[73].mxu1  ;;  %v5689_v19 = vsel %vm1495_vm3, %v18146_v54, 0.0 }
 0x8f5   : > { %v5680_v48 = vsel %vm1495_vm3, %v18148_v36, 0.0  ;;  %12751 = vmatprep.mubr.msk.f32.mxu1 %vm842_vm1, %v3940_v31 }
 0x8f6   : > { %5681 = vadd.xlane.f32.xlu1 %v5680_v48  ;;  %5690 = vadd.xlane.f32.xlu0 %v5689_v19 }
 0x8f7   : > { %v18155_v51 = vpop.eup %15194  ;;  %12752 = vmatmul.mubr.msk.f32.gmra.mrb[96].mxu1 %vm842_vm1, %v12687_v20  ;;  %v12690_v62 = vpop.f32.mrb[74].mxu1 }
 0x8f8   : > { %v18158_v45 = vpop.eup %15196  ;;  %v3950_v58 = vpop.f32.mrb[75].mxu1  ;;  %v5695_v5 = vsel %vm1495_vm3, %v18155_v51, 0.0 }
 0x8f9   : > { %v5686_v8 = vsel %vm1495_vm3, %v18158_v45, 0.0  ;;  %12754 = vmatprep.mubr.msk.f32.mxu1 %vm842_vm1, %v3950_v58 }
 0x8fa   : > { %5687 = vadd.xlane.f32.xlu1 %v5686_v8  ;;  %5696 = vadd.xlane.f32.xlu0 %v5695_v5 }
 0x8fb   : > { %12755 = vmatmul.mubr.msk.f32.gmra.mrb[98].mxu1 %vm842_vm1, %v12690_v62  ;;  %v12693_v63 = vpop.f32.mrb[76].mxu1 }
 0x8fc   : > { %v18166_v61 = vpop.eup %15198  ;;  %v5511_v43 = vpop.xlane.xlu0 %5510 }
 0x8fd   : > { %v3960_v28 = vpop.f32.mrb[77].mxu1  ;;  %v5587_v9 = vsub.f32 %v18024_v11, %v5511_v43  ;;  %v5508_v57 = vpop.xlane.xlu1 %5507  ;;  %v5692_v1 = vsel %vm1495_vm3, %v18166_v61, 0.0 }
 0x8fe   : > { %12757 = vmatprep.mubr.msk.f32.mxu1 %vm842_vm1, %v3960_v28  ;;  %v5586_v20 = vsub.f32 %v18026_v50, %v5508_v57  ;;  %5693 = vadd.xlane.f32.xlu0 %v5692_v1 }
 0x8ff   : > { %v5628_v31 = vmul.f32 1.442695, %v5587_v9  ;;  %12758 = vmatmul.mubr.msk.f32.gmra.mrb[100].mxu1 %vm842_vm1, %v12693_v63  ;;  %v12696_v19 = vpop.f32.mrb[78].mxu1 }
 0x900   : > { %v5626_v48 = vmul.f32 1.442695, %v5586_v20  ;;  %v5517_v62 = vpop.xlane.xlu0 %5516  ;;  %v3970_v58 = vpop.f32.mrb[79].mxu1 }
 0x901   : > { %15200 = vpow2.f32 %v5628_v31  ;;  %v5589_v5 = vsub.f32 %v18032_v39, %v5517_v62  ;;  %v5514_v11 = vpop.xlane.xlu1 %5513  ;;  %12760 = vmatprep.mubr.msk.f32.mxu1 %vm842_vm1, %v3970_v58  ;;  %v14697_v62 = vunpack.i.h.bf16 %v17918_v41  ;;  %v14696_v58 = vunpack.i.l.bf16 %v17918_v41  ;;  %v20963_v41 = vld [vmem:[#allocation59_spill] sm:$0xff] }
 0x902   : > { %15202 = vpow2.f32 %v5626_v48  ;;  %v5588_v8 = vsub.f32 %v18034_v4, %v5514_v11  ;;  %v20962_v11 = vld [vmem:[#allocation51_spill] sm:$0xff] }
 0x903   : > { %v5632_v43 = vmul.f32 1.442695, %v5589_v5  ;;  %12761 = vmatmul.mubr.msk.f32.gmra.mrb[102].mxu1 %vm842_vm1, %v12696_v19 }
 0x904   : > { %v5630_v50 = vmul.f32 1.442695, %v5588_v8  ;;  %v5523_v28 = vpop.xlane.xlu0 %5522  ;;  %12763 = vmatprep.mubr.msk.f32.mxu1 %vm842_vm1, %v17908_v16 }
 0x905   : > { %15204 = vpow2.f32 %v5632_v43  ;;  %v5591_v63 = vsub.f32 %v18040_v47, %v5523_v28  ;;  %v5520_v9 = vpop.xlane.xlu1 %5519  ;;  %v14701_v43 = vunpack.i.l.bf16 %v17910_v59 }
 0x906   : > { %v5590_v39 = vsub.f32 %v18042_v34, %v5520_v9  ;;  %15206 = vpow2.f32 %v5630_v50  ;;  %v13921_v9 = vpack.c.bf16 %v14697_v62, %v14696_v58 }
 0x907   : > { %v5636_v57 = vmul.f32 1.442695, %v5591_v63  ;;  %12764 = vmatmul.mubr.msk.f32.gmra.mrb[104].mxu1 %vm842_vm1, %v17906_v42  ;;  %v20964_v63 = vld [vmem:[#allocation52_spill] sm:$0xff] }
 0x908   : > { %v5634_v4 = vmul.f32 1.442695, %v5590_v39  ;;  %v5529_v1 = vpop.xlane.xlu0 %5528  ;;  %12766 = vmatprep.mubr.msk.f32.mxu1 %vm842_vm1, %v17914_v33 }
 0x909   : > { %15208 = vpow2.f32 %v5636_v57  ;;  %v5593_v20 = vsub.f32 %v18048_v52, %v5529_v1  ;;  %v5526_v16 = vpop.xlane.xlu1 %5525  ;;  %v14706_v57 = vunpack.i.l.bf16 %v17916_v27 }
 0x90a   : > { %v5592_v31 = vsub.f32 %v18050_v17, %v5526_v16  ;;  %15210 = vpow2.f32 %v5634_v4  ;;  %v20966_v16 = vld [vmem:[#allocation54_spill] sm:$0xff] }
 0x90b   : > { %v18188_v47 = vpop.eup %15200  ;;  %v5640_v34 = vmul.f32 1.442695, %v5593_v20  ;;  %12767 = vmatmul.mubr.msk.f32.gmra.mrb[106].mxu1 %vm842_vm1, %v17912_v18 }
 0x90c   : > { %v18192_v19 = vpop.eup %15202  ;;  %v5638_v42 = vmul.f32 1.442695, %v5592_v31  ;;  %v5701_v48 = vsel %vm1495_vm3, %v18188_v47, 0.0  ;;  %12769 = vmatprep.mubr.msk.f32.mxu1 %vm842_vm1, %v17976_v3 }
 0x90d   : > { %15212 = vpow2.f32 %v5640_v34  ;;  %5702 = vadd.xlane.f32.xlu0 %v5701_v48  ;;  %v5698_v33 = vsel %vm1495_vm3, %v18192_v19, 0.0  ;;  %v14731_v48 = vunpack.i.l.bf16 %v17931_v44 }
 0x90e   : > { %5699 = vadd.xlane.f32.xlu1 %v5698_v33  ;;  %15214 = vpow2.f32 %v5638_v42 }
 0x90f   : > { %v18200_v52 = vpop.eup %15204  ;;  %12770 = vmatmul.mubr.msk.f32.gmra.mrb[108].mxu1 %vm842_vm1, %v17974_v56 }
 0x910   : > { %v5707_v18 = vsel %vm1495_vm3, %v18200_v52, 0.0  ;;  %12772 = vmatprep.mubr.msk.f32.mxu1 %vm842_vm1, %v17984_v14  ;;  %v18208_v17 = vpop.eup %15206 }
 0x911   : > { %5708 = vadd.xlane.f32.xlu0 %v5707_v18  ;;  %v5704_v56 = vsel %vm1495_vm3, %v18208_v17, 0.0  ;;  %v20967_v18 = vld [vmem:[#allocation69_spill] sm:$0xff] }
 0x913   : > { %v18210_v3 = vpop.eup %15208  ;;  %12773 = vmatmul.mubr.msk.f32.gmra.mrb[110].mxu1 %vm842_vm1, %v17982_v40  ;;  %v14702_v40 = vunpack.i.h.bf16 %v17910_v59  ;;  %v14707_v59 = vunpack.i.h.bf16 %v17916_v27  ;;  %v14732_v27 = vunpack.i.h.bf16 %v17931_v44 }
 0x914   : > { %v5713_v5 = vsel %vm1495_vm3, %v18210_v3, 0.0  ;;  %12777 = vmatprep.mubr.msk.f32.mxu1 %vm842_vm1, %v20962_v11  ;;  %v18222_v14 = vpop.eup %15210 }
 0x915   : > { %5705 = vadd.xlane.f32.xlu0 %v5704_v56  ;;  %5714 = vadd.xlane.f32.xlu1 %v5713_v5  ;;  %v5710_v50 = vsel %vm1495_vm3, %v18222_v14, 0.0  ;;  %v13925_v4 = vpack.c.bf16 %v14702_v40, %v14701_v43  ;;  %v13929_v62 = vpack.c.bf16 %v14707_v59, %v14706_v57  ;;  %v20968_v5 = vld [vmem:[#allocation60_spill] sm:$0xff]  ;;  %v20969_v40 = vld [vmem:[#allocation53_spill] sm:$0xff]  ;;  %v18259_v43 = vpack.c.bf16 %v14732_v27, %v14731_v48  ;;  %v20971_v59 = vld [vmem:[#allocation62_spill] sm:$0xff] }
 0x916   : > { %v20974_v48 = vld [vmem:[#allocation88_spill] sm:$0xff] }
 0x917   : > { %v18224_v8 = vpop.eup %15212  ;;  %12778 = vmatmul.mubr.msk.f32.vlgmr.msra.gmra.mrb[80].mxu1 %vm842_vm1, %v20963_v41 }
 0x918   : > { %13920 = vmatpush3.bf16.msra.mxu1 %v17953_v35  ;;  %v5719_v28 = vsel %vm1495_vm3, %v18224_v8, 0.0  ;;  %12780 = vmatprep.mubr.msk.f32.mxu1 %vm842_vm1, %v20964_v63  ;;  %v18237_v39 = vpop.eup %15214  ;;  %v20965_v35 = vld [vmem:[#allocation61_spill] sm:$0xff] }
 0x919   : > { %5711 = vadd.xlane.f32.xlu0 %v5710_v50  ;;  %5720 = vadd.xlane.f32.xlu1 %v5719_v28  ;;  %v5716_v20 = vsel %vm1495_vm3, %v18237_v39, 0.0  ;;  %v20970_v28 = vld [vmem:[#allocation65_spill] sm:$0xff] }
 0x91a   : > { %13922 = vmatprep.subr.bf16.mxu1 %v13921_v9 }
 0x91b   : > { %12781 = vmatmul.mubr.msk.f32.gmra.mrb[82].mxu1 %vm842_vm1, %v20965_v35 }
 0x91c   : > { %v5535_v1 = vpop.xlane.xlu0 %5534  ;;  %13924 = vmatpush3.bf16.msra.mxu1 %v13921_v9  ;;  %12783 = vmatprep.mubr.msk.f32.mxu1 %vm842_vm1, %v20966_v16 }
 0x91d   : > { %v5595_v31 = vsub.f32 %v18056_v13, %v5535_v1  ;;  %v5532_v34 = vpop.xlane.xlu1 %5531  ;;  %5717 = vadd.xlane.f32.xlu0 %v5716_v20  ;;  %13926 = vmatprep.subr.bf16.mxu1 %v13925_v4 }
 0x91e   : > { %v5594_v42 = vsub.f32 %v18058_v49, %v5532_v34 }
 0x91f   : > { %v5644_v33 = vmul.f32 1.442695, %v5595_v31  ;;  %12784 = vmatmul.mubr.msk.f32.gmra.mrb[84].mxu1 %vm842_vm1, %v20967_v18 }
 0x920   : > { %v5642_v58 = vmul.f32 1.442695, %v5594_v42  ;;  %v5541_v56 = vpop.xlane.xlu0 %5540  ;;  %13928 = vmatpush3.bf16.msra.mxu1 %v13925_v4  ;;  %12786 = vmatprep.mubr.msk.f32.mxu1 %vm842_vm1, %v20968_v5  ;;  %v20972_v4 = vld [vmem:[#allocation84_spill] sm:$0xff] }
 0x921   : > { %15216 = vpow2.f32 %v5644_v33  ;;  %v5597_v13 = vsub.f32 %v18064_v38, %v5541_v56  ;;  %v5538_v11 = vpop.xlane.xlu1 %5537  ;;  %13930 = vmatprep.subr.bf16.mxu1 %v13929_v62  ;;  %v20975_v33 = vld [vmem:[#allocation86_spill] sm:$0xff] }
 0x922   : > { %15218 = vpow2.f32 %v5642_v58  ;;  %v5596_v49 = vsub.f32 %v18066_v12, %v5538_v11  ;;  %v20976_v58 = vld [vmem:[#allocation93_spill] sm:$0xff] }
 0x923   : > { %v5648_v44 = vmul.f32 1.442695, %v5597_v13  ;;  %12787 = vmatmul.mubr.msk.f32.gmra.mrb[86].mxu1 %vm842_vm1, %v20969_v40  ;;  %v20977_v13 = vld [vmem:[#allocation92_spill] sm:$0xff] }
 0x924   : > { %v5646_v41 = vmul.f32 1.442695, %v5596_v49  ;;  %v5547_v50 = vpop.xlane.xlu0 %5546  ;;  %13932 = vmatpush3.bf16.msra.mxu1 %v13929_v62  ;;  %12789 = vmatprep.mubr.msk.f32.mxu1 %vm842_vm1, %v20970_v28 }
 0x925   : > { %15220 = vpow2.f32 %v5648_v44  ;;  %v5599_v38 = vsub.f32 %v18072_v25, %v5547_v50  ;;  %v5544_v63 = vpop.xlane.xlu1 %5543  ;;  %13950 = vmatprep.subr.bf16.mxu1 %v18259_v43  ;;  %v20978_v44 = vld [vmem:[#allocation101_spill] sm:$0xff]  ;;  %v20979_v50 = vld [vmem:[#allocation100_spill] sm:$0xff] }
 0x926   : > { %15222 = vpow2.f32 %v5646_v41  ;;  %v5598_v12 = vsub.f32 %v18074_v23, %v5544_v63  ;;  %v20973_v23 = vld [vmem:[#allocation82_spill] sm:$0xff]  ;;  %v20980_v63 = vld [vmem:[#allocation109_spill] sm:$0xff] }
 0x927   : > { %v5652_v9 = vmul.f32 1.442695, %v5599_v38  ;;  %12790 = vmatmul.mubr.msk.f32.gmra.mrb[88].mxu1 %vm842_vm1, %v20971_v59 }
 0x928   : > { %v5650_v57 = vmul.f32 1.442695, %v5598_v12  ;;  %v5553_v35 = vpop.xlane.xlu0 %5552  ;;  %12792 = vmatprep.mubr.msk.f32.mxu1 %vm842_vm1, %v20972_v4 }
 0x929   : > { %15224 = vpow2.f32 %v5652_v9  ;;  %v5601_v1 = vsub.f32 %v18080_v7, %v5553_v35  ;;  %v5550_v20 = vpop.xlane.xlu1 %5549  ;;  %v20981_v9 = vld [vmem:[#allocation108_spill] sm:$0xff] }
 0x92a   : > { %15226 = vpow2.f32 %v5650_v57  ;;  %v5600_v25 = vsub.f32 %v18082_v29, %v5550_v20  ;;  %v20982_v57 = vld [vmem:[#allocation111_spill] sm:$0xff] }
 0x92b   : > { %v18272_v16 = vpop.eup %15216  ;;  %v5656_v31 = vmul.f32 1.442695, %v5601_v1  ;;  %12793 = vmatmul.mubr.msk.f32.gmra.mrb[90].mxu1 %vm842_vm1, %v20973_v23 }
 0x92c   : > { %v18276_v34 = vpop.eup %15218  ;;  %v5654_v42 = vmul.f32 1.442695, %v5600_v25  ;;  %v5725_v27 = vsel %vm1495_vm3, %v18272_v16, 0.0  ;;  %12795 = vmatprep.mubr.msk.f32.mxu1 %vm842_vm1, %v20974_v48  ;;  %v20983_v25 = vld [vmem:[#allocation110_spill] sm:$0xff] }
 0x92d   : > { %15228 = vpow2.f32 %v5656_v31  ;;  %5726 = vadd.xlane.f32.xlu1 %v5725_v27  ;;  %v5722_v7 = vsel %vm1495_vm3, %v18276_v34, 0.0 }
 0x92e   : > { %15230 = vpow2.f32 %v5654_v42  ;;  %5723 = vadd.xlane.f32.xlu0 %v5722_v7  ;;  %v20984_v42 = vld [vmem:[#allocation113_spill] sm:$0xff] }
 0x92f   : > { %v18284_v29 = vpop.eup %15220  ;;  %12796 = vmatmul.mubr.msk.f32.gmra.mrb[92].mxu1 %vm842_vm1, %v20975_v33  ;;  %v20985_v33 = vld [vmem:[#allocation112_spill] sm:$0xff] }
 0x930   : > { %v18288_v18 = vpop.eup %15222  ;;  %v5731_v62 = vsel %vm1495_vm3, %v18284_v29, 0.0  ;;  %12798 = vmatprep.mubr.msk.f32.mxu1 %vm842_vm1, %v20976_v58  ;;  %v20986_v58 = vld [vmem:[#allocation97_spill] sm:$0xff] }
 0x931   : > { %5732 = vadd.xlane.f32.xlu1 %v5731_v62  ;;  %v5728_v56 = vsel %vm1495_vm3, %v18288_v18, 0.0 }
 0x932   : > { %5729 = vadd.xlane.f32.xlu0 %v5728_v56 }
 0x933   : > { %v18296_v5 = vpop.eup %15224  ;;  %12799 = vmatmul.mubr.msk.f32.gmra.mrb[94].mxu1 %vm842_vm1, %v20977_v13 }
 0x934   : > { %v18300_v11 = vpop.eup %15226  ;;  %v5737_v49 = vsel %vm1495_vm3, %v18296_v5, 0.0  ;;  %12801 = vmatprep.mubr.msk.f32.mxu1 %vm842_vm1, %v20978_v44  ;;  %v20987_v44 = vld [vmem:[#allocation96_spill] sm:$0xff] }
 0x935   : > { %5738 = vadd.xlane.f32.xlu1 %v5737_v49  ;;  %v5734_v40 = vsel %vm1495_vm3, %v18300_v11, 0.0 }
 0x936   : > { %5735 = vadd.xlane.f32.xlu0 %v5734_v40 }
 0x937   : > { %v18308_v41 = vpop.eup %15228  ;;  %12802 = vmatmul.mubr.msk.f32.gmra.mrb[96].mxu1 %vm842_vm1, %v20979_v50  ;;  %v20988_v50 = vld [vmem:[#allocation103_spill] sm:$0xff] }
 0x938   : > { %v18312_v28 = vpop.eup %15230  ;;  %v5743_v38 = vsel %vm1495_vm3, %v18308_v41, 0.0  ;;  %12804 = vmatprep.mubr.msk.f32.mxu1 %vm842_vm1, %v20980_v63 }
 0x939   : > { %5744 = vadd.xlane.f32.xlu1 %v5743_v38  ;;  %v5740_v12 = vsel %vm1495_vm3, %v18312_v28, 0.0 }
 0x93a   : > { %5741 = vadd.xlane.f32.xlu0 %v5740_v12 }
 0x93b   : > { %12805 = vmatmul.mubr.msk.f32.gmra.mrb[98].mxu1 %vm842_vm1, %v20981_v9 }
 0x93c   : > { %v5559_v59 = vpop.xlane.xlu0 %5558  ;;  %12807 = vmatprep.mubr.msk.f32.mxu1 %vm842_vm1, %v20982_v57 }
 0x93d   : > { %v5603_v35 = vsub.f32 %v18088_v0, %v5559_v59  ;;  %v5556_v4 = vpop.xlane.xlu1 %5555 }
 0x93e   : > { %v5602_v1 = vsub.f32 %v18090_v6, %v5556_v4  ;;  %v20990_v4 = vld [vmem:[#allocation105_spill] sm:$0xff] }
 0x93f   : > { %v5660_v20 = vmul.f32 1.442695, %v5603_v35  ;;  %12808 = vmatmul.mubr.msk.f32.gmra.mrb[100].mxu1 %vm842_vm1, %v20983_v25 }
 0x940   : > { %v5658_v31 = vmul.f32 1.442695, %v5602_v1  ;;  %v5565_v23 = vpop.xlane.xlu0 %5564  ;;  %12810 = vmatprep.mubr.msk.f32.mxu1 %vm842_vm1, %v20984_v42  ;;  %v20991_v1 = vld [vmem:[#allocation104_spill] sm:$0xff] }
 0x941   : > { %15232 = vpow2.f32 %v5660_v20  ;;  %v5605_v27 = vsub.f32 %v18096_v22, %v5565_v23  ;;  %v5562_v48 = vpop.xlane.xlu1 %5561 }
 0x942   : > { %15234 = vpow2.f32 %v5658_v31  ;;  %v5604_v7 = vsub.f32 %v18098_v53, %v5562_v48  ;;  %v20992_v31 = vld [vmem:[#allocation107_spill] sm:$0xff] }
 0x943   : > { %v5664_v0 = vmul.f32 1.442695, %v5605_v27  ;;  %12811 = vmatmul.mubr.msk.f32.gmra.mrb[102].mxu1 %vm842_vm1, %v20985_v33  ;;  %v20993_v27 = vld [vmem:[#allocation106_spill] sm:$0xff] }
 0x944   : > { %v5662_v6 = vmul.f32 1.442695, %v5604_v7  ;;  %v5571_v62 = vpop.xlane.xlu0 %5570  ;;  %12813 = vmatprep.mubr.msk.f32.mxu1 %vm842_vm1, %v20986_v58 }
 0x945   : > { %15236 = vpow2.f32 %v5664_v0  ;;  %v5607_v56 = vsub.f32 %v18104_v26, %v5571_v62  ;;  %v5568_v13 = vpop.xlane.xlu1 %5567 }
 0x946   : > { %15238 = vpow2.f32 %v5662_v6  ;;  %v5606_v22 = vsub.f32 %v18106_v15, %v5568_v13  ;;  %v20989_v15 = vld [vmem:[#allocation102_spill] sm:$0xff]  ;;  %v20995_v13 = vld [vmem:[#allocation36_spill] sm:$0xff] }
 0x947   : > { %v5668_v49 = vmul.f32 1.442695, %v5607_v56  ;;  %12814 = vmatmul.mubr.msk.f32.gmra.mrb[104].mxu1 %vm842_vm1, %v20987_v44  ;;  %v20994_v56 = vld [vmem:[#allocation39_spill] sm:$0xff] }
 0x948   : > { %v5666_v53 = vmul.f32 1.442695, %v5606_v22  ;;  %v5577_v40 = vpop.xlane.xlu0 %5576  ;;  %12816 = vmatprep.mubr.msk.f32.mxu1 %vm842_vm1, %v20988_v50  ;;  %v20996_v22 = vld [vmem:[#allocation2_spill] sm:$0xff]  ;;  %v20998_v50 = vld [vmem:[#allocation3_spill] sm:$0xff] }
 0x949   : > { %15240 = vpow2.f32 %v5668_v49  ;;  %v5609_v38 = vsub.f32 %v18112_v2, %v5577_v40  ;;  %v5574_v63 = vpop.xlane.xlu1 %5573 }
 0x94a   : > { %15242 = vpow2.f32 %v5666_v53  ;;  %v5608_v26 = vsub.f32 %v18114_v55, %v5574_v63  ;;  %v20997_v53 = vld [vmem:[#allocation25_spill] sm:$0xff]  ;;  %v20999_v63 = vld [vmem:[#allocation7_spill] sm:$0xff] }
 0x94b   : > { %v18344_v12 = vpop.eup %15232  ;;  %v5672_v9 = vmul.f32 1.442695, %v5609_v38  ;;  %12817 = vmatmul.mubr.msk.f32.gmra.mrb[106].mxu1 %vm842_vm1, %v20989_v15 }
 0x94c   : > { %v18348_v59 = vpop.eup %15234  ;;  %v5670_v57 = vmul.f32 1.442695, %v5608_v26  ;;  %v5749_v35 = vsel %vm1495_vm3, %v18344_v12, 0.0  ;;  %12819 = vmatprep.mubr.msk.f32.mxu1 %vm842_vm1, %v20990_v4  ;;  %v21000_v26 = vld [vmem:[#allocation20_spill] sm:$0xff] }
 0x94d   : > { %15244 = vpow2.f32 %v5672_v9  ;;  %5750 = vadd.xlane.f32.xlu1 %v5749_v35  ;;  %v5746_v2 = vsel %vm1495_vm3, %v18348_v59, 0.0  ;;  %v18400_v49 = vpop.permute.xlu1 %14754  ;;  %v21002_v35 = vld [vmem:[#allocation40_spill] sm:$0xff] }
 0x94e   : > { %15246 = vpow2.f32 %v5670_v57  ;;  %5747 = vadd.xlane.f32.xlu0 %v5746_v2  ;;  %v21001_v57 = vld [vmem:[#allocation32_spill] sm:$0xff] }
 0x94f   : > { %v18356_v55 = vpop.eup %15236  ;;  %12820 = vmatmul.mubr.msk.f32.gmra.mrb[108].mxu1 %vm842_vm1, %v20991_v1 }
 0x950   : > { %v18360_v20 = vpop.eup %15238  ;;  %v5755_v25 = vsel %vm1495_vm3, %v18356_v55, 0.0  ;;  %12822 = vmatprep.mubr.msk.f32.mxu1 %vm842_vm1, %v20992_v31 }
 0x951   : > { %5756 = vadd.xlane.f32.xlu1 %v5755_v25  ;;  %v5752_v23 = vsel %vm1495_vm3, %v18360_v20, 0.0  ;;  %v21003_v25 = vld [vmem:[#allocation10_spill] sm:$0xff] }
 0x952   : > { %5753 = vadd.xlane.f32.xlu0 %v5752_v23  ;;  %v21004_v23 = vld [vmem:[#allocation14_spill] sm:$0xff] }
 0x953   : > { %v18368_v42 = vpop.eup %15240  ;;  %12823 = vmatmul.mubr.msk.f32.gmra.mrb[110].mxu1 %vm842_vm1, %v20993_v27  ;;  %v14737_v27 = vunpack.i.h.bf16 %v21004_v23 }
 0x954   : > { %v18372_v48 = vpop.eup %15242  ;;  %v5761_v7 = vsel %vm1495_vm3, %v18368_v42, 0.0 }
 0x955   : > { %5762 = vadd.xlane.f32.xlu1 %v5761_v7  ;;  %v5758_v0 = vsel %vm1495_vm3, %v18372_v48, 0.0  ;;  %v14736_v7 = vunpack.i.l.bf16 %v21004_v23 }
 0x956   : > { %5759 = vadd.xlane.f32.xlu0 %v5758_v0  ;;  %v21005_v0 = vld [vmem:[#allocation6_spill] sm:$0xff] }
 0x957   : > { %v18378_v33 = vpop.eup %15244 }
 0x958   : > { %v18380_v6 = vpop.eup %15246  ;;  %v5767_v62 = vsel %vm1495_vm3, %v18378_v33, 0.0 }
 0x959   : > { %5768 = vadd.xlane.f32.xlu1 %v5767_v62  ;;  %v5764_v58 = vsel %vm1495_vm3, %v18380_v6, 0.0 }
 0x95a   : > { %5765 = vadd.xlane.f32.xlu0 %v5764_v58 }
 0x96a   : > { %14764 = vrot.lane.b32.xlu1 %v20994_v56, %s15679_s17 }
 0x96e   : > { %14769 = vrot.lane.b32.xlu1 %v20908_v10, %s15680_s24 }
 0x970   : > { %14759 = vrot.lane.b32.xlu0 %v20995_v13, %s15679_s17 }
 0x972   : > { %14774 = vrot.lane.b32.xlu1 %v20935_v37, %s15680_s24 }
 0x974   : > { %14789 = vrot.lane.b32.xlu0 %v20938_v30, %s15680_s24 }
 0x976   : > { %14779 = vrot.lane.b32.xlu1 %v20909_v21, %s15680_s24 }
 0x978   : > { %6801 = vrot.lane.b32.xlu0 %v20996_v22, %s15681_s26 }
 0x97a   : > { %14784 = vrot.lane.b32.xlu1 %v20910_v32, %s15680_s24  ;;  %v5679_v44 = vpop.xlane.xlu0 %5678 }
 0x97b   : > { %15248 = vrcp.f32 %v5679_v44  ;;  %v21006_v44 = vld [vmem:[#allocation13_spill] sm:$0xff] }
 0x97c   : > { %14799 = vrot.lane.b32.xlu0 %v20997_v53, %s15680_s24 }
 0x97e   : > { %v5676_v40 = vpop.xlane.xlu1 %5675  ;;  %6799 = vrot.lane.b32.xlu1 %v20998_v50, %s15681_s26  ;;  %v21007_v50 = vld [vmem:[#allocation5_spill] sm:$0xff] }
 0x97f   : > { %15250 = vrcp.f32 %v5676_v40  ;;  %v5685_v38 = vpop.xlane.xlu0 %5684 }
 0x980   : > { %6803 = vrot.lane.b32.xlu0 %v20999_v63, %s15681_s26  ;;  %15252 = vrcp.f32 %v5685_v38  ;;  %v14742_v38 = vunpack.i.h.bf16 %v21007_v50  ;;  %v14741_v63 = vunpack.i.l.bf16 %v21007_v50  ;;  %v18457_v50 = vld [vmem:[%s20526_s3 + $0x10] sm:$0xff] }
 0x982   : > { %14794 = vrot.lane.b32.xlu1 %v21000_v26, %s15680_s24  ;;  %v13957_v23 = vpack.c.bf16 %v14742_v38, %v14741_v63  ;;  %v21015_v38 = vld [vmem:[#allocation33_spill] sm:$0xff] }
 0x983   : > { %v5682_v9 = vpop.xlane.xlu1 %5681  ;;  %v5691_v15 = vpop.xlane.xlu0 %5690 }
 0x984   : > { %15254 = vrcp.f32 %v5682_v9  ;;  %14809 = vrot.lane.b32.xlu0 %v21001_v57, %s15680_s24  ;;  %v13953_v9 = vpack.c.bf16 %v14737_v27, %v14736_v7  ;;  %v21011_v7 = vld [vmem:[#allocation9_spill] sm:$0xff] }
 0x985   : > { %15256 = vrcp.f32 %v5691_v15  ;;  %v15249_v1 = vpop.eup %15248 }
 0x986   : > { %14804 = vrot.lane.b32.xlu1 %v21002_v35, %s15680_s24  ;;  %v5773_v58 = vmul.f32 %v15249_v1, %v18133_v24  ;;  %v21008_v24 = vld [vmem:[#allocation47_spill] sm:$0xff]  ;;  %v21010_v1 = vld [vmem:[#allocation118_spill] sm:$0xff] }
 0x987   : > { %v5688_v4 = vpop.xlane.xlu1 %5687  ;;  %v5697_v2 = vpop.xlane.xlu0 %5696 }
 0x988   : > { %15258 = vrcp.f32 %v5688_v4  ;;  %6807 = vrot.lane.b32.xlu0 %v21003_v25, %s15681_s26  ;;  %v21009_v4 = vld [vmem:[#allocation48_spill] sm:$0xff]  ;;  %v14747_v25 = vunpack.i.h.bf16 %v21010_v1 }
 0x989   : > { %v15251_v31 = vpop.eup %15250  ;;  %15260 = vrcp.f32 %v5697_v2 }
 0x98a   : > { %6805 = vrot.lane.b32.xlu1 %v21005_v0, %s15681_s26  ;;  %v5771_v62 = vmul.f32 %v15251_v31, %v18137_v60  ;;  %v15253_v40 = vpop.eup %15252  ;;  %v14746_v31 = vunpack.i.l.bf16 %v21010_v1  ;;  %v21012_v0 = vld [vmem:[#allocation16_spill] sm:$0xff]  ;;  %v21019_v1 = vld [vmem:[#allocation18_spill] sm:$0xff] }
 0x98b   : > { %v5694_v22 = vpop.xlane.xlu0 %5693  ;;  %v5777_v27 = vmul.f32 %v15253_v40, %v18140_v46 }
 0x98c   : > { %6811 = vrot.lane.b32.xlu0 %v21006_v44, %s15681_s26  ;;  %15262 = vrcp.f32 %v5694_v22  ;;  %12953 = vmatprep.mubr.msk.f32.mxu1 %vm1495_vm3, %v5771_v62  ;;  %v21013_v44 = vld [vmem:[#allocation12_spill] sm:$0xff] }
 0x98d   : > { %12954 = vmatmul.mubr.msk.f32.vlgmr.msra.gmra.mrb[112].mxu1 %vm1495_vm3, %v5773_v58  ;;  %v13961_v58 = vpack.c.bf16 %v14747_v25, %v14746_v31  ;;  %v21020_v31 = vld [vmem:[#allocation27_spill] sm:$0xff] }
 0x98e   : > { %v15255_v15 = vpop.eup %15254  ;;  %13952 = vmatpush3.bf16.msra.mxu1 %v18259_v43  ;;  %14814 = vrot.lane.b32.xlu1 %v21008_v24, %s15680_s24 }
 0x98f   : > { %13954 = vmatprep.subr.bf16.mxu1 %v13953_v9  ;;  %v5775_v60 = vmul.f32 %v15255_v15, %v18148_v36  ;;  %v15257_v2 = vpop.eup %15256  ;;  %v21017_v15 = vld [vmem:[#allocation15_spill] sm:$0xff] }
 0x990   : > { %14819 = vrot.lane.b32.xlu0 %v21009_v4, %s15680_s24  ;;  %v5781_v22 = vmul.f32 %v15257_v2, %v18146_v54 }
 0x991   : > { %12956 = vmatprep.mubr.msk.f32.mxu1 %vm1495_vm3, %v5775_v60 }
 0x992   : > { %v15259_v43 = vpop.eup %15258  ;;  %13956 = vmatpush3.bf16.msra.mxu1 %v13953_v9  ;;  %6809 = vrot.lane.b32.xlu1 %v21011_v7, %s15681_s26  ;;  %v14756_v7 = vunpack.i.l.bf16 %v18400_v49 }
 0x993   : > { %13958 = vmatprep.subr.bf16.mxu1 %v13957_v23  ;;  %12957 = vmatmul.mubr.msk.f32.gmra.mrb[114].mxu1 %vm1495_vm3, %v5777_v27  ;;  %v5779_v36 = vmul.f32 %v15259_v43, %v18158_v45  ;;  %v15261_v62 = vpop.eup %15260  ;;  %v21014_v45 = vld [vmem:[#allocation19_spill] sm:$0xff]  ;;  %v14757_v43 = vunpack.i.h.bf16 %v18400_v49 }
 0x994   : > { %6968 = vrot.lane.b32.xlu0 %v21012_v0, %s15681_s26  ;;  %v5785_v54 = vmul.f32 %v15261_v62, %v18155_v51  ;;  %v21018_v51 = vld [vmem:[#allocation22_spill] sm:$0xff] }
 0x995   : > { %12959 = vmatprep.mubr.msk.f32.mxu1 %vm1495_vm3, %v5779_v36  ;;  %v21021_v36 = vld [vmem:[#allocation38_spill] sm:$0xff] }
 0x996   : > { %v15263_v46 = vpop.eup %15262  ;;  %13960 = vmatpush3.bf16.msra.mxu1 %v13957_v23  ;;  %6813 = vrot.lane.b32.xlu1 %v21013_v44, %s15681_s26  ;;  %v13969_v44 = vpack.c.bf16 %v14757_v43, %v14756_v7  ;;  %v21030_v43 = vld [vmem:[#allocation46_spill] sm:$0xff] }
 0x997   : > { %13962 = vmatprep.subr.bf16.mxu1 %v13961_v58  ;;  %12960 = vmatmul.mubr.msk.f32.gmra.mrb[116].mxu1 %vm1495_vm3, %v5781_v22  ;;  %v5783_v40 = vmul.f32 %v15263_v46, %v18166_v61  ;;  %v21016_v61 = vld [vmem:[#allocation49_spill] sm:$0xff] }
 0x998   : > { %6972 = vrot.lane.b32.xlu0 %v21014_v45, %s15681_s26  ;;  %v21022_v46 = vld [vmem:[#allocation21_spill] sm:$0xff] }
 0x999   : > { %12962 = vmatprep.mubr.msk.f32.mxu1 %vm1495_vm3, %v5783_v40  ;;  %v21023_v40 = vld [vmem:[#allocation11_spill] sm:$0xff] }
 0x99a   : > { %13964 = vmatpush3.bf16.msra.mxu1 %v13961_v58  ;;  %14824 = vrot.lane.b32.xlu1 %v21015_v38, %s15680_s24  ;;  %v5703_v63 = vpop.xlane.xlu0 %5702 }
 0x99b   : > { %15264 = vrcp.f32 %v5703_v63  ;;  %v5700_v9 = vpop.xlane.xlu1 %5699  ;;  %12963 = vmatmul.mubr.msk.f32.gmra.mrb[118].mxu1 %vm1495_vm3, %v5785_v54  ;;  %13049 = vmatprep.subr.mxu1 %v18457_v50  ;;  %v21025_v54 = vld [vmem:[#allocation26_spill] sm:$0xff] }
 0x99c   : > { %15266 = vrcp.f32 %v5700_v9  ;;  %14829 = vrot.lane.b32.xlu0 %v21016_v61, %s15680_s24  ;;  %v21026_v9 = vld [vmem:[#allocation41_spill] sm:$0xff] }
 0x99e   : > { %6970 = vrot.lane.b32.xlu1 %v21017_v15, %s15681_s26  ;;  %v5709_v60 = vpop.xlane.xlu0 %5708 }
 0x99f   : > { %15268 = vrcp.f32 %v5709_v60 }
 0x9a0   : > { %6976 = vrot.lane.b32.xlu0 %v21018_v51, %s15681_s26 }
 0x9a2   : > { %v5715_v2 = vpop.xlane.xlu1 %5714  ;;  %6974 = vrot.lane.b32.xlu1 %v21019_v1, %s15681_s26  ;;  %v5706_v25 = vpop.xlane.xlu0 %5705 }
 0x9a3   : > { %15270 = vrcp.f32 %v5706_v25 }
 0x9a4   : > { %6980 = vrot.lane.b32.xlu0 %v21020_v31, %s15681_s26  ;;  %15272 = vrcp.f32 %v5715_v2  ;;  %v21027_v2 = vld [vmem:[#allocation4_spill] sm:$0xff] }
 0x9a5   : > { %v15265_v23 = vpop.eup %15264  ;;  %v21028_v31 = vld [vmem:[#allocation44_spill] sm:$0xff] }
 0x9a6   : > { %v15267_v27 = vpop.eup %15266  ;;  %14834 = vrot.lane.b32.xlu1 %v21021_v36, %s15680_s24  ;;  %v5712_v0 = vpop.xlane.xlu0 %5711  ;;  %v5789_v22 = vmul.f32 %v15265_v23, %v18188_v47  ;;  %v21024_v47 = vld [vmem:[#allocation37_spill] sm:$0xff] }
 0x9a7   : > { %v5721_v62 = vpop.xlane.xlu1 %5720  ;;  %v5787_v58 = vmul.f32 %v15267_v27, %v18192_v19  ;;  %15274 = vrcp.f32 %v5712_v0  ;;  %v21031_v0 = vld [vmem:[#allocation24_spill] sm:$0xff] }
 0x9a8   : > { %14839 = vrot.lane.b32.xlu0 %v20995_v13, %s15680_s24  ;;  %15276 = vrcp.f32 %v5721_v62  ;;  %v21032_v62 = vld [vmem:[#allocation43_spill] sm:$0xff] }
 0x9a9   : > { %12981 = vmatprep.mubr.msk.f32.mxu0 %vm1495_vm3, %v5787_v58  ;;  %v15269_v19 = vpop.eup %15268 }
 0x9aa   : > { %6978 = vrot.lane.b32.xlu1 %v21022_v46, %s15681_s26  ;;  %v5718_v49 = vpop.xlane.xlu0 %5717  ;;  %12982 = vmatmul.mubr.msk.f32.vlgmr.msra.gmra.mrb[112].mxu0 %vm1495_vm3, %v5789_v22  ;;  %v5793_v15 = vmul.f32 %v15269_v19, %v18200_v52  ;;  %v21029_v52 = vld [vmem:[#allocation42_spill] sm:$0xff]  ;;  %v21034_v46 = vld [vmem:[#allocation45_spill] sm:$0xff] }
 0x9ab   : > { %15278 = vrcp.f32 %v5718_v49  ;;  %13968 = vmatpush3.bf16.msra.mxu0 %v21023_v40 }
 0x9ac   : > { %13970 = vmatprep.subr.bf16.mxu0 %v13969_v44  ;;  %7139 = vrot.lane.b32.xlu0 %v21024_v47, %s15681_s26 }
 0x9ad   : > { %v15271_v45 = vpop.eup %15270 }
 0x9ae   : > { %6982 = vrot.lane.b32.xlu1 %v21025_v54, %s15681_s26  ;;  %v5791_v63 = vmul.f32 %v15271_v45, %v18208_v17  ;;  %v15273_v60 = vpop.eup %15272  ;;  %v21036_v45 = vld [vmem:[#allocation23_spill] sm:$0xff] }
 0x9af   : > { %13972 = vmatpush3.bf16.msra.mxu0 %v13969_v44  ;;  %v5797_v17 = vmul.f32 %v15273_v60, %v18210_v3  ;;  %v21035_v44 = vld [vmem:[#allocation29_spill] sm:$0xff] }
 0x9b0   : > { %7143 = vrot.lane.b32.xlu0 %v21026_v9, %s15681_s26  ;;  %12984 = vmatprep.mubr.msk.f32.mxu0 %vm1495_vm3, %v5791_v63 }
 0x9b1   : > { %v15275_v51 = vpop.eup %15274  ;;  %12985 = vmatmul.mubr.msk.f32.gmra.mrb[114].mxu0 %vm1495_vm3, %v5793_v15  ;;  %v21037_v15 = vld [vmem:[#allocation35_spill] sm:$0xff] }
 0x9b2   : > { %7137 = vrot.lane.b32.xlu1 %v21027_v2, %s15681_s26  ;;  %v5795_v1 = vmul.f32 %v15275_v51, %v18222_v14  ;;  %v15277_v25 = vpop.eup %15276  ;;  %v21038_v2 = vld [vmem:[#allocation30_spill] sm:$0xff] }
 0x9b3   : > { %v5801_v14 = vmul.f32 %v15277_v25, %v18224_v8  ;;  %v21033_v8 = vld [vmem:[#allocation31_spill] sm:$0xff] }
 0x9b4   : > { %7145 = vrot.lane.b32.xlu0 %v21028_v31, %s15681_s26  ;;  %12987 = vmatprep.mubr.msk.f32.mxu0 %vm1495_vm3, %v5795_v1  ;;  %v21039_v31 = vld [vmem:[#allocation28_spill] sm:$0xff] }
 0x9b5   : > { %v15279_v23 = vpop.eup %15278  ;;  %12988 = vmatmul.mubr.msk.f32.gmra.mrb[116].mxu0 %vm1495_vm3, %v5797_v17 }
 0x9b6   : > { %7141 = vrot.lane.b32.xlu1 %v21029_v52, %s15681_s26  ;;  %v5799_v27 = vmul.f32 %v15279_v23, %v18237_v39 }
 0x9b8   : > { %7149 = vrot.lane.b32.xlu0 %v21030_v43, %s15681_s26  ;;  %12990 = vmatprep.mubr.msk.f32.mxu0 %vm1495_vm3, %v5799_v27 }
 0x9b9   : > { %12991 = vmatmul.mubr.msk.f32.gmra.mrb[118].mxu0 %vm1495_vm3, %v5801_v14 }
 0x9ba   : > { %v5727_v3 = vpop.xlane.xlu1 %5726  ;;  %14844 = vrot.lane.b32.xlu1 %v20994_v56, %s15680_s24 }
 0x9bb   : > { %15280 = vrcp.f32 %v5727_v3  ;;  %v5724_v7 = vpop.xlane.xlu0 %5723 }
 0x9bc   : > { %15282 = vrcp.f32 %v5724_v7  ;;  %7306 = vrot.lane.b32.xlu0 %v21031_v0, %s15681_s26 }
 0x9be   : > { %v5733_v39 = vpop.xlane.xlu1 %5732  ;;  %7147 = vrot.lane.b32.xlu1 %v21032_v62, %s15681_s26 }
 0x9bf   : > { %15284 = vrcp.f32 %v5733_v39  ;;  %v5730_v58 = vpop.xlane.xlu0 %5729 }
 0x9c0   : > { %15286 = vrcp.f32 %v5730_v58  ;;  %7310 = vrot.lane.b32.xlu0 %v21033_v8, %s15681_s26 }
 0x9c2   : > { %v5739_v22 = vpop.xlane.xlu1 %5738  ;;  %7151 = vrot.lane.b32.xlu1 %v21034_v46, %s15681_s26 }
 0x9c3   : > { %15288 = vrcp.f32 %v5739_v22  ;;  %v5736_v49 = vpop.xlane.xlu0 %5735 }
 0x9c4   : > { %15290 = vrcp.f32 %v5736_v49  ;;  %7314 = vrot.lane.b32.xlu0 %v21035_v44, %s15681_s26 }
 0x9c5   : > { %v15281_v40 = vpop.eup %15280 }
 0x9c6   : > { %v15283_v47 = vpop.eup %15282  ;;  %v5745_v19 = vpop.xlane.xlu1 %5744  ;;  %7308 = vrot.lane.b32.xlu1 %v21036_v45, %s15681_s26  ;;  %v5805_v9 = vmul.f32 %v15281_v40, %v18272_v16 }
 0x9c7   : > { %15292 = vrcp.f32 %v5745_v19  ;;  %v5742_v54 = vpop.xlane.xlu0 %5741  ;;  %v5803_v63 = vmul.f32 %v15283_v47, %v18276_v34 }
 0x9c8   : > { %15294 = vrcp.f32 %v5742_v54  ;;  %7318 = vrot.lane.b32.xlu0 %v21037_v15, %s15681_s26 }
 0x9c9   : > { %v15285_v60 = vpop.eup %15284  ;;  %13009 = vmatprep.mubr.msk.f32.mxu1 %vm1495_vm3, %v5803_v63 }
 0x9ca   : > { %v15287_v51 = vpop.eup %15286  ;;  %7312 = vrot.lane.b32.xlu1 %v21038_v2, %s15681_s26  ;;  %13010 = vmatmul.mubr.msk.f32.vlgmr.msra.gmra.mrb[120].mxu1 %vm1495_vm3, %v5805_v9  ;;  %v5809_v16 = vmul.f32 %v15285_v60, %v18284_v29  ;;  %v21040_v29 = vld [vmem:[#allocation34_spill] sm:$0xff] }
 0x9cb   : > { %v5807_v1 = vmul.f32 %v15287_v51, %v18288_v18  ;;  %13050 = vmatpush3.msra.mxu1 %v18457_v50 }
 0x9cc   : > { %14854 = vrot.lane.b32.xlu0 %v20935_v37, %s15682_s29 }
 0x9cd   : > { %v15289_v34 = vpop.eup %15288  ;;  %13012 = vmatprep.mubr.msk.f32.mxu1 %vm1495_vm3, %v5807_v1 }
 0x9ce   : > { %v15291_v25 = vpop.eup %15290  ;;  %7316 = vrot.lane.b32.xlu1 %v21039_v31, %s15681_s26  ;;  %13013 = vmatmul.mubr.msk.f32.gmra.mrb[122].mxu1 %vm1495_vm3, %v5809_v16  ;;  %v5813_v18 = vmul.f32 %v15289_v34, %v18296_v5 }
 0x9cf   : > { %v5811_v17 = vmul.f32 %v15291_v25, %v18300_v11 }
 0x9d0   : > { %14869 = vrot.lane.b32.xlu0 %v20938_v30, %s15682_s29 }
 0x9d1   : > { %v15293_v50 = vpop.eup %15292  ;;  %13015 = vmatprep.mubr.msk.f32.mxu1 %vm1495_vm3, %v5811_v17 }
 0x9d2   : > { %v15295_v37 = vpop.eup %15294  ;;  %7320 = vrot.lane.b32.xlu1 %v21040_v29, %s15681_s26  ;;  %13016 = vmatmul.mubr.msk.f32.gmra.mrb[124].mxu1 %vm1495_vm3, %v5813_v18  ;;  %v5817_v11 = vmul.f32 %v15293_v50, %v18308_v41 }
 0x9d3   : > { %v5815_v23 = vmul.f32 %v15295_v37, %v18312_v28 }
 0x9d4   : > { %14879 = vrot.lane.b32.xlu0 %v20997_v53, %s15682_s29 }
 0x9d5   : > { %13018 = vmatprep.mubr.msk.f32.mxu1 %vm1495_vm3, %v5815_v23 }
 0x9d6   : > { %14849 = vrot.lane.b32.xlu1 %v20908_v10, %s15682_s29  ;;  %13019 = vmatmul.mubr.msk.f32.gmra.mrb[126].mxu1 %vm1495_vm3, %v5817_v11 }
 0x9d8   : > { %14889 = vrot.lane.b32.xlu0 %v21002_v35, %s15682_s29 }
 0x9da   : > { %v5751_v30 = vpop.xlane.xlu1 %5750  ;;  %14859 = vrot.lane.b32.xlu1 %v20909_v21, %s15682_s29 }
 0x9db   : > { %v5748_v5 = vpop.xlane.xlu0 %5747 }
 0x9dc   : > { %15296 = vrcp.f32 %v5748_v5  ;;  %14899 = vrot.lane.b32.xlu0 %v21009_v4, %s15682_s29 }
 0x9dd   : > { %15298 = vrcp.f32 %v5751_v30 }
 0x9de   : > { %v5757_v41 = vpop.xlane.xlu1 %5756  ;;  %14864 = vrot.lane.b32.xlu1 %v20910_v32, %s15682_s29 }
 0x9df   : > { %v5754_v28 = vpop.xlane.xlu0 %5753 }
 0x9e0   : > { %15300 = vrcp.f32 %v5754_v28 }
 0x9e1   : > { %15302 = vrcp.f32 %v5757_v41 }
 0x9e2   : > { %v5763_v10 = vpop.xlane.xlu1 %5762  ;;  %14874 = vrot.lane.b32.xlu1 %v21000_v26, %s15682_s29 }
 0x9e3   : > { %v5760_v53 = vpop.xlane.xlu0 %5759 }
 0x9e4   : > { %15304 = vrcp.f32 %v5760_v53 }
 0x9e5   : > { %15306 = vrcp.f32 %v5763_v10 }
 0x9e6   : > { %v15297_v35 = vpop.eup %15296  ;;  %14884 = vrot.lane.b32.xlu1 %v21001_v57, %s15682_s29  ;;  %v5769_v21 = vpop.xlane.xlu1 %5768 }
 0x9e7   : > { %v5766_v52 = vpop.xlane.xlu0 %5765  ;;  %v5819_v27 = vmul.f32 %v15297_v35, %v18348_v59  ;;  %v15299_v58 = vpop.eup %15298 }
 0x9e8   : > { %15308 = vrcp.f32 %v5766_v52 }
 0x9e9   : > { %13037 = vmatprep.mubr.msk.f32.mxu0 %vm1495_vm3, %v5819_v27  ;;  %15310 = vrcp.f32 %v5769_v21 }
 0x9ea   : > { %14894 = vrot.lane.b32.xlu1 %v21008_v24, %s15682_s29  ;;  %v14765_v32 = vpop.permute.xlu1 %14764  ;;  %v15301_v22 = vpop.eup %15300 }
 0x9eb   : > { %v14760_v4 = vpop.permute.xlu0 %14759  ;;  %v14767_v43 = vunpack.i.h.bf16 %v14765_v32  ;;  %v14766_v26 = vunpack.i.l.bf16 %v14765_v32  ;;  %v15303_v40 = vpop.eup %15302  ;;  %v5823_v19 = vmul.f32 %v15301_v22, %v18360_v20 }
 0x9ec   : > { %v14762_v14 = vunpack.i.h.bf16 %v14760_v4  ;;  %v14761_v3 = vunpack.i.l.bf16 %v14760_v4  ;;  %v5825_v15 = vmul.f32 %v15303_v40, %v18356_v55 }
 0x9ed   : > { %v13977_v62 = vpack.c.bf16 %v14767_v43, %v14766_v26 }
 0x9ee   : > { %14904 = vrot.lane.b32.xlu1 %v21016_v61, %s15682_s29  ;;  %v14770_v57 = vpop.permute.xlu1 %14769  ;;  %v13973_v59 = vpack.c.bf16 %v14762_v14, %v14761_v3  ;;  %v5821_v61 = vmul.f32 %v15299_v58, %v18344_v12  ;;  %v15305_v45 = vpop.eup %15304 }
 0x9ef   : > { %v18579_v7 = vpop.permute.xlu0 %14789  ;;  %v14772_v0 = vunpack.i.h.bf16 %v14770_v57  ;;  %v14771_v39 = vunpack.i.l.bf16 %v14770_v57  ;;  %v15307_v12 = vpop.eup %15306  ;;  %v5827_v51 = vmul.f32 %v15305_v45, %v18372_v48 }
 0x9f0   : > { %13974 = vmatprep.subr.bf16.mxu0 %v13973_v59  ;;  %v5829_v16 = vmul.f32 %v15307_v12, %v18368_v42  ;;  %v14792_v35 = vunpack.i.h.bf16 %v18579_v7  ;;  %v14791_v21 = vunpack.i.l.bf16 %v18579_v7 }
 0x9f1   : > { %13976 = vmatpush3.bf16.msra.mxu0 %v13973_v59  ;;  %v13981_v46 = vpack.c.bf16 %v14772_v0, %v14771_v39 }
 0x9f2   : > { %v14775_v24 = vpop.permute.xlu1 %14774  ;;  %13978 = vmatprep.subr.bf16.mxu0 %v13977_v62  ;;  %v15309_v2 = vpop.eup %15308  ;;  %v14005_v32 = vpack.c.bf16 %v14792_v35, %v14791_v21 }
 0x9f3   : > { %v18581_v8 = vpop.permute.xlu0 %6801  ;;  %v14777_v54 = vunpack.i.h.bf16 %v14775_v24  ;;  %v14776_v63 = vunpack.i.l.bf16 %v14775_v24  ;;  %v15311_v34 = vpop.eup %15310  ;;  %v5831_v55 = vmul.f32 %v15309_v2, %v18380_v6 }
 0x9f4   : > { %v5833_v18 = vmul.f32 %v15311_v34, %v18378_v33 }
 0x9f5   : > { %13980 = vmatpush3.bf16.msra.mxu0 %v13977_v62  ;;  %v13987_v1 = vpack.c.bf16 %v14777_v54, %v14776_v63 }
 0x9f6   : > { %v14780_v49 = vpop.permute.xlu1 %14779  ;;  %13983 = vmatprep.subr.msk.bf16.mxu0 %vm16127_vm2, %v13981_v46 }
 0x9f7   : > { %v18586_v47 = vpop.permute.xlu0 %14799  ;;  %v14782_v48 = vunpack.i.h.bf16 %v14780_v49  ;;  %v14781_v31 = vunpack.i.l.bf16 %v14780_v49 }
 0x9f8   : > { %13038 = vmatmul.mubr.msk.f32.vlgmr.msra.gmra.mrb[120].mxu0 %vm1495_vm3, %v5821_v61  ;;  %v14802_v39 = vunpack.i.h.bf16 %v18586_v47  ;;  %v14801_v62 = vunpack.i.l.bf16 %v18586_v47 }
 0x9f9   : > { %13040 = vmatprep.mubr.msk.f32.mxu0 %vm1495_vm3, %v5823_v19  ;;  %v13993_v42 = vpack.c.bf16 %v14782_v48, %v14781_v31 }
 0x9fa   : > { %v14785_v9 = vpop.permute.xlu1 %14784 }
 0x9fb   : > { %v6804_v60 = vpop.permute.xlu0 %6803  ;;  %v14787_v11 = vunpack.i.h.bf16 %v14785_v9  ;;  %v14786_v30 = vunpack.i.l.bf16 %v14785_v9 }
 0x9fc   : > { %13041 = vmatmul.mubr.msk.f32.gmra.mrb[122].mxu0 %vm1495_vm3, %v5825_v15 }
 0x9fd   : > { %13043 = vmatprep.mubr.msk.f32.mxu0 %vm1495_vm3, %v5827_v51  ;;  %v13999_v28 = vpack.c.bf16 %v14787_v11, %v14786_v30 }
 0x9fe   : > { %v6800_v20 = vpop.permute.xlu1 %6799  ;;  %13986 = vmatpush3.bf16.xpose.msk.msra.mxu0 %vm16127_vm2, %v13981_v46 }
 0x9ff   : > { %v18598_v25 = vpop.permute.xlu0 %14809  ;;  %13989 = vmatprep.subr.msk.bf16.mxu0 %vm16127_vm2, %v13987_v1 }
 0xa00   : > { %13044 = vmatmul.mubr.msk.f32.gmra.mrb[124].mxu0 %vm1495_vm3, %v5829_v16  ;;  %v14812_v61 = vunpack.i.h.bf16 %v18598_v25  ;;  %v14811_v49 = vunpack.i.l.bf16 %v18598_v25 }
 0xa01   : > { %13046 = vmatprep.mubr.msk.f32.mxu0 %vm1495_vm3, %v5831_v55 }
 0xa02   : > { %v14795_v17 = vpop.permute.xlu1 %14794  ;;  %v14023_v19 = vpack.c.bf16 %v14812_v61, %v14811_v49 }
 0xa03   : > { %v6808_v50 = vpop.permute.xlu0 %6807  ;;  %v14797_v26 = vunpack.i.h.bf16 %v14795_v17  ;;  %v14796_v14 = vunpack.i.l.bf16 %v14795_v17 }
 0xa04   : > { %13047 = vmatmul.mubr.msk.f32.gmra.mrb[126].mxu0 %vm1495_vm3, %v5833_v18 }
 0xa05   : > { %13115 = vmatprep.mubr.msk.f32.mxu0 %vm842_vm1, %v6800_v20  ;;  %v14011_v59 = vpack.c.bf16 %v14797_v26, %v14796_v14 }
 0xa06   : > { %v14805_v37 = vpop.permute.xlu1 %14804  ;;  %13992 = vmatpush3.bf16.xpose.msk.msra.mxu0 %vm16127_vm2, %v13987_v1 }
 0xa07   : > { %v14807_v6 = vunpack.i.h.bf16 %v14805_v37  ;;  %v14806_v29 = vunpack.i.l.bf16 %v14805_v37  ;;  %v6812_v23 = vpop.permute.xlu0 %6811  ;;  %13995 = vmatprep.subr.msk.bf16.mxu0 %vm16127_vm2, %v13993_v42 }
 0xa09   : > { %v18612_v5 = vpack.c.bf16 %v14807_v6, %v14806_v29 }
 0xa0a   : > { %v6806_v33 = vpop.permute.xlu1 %6805 }
 0xa0b   : > { %v18614_v41 = vpop.permute.xlu0 %14819  ;;  %14031 = vmatprep.subr.msk.bf16.mxu1 %vm16127_vm2, %v18612_v5 }
 0xa0e   : > { %v18619_v10 = vpop.permute.xlu1 %14814  ;;  %13998 = vmatpush3.bf16.xpose.msk.msra.mxu0 %vm16127_vm2, %v13993_v42 }
 0xa0f   : > { %v6969_v53 = vpop.permute.xlu0 %6968  ;;  %14001 = vmatprep.subr.msk.bf16.mxu0 %vm16127_vm2, %v13999_v28 }
 0xa12   : > { %v6810_v52 = vpop.permute.xlu1 %6809 }
 0xa13   : > { %v6973_v27 = vpop.permute.xlu0 %6972 }
 0xa16   : > { %v6814_v4 = vpop.permute.xlu1 %6813  ;;  %14004 = vmatpush3.bf16.xpose.msk.msra.mxu0 %vm16127_vm2, %v13999_v28 }
 0xa17   : > { %v18629_v43 = vpop.permute.xlu0 %14829  ;;  %14007 = vmatprep.subr.msk.bf16.mxu0 %vm16127_vm2, %v14005_v32 }
 0xa1a   : > { %v14825_v3 = vpop.permute.xlu1 %14824 }
 0xa1b   : > { %v6977_v57 = vpop.permute.xlu0 %6976  ;;  %v14827_v63 = vunpack.i.h.bf16 %v14825_v3  ;;  %v14826_v9 = vunpack.i.l.bf16 %v14825_v3  ;;  %v14817_v3 = vunpack.i.h.bf16 %v18619_v10 }
 0xa1d   : > { %13116 = vmatmul.mubr.msk.f32.vlgmr.msra.gmra.mrb[128].mxu0 %vm842_vm1, %v18581_v8  ;;  %v14017_v8 = vpack.c.bf16 %v14802_v39, %v14801_v62  ;;  %v14821_v62 = vunpack.i.l.bf16 %v18614_v41 }
 0xa1e   : > { %v6971_v7 = vpop.permute.xlu1 %6970  ;;  %13118 = vmatprep.mubr.msk.f32.mxu0 %vm842_vm1, %v6804_v60  ;;  %14010 = vmatpush3.bf16.xpose.msk.msra.mxu0 %vm16127_vm2, %v14005_v32  ;;  %v14053_v60 = vpack.c.bf16 %v14827_v63, %v14826_v9 }
 0xa1f   : > { %v6981_v0 = vpop.permute.xlu0 %6980  ;;  %14013 = vmatprep.subr.msk.bf16.mxu0 %vm16127_vm2, %v14011_v59 }
 0xa21   : > { %13119 = vmatmul.mubr.msk.f32.gmra.mrb[130].mxu0 %vm842_vm1, %v6806_v33 }
 0xa22   : > { %v6975_v24 = vpop.permute.xlu1 %6974  ;;  %13121 = vmatprep.mubr.msk.f32.mxu0 %vm842_vm1, %v6808_v50 }
 0xa23   : > { %v14840_v58 = vpop.permute.xlu0 %14839 }
 0xa24   : > { %v14842_v31 = vunpack.i.h.bf16 %v14840_v58  ;;  %v14841_v17 = vunpack.i.l.bf16 %v14840_v58 }
 0xa25   : > { %13122 = vmatmul.mubr.msk.f32.gmra.mrb[132].mxu0 %vm842_vm1, %v6810_v52 }
 0xa26   : > { %v14835_v22 = vpop.permute.xlu1 %14834  ;;  %13124 = vmatprep.mubr.msk.f32.mxu0 %vm842_vm1, %v6812_v23  ;;  %14016 = vmatpush3.bf16.xpose.msk.msra.mxu0 %vm16127_vm2, %v14011_v59  ;;  %v14065_v42 = vpack.c.bf16 %v14842_v31, %v14841_v17 }
 0xa27   : > { %v18648_v46 = vpop.permute.xlu0 %7139  ;;  %14019 = vmatprep.subr.msk.bf16.mxu0 %vm16127_vm2, %v14017_v8  ;;  %v14837_v1 = vunpack.i.h.bf16 %v14835_v22  ;;  %v14836_v20 = vunpack.i.l.bf16 %v14835_v22 }
 0xa29   : > { %13125 = vmatmul.mubr.msk.f32.gmra.mrb[134].mxu0 %vm842_vm1, %v6814_v4  ;;  %v14059_v25 = vpack.c.bf16 %v14837_v1, %v14836_v20  ;;  %v14831_v20 = vunpack.i.l.bf16 %v18629_v43 }
 0xa2a   : > { %v6979_v40 = vpop.permute.xlu1 %6978  ;;  %13143 = vmatprep.mubr.msk.f32.mxu0 %vm842_vm1, %v6969_v53 }
 0xa2b   : > { %v18656_v47 = vpop.permute.xlu0 %7143 }
 0xa2e   : > { %v6983_v45 = vpop.permute.xlu1 %6982  ;;  %14022 = vmatpush3.bf16.xpose.msk.msra.mxu0 %vm16127_vm2, %v14017_v8 }
 0xa2f   : > { %v18660_v54 = vpop.permute.xlu0 %7145  ;;  %14025 = vmatprep.subr.msk.bf16.mxu0 %vm16127_vm2, %v14023_v19 }
 0xa32   : > { %v18664_v15 = vpop.permute.xlu1 %7137 }
 0xa33   : > { %v18666_v12 = vpop.permute.xlu0 %7149 }
 0xa36   : > { %v18668_v51 = vpop.permute.xlu1 %7141  ;;  %14028 = vmatpush3.bf16.xpose.msk.msra.mxu0 %vm16127_vm2, %v14023_v19 }
 0xa37   : > { %v7307_v2 = vpop.permute.xlu0 %7306  ;;  %14055 = vmatprep.subr.msk.bf16.mxu0 %vm16127_vm2, %v14053_v60 }
 0xa3a   : > { %v14845_v16 = vpop.permute.xlu1 %14844 }
 0xa3b   : > { %v7311_v34 = vpop.permute.xlu0 %7310  ;;  %v14847_v29 = vunpack.i.h.bf16 %v14845_v16  ;;  %v14846_v23 = vunpack.i.l.bf16 %v14845_v16 }
 0xa3d   : > { %13144 = vmatmul.mubr.msk.f32.vlgmr.msra.gmra.mrb[136].mxu0 %vm842_vm1, %v6971_v7  ;;  %v14071_v33 = vpack.c.bf16 %v14847_v29, %v14846_v23 }
 0xa3e   : > { %v18675_v55 = vpop.permute.xlu1 %7147  ;;  %13146 = vmatprep.mubr.msk.f32.mxu0 %vm842_vm1, %v6973_v27  ;;  %14058 = vmatpush3.bf16.xpose.msk.msra.mxu0 %vm16127_vm2, %v14053_v60  ;;  %v14832_v60 = vunpack.i.h.bf16 %v18629_v43 }
 0xa3f   : > { %v7315_v48 = vpop.permute.xlu0 %7314  ;;  %14061 = vmatprep.subr.msk.bf16.mxu0 %vm16127_vm2, %v14059_v25 }
 0xa40   : > { %v14047_v31 = vpack.c.bf16 %v14832_v60, %v14831_v20 }
 0xa41   : > { %13147 = vmatmul.mubr.msk.f32.gmra.mrb[138].mxu0 %vm842_vm1, %v6975_v24 }
 0xa42   : > { %v18683_v18 = vpop.permute.xlu1 %7151  ;;  %13149 = vmatprep.mubr.msk.f32.mxu0 %vm842_vm1, %v6977_v57  ;;  %v14816_v57 = vunpack.i.l.bf16 %v18619_v10  ;;  %v14822_v10 = vunpack.i.h.bf16 %v18614_v41 }
 0xa43   : > { %v7319_v50 = vpop.permute.xlu0 %7318 }
 0xa44   : > { %v14035_v39 = vpack.c.bf16 %v14817_v3, %v14816_v57 }
 0xa45   : > { %13150 = vmatmul.mubr.msk.f32.gmra.mrb[140].mxu0 %vm842_vm1, %v6979_v40 }
 0xa46   : > { %v7309_v37 = vpop.permute.xlu1 %7308  ;;  %13152 = vmatprep.mubr.msk.f32.mxu0 %vm842_vm1, %v6981_v0  ;;  %14064 = vmatpush3.bf16.xpose.msk.msra.mxu0 %vm16127_vm2, %v14059_v25 }
 0xa47   : > { %v18690_v6 = vpop.permute.xlu0 %14854  ;;  %14067 = vmatprep.subr.msk.bf16.mxu0 %vm16127_vm2, %v14065_v42 }
 0xa49   : > { %13153 = vmatmul.mubr.msk.f32.gmra.mrb[142].mxu0 %vm842_vm1, %v6983_v45 }
 0xa4a   : > { %v7313_v11 = vpop.permute.xlu1 %7312  ;;  %13199 = vmatprep.mubr.msk.f32.mxu0 %vm842_vm1, %v7307_v2 }
 0xa4b   : > { %v18696_v30 = vpop.permute.xlu0 %14869 }
 0xa4e   : > { %v7317_v28 = vpop.permute.xlu1 %7316  ;;  %14070 = vmatpush3.bf16.xpose.msk.msra.mxu0 %vm16127_vm2, %v14065_v42 }
 0xa4f   : > { %v18700_v53 = vpop.permute.xlu0 %14879  ;;  %14073 = vmatprep.subr.msk.bf16.mxu0 %vm16127_vm2, %v14071_v33 }
 0xa52   : > { %v7321_v35 = vpop.permute.xlu1 %7320 }
 0xa53   : > { %v14890_v21 = vpop.permute.xlu0 %14889 }
 0xa54   : > { %v14892_v52 = vunpack.i.h.bf16 %v14890_v21  ;;  %v14891_v27 = vunpack.i.l.bf16 %v14890_v21 }
 0xa56   : > { %v18704_v32 = vpop.permute.xlu1 %14849  ;;  %14076 = vmatpush3.bf16.xpose.msk.msra.mxu0 %vm16127_vm2, %v14071_v33  ;;  %v14109_v4 = vpack.c.bf16 %v14892_v52, %v14891_v27 }
 0xa57   : > { %v14900_v22 = vpop.permute.xlu0 %14899  ;;  %v14852_v43 = vunpack.i.h.bf16 %v18704_v32 }
 0xa58   : > { %14110 = vmatprep.subr.bf16.mxu0 %v14109_v4  ;;  %v14902_v40 = vunpack.i.h.bf16 %v14900_v22  ;;  %v14901_v19 = vunpack.i.l.bf16 %v14900_v22 }
 0xa5a   : > { %v18708_v26 = vpop.permute.xlu1 %14859 }
 0xa5d   : > { %13200 = vmatmul.mubr.msk.f32.vlgmr.msra.gmra.mrb[144].mxu0 %vm842_vm1, %v7309_v37 }
 0xa5e   : > { %v18711_v14 = vpop.permute.xlu1 %14864  ;;  %13202 = vmatprep.mubr.msk.f32.mxu0 %vm842_vm1, %v7311_v34  ;;  %14112 = vmatpush3.bf16.msra.mxu0 %v14109_v4 }
 0xa60   : > { %v12955_v59 = vpop.f32.mrb[112].mxu1 }
 0xa61   : > { %v5948_v7 = vpop.f32.mrb[113].mxu1  ;;  %13203 = vmatmul.mubr.msk.f32.gmra.mrb[146].mxu0 %vm842_vm1, %v7313_v11 }
 0xa62   : > { %v18717_v0 = vpop.permute.xlu1 %14874  ;;  %13051 = vmatprep.mubr.msk.f32.mxu1 %vm842_vm1, %v5948_v7  ;;  %13205 = vmatprep.mubr.msk.f32.mxu0 %vm842_vm1, %v7315_v48  ;;  %v14117_v48 = vpack.c.bf16 %v14902_v40, %v14901_v19  ;;  %v14862_v40 = vunpack.i.h.bf16 %v18708_v26  ;;  %v14861_v19 = vunpack.i.l.bf16 %v18708_v26  ;;  %v14871_v26 = vunpack.i.l.bf16 %v18696_v30 }
 0xa63   : > { %13052 = vmatmul.mubr.msk.f32.vlgmr.msra.gmra.mrb[80].mxu1 %vm842_vm1, %v12955_v59 }
 0xa64   : > { %14034 = vmatpush3.bf16.xpose.msk.msra.mxu1 %vm16127_vm2, %v18612_v5  ;;  %v14041_v5 = vpack.c.bf16 %v14822_v10, %v14821_v62 }
 0xa65   : > { %14037 = vmatprep.subr.msk.bf16.mxu1 %vm16127_vm2, %v14035_v39  ;;  %13206 = vmatmul.mubr.msk.f32.gmra.mrb[148].mxu0 %vm842_vm1, %v7317_v28 }
 0xa66   : > { %v18730_v24 = vpop.permute.xlu1 %14884  ;;  %v12958_v58 = vpop.f32.mrb[114].mxu1  ;;  %13208 = vmatprep.mubr.msk.f32.mxu0 %vm842_vm1, %v7319_v50  ;;  %v14851_v50 = vunpack.i.l.bf16 %v18704_v32 }
 0xa67   : > { %v5958_v8 = vpop.f32.mrb[115].mxu1 }
 0xa68   : > { %13054 = vmatprep.mubr.msk.f32.mxu1 %vm842_vm1, %v5958_v8  ;;  %v14077_v42 = vpack.c.bf16 %v14852_v43, %v14851_v50 }
 0xa69   : > { %13055 = vmatmul.mubr.msk.f32.gmra.mrb[82].mxu1 %vm842_vm1, %v12958_v58  ;;  %13209 = vmatmul.mubr.msk.f32.gmra.mrb[150].mxu0 %vm842_vm1, %v7321_v35 }
 0xa6a   : > { %v14895_v61 = vpop.permute.xlu1 %14894  ;;  %v12961_v49 = vpop.f32.mrb[116].mxu1 }
 0xa6b   : > { %v14897_v45 = vunpack.i.h.bf16 %v14895_v61  ;;  %v14896_v41 = vunpack.i.l.bf16 %v14895_v61  ;;  %v5968_v63 = vpop.f32.mrb[117].mxu1  ;;  %v14857_v61 = vunpack.i.h.bf16 %v18690_v6 }
 0xa6c   : > { %14040 = vmatpush3.bf16.xpose.msk.msra.mxu1 %vm16127_vm2, %v14035_v39  ;;  %13057 = vmatprep.mubr.msk.f32.mxu1 %vm842_vm1, %v5968_v63 }
 0xa6d   : > { %14043 = vmatprep.subr.msk.bf16.mxu1 %vm16127_vm2, %v14041_v5  ;;  %13058 = vmatmul.mubr.msk.f32.gmra.mrb[84].mxu1 %vm842_vm1, %v12961_v49  ;;  %v14113_v9 = vpack.c.bf16 %v14897_v45, %v14896_v41  ;;  %v14856_v49 = vunpack.i.l.bf16 %v18690_v6  ;;  %v14867_v6 = vunpack.i.h.bf16 %v18711_v14  ;;  %v14866_v41 = vunpack.i.l.bf16 %v18711_v14 }
 0xa6e   : > { %v14905_v2 = vpop.permute.xlu1 %14904  ;;  %v12964_v1 = vpop.f32.mrb[118].mxu1 }
 0xa6f   : > { %v14907_v16 = vunpack.i.h.bf16 %v14905_v2  ;;  %v14906_v34 = vunpack.i.l.bf16 %v14905_v2  ;;  %v5978_v25 = vpop.f32.mrb[119].mxu1  ;;  %14114 = vmatprep.subr.bf16.mxu0 %v14113_v9  ;;  %v14081_v45 = vpack.c.bf16 %v14857_v61, %v14856_v49 }
 0xa70   : > { %13060 = vmatprep.mubr.msk.f32.mxu1 %vm842_vm1, %v5978_v25  ;;  %14116 = vmatpush3.bf16.msra.mxu0 %v14113_v9 }
 0xa71   : > { %13061 = vmatmul.mubr.msk.f32.gmra.mrb[86].mxu1 %vm842_vm1, %v12964_v1  ;;  %14118 = vmatprep.subr.bf16.mxu0 %v14117_v48  ;;  %v14121_v17 = vpack.c.bf16 %v14907_v16, %v14906_v34 }
 0xa74   : > { %14046 = vmatpush3.bf16.xpose.msk.msra.mxu1 %vm16127_vm2, %v14041_v5  ;;  %14120 = vmatpush3.bf16.msra.mxu0 %v14117_v48 }
 0xa75   : > { %14049 = vmatprep.subr.msk.bf16.mxu1 %vm16127_vm2, %v14047_v31  ;;  %14122 = vmatprep.subr.bf16.mxu0 %v14121_v17 }
 0xa78   : > { %14124 = vmatpush3.bf16.msra.mxu0 %v14121_v17 }
 0xa7c   : > { %14052 = vmatpush3.bf16.xpose.msk.msra.mxu1 %vm16127_vm2, %v14047_v31 }
 0xa7d   : > { %14078 = vmatprep.subr.bf16.mxu1 %v14077_v42  ;;  %v12983_v37 = vpop.f32.mrb[112].mxu0 }
 0xa7e   : > { %v6101_v29 = vpop.f32.mrb[113].mxu0 }
 0xa7f   : > { %13063 = vmatprep.mubr.msk.f32.mxu1 %vm842_vm1, %v6101_v29 }
 0xa80   : > { %13064 = vmatmul.mubr.msk.f32.gmra.mrb[88].mxu1 %vm842_vm1, %v12983_v37 }
 0xa84   : > { %v12986_v23 = vpop.f32.mrb[114].mxu0 }
 0xa85   : > { %v6111_v11 = vpop.f32.mrb[115].mxu0 }
 0xa86   : > { %13066 = vmatprep.mubr.msk.f32.mxu1 %vm842_vm1, %v6111_v11 }
 0xa87   : > { %13067 = vmatmul.mubr.msk.f32.gmra.mrb[90].mxu1 %vm842_vm1, %v12986_v23 }
 0xa88   : > { %v12989_v33 = vpop.f32.mrb[116].mxu0 }
 0xa89   : > { %v6121_v28 = vpop.f32.mrb[117].mxu0 }
 0xa8a   : > { %13069 = vmatprep.mubr.msk.f32.mxu1 %vm842_vm1, %v6121_v28 }
 0xa8b   : > { %13070 = vmatmul.mubr.msk.f32.gmra.mrb[92].mxu1 %vm842_vm1, %v12989_v33 }
 0xa8c   : > { %v12992_v44 = vpop.f32.mrb[118].mxu0 }
 0xa8d   : > { %v6131_v35 = vpop.f32.mrb[119].mxu0 }
 0xa8e   : > { %13072 = vmatprep.mubr.msk.f32.mxu1 %vm842_vm1, %v6131_v35 }
 0xa8f   : > { %13073 = vmatmul.mubr.msk.f32.gmra.mrb[94].mxu1 %vm842_vm1, %v12992_v44 }
 0xa9d   : > { %v13011_v21 = vpop.f32.mrb[120].mxu1 }
 0xa9e   : > { %v6254_v52 = vpop.f32.mrb[121].mxu1 }
 0xa9f   : > { %13075 = vmatprep.mubr.msk.f32.mxu1 %vm842_vm1, %v6254_v52 }
 0xaa0   : > { %13076 = vmatmul.mubr.msk.f32.gmra.mrb[96].mxu1 %vm842_vm1, %v13011_v21 }
 0xaa1   : > { %v13014_v27 = vpop.f32.mrb[122].mxu1 }
 0xaa2   : > { %v6264_v32 = vpop.f32.mrb[123].mxu1 }
 0xaa3   : > { %13078 = vmatprep.mubr.msk.f32.mxu1 %vm842_vm1, %v6264_v32 }
 0xaa4   : > { %13079 = vmatmul.mubr.msk.f32.gmra.mrb[98].mxu1 %vm842_vm1, %v13014_v27 }
 0xaa5   : > { %v13017_v4 = vpop.f32.mrb[124].mxu1 }
 0xaa6   : > { %v6274_v3 = vpop.f32.mrb[125].mxu1 }
 0xaa7   : > { %13081 = vmatprep.mubr.msk.f32.mxu1 %vm842_vm1, %v6274_v3 }
 0xaa8   : > { %13082 = vmatmul.mubr.msk.f32.gmra.mrb[100].mxu1 %vm842_vm1, %v13017_v4 }
 0xaa9   : > { %v13020_v57 = vpop.f32.mrb[126].mxu1 }
 0xaaa   : > { %v6284_v59 = vpop.f32.mrb[127].mxu1 }
 0xaab   : > { %13084 = vmatprep.mubr.msk.f32.mxu1 %vm842_vm1, %v6284_v59 }
 0xaac   : > { %13085 = vmatmul.mubr.msk.f32.gmra.mrb[102].mxu1 %vm842_vm1, %v13020_v57 }
 0xacb   : > { %v13039_v7 = vpop.f32.mrb[120].mxu0 }
 0xacc   : > { %v6407_v39 = vpop.f32.mrb[121].mxu0 }
 0xacd   : > { %13087 = vmatprep.mubr.msk.f32.mxu1 %vm842_vm1, %v6407_v39 }
 0xace   : > { %13088 = vmatmul.mubr.msk.f32.gmra.mrb[104].mxu1 %vm842_vm1, %v13039_v7 }
 0xacf   : > { %v13042_v10 = vpop.f32.mrb[122].mxu0 }
 0xad0   : > { %v6417_v62 = vpop.f32.mrb[123].mxu0 }
 0xad1   : > { %13090 = vmatprep.mubr.msk.f32.mxu1 %vm842_vm1, %v6417_v62 }
 0xad2   : > { %13091 = vmatmul.mubr.msk.f32.gmra.mrb[106].mxu1 %vm842_vm1, %v13042_v10 }
 0xad3   : > { %v13045_v58 = vpop.f32.mrb[124].mxu0 }
 0xad4   : > { %v6427_v8 = vpop.f32.mrb[125].mxu0 }
 0xad5   : > { %13093 = vmatprep.mubr.msk.f32.mxu1 %vm842_vm1, %v6427_v8 }
 0xad6   : > { %13094 = vmatmul.mubr.msk.f32.gmra.mrb[108].mxu1 %vm842_vm1, %v13045_v58 }
 0xad7   : > { %v13048_v22 = vpop.f32.mrb[126].mxu0 }
 0xad8   : > { %v6437_v5 = vpop.f32.mrb[127].mxu0 }
 0xad9   : > { %13096 = vmatprep.mubr.msk.f32.mxu1 %vm842_vm1, %v6437_v5 }
 0xada   : > { %13097 = vmatmul.mubr.msk.f32.gmra.mrb[110].mxu1 %vm842_vm1, %v13048_v22 }
 0xadb   : > { %13171 = vmatprep.mubr.msk.f32.mxu1 %vm842_vm1, %v18664_v15  ;;  %v14085_v15 = vpack.c.bf16 %v14862_v40, %v14861_v19 }
 0xade   : > { %13172 = vmatmul.mubr.msk.f32.vlgmr.msra.gmra.mrb[128].mxu1 %vm842_vm1, %v18648_v46  ;;  %v14872_v46 = vunpack.i.h.bf16 %v18696_v30 }
 0xadf   : > { %14080 = vmatpush3.bf16.msra.mxu1 %v14077_v42  ;;  %13174 = vmatprep.mubr.msk.f32.mxu1 %vm842_vm1, %v18668_v51  ;;  %v14089_v51 = vpack.c.bf16 %v14867_v6, %v14866_v41 }
 0xae0   : > { %14082 = vmatprep.subr.bf16.mxu1 %v14081_v45 }
 0xae2   : > { %13175 = vmatmul.mubr.msk.f32.gmra.mrb[130].mxu1 %vm842_vm1, %v18656_v47  ;;  %v18802_v47 = vpack.c.bf16 %v14872_v46, %v14871_v26 }
 0xae3   : > { %14084 = vmatpush3.bf16.msra.mxu1 %v14081_v45  ;;  %13177 = vmatprep.mubr.msk.f32.mxu1 %vm842_vm1, %v18660_v54 }
 0xae4   : > { %14086 = vmatprep.subr.bf16.mxu1 %v14085_v15 }
 0xae6   : > { %13178 = vmatmul.mubr.msk.f32.gmra.mrb[132].mxu1 %vm842_vm1, %v18675_v55 }
 0xae7   : > { %14088 = vmatpush3.bf16.msra.mxu1 %v14085_v15  ;;  %13180 = vmatprep.mubr.msk.f32.mxu1 %vm842_vm1, %v18666_v12 }
 0xae8   : > { %14090 = vmatprep.subr.bf16.mxu1 %v14089_v51 }
 0xaea   : > { %13181 = vmatmul.mubr.msk.f32.gmra.mrb[134].mxu1 %vm842_vm1, %v18683_v18 }
 0xaeb   : > { %14092 = vmatpush3.bf16.msra.mxu1 %v14089_v51 }
 0xaec   : > { %14094 = vmatprep.subr.bf16.mxu1 %v18802_v47 }
 0xaf0   : > { %v13117_v54 = vpop.f32.mrb[128].mxu0 }
 0xaf1   : > { %v18805_v14 = vmul.f32 0.35355338, %v13117_v54  ;;  %v6929_v30 = vpop.f32.mrb[129].mxu0 }
 0xaf2   : > { %v18807_v63 = vmul.f32 0.35355338, %v6929_v30 }
 0xaf3   : > { %v7510_v55 = vsel %vm1495_vm3, %v18805_v14, -inf }
 0xaf4   : > { %7511 = vmax.xlane.f32.xlu1 %v7510_v55  ;;  %v13120_v12 = vpop.f32.mrb[130].mxu0  ;;  %v7507_v9 = vsel %vm1495_vm3, %v18807_v63, -inf }
 0xaf5   : > { %v18813_v18 = vmul.f32 0.35355338, %v13120_v12  ;;  %7508 = vmax.xlane.f32.xlu0 %v7507_v9  ;;  %v6939_v60 = vpop.f32.mrb[131].mxu0 }
 0xaf6   : > { %v18817_v1 = vmul.f32 0.35355338, %v6939_v60 }
 0xaf7   : > { %v7516_v2 = vsel %vm1495_vm3, %v18813_v18, -inf }
 0xaf8   : > { %v13123_v20 = vpop.f32.mrb[132].mxu0  ;;  %v7513_v31 = vsel %vm1495_vm3, %v18817_v1, -inf }
 0xaf9   : > { %7517 = vmax.xlane.f32.xlu0 %v7516_v2  ;;  %v6949_v16 = vpop.f32.mrb[133].mxu0  ;;  %v18821_v25 = vmul.f32 0.35355338, %v13123_v20 }
 0xafa   : > { %v18819_v34 = vmul.f32 0.35355338, %v6949_v16 }
 0xafb   : > { %v7522_v37 = vsel %vm1495_vm3, %v18821_v25, -inf }
 0xafc   : > { %v13126_v48 = vpop.f32.mrb[134].mxu0  ;;  %v7519_v17 = vsel %vm1495_vm3, %v18819_v34, -inf }
 0xafd   : > { %7514 = vmax.xlane.f32.xlu0 %v7513_v31  ;;  %7520 = vmax.xlane.f32.xlu1 %v7519_v17  ;;  %v6959_v43 = vpop.f32.mrb[135].mxu0  ;;  %v18829_v42 = vmul.f32 0.35355338, %v13126_v48 }
 0xafe   : > { %v18827_v50 = vmul.f32 0.35355338, %v6959_v43 }
 0xaff   : > { %v7528_v23 = vsel %vm1495_vm3, %v18829_v42, -inf }
 0xb00   : > { %v7525_v29 = vsel %vm1495_vm3, %v18827_v50, -inf }
 0xb01   : > { %7523 = vmax.xlane.f32.xlu0 %v7522_v37  ;;  %7526 = vmax.xlane.f32.xlu1 %v7525_v29 }
 0xb05   : > { %7529 = vmax.xlane.f32.xlu0 %v7528_v23 }
 0xb10   : > { %v13145_v11 = vpop.f32.mrb[136].mxu0 }
 0xb11   : > { %v18837_v33 = vmul.f32 0.35355338, %v13145_v11  ;;  %v7098_v28 = vpop.f32.mrb[137].mxu0 }
 0xb12   : > { %v18839_v44 = vmul.f32 0.35355338, %v7098_v28 }
 0xb13   : > { %v7534_v35 = vsel %vm1495_vm3, %v18837_v33, -inf }
 0xb14   : > { %7535 = vmax.xlane.f32.xlu0 %v7534_v35  ;;  %v13148_v21 = vpop.f32.mrb[138].mxu0  ;;  %v7531_v52 = vsel %vm1495_vm3, %v18839_v44, -inf }
 0xb15   : > { %v18845_v27 = vmul.f32 0.35355338, %v13148_v21  ;;  %7532 = vmax.xlane.f32.xlu1 %v7531_v52  ;;  %v7108_v32 = vpop.f32.mrb[139].mxu0 }
 0xb16   : > { %v18847_v4 = vmul.f32 0.35355338, %v7108_v32 }
 0xb17   : > { %v7540_v3 = vsel %vm1495_vm3, %v18845_v27, -inf }
 0xb18   : > { %7541 = vmax.xlane.f32.xlu0 %v7540_v3  ;;  %v13151_v57 = vpop.f32.mrb[140].mxu0  ;;  %v7537_v59 = vsel %vm1495_vm3, %v18847_v4, -inf }
 0xb19   : > { %v18853_v7 = vmul.f32 0.35355338, %v13151_v57  ;;  %7538 = vmax.xlane.f32.xlu1 %v7537_v59  ;;  %v7118_v39 = vpop.f32.mrb[141].mxu0 }
 0xb1a   : > { %v18855_v10 = vmul.f32 0.35355338, %v7118_v39 }
 0xb1b   : > { %v7546_v62 = vsel %vm1495_vm3, %v18853_v7, -inf }
 0xb1c   : > { %7547 = vmax.xlane.f32.xlu0 %v7546_v62  ;;  %v13154_v58 = vpop.f32.mrb[142].mxu0  ;;  %v7543_v8 = vsel %vm1495_vm3, %v18855_v10, -inf }
 0xb1d   : > { %v18861_v22 = vmul.f32 0.35355338, %v13154_v58  ;;  %7544 = vmax.xlane.f32.xlu1 %v7543_v8  ;;  %v7128_v5 = vpop.f32.mrb[143].mxu0 }
 0xb1e   : > { %v18863_v61 = vmul.f32 0.35355338, %v7128_v5 }
 0xb1f   : > { %v7552_v49 = vsel %vm1495_vm3, %v18861_v22, -inf }
 0xb20   : > { %7553 = vmax.xlane.f32.xlu0 %v7552_v49  ;;  %v7549_v40 = vsel %vm1495_vm3, %v18863_v61, -inf }
 0xb21   : > { %7550 = vmax.xlane.f32.xlu1 %v7549_v40 }
 0xb30   : > { %v13201_v19 = vpop.f32.mrb[144].mxu0 }
 0xb31   : > { %v18869_v45 = vmul.f32 0.35355338, %v13201_v19  ;;  %v7436_v6 = vpop.f32.mrb[145].mxu0 }
 0xb32   : > { %v18871_v41 = vmul.f32 0.35355338, %v7436_v6 }
 0xb33   : > { %v7582_v15 = vsel %vm1495_vm3, %v18869_v45, -inf }
 0xb34   : > { %7583 = vmax.xlane.f32.xlu0 %v7582_v15  ;;  %v13204_v46 = vpop.f32.mrb[146].mxu0  ;;  %v7579_v26 = vsel %vm1495_vm3, %v18871_v41, -inf }
 0xb35   : > { %v18877_v51 = vmul.f32 0.35355338, %v13204_v46  ;;  %7580 = vmax.xlane.f32.xlu1 %v7579_v26  ;;  %v7446_v54 = vpop.f32.mrb[147].mxu0 }
 0xb36   : > { %v18879_v30 = vmul.f32 0.35355338, %v7446_v54 }
 0xb37   : > { %v7588_v55 = vsel %vm1495_vm3, %v18877_v51, -inf }
 0xb38   : > { %7589 = vmax.xlane.f32.xlu0 %v7588_v55  ;;  %v13207_v12 = vpop.f32.mrb[148].mxu0  ;;  %v7585_v9 = vsel %vm1495_vm3, %v18879_v30, -inf }
 0xb39   : > { %v18885_v60 = vmul.f32 0.35355338, %v13207_v12  ;;  %7586 = vmax.xlane.f32.xlu1 %v7585_v9  ;;  %v7456_v2 = vpop.f32.mrb[149].mxu0 }
 0xb3a   : > { %v18887_v20 = vmul.f32 0.35355338, %v7456_v2 }
 0xb3b   : > { %v7594_v16 = vsel %vm1495_vm3, %v18885_v60, -inf }
 0xb3c   : > { %7595 = vmax.xlane.f32.xlu0 %v7594_v16  ;;  %v13210_v48 = vpop.f32.mrb[150].mxu0  ;;  %v7591_v31 = vsel %vm1495_vm3, %v18887_v20, -inf }
 0xb3d   : > { %v18893_v17 = vmul.f32 0.35355338, %v13210_v48  ;;  %7592 = vmax.xlane.f32.xlu1 %v7591_v31  ;;  %v7466_v43 = vpop.f32.mrb[151].mxu0 }
 0xb3e   : > { %v18895_v37 = vmul.f32 0.35355338, %v7466_v43 }
 0xb3f   : > { %v7600_v29 = vsel %vm1495_vm3, %v18893_v17, -inf }
 0xb40   : > { %7601 = vmax.xlane.f32.xlu0 %v7600_v29  ;;  %v7597_v23 = vsel %vm1495_vm3, %v18895_v37, -inf }
 0xb41   : > { %7598 = vmax.xlane.f32.xlu1 %v7597_v23 }
 0xb81   : > { %v7512_v11 = vpop.xlane.xlu1 %7511 }
 0xb82   : > { %v7604_v28 = vsub.f32 %v18805_v14, %v7512_v11  ;;  %v7509_v35 = vpop.xlane.xlu0 %7508 }
 0xb83   : > { %v7603_v21 = vsub.f32 %v18807_v63, %v7509_v35 }
 0xb84   : > { %v7637_v52 = vmul.f32 1.442695, %v7604_v28 }
 0xb85   : > { %v7635_v32 = vmul.f32 1.442695, %v7603_v21 }
 0xb86   : > { %15312 = vpow2.f32 %v7637_v52  ;;  %v7518_v3 = vpop.xlane.xlu0 %7517 }
 0xb87   : > { %15314 = vpow2.f32 %v7635_v32  ;;  %v7606_v57 = vsub.f32 %v18813_v18, %v7518_v3 }
 0xb89   : > { %v7641_v59 = vmul.f32 1.442695, %v7606_v57 }
 0xb8a   : > { %v7515_v39 = vpop.xlane.xlu0 %7514  ;;  %v7521_v62 = vpop.xlane.xlu1 %7520 }
 0xb8b   : > { %15316 = vpow2.f32 %v7641_v59  ;;  %v7605_v58 = vsub.f32 %v18817_v1, %v7515_v39  ;;  %v7607_v8 = vsub.f32 %v18819_v34, %v7521_v62 }
 0xb8d   : > { %v7639_v5 = vmul.f32 1.442695, %v7605_v58  ;;  %v7643_v14 = vmul.f32 1.442695, %v7607_v8 }
 0xb8e   : > { %v7524_v49 = vpop.xlane.xlu0 %7523  ;;  %v7527_v40 = vpop.xlane.xlu1 %7526 }
 0xb8f   : > { %15318 = vpow2.f32 %v7639_v5  ;;  %v7608_v63 = vsub.f32 %v18821_v25, %v7524_v49  ;;  %v7609_v15 = vsub.f32 %v18827_v50, %v7527_v40 }
 0xb90   : > { %v18907_v19 = vpop.eup %15312  ;;  %15320 = vpow2.f32 %v7643_v14 }
 0xb91   : > { %v18909_v6 = vpop.eup %15314  ;;  %v7645_v18 = vmul.f32 1.442695, %v7608_v63  ;;  %v7702_v1 = vsel %vm1495_vm3, %v18907_v19, 0.0  ;;  %v7647_v54 = vmul.f32 1.442695, %v7609_v15 }
 0xb92   : > { %v7530_v46 = vpop.xlane.xlu0 %7529  ;;  %7703 = vadd.xlane.f32.xlu0 %v7702_v1  ;;  %v7699_v34 = vsel %vm1495_vm3, %v18909_v6, 0.0 }
 0xb93   : > { %15322 = vpow2.f32 %v7645_v18  ;;  %v7610_v26 = vsub.f32 %v18829_v42, %v7530_v46  ;;  %7700 = vadd.xlane.f32.xlu1 %v7699_v34 }
 0xb95   : > { %v18917_v25 = vpop.eup %15316  ;;  %v7649_v55 = vmul.f32 1.442695, %v7610_v26 }
 0xb96   : > { %v7708_v12 = vsel %vm1495_vm3, %v18917_v25, 0.0 }
 0xb97   : > { %15324 = vpow2.f32 %v7649_v55  ;;  %7709 = vadd.xlane.f32.xlu0 %v7708_v12 }
 0xb98   : > { %15326 = vpow2.f32 %v7647_v54 }
 0xb99   : > { %v18921_v50 = vpop.eup %15318 }
 0xb9a   : > { %v7705_v9 = vsel %vm1495_vm3, %v18921_v50, 0.0  ;;  %v18925_v2 = vpop.eup %15320 }
 0xb9b   : > { %7706 = vadd.xlane.f32.xlu1 %v7705_v9  ;;  %v7711_v48 = vsel %vm1495_vm3, %v18925_v2, 0.0 }
 0xb9d   : > { %v18927_v42 = vpop.eup %15322 }
 0xb9e   : > { %v7714_v16 = vsel %vm1495_vm3, %v18927_v42, 0.0 }
 0xb9f   : > { %7715 = vadd.xlane.f32.xlu0 %v7714_v16  ;;  %7712 = vadd.xlane.f32.xlu1 %v7711_v48 }
 0xba1   : > { %v18933_v31 = vpop.eup %15324  ;;  %v7536_v43 = vpop.xlane.xlu0 %7535 }
 0xba2   : > { %v7612_v29 = vsub.f32 %v18837_v33, %v7536_v43  ;;  %v7533_v23 = vpop.xlane.xlu1 %7532  ;;  %v7720_v11 = vsel %vm1495_vm3, %v18933_v31, 0.0  ;;  %v18938_v28 = vpop.eup %15326 }
 0xba3   : > { %v7611_v35 = vsub.f32 %v18839_v44, %v7533_v23  ;;  %7721 = vadd.xlane.f32.xlu0 %v7720_v11  ;;  %v7717_v59 = vsel %vm1495_vm3, %v18938_v28, 0.0 }
 0xba4   : > { %v7653_v21 = vmul.f32 1.442695, %v7612_v29 }
 0xba5   : > { %v7651_v52 = vmul.f32 1.442695, %v7611_v35  ;;  %v7542_v32 = vpop.xlane.xlu0 %7541 }
 0xba6   : > { %15328 = vpow2.f32 %v7653_v21  ;;  %v7614_v3 = vsub.f32 %v18845_v27, %v7542_v32  ;;  %v7539_v57 = vpop.xlane.xlu1 %7538 }
 0xba7   : > { %15330 = vpow2.f32 %v7651_v52  ;;  %v7613_v33 = vsub.f32 %v18847_v4, %v7539_v57  ;;  %7718 = vadd.xlane.f32.xlu0 %v7717_v59 }
 0xba8   : > { %v7657_v39 = vmul.f32 1.442695, %v7614_v3 }
 0xba9   : > { %v7655_v62 = vmul.f32 1.442695, %v7613_v33  ;;  %v7548_v58 = vpop.xlane.xlu0 %7547 }
 0xbaa   : > { %15332 = vpow2.f32 %v7657_v39  ;;  %v7616_v44 = vsub.f32 %v18853_v7, %v7548_v58  ;;  %v7545_v8 = vpop.xlane.xlu1 %7544 }
 0xbab   : > { %v7615_v5 = vsub.f32 %v18855_v10, %v7545_v8  ;;  %15334 = vpow2.f32 %v7655_v62 }
 0xbac   : > { %v7661_v14 = vmul.f32 1.442695, %v7616_v44 }
 0xbad   : > { %v7554_v27 = vpop.xlane.xlu0 %7553  ;;  %v7659_v40 = vmul.f32 1.442695, %v7615_v5 }
 0xbae   : > { %15336 = vpow2.f32 %v7661_v14  ;;  %v7618_v49 = vsub.f32 %v18861_v22, %v7554_v27  ;;  %v7551_v15 = vpop.xlane.xlu1 %7550 }
 0xbaf   : > { %15338 = vpow2.f32 %v7659_v40  ;;  %v7617_v22 = vsub.f32 %v18863_v61, %v7551_v15 }
 0xbb0   : > { %v18948_v63 = vpop.eup %15328  ;;  %v7665_v4 = vmul.f32 1.442695, %v7618_v49 }
 0xbb1   : > { %v18950_v18 = vpop.eup %15330  ;;  %v13173_v1 = vpop.f32.mrb[128].mxu1  ;;  %v7726_v7 = vsel %vm1495_vm3, %v18948_v63, 0.0  ;;  %v7663_v16 = vmul.f32 1.442695, %v7617_v22 }
 0xbb2   : > { %7727 = vadd.xlane.f32.xlu0 %v7726_v7  ;;  %v7267_v46 = vpop.f32.mrb[129].mxu1  ;;  %v7723_v10 = vsel %vm1495_vm3, %v18950_v18, 0.0  ;;  %15340 = vpow2.f32 %v7665_v4  ;;  %v18965_v48 = vmul.f32 0.35355338, %v13173_v1 }
 0xbb3   : > { %7724 = vadd.xlane.f32.xlu1 %v7723_v10  ;;  %v18967_v43 = vmul.f32 0.35355338, %v7267_v46  ;;  %15342 = vpow2.f32 %v7663_v16 }
 0xbb4   : > { %v18956_v34 = vpop.eup %15332  ;;  %v7558_v52 = vsel %vm1495_vm3, %v18965_v48, -inf }
 0xbb5   : > { %v13176_v26 = vpop.f32.mrb[130].mxu1  ;;  %v7732_v54 = vsel %vm1495_vm3, %v18956_v34, 0.0  ;;  %v18961_v55 = vpop.eup %15334  ;;  %v7555_v32 = vsel %vm1495_vm3, %v18967_v43, -inf }
 0xbb6   : > { %7733 = vadd.xlane.f32.xlu0 %v7732_v54  ;;  %v7277_v12 = vpop.f32.mrb[131].mxu1  ;;  %v7729_v23 = vsel %vm1495_vm3, %v18961_v55, 0.0  ;;  %v18981_v59 = vmul.f32 0.35355338, %v13176_v26 }
 0xbb7   : > { %v18983_v33 = vmul.f32 0.35355338, %v7277_v12 }
 0xbb8   : > { %v18963_v9 = vpop.eup %15336  ;;  %v7564_v44 = vsel %vm1495_vm3, %v18981_v59, -inf }
 0xbb9   : > { %v13179_v29 = vpop.f32.mrb[132].mxu1  ;;  %v7738_v61 = vsel %vm1495_vm3, %v18963_v9, 0.0  ;;  %v18973_v35 = vpop.eup %15338  ;;  %v7561_v8 = vsel %vm1495_vm3, %v18983_v33, -inf }
 0xbba   : > { %7730 = vadd.xlane.f32.xlu0 %v7729_v23  ;;  %7739 = vadd.xlane.f32.xlu1 %v7738_v61  ;;  %v7287_v11 = vpop.f32.mrb[133].mxu1  ;;  %v7735_v39 = vsel %vm1495_vm3, %v18973_v35, 0.0  ;;  %v18997_v14 = vmul.f32 0.35355338, %v13179_v29 }
 0xbbb   : > { %v18989_v58 = vmul.f32 0.35355338, %v7287_v11 }
 0xbbc   : > { %v18979_v3 = vpop.eup %15340  ;;  %v7570_v15 = vsel %vm1495_vm3, %v18997_v14, -inf }
 0xbbd   : > { %v13182_v21 = vpop.f32.mrb[134].mxu1  ;;  %v7744_v62 = vsel %vm1495_vm3, %v18979_v3, 0.0  ;;  %v18995_v5 = vpop.eup %15342  ;;  %v7567_v40 = vsel %vm1495_vm3, %v18989_v58, -inf }
 0xbbe   : > { %7559 = vmax.xlane.f32.xlu0 %v7558_v52  ;;  %7556 = vmax.xlane.f32.xlu1 %v7555_v32  ;;  %v7297_v57 = vpop.f32.mrb[135].mxu1  ;;  %v7741_v49 = vsel %vm1495_vm3, %v18995_v5, 0.0  ;;  %v19005_v4 = vmul.f32 0.35355338, %v13182_v21 }
 0xbbf   : > { %v18999_v27 = vmul.f32 0.35355338, %v7297_v57 }
 0xbc0   : > { %v7576_v7 = vsel %vm1495_vm3, %v19005_v4, -inf }
 0xbc1   : > { %v7573_v1 = vsel %vm1495_vm3, %v18999_v27, -inf  ;;  %v7584_v46 = vpop.xlane.xlu0 %7583 }
 0xbc2   : > { %7736 = vadd.xlane.f32.xlu0 %v7735_v39  ;;  %7745 = vadd.xlane.f32.xlu1 %v7744_v62  ;;  %v7581_v10 = vpop.xlane.xlu1 %7580  ;;  %v7628_v26 = vsub.f32 %v18869_v45, %v7584_v46 }
 0xbc3   : > { %v7627_v12 = vsub.f32 %v18871_v41, %v7581_v10 }
 0xbc4   : > { %v7685_v29 = vmul.f32 1.442695, %v7628_v26 }
 0xbc5   : > { %v7590_v22 = vpop.xlane.xlu0 %7589  ;;  %v7683_v61 = vmul.f32 1.442695, %v7627_v12 }
 0xbc6   : > { %7565 = vmax.xlane.f32.xlu0 %v7564_v44  ;;  %7562 = vmax.xlane.f32.xlu1 %v7561_v8  ;;  %v7587_v54 = vpop.xlane.xlu1 %7586  ;;  %v7630_v23 = vsub.f32 %v18877_v51, %v7590_v22  ;;  %15344 = vpow2.f32 %v7685_v29 }
 0xbc7   : > { %v7629_v11 = vsub.f32 %v18879_v30, %v7587_v54  ;;  %15346 = vpow2.f32 %v7683_v61 }
 0xbc9   : > { %v7596_v16 = vpop.xlane.xlu0 %7595 }
 0xbca   : > { %7742 = vadd.xlane.f32.xlu0 %v7741_v49  ;;  %7568 = vmax.xlane.f32.xlu1 %v7567_v40  ;;  %v7593_v21 = vpop.xlane.xlu1 %7592  ;;  %v7632_v52 = vsub.f32 %v18885_v60, %v7596_v16 }
 0xbcb   : > { %v7631_v45 = vsub.f32 %v18887_v20, %v7593_v21 }
 0xbcc   : > { %v7693_v57 = vmul.f32 1.442695, %v7632_v52  ;;  %v14876_v52 = vunpack.i.l.bf16 %v18717_v0 }
 0xbcd   : > { %v7602_v32 = vpop.xlane.xlu0 %7601  ;;  %v7691_v51 = vmul.f32 1.442695, %v7631_v45 }
 0xbce   : > { %7571 = vmax.xlane.f32.xlu0 %v7570_v15  ;;  %7574 = vmax.xlane.f32.xlu1 %v7573_v1  ;;  %v7634_v41 = vsub.f32 %v18893_v17, %v7602_v32  ;;  %v7599_v39 = vpop.xlane.xlu1 %7598 }
 0xbcf   : > { %v7633_v30 = vsub.f32 %v18895_v37, %v7599_v39  ;;  %v14881_v39 = vunpack.i.l.bf16 %v18700_v53 }
 0xbd0   : > { %v7697_v62 = vmul.f32 1.442695, %v7634_v41  ;;  %v19025_v44 = vpop.eup %15344  ;;  %v14882_v41 = vunpack.i.h.bf16 %v18700_v53 }
 0xbd1   : > { %v7695_v60 = vmul.f32 1.442695, %v7633_v30  ;;  %v19027_v8 = vpop.eup %15346  ;;  %v7774_v20 = vsel %vm1495_vm3, %v19025_v44, 0.0 }
 0xbd2   : > { %7577 = vmax.xlane.f32.xlu0 %v7576_v7  ;;  %v7771_v40 = vsel %vm1495_vm3, %v19027_v8, 0.0 }
 0xbdf   : > { %14914 = vrot.lane.b32.xlu1 %v21021_v36, %s15682_s29  ;;  %v7689_v36 = vmul.f32 1.442695, %v7630_v23 }
 0xbe1   : > { %15348 = vpow2.f32 %v7689_v36  ;;  %v14877_v36 = vunpack.i.h.bf16 %v18717_v0 }
 0xbe8   : > { %14909 = vrot.lane.b32.xlu0 %v21015_v38, %s15682_s29  ;;  %v7687_v38 = vmul.f32 1.442695, %v7629_v11 }
 0xbea   : > { %15350 = vpow2.f32 %v7687_v38 }
 0xbeb   : > { %15352 = vpow2.f32 %v7693_v57  ;;  %v19031_v49 = vpop.eup %15348 }
 0xbec   : > { %15354 = vpow2.f32 %v7691_v51  ;;  %v7780_v37 = vsel %vm1495_vm3, %v19031_v49, 0.0  ;;  %v14097_v51 = vpack.c.bf16 %v14877_v36, %v14876_v52 }
 0xbed   : > { %15356 = vpow2.f32 %v7697_v62 }
 0xbee   : > { %15358 = vpow2.f32 %v7695_v60  ;;  %v14101_v60 = vpack.c.bf16 %v14882_v41, %v14881_v39 }
 0xbf4   : > { %v19033_v17 = vpop.eup %15350 }
 0xbf5   : > { %v19039_v15 = vpop.eup %15352  ;;  %v7777_v7 = vsel %vm1495_vm3, %v19033_v17, 0.0 }
 0xbf6   : > { %v19041_v1 = vpop.eup %15354  ;;  %v7786_v46 = vsel %vm1495_vm3, %v19039_v15, 0.0 }
 0xbf7   : > { %v19047_v10 = vpop.eup %15356  ;;  %v7783_v22 = vsel %vm1495_vm3, %v19041_v1, 0.0 }
 0xbf8   : > { %v7792_v26 = vsel %vm1495_vm3, %v19047_v10, 0.0  ;;  %v19053_v54 = vpop.eup %15358 }
 0xbf9   : > { %v7789_v12 = vsel %vm1495_vm3, %v19053_v54, 0.0 }
 0xc03   : > { %7775 = vadd.xlane.f32.xlu1 %v7774_v20 }
 0xc07   : > { %7772 = vadd.xlane.f32.xlu0 %v7771_v40  ;;  %7781 = vadd.xlane.f32.xlu1 %v7780_v37 }
 0xc0b   : > { %7778 = vadd.xlane.f32.xlu0 %v7777_v7  ;;  %7787 = vadd.xlane.f32.xlu1 %v7786_v46 }
 0xc0f   : > { %7784 = vadd.xlane.f32.xlu0 %v7783_v22  ;;  %7793 = vadd.xlane.f32.xlu1 %v7792_v26 }
 0xc13   : > { %7790 = vadd.xlane.f32.xlu0 %v7789_v12 }
 0xc1f   : > { %v7704_v16 = vpop.xlane.xlu0 %7703 }
 0xc20   : > { %15360 = vrcp.f32 %v7704_v16  ;;  %v7701_v29 = vpop.xlane.xlu1 %7700 }
 0xc21   : > { %15362 = vrcp.f32 %v7701_v29 }
 0xc24   : > { %v7710_v23 = vpop.xlane.xlu0 %7709 }
 0xc25   : > { %15364 = vrcp.f32 %v7710_v23 }
 0xc28   : > { %v7707_v61 = vpop.xlane.xlu1 %7706 }
 0xc29   : > { %15366 = vrcp.f32 %v7707_v61 }
 0xc2a   : > { %v15361_v11 = vpop.eup %15360 }
 0xc2b   : > { %v15363_v21 = vpop.eup %15362  ;;  %v7798_v57 = vmul.f32 %v15361_v11, %v18907_v19  ;;  %v14886_v19 = vunpack.i.l.bf16 %v18730_v24 }
 0xc2c   : > { %v7716_v32 = vpop.xlane.xlu0 %7715  ;;  %v7713_v38 = vpop.xlane.xlu1 %7712  ;;  %v7796_v45 = vmul.f32 %v15363_v21, %v18909_v6  ;;  %v14887_v6 = vunpack.i.h.bf16 %v18730_v24 }
 0xc2d   : > { %15368 = vrcp.f32 %v7716_v32 }
 0xc2e   : > { %15370 = vrcp.f32 %v7713_v38  ;;  %13227 = vmatprep.mubr.msk.f32.mxu1 %vm1495_vm3, %v7796_v45  ;;  %v14105_v37 = vpack.c.bf16 %v14887_v6, %v14886_v19 }
 0xc2f   : > { %13228 = vmatmul.mubr.msk.f32.vlgmr.msra.gmra.mrb[136].mxu1 %vm1495_vm3, %v7798_v57  ;;  %v15365_v62 = vpop.eup %15364 }
 0xc30   : > { %14096 = vmatpush3.bf16.msra.mxu1 %v18802_v47  ;;  %v7722_v0 = vpop.xlane.xlu0 %7721  ;;  %v7802_v53 = vmul.f32 %v15365_v62, %v18917_v25 }
 0xc31   : > { %14098 = vmatprep.subr.bf16.mxu1 %v14097_v51  ;;  %15372 = vrcp.f32 %v7722_v0 }
 0xc33   : > { %v15367_v30 = vpop.eup %15366 }
 0xc34   : > { %14100 = vmatpush3.bf16.msra.mxu1 %v14097_v51  ;;  %v7719_v20 = vpop.xlane.xlu0 %7718  ;;  %v7800_v40 = vmul.f32 %v15367_v30, %v18921_v50 }
 0xc35   : > { %15374 = vrcp.f32 %v7719_v20  ;;  %14102 = vmatprep.subr.bf16.mxu1 %v14101_v60 }
 0xc36   : > { %13230 = vmatprep.mubr.msk.f32.mxu1 %vm1495_vm3, %v7800_v40 }
 0xc37   : > { %v15369_v47 = vpop.eup %15368  ;;  %13231 = vmatmul.mubr.msk.f32.gmra.mrb[138].mxu1 %vm1495_vm3, %v7802_v53 }
 0xc38   : > { %v15371_v7 = vpop.eup %15370  ;;  %14104 = vmatpush3.bf16.msra.mxu1 %v14101_v60  ;;  %v7806_v24 = vmul.f32 %v15369_v47, %v18927_v42 }
 0xc39   : > { %14106 = vmatprep.subr.bf16.mxu1 %v14105_v37  ;;  %v7804_v46 = vmul.f32 %v15371_v7, %v18925_v2 }
 0xc3b   : > { %13233 = vmatprep.mubr.msk.f32.mxu1 %vm1495_vm3, %v7804_v46  ;;  %v15373_v50 = vpop.eup %15372 }
 0xc3c   : > { %13234 = vmatmul.mubr.msk.f32.gmra.mrb[140].mxu1 %vm1495_vm3, %v7806_v24  ;;  %v7810_v16 = vmul.f32 %v15373_v50, %v18933_v31 }
 0xc3d   : > { %14108 = vmatpush3.bf16.msra.mxu1 %v14105_v37 }
 0xc3f   : > { %v15375_v25 = vpop.eup %15374  ;;  %v7728_v22 = vpop.xlane.xlu0 %7727 }
 0xc40   : > { %15376 = vrcp.f32 %v7728_v22  ;;  %v7725_v26 = vpop.xlane.xlu1 %7724  ;;  %v7808_v12 = vmul.f32 %v15375_v25, %v18938_v28 }
 0xc41   : > { %15378 = vrcp.f32 %v7725_v26 }
 0xc42   : > { %13236 = vmatprep.mubr.msk.f32.mxu1 %vm1495_vm3, %v7808_v12 }
 0xc43   : > { %v7734_v42 = vpop.xlane.xlu0 %7733  ;;  %13237 = vmatmul.mubr.msk.f32.gmra.mrb[142].mxu1 %vm1495_vm3, %v7810_v16 }
 0xc44   : > { %15380 = vrcp.f32 %v7734_v42 }
 0xc47   : > { %v7731_v2 = vpop.xlane.xlu0 %7730  ;;  %v7740_v29 = vpop.xlane.xlu1 %7739 }
 0xc48   : > { %15382 = vrcp.f32 %v7731_v2 }
 0xc49   : > { %15384 = vrcp.f32 %v7740_v29 }
 0xc4a   : > { %v15377_v23 = vpop.eup %15376 }
 0xc4b   : > { %v15379_v61 = vpop.eup %15378  ;;  %v7560_v11 = vpop.xlane.xlu0 %7559  ;;  %v7814_v31 = vmul.f32 %v15377_v23, %v18948_v63 }
 0xc4c   : > { %v7557_v21 = vpop.xlane.xlu1 %7556  ;;  %v7620_v36 = vsub.f32 %v18965_v48, %v7560_v11  ;;  %v7812_v52 = vmul.f32 %v15379_v61, %v18950_v18 }
 0xc4d   : > { %v7619_v28 = vsub.f32 %v18967_v43, %v7557_v21 }
 0xc4e   : > { %v7669_v32 = vmul.f32 1.442695, %v7620_v36  ;;  %13255 = vmatprep.mubr.msk.f32.mxu1 %vm1495_vm3, %v7812_v52  ;;  %v15381_v41 = vpop.eup %15380 }
 0xc4f   : > { %v7667_v38 = vmul.f32 1.442695, %v7619_v28  ;;  %13256 = vmatmul.mubr.msk.f32.vlgmr.msra.gmra.mrb[144].mxu1 %vm1495_vm3, %v7814_v31  ;;  %v7737_v45 = vpop.xlane.xlu0 %7736  ;;  %v7818_v0 = vmul.f32 %v15381_v41, %v18956_v34 }
 0xc50   : > { %v7746_v57 = vpop.xlane.xlu1 %7745  ;;  %15386 = vpow2.f32 %v7669_v32 }
 0xc51   : > { %15388 = vpow2.f32 %v7667_v38 }
 0xc52   : > { %v15383_v39 = vpop.eup %15382  ;;  %15390 = vrcp.f32 %v7737_v45 }
 0xc53   : > { %v7566_v48 = vpop.xlane.xlu0 %7565  ;;  %v7816_v18 = vmul.f32 %v15383_v39, %v18961_v55  ;;  %15392 = vrcp.f32 %v7746_v57  ;;  %v15385_v20 = vpop.eup %15384 }
 0xc54   : > { %v7563_v43 = vpop.xlane.xlu1 %7562  ;;  %v7622_v63 = vsub.f32 %v18981_v59, %v7566_v48  ;;  %v7822_v25 = vmul.f32 %v15385_v20, %v18963_v9 }
 0xc55   : > { %v7621_v51 = vsub.f32 %v18983_v33, %v7563_v43  ;;  %13258 = vmatprep.mubr.msk.f32.mxu1 %vm1495_vm3, %v7816_v18 }
 0xc56   : > { %v7673_v62 = vmul.f32 1.442695, %v7622_v63  ;;  %13259 = vmatmul.mubr.msk.f32.gmra.mrb[146].mxu1 %vm1495_vm3, %v7818_v0 }
 0xc57   : > { %v7671_v30 = vmul.f32 1.442695, %v7621_v51  ;;  %v7743_v6 = vpop.xlane.xlu0 %7742 }
 0xc58   : > { %v7569_v19 = vpop.xlane.xlu1 %7568  ;;  %15394 = vpow2.f32 %v7673_v62 }
 0xc59   : > { %v7623_v60 = vsub.f32 %v18989_v58, %v7569_v19  ;;  %15396 = vpow2.f32 %v7671_v30 }
 0xc5a   : > { %v19093_v55 = vpop.eup %15386  ;;  %15398 = vrcp.f32 %v7743_v6 }
 0xc5b   : > { %v7675_v59 = vmul.f32 1.442695, %v7623_v60  ;;  %v19095_v33 = vpop.eup %15388  ;;  %v7572_v34 = vpop.xlane.xlu0 %7571  ;;  %v7750_v53 = vsel %vm1495_vm3, %v19093_v55, 0.0 }
 0xc5c   : > { %v7575_v40 = vpop.xlane.xlu1 %7574  ;;  %v15391_v47 = vpop.eup %15390  ;;  %v7624_v37 = vsub.f32 %v18997_v14, %v7572_v34  ;;  %v7747_v58 = vsel %vm1495_vm3, %v19095_v33, 0.0  ;;  %7751 = vadd.xlane.f32.xlu1 %v7750_v53 }
 0xc5d   : > { %15400 = vpow2.f32 %v7675_v59  ;;  %v7625_v7 = vsub.f32 %v18999_v27, %v7575_v40  ;;  %7748 = vadd.xlane.f32.xlu0 %v7747_v58  ;;  %v7820_v24 = vmul.f32 %v15391_v47, %v18973_v35  ;;  %v15393_v26 = vpop.eup %15392 }
 0xc5e   : > { %v7677_v46 = vmul.f32 1.442695, %v7624_v37  ;;  %v7826_v28 = vmul.f32 %v15393_v26, %v18979_v3 }
 0xc5f   : > { %v7679_v50 = vmul.f32 1.442695, %v7625_v7  ;;  %13261 = vmatprep.mubr.msk.f32.mxu1 %vm1495_vm3, %v7820_v24  ;;  %v7578_v22 = vpop.xlane.xlu0 %7577 }
 0xc60   : > { %15402 = vpow2.f32 %v7677_v46  ;;  %13262 = vmatmul.mubr.msk.f32.gmra.mrb[148].mxu1 %vm1495_vm3, %v7822_v25  ;;  %v7626_v14 = vsub.f32 %v19005_v4, %v7578_v22  ;;  %v14915_v27 = vpop.permute.xlu1 %14914 }
 0xc61   : > { %15404 = vpow2.f32 %v7679_v50  ;;  %v14917_v35 = vunpack.i.h.bf16 %v14915_v27  ;;  %v14916_v2 = vunpack.i.l.bf16 %v14915_v27 }
 0xc62   : > { %v19108_v12 = vpop.eup %15394  ;;  %v7681_v16 = vmul.f32 1.442695, %v7626_v14 }
 0xc63   : > { %v19110_v42 = vpop.eup %15396  ;;  %v14910_v29 = vpop.permute.xlu0 %14909  ;;  %v7756_v9 = vsel %vm1495_vm3, %v19108_v12, 0.0  ;;  %v14129_v32 = vpack.c.bf16 %v14917_v35, %v14916_v2 }
 0xc64   : > { %v15399_v23 = vpop.eup %15398  ;;  %15406 = vpow2.f32 %v7681_v16  ;;  %v14912_v61 = vunpack.i.h.bf16 %v14910_v29  ;;  %v14911_v11 = vunpack.i.l.bf16 %v14910_v29  ;;  %v7753_v4 = vsel %vm1495_vm3, %v19110_v42, 0.0  ;;  %7757 = vadd.xlane.f32.xlu1 %v7756_v9 }
 0xc65   : > { %7754 = vadd.xlane.f32.xlu0 %v7753_v4  ;;  %v7824_v21 = vmul.f32 %v15399_v23, %v18995_v5 }
 0xc66   : > { %v14125_v52 = vpack.c.bf16 %v14912_v61, %v14911_v11  ;;  %v817_v11 = vld [vmem:[%s20526_s3 + $0x18] sm:$0xff] }
 0xc67   : > { %v19117_v36 = vpop.eup %15400  ;;  %13264 = vmatprep.mubr.msk.f32.mxu1 %vm1495_vm3, %v7824_v21 }
 0xc68   : > { %v7759_v31 = vsel %vm1495_vm3, %v19117_v36, 0.0  ;;  %13265 = vmatmul.mubr.msk.f32.gmra.mrb[150].mxu1 %vm1495_vm3, %v7826_v28  ;;  %14126 = vmatprep.subr.bf16.mxu1 %v14125_v52 }
 0xc69   : > { %7760 = vadd.xlane.f32.xlu0 %v7759_v31  ;;  %14128 = vmatpush3.bf16.msra.mxu1 %v14125_v52 }
 0xc6a   : > { %v19124_v38 = vpop.eup %15402  ;;  %14130 = vmatprep.subr.bf16.mxu1 %v14129_v32 }
 0xc6b   : > { %v19126_v5 = vpop.eup %15404  ;;  %v7762_v3 = vsel %vm1495_vm3, %v19124_v38, 0.0 }
 0xc6c   : > { %7763 = vadd.xlane.f32.xlu1 %v7762_v3  ;;  %v7765_v45 = vsel %vm1495_vm3, %v19126_v5, 0.0 }
 0xc6d   : > { %7766 = vadd.xlane.f32.xlu0 %v7765_v45  ;;  %14132 = vmatpush3.bf16.msra.mxu1 %v14129_v32 }
 0xc6e   : > { %v19132_v57 = vpop.eup %15406 }
 0xc6f   : > { %v7768_v41 = vsel %vm1495_vm3, %v19132_v57, 0.0 }
 0xc70   : > { %7769 = vadd.xlane.f32.xlu1 %v7768_v41 }
 0xc81   : > { %14924 = vrot.lane.b32.xlu1 %v20994_v56, %s15682_s29 }
 0xc83   : > { %14919 = vrot.lane.b32.xlu0 %v20995_v13, %s15682_s29 }
 0xc90   : > { %v7776_v18 = vpop.xlane.xlu1 %7775 }
 0xc94   : > { %v7773_v39 = vpop.xlane.xlu0 %7772  ;;  %v7782_v63 = vpop.xlane.xlu1 %7781 }
 0xc95   : > { %15408 = vrcp.f32 %v7773_v39 }
 0xc98   : > { %v7779_v51 = vpop.xlane.xlu0 %7778  ;;  %v7788_v0 = vpop.xlane.xlu1 %7787 }
 0xc9c   : > { %v7785_v62 = vpop.xlane.xlu0 %7784  ;;  %v7794_v30 = vpop.xlane.xlu1 %7793 }
 0xc9f   : > { %v15409_v48 = vpop.eup %15408 }
 0xca0   : > { %v7844_v43 = vmul.f32 %v15409_v48, %v19027_v8  ;;  %v7791_v6 = vpop.xlane.xlu0 %7790 }
 0xca2   : > { %13311 = vmatprep.mubr.msk.f32.mxu1 %vm1495_vm3, %v7844_v43 }
 0xce9   : > { %v7752_v19 = vpop.xlane.xlu1 %7751 }
 0xcea   : > { %v7749_v60 = vpop.xlane.xlu0 %7748  ;;  %15410 = vrcp.f32 %v7752_v19 }
 0xceb   : > { %15412 = vrcp.f32 %v7749_v60 }
 0xcf1   : > { %v7758_v56 = vpop.xlane.xlu1 %7757 }
 0xcf2   : > { %v7755_v13 = vpop.xlane.xlu0 %7754  ;;  %15414 = vrcp.f32 %v7758_v56 }
 0xcf3   : > { %15416 = vrcp.f32 %v7755_v13 }
 0xcf4   : > { %v15411_v20 = vpop.eup %15410 }
 0xcf5   : > { %v15413_v59 = vpop.eup %15412  ;;  %v7830_v8 = vmul.f32 %v15411_v20, %v19093_v55 }
 0xcf6   : > { %v7761_v34 = vpop.xlane.xlu0 %7760  ;;  %v7828_v40 = vmul.f32 %v15413_v59, %v19095_v33 }
 0xcf7   : > { %15418 = vrcp.f32 %v7761_v34 }
 0xcf8   : > { %13283 = vmatprep.mubr.msk.f32.mxu0 %vm1495_vm3, %v7828_v40 }
 0xcf9   : > { %13284 = vmatmul.mubr.msk.f32.vlgmr.msra.gmra.mrb[152].mxu0 %vm1495_vm3, %v7830_v8  ;;  %v7764_v53 = vpop.xlane.xlu1 %7763 }
 0xcfa   : > { %v7767_v47 = vpop.xlane.xlu0 %7766  ;;  %15420 = vrcp.f32 %v7764_v53 }
 0xcfb   : > { %15422 = vrcp.f32 %v7767_v47 }
 0xcfc   : > { %v15415_v37 = vpop.eup %15414  ;;  %15424 = vrcp.f32 %v7776_v18 }
 0xcfd   : > { %v15417_v7 = vpop.eup %15416  ;;  %15426 = vrcp.f32 %v7779_v51  ;;  %v7770_v58 = vpop.xlane.xlu1 %7769  ;;  %v7834_v24 = vmul.f32 %v15415_v37, %v19108_v12 }
 0xcfe   : > { %v14920_v55 = vpop.permute.xlu0 %14919  ;;  %15428 = vrcp.f32 %v7770_v58  ;;  %v7832_v33 = vmul.f32 %v15417_v7, %v19110_v42 }
 0xcff   : > { %v14922_v46 = vunpack.i.h.bf16 %v14920_v55  ;;  %v14921_v50 = vunpack.i.l.bf16 %v14920_v55  ;;  %15430 = vrcp.f32 %v7782_v63  ;;  %v19207_v55 = vld [vmem:[%s20527_s4] ss:$0 sm:$0xff] }
 0xd00   : > { %13286 = vmatprep.mubr.msk.f32.mxu0 %vm1495_vm3, %v7832_v33  ;;  %15432 = vrcp.f32 %v7785_v62 }
 0xd01   : > { %v15419_v25 = vpop.eup %15418  ;;  %13287 = vmatmul.mubr.msk.f32.gmra.mrb[154].mxu0 %vm1495_vm3, %v7834_v24  ;;  %v14925_v22 = vpop.permute.xlu1 %14924  ;;  %v14133_v14 = vpack.c.bf16 %v14922_v46, %v14921_v50  ;;  %15434 = vrcp.f32 %v7788_v0 }
 0xd02   : > { %v14927_v27 = vunpack.i.h.bf16 %v14925_v22  ;;  %v14926_v26 = vunpack.i.l.bf16 %v14925_v22  ;;  %v13229_v16 = vpop.f32.mrb[136].mxu1  ;;  %v7836_v12 = vmul.f32 %v15419_v25, %v19117_v36  ;;  %15436 = vrcp.f32 %v7791_v6  ;;  %v15632_v22 = vld [vmem:[%s15781_s22 + $0x8] sm:$0xff] }
 0xd03   : > { %14134 = vmatprep.subr.bf16.mxu1 %v14133_v14  ;;  %v7973_v35 = vpop.f32.mrb[137].mxu1  ;;  %15438 = vrcp.f32 %v7794_v30 }
 0xd04   : > { %v15421_v2 = vpop.eup %15420  ;;  %13289 = vmatprep.mubr.msk.f32.mxu0 %vm1495_vm3, %v7836_v12  ;;  %14136 = vmatpush3.bf16.msra.mxu1 %v14133_v14  ;;  %v14137_v42 = vpack.c.bf16 %v14927_v27, %v14926_v26  ;;  %v15633_v27 = vld [vmem:[%s15781_s22] sm:$0xff] }
 0xd05   : > { %v15423_v29 = vpop.eup %15422  ;;  %v7838_v9 = vmul.f32 %v15421_v2, %v19124_v38 }
 0xd06   : > { %v15425_v23 = vpop.eup %15424  ;;  %14138 = vmatprep.subr.bf16.mxu1 %v14137_v42  ;;  %v7840_v61 = vmul.f32 %v15423_v29, %v19126_v5 }
 0xd07   : > { %v15427_v4 = vpop.eup %15426  ;;  %13290 = vmatmul.mubr.msk.f32.gmra.mrb[156].mxu0 %vm1495_vm3, %v7838_v9  ;;  %v7846_v36 = vmul.f32 %v15425_v23, %v19025_v44  ;;  %v15634_v9 = vld [vmem:[%s15781_s22 + $0x18] sm:$0xff] }
 0xd08   : > { %v15429_v21 = vpop.eup %15428  ;;  %14140 = vmatpush3.bf16.msra.mxu1 %v14137_v42  ;;  %13292 = vmatprep.mubr.msk.f32.mxu0 %vm1495_vm3, %v7840_v61  ;;  %v7848_v32 = vmul.f32 %v15427_v4, %v19033_v17 }
 0xd09   : > { %v7842_v28 = vmul.f32 %v15429_v21, %v19132_v57  ;;  %13323 = vmatprep.subr.mxu1 %v817_v11  ;;  %v15431_v52 = vpop.eup %15430 }
 0xd0a   : > { %v13232_v31 = vpop.f32.mrb[138].mxu1  ;;  %v15433_v38 = vpop.eup %15432  ;;  %v7850_v3 = vmul.f32 %v15431_v52, %v19031_v49 }
 0xd0b   : > { %13312 = vmatmul.mubr.msk.f32.vlgmr.msra.gmra.mrb[152].mxu1 %vm1495_vm3, %v7846_v36  ;;  %v7983_v5 = vpop.f32.mrb[139].mxu1  ;;  %13293 = vmatmul.mubr.msk.f32.gmra.mrb[158].mxu0 %vm1495_vm3, %v7842_v28  ;;  %v15435_v45 = vpop.eup %15434  ;;  %v7852_v44 = vmul.f32 %v15433_v38, %v19041_v1  ;;  %v15635_v36 = vld [vmem:[%s15781_s22 + $0x10] sm:$0xff] }
 0xd0c   : > { %13314 = vmatprep.mubr.msk.f32.mxu1 %vm1495_vm3, %v7848_v32  ;;  %13324 = vmatpush3.msra.mxu1 %v817_v11  ;;  %v15437_v57 = vpop.eup %15436  ;;  %v7854_v17 = vmul.f32 %v15435_v45, %v19039_v15 }
 0xd0d   : > { %v15439_v48 = vpop.eup %15438  ;;  %v7856_v43 = vmul.f32 %v15437_v57, %v19053_v54 }
 0xd0e   : > { %v7858_v49 = vmul.f32 %v15439_v48, %v19047_v10 }
 0xd0f   : > { %v13235_v41 = vpop.f32.mrb[140].mxu1  ;;  %13315 = vmatmul.mubr.msk.f32.gmra.mrb[154].mxu1 %vm1495_vm3, %v7850_v3 }
 0xd10   : > { %v7993_v39 = vpop.f32.mrb[141].mxu1  ;;  %13317 = vmatprep.mubr.msk.f32.mxu1 %vm1495_vm3, %v7852_v44  ;;  %v15637_v44 = vld [vmem:[%s15781_s22 + $0x20] sm:$0xff] }
 0xd13   : > { %13318 = vmatmul.mubr.msk.f32.gmra.mrb[156].mxu1 %vm1495_vm3, %v7854_v17  ;;  %v15638_v17 = vld [vmem:[%s15781_s22 + $0x38] sm:$0xff] }
 0xd14   : > { %13320 = vmatprep.mubr.msk.f32.mxu1 %vm1495_vm3, %v7856_v43 }
 0xd16   : > { %v13238_v18 = vpop.f32.mrb[142].mxu1 }
 0xd17   : > { %13321 = vmatmul.mubr.msk.f32.gmra.mrb[158].mxu1 %vm1495_vm3, %v7858_v49  ;;  %v8003_v1 = vpop.f32.mrb[143].mxu1 }
 0xd18   : > { %13325 = vmatprep.mubr.msk.f32.mxu1 %vm842_vm1, %v7973_v35 }
 0xd1b   : > { %13326 = vmatmul.mubr.msk.f32.vlgmr.msra.gmra.mrb[80].mxu1 %vm842_vm1, %v13229_v16 }
 0xd1c   : > { %13328 = vmatprep.mubr.msk.f32.mxu1 %vm842_vm1, %v7983_v5 }
 0xd1f   : > { %13329 = vmatmul.mubr.msk.f32.gmra.mrb[82].mxu1 %vm842_vm1, %v13232_v31  ;;  %v15636_v31 = vld [vmem:[%s15781_s22 + $0x28] sm:$0xff] }
 0xd20   : > { %13331 = vmatprep.mubr.msk.f32.mxu1 %vm842_vm1, %v7993_v39 }
 0xd22   : > { %v13257_v15 = vpop.f32.mrb[144].mxu1 }
 0xd23   : > { %13332 = vmatmul.mubr.msk.f32.gmra.mrb[84].mxu1 %vm842_vm1, %v13235_v41  ;;  %v8126_v54 = vpop.f32.mrb[145].mxu1 }
 0xd24   : > { %13334 = vmatprep.mubr.msk.f32.mxu1 %vm842_vm1, %v8003_v1 }
 0xd27   : > { %13335 = vmatmul.mubr.msk.f32.gmra.mrb[86].mxu1 %vm842_vm1, %v13238_v18 }
 0xd28   : > { %13337 = vmatprep.mubr.msk.f32.mxu1 %vm842_vm1, %v8126_v54 }
 0xd29   : > { %v13260_v10 = vpop.f32.mrb[146].mxu1 }
 0xd2a   : > { %v8136_v63 = vpop.f32.mrb[147].mxu1 }
 0xd2b   : > { %13338 = vmatmul.mubr.msk.f32.gmra.mrb[88].mxu1 %vm842_vm1, %v13257_v15  ;;  %v15639_v15 = vld [vmem:[%s15781_s22 + $0x30] sm:$0xff] }
 0xd2c   : > { %13340 = vmatprep.mubr.msk.f32.mxu1 %vm842_vm1, %v8136_v63 }
 0xd2f   : > { %13341 = vmatmul.mubr.msk.f32.gmra.mrb[90].mxu1 %vm842_vm1, %v13260_v10 }
 0xd33   : > { %v13263_v51 = vpop.f32.mrb[148].mxu1 }
 0xd34   : > { %v8146_v0 = vpop.f32.mrb[149].mxu1 }
 0xd35   : > { %13343 = vmatprep.mubr.msk.f32.mxu1 %vm842_vm1, %v8146_v0 }
 0xd36   : > { %13344 = vmatmul.mubr.msk.f32.gmra.mrb[92].mxu1 %vm842_vm1, %v13263_v51  ;;  %v15640_v51 = vld [vmem:[%s15781_s22 + $0x48] sm:$0xff] }
 0xd3b   : > { %v13266_v62 = vpop.f32.mrb[150].mxu1 }
 0xd3c   : > { %v8156_v30 = vpop.f32.mrb[151].mxu1 }
 0xd3d   : > { %13346 = vmatprep.mubr.msk.f32.mxu1 %vm842_vm1, %v8156_v30 }
 0xd3e   : > { %13347 = vmatmul.mubr.msk.f32.gmra.mrb[94].mxu1 %vm842_vm1, %v13266_v62 }
 0xdcc   : > { %v13285_v6 = vpop.f32.mrb[152].mxu0 }
 0xdcd   : > { %v8279_v19 = vpop.f32.mrb[153].mxu0 }
 0xdce   : > { %13349 = vmatprep.mubr.msk.f32.mxu1 %vm842_vm1, %v8279_v19 }
 0xdcf   : > { %13350 = vmatmul.mubr.msk.f32.gmra.mrb[96].mxu1 %vm842_vm1, %v13285_v6 }
 0xdd4   : > { %v13288_v60 = vpop.f32.mrb[154].mxu0 }
 0xdd5   : > { %v8289_v56 = vpop.f32.mrb[155].mxu0 }
 0xdd6   : > { %13352 = vmatprep.mubr.msk.f32.mxu1 %vm842_vm1, %v8289_v56 }
 0xdd7   : > { %13353 = vmatmul.mubr.msk.f32.gmra.mrb[98].mxu1 %vm842_vm1, %v13288_v60  ;;  %v15641_v60 = vld [vmem:[%s15781_s22 + $0x40] sm:$0xff] }
 0xdda   : > { %v13291_v13 = vpop.f32.mrb[156].mxu0 }
 0xddb   : > { %v8299_v20 = vpop.f32.mrb[157].mxu0 }
 0xddc   : > { %13355 = vmatprep.mubr.msk.f32.mxu1 %vm842_vm1, %v8299_v20 }
 0xddd   : > { %13356 = vmatmul.mubr.msk.f32.gmra.mrb[100].mxu1 %vm842_vm1, %v13291_v13 }
 0xdde   : > { %v13313_v59 = vpop.f32.mrb[152].mxu1  ;;  %v13294_v8 = vpop.f32.mrb[158].mxu0 }
 0xddf   : > { %v8432_v34 = vpop.f32.mrb[153].mxu1  ;;  %v8309_v40 = vpop.f32.mrb[159].mxu0 }
 0xde0   : > { %13358 = vmatprep.mubr.msk.f32.mxu1 %vm842_vm1, %v8309_v40  ;;  %v15643_v40 = vld [vmem:[%s15781_s22 + $0x50] sm:$0xff] }
 0xde1   : > { %13359 = vmatmul.mubr.msk.f32.gmra.mrb[102].mxu1 %vm842_vm1, %v13294_v8 }
 0xde2   : > { %v13316_v53 = vpop.f32.mrb[154].mxu1  ;;  %13361 = vmatprep.mubr.msk.f32.mxu1 %vm842_vm1, %v8432_v34 }
 0xde3   : > { %v8442_v47 = vpop.f32.mrb[155].mxu1 }
 0xde5   : > { %13362 = vmatmul.mubr.msk.f32.gmra.mrb[104].mxu1 %vm842_vm1, %v13313_v59  ;;  %v15642_v59 = vld [vmem:[%s15781_s22 + $0x58] sm:$0xff] }
 0xde6   : > { %v13319_v37 = vpop.f32.mrb[156].mxu1  ;;  %13364 = vmatprep.mubr.msk.f32.mxu1 %vm842_vm1, %v8442_v47 }
 0xde7   : > { %v8452_v7 = vpop.f32.mrb[157].mxu1 }
 0xde9   : > { %13365 = vmatmul.mubr.msk.f32.gmra.mrb[106].mxu1 %vm842_vm1, %v13316_v53 }
 0xdea   : > { %v13322_v58 = vpop.f32.mrb[158].mxu1  ;;  %13367 = vmatprep.mubr.msk.f32.mxu1 %vm842_vm1, %v8452_v7 }
 0xdeb   : > { %v8462_v24 = vpop.f32.mrb[159].mxu1 }
 0xded   : > { %13368 = vmatmul.mubr.msk.f32.gmra.mrb[108].mxu1 %vm842_vm1, %v13319_v37 }
 0xdee   : > { %v13327_v33 = vpop.f32.mrb[80].mxu1  ;;  %13370 = vmatprep.mubr.msk.f32.mxu1 %vm842_vm1, %v8462_v24 }
 0xdef   : > { %v8832_v46 = vadd.f32 %v13327_v33, %v19207_v55  ;;  %v8633_v50 = vpop.f32.mrb[81].mxu1  ;;  %v15644_v33 = vld [vmem:[%s15781_s22 + $0x68] sm:$0xff] }
 0xdf0   : > { %v8831_v25 = vadd.f32 %v19207_v55, %v8633_v50 }
 0xdf1   : > { %v19214_v14 = vadd.f32 %v15632_v22, %v8832_v46  ;;  %13371 = vmatmul.mubr.msk.f32.gmra.mrb[110].mxu1 %vm842_vm1, %v13322_v58 }
 0xdf2   : > { %v19218_v26 = vadd.f32 %v15633_v27, %v8831_v25  ;;  %v13330_v16 = vpop.f32.mrb[82].mxu1  ;;  %v15645_v25 = vld [vmem:[%s15781_s22 + $0x60] sm:$0xff] }
 0xdf3   : > { %v8834_v12 = vadd.f32 %v13330_v16, %v19207_v55  ;;  %v8643_v35 = vpop.f32.mrb[83].mxu1  ;;  %v8900_v2 = vsel %vm492_vm0, %v19214_v14, 0.0 }
 0xdf4   : > { %v8833_v42 = vadd.f32 %v19207_v55, %v8643_v35  ;;  %8901 = vadd.xlane.f32.xlu0 %v8900_v2  ;;  %v8897_v29 = vsel %vm492_vm0, %v19218_v26, 0.0 }
 0xdf5   : > { %v19227_v23 = vadd.f32 %v15634_v9, %v8834_v12  ;;  %8898 = vadd.xlane.f32.xlu1 %v8897_v29  ;;  %v15646_v29 = vld [vmem:[%s15781_s22 + $0x78] sm:$0xff] }
 0xdf6   : > { %v13333_v61 = vpop.f32.mrb[84].mxu1  ;;  %v19233_v28 = vadd.f32 %v15635_v36, %v8833_v42 }
 0xdf7   : > { %v8836_v11 = vadd.f32 %v13333_v61, %v19207_v55  ;;  %v8653_v4 = vpop.f32.mrb[85].mxu1  ;;  %v8906_v21 = vsel %vm492_vm0, %v19227_v23, 0.0  ;;  %v15647_v61 = vld [vmem:[%s15781_s22 + $0x70] sm:$0xff] }
 0xdf8   : > { %v8835_v52 = vadd.f32 %v19207_v55, %v8653_v4  ;;  %v8903_v39 = vsel %vm492_vm0, %v19233_v28, 0.0 }
 0xdf9   : > { %v19237_v32 = vadd.f32 %v15636_v31, %v8836_v11  ;;  %8907 = vadd.xlane.f32.xlu1 %v8906_v21 }
 0xdfa   : > { %v13336_v38 = vpop.f32.mrb[86].mxu1  ;;  %v19243_v57 = vadd.f32 %v15637_v44, %v8835_v52 }
 0xdfb   : > { %v8838_v5 = vadd.f32 %v13336_v38, %v19207_v55  ;;  %v8663_v3 = vpop.f32.mrb[87].mxu1  ;;  %v8912_v45 = vsel %vm492_vm0, %v19237_v32, 0.0 }
 0xdfc   : > { %v8837_v41 = vadd.f32 %v19207_v55, %v8663_v3  ;;  %8913 = vadd.xlane.f32.xlu0 %v8912_v45  ;;  %v8909_v63 = vsel %vm492_vm0, %v19243_v57, 0.0  ;;  %v15649_v45 = vld [vmem:[%s15781_s22 + $0x80] sm:$0xff] }
 0xdfd   : > { %v19249_v48 = vadd.f32 %v15638_v17, %v8838_v5  ;;  %8904 = vadd.xlane.f32.xlu1 %v8903_v39  ;;  %v15648_v5 = vld [vmem:[%s15781_s22 + $0x88] sm:$0xff] }
 0xdfe   : > { %v13339_v43 = vpop.f32.mrb[88].mxu1  ;;  %v19255_v54 = vadd.f32 %v15639_v15, %v8837_v41  ;;  %v15650_v15 = vld [vmem:[%s15781_s22 + $0x98] sm:$0xff] }
 0xdff   : > { %v8840_v49 = vadd.f32 %v13339_v43, %v19207_v55  ;;  %v8673_v18 = vpop.f32.mrb[89].mxu1  ;;  %v8918_v1 = vsel %vm492_vm0, %v19249_v48, 0.0 }
 0xe00   : > { %v8839_v10 = vadd.f32 %v19207_v55, %v8673_v18  ;;  %8919 = vadd.xlane.f32.xlu0 %v8918_v1  ;;  %v8915_v20 = vsel %vm492_vm0, %v19255_v54, 0.0 }
 0xe01   : > { %v19261_v0 = vadd.f32 %v15640_v51, %v8840_v49  ;;  %8910 = vadd.xlane.f32.xlu1 %v8909_v63  ;;  %v15651_v63 = vld [vmem:[%s15781_s22 + $0x90] sm:$0xff] }
 0xe02   : > { %v13342_v62 = vpop.f32.mrb[90].mxu1  ;;  %v19267_v56 = vadd.f32 %v15641_v60, %v8839_v10 }
 0xe03   : > { %v8842_v30 = vadd.f32 %v13342_v62, %v19207_v55  ;;  %v8683_v6 = vpop.f32.mrb[91].mxu1  ;;  %v8924_v19 = vsel %vm492_vm0, %v19261_v0, 0.0 }
 0xe04   : > { %v8841_v13 = vadd.f32 %v19207_v55, %v8683_v6  ;;  %8925 = vadd.xlane.f32.xlu0 %v8924_v19  ;;  %v8921_v47 = vsel %vm492_vm0, %v19267_v56, 0.0 }
 0xe05   : > { %v19273_v8 = vadd.f32 %v15642_v59, %v8842_v30  ;;  %8916 = vadd.xlane.f32.xlu1 %v8915_v20  ;;  %v15652_v59 = vld [vmem:[%s15781_s22 + $0xa8] sm:$0xff] }
 0xe06   : > { %v19278_v53 = vadd.f32 %v15643_v40, %v8841_v13  ;;  %v15653_v40 = vld [vmem:[%s15781_s22 + $0xa0] sm:$0xff] }
 0xe07   : > { %v8930_v34 = vsel %vm492_vm0, %v19273_v8, 0.0 }
 0xe08   : > { %8931 = vadd.xlane.f32.xlu0 %v8930_v34  ;;  %v8927_v50 = vsel %vm492_vm0, %v19278_v53, 0.0 }
 0xe09   : > { %v13345_v37 = vpop.f32.mrb[92].mxu1  ;;  %8922 = vadd.xlane.f32.xlu1 %v8921_v47 }
 0xe0a   : > { %v8844_v7 = vadd.f32 %v13345_v37, %v19207_v55  ;;  %v8693_v58 = vpop.f32.mrb[93].mxu1 }
 0xe0b   : > { %v8843_v24 = vadd.f32 %v19207_v55, %v8693_v58 }
 0xe0c   : > { %v19285_v46 = vadd.f32 %v15644_v33, %v8844_v7 }
 0xe0d   : > { %v19290_v22 = vadd.f32 %v15645_v25, %v8843_v24  ;;  %8928 = vadd.xlane.f32.xlu1 %v8927_v50  ;;  %v15654_v25 = vld [vmem:[%s15781_s22 + $0xb8] sm:$0xff] }
 0xe0e   : > { %v8936_v27 = vsel %vm492_vm0, %v19285_v46, 0.0 }
 0xe0f   : > { %8937 = vadd.xlane.f32.xlu0 %v8936_v27  ;;  %v8933_v16 = vsel %vm492_vm0, %v19290_v22, 0.0 }
 0xe11   : > { %v13348_v12 = vpop.f32.mrb[94].mxu1  ;;  %8934 = vadd.xlane.f32.xlu1 %v8933_v16  ;;  %v15655_v16 = vld [vmem:[%s15781_s22 + $0xb0] sm:$0xff] }
 0xe12   : > { %v8846_v35 = vadd.f32 %v13348_v12, %v19207_v55  ;;  %v8703_v2 = vpop.f32.mrb[95].mxu1 }
 0xe13   : > { %v8845_v42 = vadd.f32 %v19207_v55, %v8703_v2 }
 0xe14   : > { %v19299_v9 = vadd.f32 %v15646_v29, %v8846_v35 }
 0xe15   : > { %v19302_v11 = vadd.f32 %v15647_v61, %v8845_v42 }
 0xe16   : > { %v8942_v4 = vsel %vm492_vm0, %v19299_v9, 0.0 }
 0xe17   : > { %8943 = vadd.xlane.f32.xlu0 %v8942_v4  ;;  %v8939_v21 = vsel %vm492_vm0, %v19302_v11, 0.0 }
 0xe18   : > { %8940 = vadd.xlane.f32.xlu1 %v8939_v21 }
 0xe82   : > { %v19322_v1 = vpop.xlane.xlu1 %8898 }
 0xe86   : > { %v8908_v20 = vpop.xlane.xlu1 %8907 }
 0xe8a   : > { %v8905_v2 = vpop.xlane.xlu1 %8904 }
 0xea2   : > { %v13351_v36 = vpop.f32.mrb[96].mxu1 }
 0xea3   : > { %v8848_v52 = vadd.f32 %v13351_v36, %v19207_v55  ;;  %v8713_v31 = vpop.f32.mrb[97].mxu1  ;;  %v15656_v36 = vld [vmem:[%s15781_s22 + $0xc8] sm:$0xff] }
 0xea4   : > { %v8847_v38 = vadd.f32 %v19207_v55, %v8713_v31  ;;  %v8902_v31 = vpop.xlane.xlu0 %8901 }
 0xea5   : > { %v19311_v3 = vadd.f32 %v15648_v5, %v8848_v52 }
 0xea6   : > { %v19314_v44 = vadd.f32 %v15649_v45, %v8847_v38  ;;  %v15657_v38 = vld [vmem:[%s15781_s22 + $0xc0] sm:$0xff] }
 0xea7   : > { %v8948_v41 = vsel %vm492_vm0, %v19311_v3, 0.0 }
 0xea8   : > { %8949 = vadd.xlane.f32.xlu0 %v8948_v41  ;;  %v8945_v39 = vsel %vm492_vm0, %v19314_v44, 0.0 }
 0xea9   : > { %8946 = vadd.xlane.f32.xlu1 %v8945_v39 }
 0xeaa   : > { %v13354_v17 = vpop.f32.mrb[98].mxu1 }
 0xeab   : > { %v8850_v43 = vadd.f32 %v13354_v17, %v19207_v55  ;;  %v8723_v49 = vpop.f32.mrb[99].mxu1 }
 0xeac   : > { %v8849_v18 = vadd.f32 %v19207_v55, %v8723_v49 }
 0xead   : > { %v19325_v10 = vadd.f32 %v15650_v15, %v8850_v43  ;;  %v15658_v15 = vld [vmem:[%s15781_s22 + $0xd8] sm:$0xff] }
 0xeae   : > { %v19328_v51 = vadd.f32 %v15651_v63, %v8849_v18  ;;  %v8911_v18 = vpop.xlane.xlu1 %8910 }
 0xeaf   : > { %v8954_v62 = vsel %vm492_vm0, %v19325_v10, 0.0 }
 0xeb0   : > { %8955 = vadd.xlane.f32.xlu0 %v8954_v62  ;;  %v8951_v30 = vsel %vm492_vm0, %v19328_v51, 0.0  ;;  %v13357_v6 = vpop.f32.mrb[100].mxu1  ;;  %v8914_v62 = vpop.xlane.xlu0 %8913 }
 0xeb1   : > { %8952 = vadd.xlane.f32.xlu1 %v8951_v30  ;;  %v8852_v19 = vadd.f32 %v13357_v6, %v19207_v55  ;;  %v8733_v60 = vpop.f32.mrb[101].mxu1  ;;  %v15659_v30 = vld [vmem:[%s15781_s22 + $0xd0] sm:$0xff] }
 0xeb2   : > { %v8851_v13 = vadd.f32 %v19207_v55, %v8733_v60  ;;  %v8995_v60 = vmul.f32 0.03125, %v8902_v31 }
 0xeb3   : > { %v19337_v34 = vadd.f32 %v15652_v59, %v8852_v19 }
 0xeb4   : > { %v19340_v47 = vadd.f32 %v15653_v40, %v8851_v13  ;;  %v13360_v37 = vpop.f32.mrb[102].mxu1  ;;  %v8920_v31 = vpop.xlane.xlu0 %8919 }
 0xeb5   : > { %v8854_v7 = vadd.f32 %v13360_v37, %v19207_v55  ;;  %v8743_v58 = vpop.f32.mrb[103].mxu1  ;;  %v8960_v24 = vsel %vm492_vm0, %v19337_v34, 0.0  ;;  %v8994_v37 = vmul.f32 0.03125, %v19322_v1  ;;  %v8997_v1 = vmul.f32 0.03125, %v8908_v20 }
 0xeb6   : > { %v8853_v33 = vadd.f32 %v19207_v55, %v8743_v58  ;;  %8961 = vadd.xlane.f32.xlu0 %v8960_v24  ;;  %v8957_v50 = vsel %vm492_vm0, %v19340_v47, 0.0  ;;  %v15660_v24 = vld [vmem:[%s15781_s22 + $0xe8] sm:$0xff] }
 0xeb7   : > { %v19349_v27 = vadd.f32 %v15654_v25, %v8854_v7  ;;  %8958 = vadd.xlane.f32.xlu1 %v8957_v50  ;;  %v15661_v50 = vld [vmem:[%s15781_s22 + $0xe0] sm:$0xff] }
 0xeb8   : > { %v19352_v12 = vadd.f32 %v15655_v16, %v8853_v33  ;;  %v13363_v35 = vpop.f32.mrb[104].mxu1 }
 0xeb9   : > { %v8856_v42 = vadd.f32 %v13363_v35, %v19207_v55  ;;  %v8753_v29 = vpop.f32.mrb[105].mxu1  ;;  %v8966_v61 = vsel %vm492_vm0, %v19349_v27, 0.0  ;;  %v19392_v35 = vsub.f32 %v19214_v14, %v8995_v60  ;;  %v9001_v60 = vmul.f32 0.03125, %v8920_v31 }
 0xeba   : > { %v8855_v4 = vadd.f32 %v19207_v55, %v8753_v29  ;;  %8967 = vadd.xlane.f32.xlu0 %v8966_v61  ;;  %v8963_v21 = vsel %vm492_vm0, %v19352_v12, 0.0 }
 0xebb   : > { %v19361_v52 = vadd.f32 %v15656_v36, %v8856_v42  ;;  %8964 = vadd.xlane.f32.xlu1 %v8963_v21  ;;  %v8917_v42 = vpop.xlane.xlu1 %8916  ;;  %v19398_v21 = vsub.f32 %v19218_v26, %v8994_v37  ;;  %v8996_v36 = vmul.f32 0.03125, %v8905_v2  ;;  %v8999_v26 = vmul.f32 0.03125, %v8914_v62  ;;  %v8926_v62 = vpop.xlane.xlu0 %8925 }
 0xebc   : > { %v19364_v5 = vadd.f32 %v15657_v38, %v8855_v4  ;;  %v13366_v45 = vpop.f32.mrb[106].mxu1 }
 0xebd   : > { %v8858_v41 = vadd.f32 %v13366_v45, %v19207_v55  ;;  %v8763_v39 = vpop.f32.mrb[107].mxu1  ;;  %v8972_v17 = vsel %vm492_vm0, %v19361_v52, 0.0  ;;  %v15662_v45 = vld [vmem:[%s15781_s22 + $0xf8] sm:$0xff] }
 0xebe   : > { %v8857_v43 = vadd.f32 %v19207_v55, %v8763_v39  ;;  %8973 = vadd.xlane.f32.xlu0 %v8972_v17  ;;  %v8969_v49 = vsel %vm492_vm0, %v19364_v5, 0.0  ;;  %v19410_v17 = vsub.f32 %v19227_v23, %v8997_v1 }
 0xebf   : > { %v19373_v63 = vadd.f32 %v15658_v15, %v8858_v41  ;;  %8970 = vadd.xlane.f32.xlu1 %v8969_v49  ;;  %v15663_v41 = vld [vmem:[%s15781_s22 + $0xf0] sm:$0xff]  ;;  %v8998_v49 = vmul.f32 0.03125, %v8911_v18  ;;  %v8923_v23 = vpop.xlane.xlu1 %8922 }
 0xec0   : > { %v19376_v6 = vadd.f32 %v15659_v30, %v8857_v43  ;;  %v13369_v19 = vpop.f32.mrb[108].mxu1  ;;  %v19417_v43 = vsub.f32 %v19233_v28, %v8996_v36  ;;  %v9058_v30 = vmul.f32 %v19398_v21, %v19398_v21  ;;  %v9061_v28 = vmul.f32 %v19410_v17, %v19410_v17 }
 0xec1   : > { %v8860_v13 = vadd.f32 %v13369_v19, %v19207_v55  ;;  %v8773_v59 = vpop.f32.mrb[109].mxu1  ;;  %v8978_v40 = vsel %vm492_vm0, %v19373_v63, 0.0  ;;  %v19424_v19 = vsub.f32 %v19237_v32, %v8999_v26  ;;  %v19430_v18 = vsub.f32 %v19243_v57, %v8998_v49 }
 0xec2   : > { %v8859_v7 = vadd.f32 %v19207_v55, %v8773_v59  ;;  %8979 = vadd.xlane.f32.xlu0 %v8978_v40  ;;  %v8975_v58 = vsel %vm492_vm0, %v19376_v6, 0.0  ;;  %v9000_v59 = vmul.f32 0.03125, %v8917_v42  ;;  %v9090_v40 = vsel %vm492_vm0, %v9058_v30, 0.0 }
 0xec3   : > { %v19386_v33 = vadd.f32 %v15660_v24, %v8860_v13  ;;  %8976 = vadd.xlane.f32.xlu1 %v8975_v58  ;;  %v9060_v37 = vmul.f32 %v19417_v43, %v19417_v43  ;;  %v19436_v32 = vsub.f32 %v19249_v48, %v9001_v60  ;;  %v8929_v58 = vpop.xlane.xlu1 %8928  ;;  %v9099_v24 = vsel %vm492_vm0, %v9061_v28, 0.0 }
 0xec4   : > { %v19389_v25 = vadd.f32 %v15661_v50, %v8859_v7  ;;  %v13372_v16 = vpop.f32.mrb[110].mxu1  ;;  %v9003_v7 = vmul.f32 0.03125, %v8926_v62  ;;  %v9063_v50 = vmul.f32 %v19424_v19, %v19424_v19  ;;  %v19442_v57 = vsub.f32 %v19255_v54, %v9000_v59 }
 0xec5   : > { %v8862_v29 = vadd.f32 %v13372_v16, %v19207_v55  ;;  %v8783_v61 = vpop.f32.mrb[111].mxu1  ;;  %v8984_v4 = vsel %vm492_vm0, %v19386_v33, 0.0  ;;  %v8932_v16 = vpop.xlane.xlu0 %8931  ;;  %v9002_v1 = vmul.f32 0.03125, %v8923_v23  ;;  %v9096_v42 = vsel %vm492_vm0, %v9060_v37, 0.0 }
 0xec6   : > { %v8861_v38 = vadd.f32 %v19207_v55, %v8783_v61  ;;  %8985 = vadd.xlane.f32.xlu0 %v8984_v4  ;;  %v8981_v14 = vsel %vm492_vm0, %v19389_v25, 0.0  ;;  %v9059_v55 = vmul.f32 %v19392_v35, %v19392_v35  ;;  %v19448_v48 = vsub.f32 %v19261_v0, %v9003_v7 }
 0xec7   : > { %v19404_v20 = vadd.f32 %v15662_v45, %v8862_v29  ;;  %8982 = vadd.xlane.f32.xlu1 %v8981_v14  ;;  %v9062_v29 = vmul.f32 %v19430_v18, %v19430_v18  ;;  %v9005_v61 = vmul.f32 0.03125, %v8932_v16  ;;  %v9105_v4 = vsel %vm492_vm0, %v9063_v50, 0.0 }
 0xec8   : > { %v19407_v39 = vadd.f32 %v15663_v41, %v8861_v38  ;;  %v9093_v13 = vsel %vm492_vm0, %v9059_v55, 0.0  ;;  %v9065_v36 = vmul.f32 %v19436_v32, %v19436_v32  ;;  %v19454_v54 = vsub.f32 %v19267_v56, %v9002_v1  ;;  %v8935_v41 = vpop.xlane.xlu1 %8934 }
 0xec9   : > { %v8990_v2 = vsel %vm492_vm0, %v19404_v20, 0.0  ;;  %v9004_v31 = vmul.f32 0.03125, %v8929_v58  ;;  %v8938_v38 = vpop.xlane.xlu0 %8937  ;;  %v9102_v14 = vsel %vm492_vm0, %v9062_v29, 0.0  ;;  %v9064_v45 = vmul.f32 %v19442_v57, %v19442_v57 }
 0xeca   : > { %8991 = vadd.xlane.f32.xlu0 %v8990_v2  ;;  %v8987_v15 = vsel %vm492_vm0, %v19407_v39, 0.0  ;;  %v19460_v0 = vsub.f32 %v19273_v8, %v9005_v61  ;;  %v9007_v26 = vmul.f32 0.03125, %v8938_v38  ;;  %v9111_v2 = vsel %vm492_vm0, %v9065_v36, 0.0  ;;  %v9390_v61 = vld [vmem:[%s20530_s7] sm:$0xff]  ;;  %v9393_v38 = vld [vmem:[%s20530_s7 + $0x18] sm:$0xff] }
 0xecb   : > { %8988 = vadd.xlane.f32.xlu1 %v8987_v15  ;;  %v9067_v56 = vmul.f32 %v19448_v48, %v19448_v48  ;;  %v19466_v55 = vsub.f32 %v19278_v53, %v9004_v31  ;;  %v9006_v49 = vmul.f32 0.03125, %v8935_v41  ;;  %v9108_v30 = vsel %vm492_vm0, %v9064_v45, 0.0  ;;  %v9392_v31 = vld [vmem:[%s20530_s7 + $0x10] sm:$0xff] }
 0xecc   : > { %v9066_v23 = vmul.f32 %v19454_v54, %v19454_v54  ;;  %v8941_v62 = vpop.xlane.xlu1 %8940  ;;  %v19472_v8 = vsub.f32 %v19285_v46, %v9007_v26  ;;  %v9069_v53 = vmul.f32 %v19460_v0, %v19460_v0 }
 0xecd   : > { %v8944_v15 = vpop.xlane.xlu0 %8943  ;;  %v19478_v28 = vsub.f32 %v19290_v22, %v9006_v49  ;;  %v9008_v59 = vmul.f32 0.03125, %v8941_v62  ;;  %v9068_v37 = vmul.f32 %v19466_v55, %v19466_v55 }
 0xece   : > { %9094 = vadd.xlane.f32.xlu0 %v9093_v13  ;;  %v9009_v60 = vmul.f32 0.03125, %v8944_v15  ;;  %v9117_v13 = vsel %vm492_vm0, %v9067_v56, 0.0  ;;  %v9123_v7 = vsel %vm492_vm0, %v9069_v53, 0.0  ;;  %v9071_v58 = vmul.f32 %v19472_v8, %v19472_v8 }
 0xecf   : > { %9091 = vadd.xlane.f32.xlu1 %v9090_v40  ;;  %v9114_v40 = vsel %vm492_vm0, %v9066_v23, 0.0  ;;  %v9120_v22 = vsel %vm492_vm0, %v9068_v37, 0.0  ;;  %v9070_v50 = vmul.f32 %v19478_v28, %v19478_v28 }
 0xed0   : > { %v19484_v46 = vsub.f32 %v19299_v9, %v9009_v60  ;;  %v9129_v16 = vsel %vm492_vm0, %v9071_v58, 0.0 }
 0xed1   : > { %v9126_v1 = vsel %vm492_vm0, %v9070_v50, 0.0 }
 0xed2   : > { %9100 = vadd.xlane.f32.xlu0 %v9099_v24  ;;  %v19490_v24 = vsub.f32 %v19302_v11, %v9008_v59  ;;  %v9073_v9 = vmul.f32 %v19484_v46, %v19484_v46 }
 0xed3   : > { %9097 = vadd.xlane.f32.xlu1 %v9096_v42 }
 0xed4   : > { %v9072_v42 = vmul.f32 %v19490_v24, %v19490_v24  ;;  %v9135_v11 = vsel %vm492_vm0, %v9073_v9, 0.0 }
 0xed6   : > { %9106 = vadd.xlane.f32.xlu0 %v9105_v4  ;;  %v9132_v29 = vsel %vm492_vm0, %v9072_v42, 0.0  ;;  %v9391_v4 = vld [vmem:[%s20530_s7 + $0x8] sm:$0xff] }
 0xed7   : > { %9103 = vadd.xlane.f32.xlu1 %v9102_v14  ;;  %v14141_v36 = vpack.c.bf16 %v9391_v4, %v9390_v61  ;;  %v14145_v14 = vpack.c.bf16 %v9393_v38, %v9392_v31 }
 0xed9   : > { %14142 = vmatprep.subr.bf16.mxu0 %v14141_v36  ;;  %14169 = vmatprep.subr.bf16.mxu1 %v14141_v36 }
 0xeda   : > { %9112 = vadd.xlane.f32.xlu0 %v9111_v2  ;;  %14144 = vmatpush3.bf16.msra.mxu0 %v14141_v36 }
 0xedb   : > { %9109 = vadd.xlane.f32.xlu1 %v9108_v30  ;;  %14171 = vmatpush3.bf16.msra.mxu1 %v14141_v36 }
 0xedc   : > { %14146 = vmatprep.subr.bf16.mxu0 %v14145_v14  ;;  %14170 = vmatprep.subr.bf16.mxu1 %v14145_v14 }
 0xede   : > { %9118 = vadd.xlane.f32.xlu0 %v9117_v13  ;;  %14148 = vmatpush3.bf16.msra.mxu0 %v14145_v14 }
 0xedf   : > { %9115 = vadd.xlane.f32.xlu1 %v9114_v40  ;;  %14172 = vmatpush3.bf16.msra.mxu1 %v14145_v14 }
 0xee2   : > { %9124 = vadd.xlane.f32.xlu0 %v9123_v7 }
 0xee3   : > { %9121 = vadd.xlane.f32.xlu1 %v9120_v22 }
 0xee6   : > { %9130 = vadd.xlane.f32.xlu0 %v9129_v16 }
 0xee7   : > { %9127 = vadd.xlane.f32.xlu1 %v9126_v1 }
 0xeea   : > { %9136 = vadd.xlane.f32.xlu0 %v9135_v11 }
 0xeeb   : > { %9133 = vadd.xlane.f32.xlu1 %v9132_v29 }
 0xf35   : > { %v8950_v45 = vpop.xlane.xlu0 %8949 }
 0xf36   : > { %v9011_v41 = vmul.f32 0.03125, %v8950_v45  ;;  %v8947_v26 = vpop.xlane.xlu1 %8946 }
 0xf37   : > { %v9010_v2 = vmul.f32 0.03125, %v8947_v26 }
 0xf38   : > { %v19516_v56 = vsub.f32 %v19311_v3, %v9011_v41 }
 0xf39   : > { %v19519_v49 = vsub.f32 %v19314_v44, %v9010_v2 }
 0xf3a   : > { %v9075_v15 = vmul.f32 %v19516_v56, %v19516_v56 }
 0xf3b   : > { %v9074_v30 = vmul.f32 %v19519_v49, %v19519_v49 }
 0xf3c   : > { %v9141_v23 = vsel %vm492_vm0, %v9075_v15, 0.0 }
 0xf3d   : > { %v8956_v62 = vpop.xlane.xlu0 %8955  ;;  %9142 = vadd.xlane.f32.xlu0 %v9141_v23  ;;  %v9138_v60 = vsel %vm492_vm0, %v9074_v30, 0.0 }
 0xf3e   : > { %v9013_v13 = vmul.f32 0.03125, %v8956_v62  ;;  %v8953_v53 = vpop.xlane.xlu1 %8952  ;;  %9139 = vadd.xlane.f32.xlu1 %v9138_v60 }
 0xf3f   : > { %v9012_v3 = vmul.f32 0.03125, %v8953_v53 }
 0xf40   : > { %v19528_v59 = vsub.f32 %v19325_v10, %v9013_v13 }
 0xf41   : > { %v19531_v44 = vsub.f32 %v19328_v51, %v9012_v3 }
 0xf42   : > { %v9077_v40 = vmul.f32 %v19528_v59, %v19528_v59 }
 0xf43   : > { %v8962_v37 = vpop.xlane.xlu0 %8961  ;;  %v9076_v7 = vmul.f32 %v19531_v44, %v19531_v44 }
 0xf44   : > { %v9015_v58 = vmul.f32 0.03125, %v8962_v37  ;;  %v8959_v22 = vpop.xlane.xlu1 %8958  ;;  %v9147_v50 = vsel %vm492_vm0, %v9077_v40, 0.0 }
 0xf45   : > { %v9014_v16 = vmul.f32 0.03125, %v8959_v22  ;;  %9148 = vadd.xlane.f32.xlu0 %v9147_v50  ;;  %v9144_v9 = vsel %vm492_vm0, %v9076_v7, 0.0 }
 0xf46   : > { %v19540_v10 = vsub.f32 %v19337_v34, %v9015_v58  ;;  %9145 = vadd.xlane.f32.xlu1 %v9144_v9 }
 0xf47   : > { %v19543_v51 = vsub.f32 %v19340_v47, %v9014_v16  ;;  %v8968_v1 = vpop.xlane.xlu0 %8967 }
 0xf48   : > { %v9017_v42 = vmul.f32 0.03125, %v8968_v1  ;;  %v8965_v11 = vpop.xlane.xlu1 %8964  ;;  %v9079_v29 = vmul.f32 %v19540_v10, %v19540_v10 }
 0xf49   : > { %v9016_v61 = vmul.f32 0.03125, %v8965_v11  ;;  %v9078_v4 = vmul.f32 %v19543_v51, %v19543_v51 }
 0xf4a   : > { %v19550_v36 = vsub.f32 %v19349_v27, %v9017_v42  ;;  %v9153_v34 = vsel %vm492_vm0, %v9079_v29, 0.0 }
 0xf4b   : > { %v19554_v31 = vsub.f32 %v19352_v12, %v9016_v61  ;;  %v8974_v47 = vpop.xlane.xlu0 %8973  ;;  %9154 = vadd.xlane.f32.xlu0 %v9153_v34  ;;  %v9150_v38 = vsel %vm492_vm0, %v9078_v4, 0.0 }
 0xf4c   : > { %v9019_v14 = vmul.f32 0.03125, %v8974_v47  ;;  %v8971_v45 = vpop.xlane.xlu1 %8970  ;;  %9151 = vadd.xlane.f32.xlu1 %v9150_v38  ;;  %v9081_v41 = vmul.f32 %v19550_v36, %v19550_v36 }
 0xf4d   : > { %v9018_v26 = vmul.f32 0.03125, %v8971_v45  ;;  %v9080_v27 = vmul.f32 %v19554_v31, %v19554_v31 }
 0xf4e   : > { %v19562_v2 = vsub.f32 %v19361_v52, %v9019_v14  ;;  %v9159_v12 = vsel %vm492_vm0, %v9081_v41, 0.0 }
 0xf4f   : > { %v19566_v15 = vsub.f32 %v19364_v5, %v9018_v26  ;;  %v8980_v30 = vpop.xlane.xlu0 %8979  ;;  %9160 = vadd.xlane.f32.xlu0 %v9159_v12  ;;  %v9156_v23 = vsel %vm492_vm0, %v9080_v27, 0.0 }
 0xf50   : > { %v9021_v62 = vmul.f32 0.03125, %v8980_v30  ;;  %v8977_v60 = vpop.xlane.xlu1 %8976  ;;  %9157 = vadd.xlane.f32.xlu1 %v9156_v23  ;;  %v9083_v13 = vmul.f32 %v19562_v2, %v19562_v2 }
 0xf51   : > { %v9020_v53 = vmul.f32 0.03125, %v8977_v60  ;;  %v9082_v52 = vmul.f32 %v19566_v15, %v19566_v15 }
 0xf52   : > { %v19574_v3 = vsub.f32 %v19373_v63, %v9021_v62  ;;  %v9165_v5 = vsel %vm492_vm0, %v9083_v13, 0.0 }
 0xf53   : > { %v19578_v40 = vsub.f32 %v19376_v6, %v9020_v53  ;;  %v8986_v37 = vpop.xlane.xlu0 %8985  ;;  %9166 = vadd.xlane.f32.xlu0 %v9165_v5  ;;  %v9162_v7 = vsel %vm492_vm0, %v9082_v52, 0.0 }
 0xf54   : > { %v9023_v58 = vmul.f32 0.03125, %v8986_v37  ;;  %v8983_v22 = vpop.xlane.xlu1 %8982  ;;  %9163 = vadd.xlane.f32.xlu1 %v9162_v7  ;;  %v9085_v50 = vmul.f32 %v19574_v3, %v19574_v3 }
 0xf55   : > { %v9022_v16 = vmul.f32 0.03125, %v8983_v22  ;;  %v9084_v63 = vmul.f32 %v19578_v40, %v19578_v40 }
 0xf56   : > { %v19586_v9 = vsub.f32 %v19386_v33, %v9023_v58  ;;  %v9171_v6 = vsel %vm492_vm0, %v9085_v50, 0.0 }
 0xf57   : > { %v19590_v1 = vsub.f32 %v19389_v25, %v9022_v16  ;;  %9172 = vadd.xlane.f32.xlu0 %v9171_v6  ;;  %v8992_v42 = vpop.xlane.xlu0 %8991  ;;  %v9168_v11 = vsel %vm492_vm0, %v9084_v63, 0.0 }
 0xf58   : > { %v9025_v29 = vmul.f32 0.03125, %v8992_v42  ;;  %9169 = vadd.xlane.f32.xlu1 %v9168_v11  ;;  %v8989_v61 = vpop.xlane.xlu1 %8988  ;;  %v9087_v4 = vmul.f32 %v19586_v9, %v19586_v9 }
 0xf59   : > { %v9024_v34 = vmul.f32 0.03125, %v8989_v61  ;;  %v9086_v33 = vmul.f32 %v19590_v1, %v19590_v1 }
 0xf5a   : > { %v19598_v47 = vsub.f32 %v19404_v20, %v9025_v29  ;;  %v9177_v25 = vsel %vm492_vm0, %v9087_v4, 0.0  ;;  %v19614_v4 = vld [vmem:[%s20528_s5] ss:$0 sm:$0xff] }
 0xf5b   : > { %v19602_v38 = vsub.f32 %v19407_v39, %v9024_v34  ;;  %9178 = vadd.xlane.f32.xlu0 %v9177_v25  ;;  %v9095_v14 = vpop.xlane.xlu0 %9094  ;;  %v9174_v45 = vsel %vm492_vm0, %v9086_v33, 0.0 }
 0xf5c   : > { %v9187_v41 = vmul.f32 0.03125, %v9095_v14  ;;  %9175 = vadd.xlane.f32.xlu1 %v9174_v45  ;;  %v9092_v26 = vpop.xlane.xlu1 %9091  ;;  %v9089_v27 = vmul.f32 %v19598_v47, %v19598_v47 }
 0xf5d   : > { %v9186_v12 = vmul.f32 0.03125, %v9092_v26  ;;  %v9088_v20 = vmul.f32 %v19602_v38, %v19602_v38 }
 0xf5e   : > { %v9219_v30 = vadd.f32 1e-05, %v9187_v41  ;;  %v9183_v23 = vsel %vm492_vm0, %v9089_v27, 0.0 }
 0xf5f   : > { %v9218_v62 = vadd.f32 1e-05, %v9186_v12  ;;  %9184 = vadd.xlane.f32.xlu0 %v9183_v23  ;;  %v9101_v39 = vpop.xlane.xlu0 %9100  ;;  %v9180_v60 = vsel %vm492_vm0, %v9088_v20, 0.0  ;;  %v19621_v12 = vld [vmem:[%s20529_s6] ss:$0 sm:$0xff] }
 0xf60   : > { %15440 = vrsqrt.f32 %v9219_v30  ;;  %v9189_v13 = vmul.f32 0.03125, %v9101_v39  ;;  %9181 = vadd.xlane.f32.xlu1 %v9180_v60  ;;  %v9098_v53 = vpop.xlane.xlu1 %9097 }
 0xf61   : > { %15442 = vrsqrt.f32 %v9218_v62  ;;  %v9188_v52 = vmul.f32 0.03125, %v9098_v53 }
 0xf62   : > { %v9221_v5 = vadd.f32 1e-05, %v9189_v13 }
 0xf63   : > { %v9220_v37 = vadd.f32 1e-05, %v9188_v52  ;;  %v9107_v7 = vpop.xlane.xlu0 %9106 }
 0xf64   : > { %15444 = vrsqrt.f32 %v9221_v5  ;;  %v9191_v58 = vmul.f32 0.03125, %v9107_v7  ;;  %v9104_v22 = vpop.xlane.xlu1 %9103 }
 0xf65   : > { %15446 = vrsqrt.f32 %v9220_v37  ;;  %v9190_v50 = vmul.f32 0.03125, %v9104_v22 }
 0xf66   : > { %v9223_v16 = vadd.f32 1e-05, %v9191_v58 }
 0xf67   : > { %v9222_v63 = vadd.f32 1e-05, %v9190_v50  ;;  %v9113_v6 = vpop.xlane.xlu0 %9112 }
 0xf68   : > { %15448 = vrsqrt.f32 %v9223_v16  ;;  %v9193_v42 = vmul.f32 0.03125, %v9113_v6  ;;  %v9110_v11 = vpop.xlane.xlu1 %9109 }
 0xf69   : > { %15450 = vrsqrt.f32 %v9222_v63  ;;  %v9192_v29 = vmul.f32 0.03125, %v9110_v11 }
 0xf6a   : > { %v15441_v61 = vpop.eup %15440  ;;  %v9225_v34 = vadd.f32 1e-05, %v9193_v42 }
 0xf6b   : > { %v15443_v33 = vpop.eup %15442  ;;  %v9283_v25 = vmul.f32 %v15441_v61, %v19392_v35  ;;  %v9224_v14 = vadd.f32 1e-05, %v9192_v29  ;;  %v9119_v45 = vpop.xlane.xlu0 %9118 }
 0xf6c   : > { %15452 = vrsqrt.f32 %v9225_v34  ;;  %v9195_v41 = vmul.f32 0.03125, %v9119_v45  ;;  %v9116_v26 = vpop.xlane.xlu1 %9115  ;;  %v9282_v27 = vmul.f32 %v15443_v33, %v19398_v21 }
 0xf6d   : > { %v9321_v20 = vmul.f32 %v19614_v4, %v9283_v25  ;;  %15454 = vrsqrt.f32 %v9224_v14  ;;  %v9194_v30 = vmul.f32 0.03125, %v9116_v26 }
 0xf6e   : > { %v15445_v23 = vpop.eup %15444  ;;  %v9227_v62 = vadd.f32 1e-05, %v9195_v41  ;;  %v9320_v35 = vmul.f32 %v19614_v4, %v9282_v27 }
 0xf6f   : > { %v15447_v39 = vpop.eup %15446  ;;  %v9226_v60 = vadd.f32 1e-05, %v9194_v30  ;;  %v9125_v13 = vpop.xlane.xlu0 %9124  ;;  %v9285_v53 = vmul.f32 %v15445_v23, %v19410_v17  ;;  %v19631_v7 = vadd.f32 %v19621_v12, %v9321_v20 }
 0xf70   : > { %15456 = vrsqrt.f32 %v9227_v62  ;;  %v9197_v21 = vmul.f32 0.03125, %v9125_v13  ;;  %v9122_v52 = vpop.xlane.xlu1 %9121  ;;  %v19627_v5 = vadd.f32 %v19621_v12, %v9320_v35  ;;  %v9284_v37 = vmul.f32 %v15447_v39, %v19417_v43 }
 0xf71   : > { %15458 = vrsqrt.f32 %v9226_v60  ;;  %v9196_v58 = vmul.f32 0.03125, %v9122_v52  ;;  %v9323_v22 = vmul.f32 %v19614_v4, %v9285_v53 }
 0xf72   : > { %v15449_v50 = vpop.eup %15448  ;;  %v9229_v16 = vadd.f32 1e-05, %v9197_v21  ;;  %13381 = vmatprep.mubr.msk.f32.mxu0 %vm492_vm0, %v19627_v5  ;;  %v9322_v17 = vmul.f32 %v19614_v4, %v9284_v37 }
 0xf73   : > { %v15451_v63 = vpop.eup %15450  ;;  %v9228_v6 = vadd.f32 1e-05, %v9196_v58  ;;  %v9131_v42 = vpop.xlane.xlu0 %9130  ;;  %13382 = vmatmul.mubr.msk.f32.vlgmr.msra.gmra.mrb[160].mxu0 %vm492_vm0, %v19631_v7  ;;  %v9287_v43 = vmul.f32 %v15449_v50, %v19424_v19  ;;  %v19645_v25 = vadd.f32 %v19621_v12, %v9323_v22 }
 0xf74   : > { %15460 = vrsqrt.f32 %v9229_v16  ;;  %v9199_v11 = vmul.f32 0.03125, %v9131_v42  ;;  %v9128_v29 = vpop.xlane.xlu1 %9127  ;;  %v19641_v61 = vadd.f32 %v19621_v12, %v9322_v17  ;;  %v9286_v34 = vmul.f32 %v15451_v63, %v19430_v18 }
 0xf75   : > { %15462 = vrsqrt.f32 %v9228_v6  ;;  %v9198_v33 = vmul.f32 0.03125, %v9128_v29  ;;  %v9325_v14 = vmul.f32 %v19614_v4, %v9287_v43 }
 0xf76   : > { %v15453_v45 = vpop.eup %15452  ;;  %v9231_v41 = vadd.f32 1e-05, %v9199_v11  ;;  %13384 = vmatprep.mubr.msk.f32.mxu0 %vm492_vm0, %v19641_v61  ;;  %v9324_v19 = vmul.f32 %v19614_v4, %v9286_v34 }
 0xf77   : > { %v15455_v26 = vpop.eup %15454  ;;  %v9230_v27 = vadd.f32 1e-05, %v9198_v33  ;;  %v9137_v20 = vpop.xlane.xlu0 %9136  ;;  %13385 = vmatmul.mubr.msk.f32.gmra.mrb[162].mxu0 %vm492_vm0, %v19645_v25  ;;  %v9289_v18 = vmul.f32 %v15453_v45, %v19436_v32  ;;  %v19659_v60 = vadd.f32 %v19621_v12, %v9325_v14 }
 0xf78   : > { %15464 = vrsqrt.f32 %v9231_v41  ;;  %v9201_v30 = vmul.f32 0.03125, %v9137_v20  ;;  %v9134_v23 = vpop.xlane.xlu1 %9133  ;;  %v19655_v62 = vadd.f32 %v19621_v12, %v9324_v19  ;;  %v9288_v35 = vmul.f32 %v15455_v26, %v19442_v57 }
 0xf79   : > { %15466 = vrsqrt.f32 %v9230_v27  ;;  %v9200_v39 = vmul.f32 0.03125, %v9134_v23  ;;  %v9327_v13 = vmul.f32 %v19614_v4, %v9289_v18 }
 0xf7a   : > { %v15457_v53 = vpop.eup %15456  ;;  %v9233_v21 = vadd.f32 1e-05, %v9201_v30  ;;  %13387 = vmatprep.mubr.msk.f32.mxu0 %vm492_vm0, %v19655_v62  ;;  %v9326_v32 = vmul.f32 %v19614_v4, %v9288_v35 }
 0xf7b   : > { %v15459_v52 = vpop.eup %15458  ;;  %v9232_v37 = vadd.f32 1e-05, %v9200_v39  ;;  %13388 = vmatmul.mubr.msk.f32.gmra.mrb[164].mxu0 %vm492_vm0, %v19659_v60  ;;  %v9291_v57 = vmul.f32 %v15457_v53, %v19448_v48  ;;  %v19673_v50 = vadd.f32 %v19621_v12, %v9327_v13 }
 0xf7c   : > { %15468 = vrsqrt.f32 %v9233_v21  ;;  %v19669_v58 = vadd.f32 %v19621_v12, %v9326_v32  ;;  %v9290_v22 = vmul.f32 %v15459_v52, %v19454_v54 }
 0xf7d   : > { %15470 = vrsqrt.f32 %v9232_v37  ;;  %v9329_v16 = vmul.f32 %v19614_v4, %v9291_v57 }
 0xf7e   : > { %v15461_v17 = vpop.eup %15460  ;;  %13390 = vmatprep.mubr.msk.f32.mxu0 %vm492_vm0, %v19669_v58  ;;  %v9328_v63 = vmul.f32 %v19614_v4, %v9290_v22 }
 0xf7f   : > { %v15463_v6 = vpop.eup %15462  ;;  %13391 = vmatmul.mubr.msk.f32.gmra.mrb[166].mxu0 %vm492_vm0, %v19673_v50  ;;  %v9293_v48 = vmul.f32 %v15461_v17, %v19460_v0  ;;  %v19687_v43 = vadd.f32 %v19621_v12, %v9329_v16 }
 0xf80   : > { %v19683_v54 = vadd.f32 %v19621_v12, %v9328_v63  ;;  %v9292_v42 = vmul.f32 %v15463_v6, %v19466_v55 }
 0xf81   : > { %v9331_v11 = vmul.f32 %v19614_v4, %v9293_v48 }
 0xf82   : > { %v15465_v29 = vpop.eup %15464  ;;  %13393 = vmatprep.mubr.msk.f32.mxu0 %vm492_vm0, %v19683_v54  ;;  %v9330_v34 = vmul.f32 %v19614_v4, %v9292_v42 }
 0xf83   : > { %v15467_v33 = vpop.eup %15466  ;;  %13394 = vmatmul.mubr.msk.f32.gmra.mrb[168].mxu0 %vm492_vm0, %v19687_v43  ;;  %v9295_v0 = vmul.f32 %v15465_v29, %v19472_v8  ;;  %v19701_v45 = vadd.f32 %v19621_v12, %v9331_v11 }
 0xf84   : > { %v19697_v14 = vadd.f32 %v19621_v12, %v9330_v34  ;;  %v9294_v55 = vmul.f32 %v15467_v33, %v19478_v28 }
 0xf85   : > { %v9333_v41 = vmul.f32 %v19614_v4, %v9295_v0 }
 0xf86   : > { %v15469_v19 = vpop.eup %15468  ;;  %13396 = vmatprep.mubr.msk.f32.mxu0 %vm492_vm0, %v19697_v14  ;;  %v9332_v26 = vmul.f32 %v19614_v4, %v9294_v55 }
 0xf87   : > { %v15471_v27 = vpop.eup %15470  ;;  %13397 = vmatmul.mubr.msk.f32.gmra.mrb[170].mxu0 %vm492_vm0, %v19701_v45  ;;  %v9297_v8 = vmul.f32 %v15469_v19, %v19484_v46  ;;  %v19715_v18 = vadd.f32 %v19621_v12, %v9333_v41 }
 0xf88   : > { %v19711_v20 = vadd.f32 %v19621_v12, %v9332_v26  ;;  %v9296_v28 = vmul.f32 %v15471_v27, %v19490_v24 }
 0xf89   : > { %v9335_v30 = vmul.f32 %v19614_v4, %v9297_v8 }
 0xf8a   : > { %13399 = vmatprep.mubr.msk.f32.mxu0 %vm492_vm0, %v19711_v20  ;;  %v9334_v23 = vmul.f32 %v19614_v4, %v9296_v28  ;;  %v9882_v28 = vld [vmem:[%s20532_s9] sm:$0xff] }
 0xf8b   : > { %13400 = vmatmul.mubr.msk.f32.gmra.mrb[172].mxu0 %vm492_vm0, %v19715_v18  ;;  %v19727_v35 = vadd.f32 %v19621_v12, %v9335_v30 }
 0xf8c   : > { %v19724_v46 = vadd.f32 %v19621_v12, %v9334_v23 }
 0xf8e   : > { %13402 = vmatprep.mubr.msk.f32.mxu0 %vm492_vm0, %v19724_v46 }
 0xf8f   : > { %13403 = vmatmul.mubr.msk.f32.gmra.mrb[174].mxu0 %vm492_vm0, %v19727_v35 }
 0xfca   : > { %v9143_v24 = vpop.xlane.xlu0 %9142 }
 0xfcb   : > { %v9203_v39 = vmul.f32 0.03125, %v9143_v24  ;;  %v9140_v13 = vpop.xlane.xlu1 %9139 }
 0xfcc   : > { %v9202_v53 = vmul.f32 0.03125, %v9140_v13 }
 0xfcd   : > { %v9235_v21 = vadd.f32 1e-05, %v9203_v39 }
 0xfce   : > { %v9234_v32 = vadd.f32 1e-05, %v9202_v53 }
 0xfcf   : > { %15472 = vrsqrt.f32 %v9235_v21 }
 0xfd0   : > { %15474 = vrsqrt.f32 %v9234_v32 }
 0xfd2   : > { %v9149_v52 = vpop.xlane.xlu0 %9148 }
 0xfd3   : > { %v9205_v37 = vmul.f32 0.03125, %v9149_v52  ;;  %v9146_v57 = vpop.xlane.xlu1 %9145 }
 0xfd4   : > { %v9204_v22 = vmul.f32 0.03125, %v9146_v57  ;;  %v9885_v57 = vld [vmem:[%s20532_s9 + $0x18] sm:$0xff] }
 0xfd5   : > { %v9237_v16 = vadd.f32 1e-05, %v9205_v37  ;;  %v9884_v37 = vld [vmem:[%s20532_s9 + $0x10] sm:$0xff] }
 0xfd6   : > { %v9236_v17 = vadd.f32 1e-05, %v9204_v22 }
 0xfd7   : > { %15476 = vrsqrt.f32 %v9237_v16 }
 0xfd8   : > { %15478 = vrsqrt.f32 %v9236_v17  ;;  %v9155_v63 = vpop.xlane.xlu0 %9154 }
 0xfd9   : > { %v15473_v6 = vpop.eup %15472  ;;  %v9207_v48 = vmul.f32 0.03125, %v9155_v63  ;;  %v9152_v42 = vpop.xlane.xlu1 %9151  ;;  %v14153_v63 = vpack.c.bf16 %v9885_v57, %v9884_v37 }
 0xfda   : > { %v15475_v11 = vpop.eup %15474  ;;  %v9206_v29 = vmul.f32 0.03125, %v9152_v42  ;;  %v9299_v34 = vmul.f32 %v15473_v6, %v19516_v56  ;;  %v9883_v56 = vld [vmem:[%s20532_s9 + $0x8] sm:$0xff] }
 0xfdb   : > { %v9239_v33 = vadd.f32 1e-05, %v9207_v48  ;;  %v9298_v0 = vmul.f32 %v15475_v11, %v19519_v49  ;;  %v14149_v49 = vpack.c.bf16 %v9883_v56, %v9882_v28 }
 0xfdc   : > { %v9238_v55 = vadd.f32 1e-05, %v9206_v29  ;;  %v9161_v41 = vpop.xlane.xlu0 %9160  ;;  %v9337_v19 = vmul.f32 %v19614_v4, %v9299_v34 }
 0xfdd   : > { %15480 = vrsqrt.f32 %v9239_v33  ;;  %v9209_v26 = vmul.f32 0.03125, %v9161_v41  ;;  %v9158_v27 = vpop.xlane.xlu1 %9157  ;;  %v9336_v8 = vmul.f32 %v19614_v4, %v9298_v0  ;;  %14150 = vmatprep.subr.bf16.mxu0 %v14149_v49 }
 0xfde   : > { %15482 = vrsqrt.f32 %v9238_v55  ;;  %v9208_v30 = vmul.f32 0.03125, %v9158_v27  ;;  %v19747_v53 = vadd.f32 %v19621_v12, %v9337_v19  ;;  %14152 = vmatpush3.bf16.msra.mxu0 %v14149_v49  ;;  %v9886_v55 = vld [vmem:[%s20532_s9 + $0x20] sm:$0xff] }
 0xfdf   : > { %v9241_v23 = vadd.f32 1e-05, %v9209_v26  ;;  %v19744_v24 = vadd.f32 %v19621_v12, %v9336_v8  ;;  %14154 = vmatprep.subr.bf16.mxu0 %v14153_v63 }
 0xfe0   : > { %v9240_v39 = vadd.f32 1e-05, %v9208_v30  ;;  %v9167_v13 = vpop.xlane.xlu0 %9166 }
 0xfe1   : > { %v15477_v21 = vpop.eup %15476  ;;  %15484 = vrsqrt.f32 %v9241_v23  ;;  %v9211_v32 = vmul.f32 0.03125, %v9167_v13  ;;  %13405 = vmatprep.mubr.msk.f32.mxu0 %vm492_vm0, %v19744_v24  ;;  %v9164_v52 = vpop.xlane.xlu1 %9163 }
 0xfe2   : > { %v15479_v22 = vpop.eup %15478  ;;  %15486 = vrsqrt.f32 %v9240_v39  ;;  %13406 = vmatmul.mubr.msk.f32.gmra.mrb[176].mxu0 %vm492_vm0, %v19747_v53  ;;  %v9210_v16 = vmul.f32 0.03125, %v9164_v52  ;;  %v9301_v17 = vmul.f32 %v15477_v21, %v19528_v59  ;;  %v9887_v59 = vld [vmem:[%s20532_s9 + $0x28] sm:$0xff]  ;;  %v9888_v21 = vld [vmem:[%s20532_s9 + $0x30] sm:$0xff] }
 0xfe3   : > { %v9243_v6 = vadd.f32 1e-05, %v9211_v32  ;;  %v9300_v48 = vmul.f32 %v15479_v22, %v19531_v44  ;;  %14156 = vmatpush3.bf16.msra.mxu0 %v14153_v63  ;;  %v14157_v41 = vpack.c.bf16 %v9887_v59, %v9886_v55  ;;  %v9889_v32 = vld [vmem:[%s20532_s9 + $0x38] sm:$0xff] }
 0xfe4   : > { %v9242_v42 = vadd.f32 1e-05, %v9210_v16  ;;  %v9173_v11 = vpop.xlane.xlu0 %9172  ;;  %v9339_v29 = vmul.f32 %v19614_v4, %v9301_v17  ;;  %v14161_v37 = vpack.c.bf16 %v9889_v32, %v9888_v21 }
 0xfe5   : > { %15488 = vrsqrt.f32 %v9243_v6  ;;  %v9213_v34 = vmul.f32 0.03125, %v9173_v11  ;;  %v9170_v33 = vpop.xlane.xlu1 %9169  ;;  %v9338_v0 = vmul.f32 %v19614_v4, %v9300_v48  ;;  %14158 = vmatprep.subr.bf16.mxu0 %v14157_v41 }
 0xfe6   : > { %15490 = vrsqrt.f32 %v9242_v42  ;;  %v9212_v44 = vmul.f32 0.03125, %v9170_v33  ;;  %v19773_v30 = vadd.f32 %v19621_v12, %v9339_v29 }
 0xfe7   : > { %v15481_v19 = vpop.eup %15480  ;;  %v9245_v26 = vadd.f32 1e-05, %v9213_v34  ;;  %v19770_v27 = vadd.f32 %v19621_v12, %v9338_v0  ;;  %14160 = vmatpush3.bf16.msra.mxu0 %v14157_v41 }
 0xfe8   : > { %v15483_v8 = vpop.eup %15482  ;;  %v9244_v28 = vadd.f32 1e-05, %v9212_v44  ;;  %v9179_v56 = vpop.xlane.xlu0 %9178  ;;  %v9303_v49 = vmul.f32 %v15481_v19, %v19540_v10  ;;  %14162 = vmatprep.subr.bf16.mxu0 %v14161_v37 }
 0xfe9   : > { %15492 = vrsqrt.f32 %v9245_v26  ;;  %v9215_v23 = vmul.f32 0.03125, %v9179_v56  ;;  %13408 = vmatprep.mubr.msk.f32.mxu0 %vm492_vm0, %v19770_v27  ;;  %v9176_v39 = vpop.xlane.xlu1 %9175  ;;  %v9302_v13 = vmul.f32 %v15483_v8, %v19543_v51 }
 0xfea   : > { %15494 = vrsqrt.f32 %v9244_v28  ;;  %13409 = vmatmul.mubr.msk.f32.gmra.mrb[178].mxu0 %vm492_vm0, %v19773_v30  ;;  %v9214_v10 = vmul.f32 0.03125, %v9176_v39  ;;  %v9341_v52 = vmul.f32 %v19614_v4, %v9303_v49 }
 0xfeb   : > { %v15485_v57 = vpop.eup %15484  ;;  %v9247_v22 = vadd.f32 1e-05, %v9215_v23  ;;  %v9340_v51 = vmul.f32 %v19614_v4, %v9302_v13  ;;  %14164 = vmatpush3.bf16.msra.mxu0 %v14161_v37 }
 0xfec   : > { %v15487_v16 = vpop.eup %15486  ;;  %v9246_v17 = vadd.f32 1e-05, %v9214_v10  ;;  %v9185_v63 = vpop.xlane.xlu0 %9184  ;;  %v9305_v6 = vmul.f32 %v15485_v57, %v19550_v36  ;;  %v19795_v33 = vadd.f32 %v19621_v12, %v9341_v52 }
 0xfed   : > { %15496 = vrsqrt.f32 %v9247_v22  ;;  %v9217_v48 = vmul.f32 0.03125, %v9185_v63  ;;  %v9182_v42 = vpop.xlane.xlu1 %9181  ;;  %v19791_v11 = vadd.f32 %v19621_v12, %v9340_v51  ;;  %v9304_v29 = vmul.f32 %v15487_v16, %v19554_v31 }
 0xfee   : > { %15498 = vrsqrt.f32 %v9246_v17  ;;  %v9216_v34 = vmul.f32 0.03125, %v9182_v42  ;;  %v9343_v0 = vmul.f32 %v19614_v4, %v9305_v6 }
 0xfef   : > { %v15489_v55 = vpop.eup %15488  ;;  %v9249_v59 = vadd.f32 1e-05, %v9217_v48  ;;  %13411 = vmatprep.mubr.msk.f32.mxu0 %vm492_vm0, %v19791_v11  ;;  %v9342_v36 = vmul.f32 %v19614_v4, %v9304_v29 }
 0xff0   : > { %v15491_v44 = vpop.eup %15490  ;;  %v9248_v41 = vadd.f32 1e-05, %v9216_v34  ;;  %13412 = vmatmul.mubr.msk.f32.gmra.mrb[180].mxu0 %vm492_vm0, %v19795_v33  ;;  %v9307_v31 = vmul.f32 %v15489_v55, %v19562_v2  ;;  %v19809_v8 = vadd.f32 %v19621_v12, %v9343_v0 }
 0xff1   : > { %15500 = vrsqrt.f32 %v9249_v59  ;;  %v19805_v19 = vadd.f32 %v19621_v12, %v9342_v36  ;;  %v9306_v26 = vmul.f32 %v15491_v44, %v19566_v15 }
 0xff2   : > { %15502 = vrsqrt.f32 %v9248_v41  ;;  %v9345_v28 = vmul.f32 %v19614_v4, %v9307_v31 }
 0xff3   : > { %v15493_v56 = vpop.eup %15492  ;;  %13414 = vmatprep.mubr.msk.f32.mxu0 %vm492_vm0, %v19805_v19  ;;  %v9344_v49 = vmul.f32 %v19614_v4, %v9306_v26 }
 0xff4   : > { %v15495_v23 = vpop.eup %15494  ;;  %13415 = vmatmul.mubr.msk.f32.gmra.mrb[182].mxu0 %vm492_vm0, %v19809_v8  ;;  %v9309_v2 = vmul.f32 %v15493_v56, %v19574_v3  ;;  %v19823_v13 = vadd.f32 %v19621_v12, %v9345_v28 }
 0xff5   : > { %v19819_v15 = vadd.f32 %v19621_v12, %v9344_v49  ;;  %v9308_v39 = vmul.f32 %v15495_v23, %v19578_v40 }
 0xff6   : > { %v9347_v21 = vmul.f32 %v19614_v4, %v9309_v2 }
 0xff7   : > { %v15497_v32 = vpop.eup %15496  ;;  %13417 = vmatprep.mubr.msk.f32.mxu0 %vm492_vm0, %v19819_v15  ;;  %v9346_v10 = vmul.f32 %v19614_v4, %v9308_v39 }
 0xff8   : > { %v15499_v52 = vpop.eup %15498  ;;  %v9311_v37 = vmul.f32 %v15497_v32, %v19586_v9  ;;  %13418 = vmatmul.mubr.msk.f32.gmra.mrb[184].mxu0 %vm492_vm0, %v19823_v13  ;;  %v19838_v22 = vadd.f32 %v19621_v12, %v9347_v21 }
 0xff9   : > { %v19833_v3 = vadd.f32 %v19621_v12, %v9346_v10  ;;  %v9310_v40 = vmul.f32 %v15499_v52, %v19590_v1 }
 0xffa   : > { %v9349_v57 = vmul.f32 %v19614_v4, %v9311_v37 }
 0xffb   : > { %v15501_v51 = vpop.eup %15500  ;;  %13420 = vmatprep.mubr.msk.f32.mxu0 %vm492_vm0, %v19833_v3  ;;  %v9348_v16 = vmul.f32 %v19614_v4, %v9310_v40 }
 0xffc   : > { %v15503_v9 = vpop.eup %15502  ;;  %13421 = vmatmul.mubr.msk.f32.gmra.mrb[186].mxu0 %vm492_vm0, %v19838_v22  ;;  %v9313_v17 = vmul.f32 %v15501_v51, %v19598_v47  ;;  %v19851_v6 = vadd.f32 %v19621_v12, %v9349_v57 }
 0xffd   : > { %v19847_v63 = vadd.f32 %v19621_v12, %v9348_v16  ;;  %v9312_v1 = vmul.f32 %v15503_v9, %v19602_v38  ;;  %v19872_v38 = vld [vmem:[%s20531_s8] ss:$0 sm:$0xff] }
 0xffe   : > { %v9351_v48 = vmul.f32 %v19614_v4, %v9313_v17 }
 0xfff   : > { %13423 = vmatprep.mubr.msk.f32.mxu1 %vm492_vm0, %v19847_v63  ;;  %v9350_v42 = vmul.f32 %v19614_v4, %v9312_v1 }
0x1000   : > { %13424 = vmatmul.mubr.msk.f32.vlgmr.msra.gmra.mrb[160].mxu1 %vm492_vm0, %v19851_v6  ;;  %v19863_v29 = vadd.f32 %v19621_v12, %v9351_v48 }
0x1001   : > { %v19860_v47 = vadd.f32 %v19621_v12, %v9350_v42 }
0x1003   : > { %13426 = vmatprep.mubr.msk.f32.mxu1 %vm492_vm0, %v19860_v47 }
0x1004   : > { %13427 = vmatmul.mubr.msk.f32.gmra.mrb[162].mxu1 %vm492_vm0, %v19863_v29 }
0x1046   : > { %v13383_v4 = vpop.f32.mrb[160].mxu0 }
0x1047   : > { %v9569_v34 = vadd.f32 %v13383_v4, %v19872_v38  ;;  %v9563_v0 = vpop.f32.mrb[161].mxu0 }
0x1048   : > { %v9564_v55 = vadd.f32 %v19872_v38, %v9563_v0 }
0x1049   : > { %v9755_v59 = vmul.f32 0.70710677, %v9569_v34  ;;  %v9723_v0 = vmul.f32 0.5, %v9569_v34 }
0x104a   : > { %v9754_v12 = vmul.f32 0.70710677, %v9564_v55  ;;  %v13386_v36 = vpop.f32.mrb[162].mxu0  ;;  %v9722_v1 = vmul.f32 0.5, %v9564_v55 }
0x104b   : > { %15504 = verf.f32 %v9755_v59  ;;  %v9579_v44 = vadd.f32 %v13386_v36, %v19872_v38  ;;  %v9573_v41 = vpop.f32.mrb[163].mxu0 }
0x104c   : > { %15506 = verf.f32 %v9754_v12  ;;  %v9574_v31 = vadd.f32 %v19872_v38, %v9573_v41 }
0x104d   : > { %v9757_v26 = vmul.f32 0.70710677, %v9579_v44  ;;  %v9725_v34 = vmul.f32 0.5, %v9579_v44 }
0x104e   : > { %v9756_v28 = vmul.f32 0.70710677, %v9574_v31  ;;  %v13389_v56 = vpop.f32.mrb[164].mxu0  ;;  %v9724_v55 = vmul.f32 0.5, %v9574_v31 }
0x104f   : > { %15508 = verf.f32 %v9757_v26  ;;  %v9589_v49 = vadd.f32 %v13389_v56, %v19872_v38  ;;  %v9583_v23 = vpop.f32.mrb[165].mxu0 }
0x1050   : > { %15510 = verf.f32 %v9756_v28  ;;  %v9584_v2 = vadd.f32 %v19872_v38, %v9583_v23 }
0x1051   : > { %v9759_v39 = vmul.f32 0.70710677, %v9589_v49 }
0x1052   : > { %v9758_v21 = vmul.f32 0.70710677, %v9584_v2  ;;  %v13392_v32 = vpop.f32.mrb[166].mxu0 }
0x1053   : > { %15512 = verf.f32 %v9759_v39  ;;  %v19881_v10 = vadd.f32 %v13392_v32, %v19872_v38  ;;  %v9593_v52 = vpop.f32.mrb[167].mxu0 }
0x1054   : > { %15514 = verf.f32 %v9758_v21  ;;  %v9594_v37 = vadd.f32 %v19872_v38, %v9593_v52 }
0x1055   : > { %v15505_v40 = vpop.eup %15504  ;;  %v9761_v57 = vmul.f32 0.70710677, %v19881_v10 }
0x1056   : > { %v15507_v51 = vpop.eup %15506  ;;  %v9819_v16 = vadd.f32 1.0, %v15505_v40  ;;  %v9760_v9 = vmul.f32 0.70710677, %v9594_v37  ;;  %v13395_v17 = vpop.f32.mrb[168].mxu0 }
0x1057   : > { %v9818_v48 = vadd.f32 1.0, %v15507_v51  ;;  %15516 = verf.f32 %v9761_v57  ;;  %v19886_v42 = vadd.f32 %v13395_v17, %v19872_v38  ;;  %v9603_v4 = vpop.f32.mrb[169].mxu0 }
0x1058   : > { %15518 = verf.f32 %v9760_v9  ;;  %v9604_v59 = vadd.f32 %v19872_v38, %v9603_v4  ;;  %v9851_v28 = vmul.f32 %v9819_v16, %v9723_v0  ;;  %v9726_v4 = vmul.f32 0.5, %v9584_v2 }
0x1059   : > { %v15509_v12 = vpop.eup %15508  ;;  %v9850_v36 = vmul.f32 %v9818_v48, %v9722_v1  ;;  %v9763_v41 = vmul.f32 0.70710677, %v19886_v42 }
0x105a   : > { %v15511_v26 = vpop.eup %15510  ;;  %v9821_v56 = vadd.f32 1.0, %v15509_v12  ;;  %v9762_v23 = vmul.f32 0.70710677, %v9604_v59  ;;  %v13398_v39 = vpop.f32.mrb[170].mxu0 }
0x105b   : > { %v9820_v21 = vadd.f32 1.0, %v15511_v26  ;;  %15520 = verf.f32 %v9763_v41  ;;  %v19891_v32 = vadd.f32 %v13398_v39, %v19872_v38  ;;  %v9613_v52 = vpop.f32.mrb[171].mxu0  ;;  %13445 = vmatprep.mubr.msk.f32.mxu0 %vm1495_vm3, %v9850_v36  ;;  %v9727_v36 = vmul.f32 0.5, %v9589_v49 }
0x105c   : > { %15522 = verf.f32 %v9762_v23  ;;  %v9614_v40 = vadd.f32 %v19872_v38, %v9613_v52  ;;  %13446 = vmatmul.mubr.msk.f32.vlgmr.msra.gmra.mrb[188].mxu0 %vm1495_vm3, %v9851_v28  ;;  %v9853_v31 = vmul.f32 %v9821_v56, %v9725_v34  ;;  %v9728_v52 = vmul.f32 0.5, %v9594_v37 }
0x105d   : > { %v15513_v57 = vpop.eup %15512  ;;  %v9852_v51 = vmul.f32 %v9820_v21, %v9724_v55  ;;  %v9765_v16 = vmul.f32 0.70710677, %v19891_v32  ;;  %v9729_v49 = vmul.f32 0.5, %v19881_v10 }
0x105e   : > { %v15515_v9 = vpop.eup %15514  ;;  %v9823_v17 = vadd.f32 1.0, %v15513_v57  ;;  %v9764_v1 = vmul.f32 0.70710677, %v9614_v40  ;;  %v13401_v48 = vpop.f32.mrb[172].mxu0 }
0x105f   : > { %v9822_v0 = vadd.f32 1.0, %v15515_v9  ;;  %15524 = verf.f32 %v9765_v16  ;;  %v9629_v12 = vadd.f32 %v13401_v48, %v19872_v38  ;;  %v9623_v44 = vpop.f32.mrb[173].mxu0  ;;  %13448 = vmatprep.mubr.msk.f32.mxu0 %vm1495_vm3, %v9852_v51 }
0x1060   : > { %15526 = verf.f32 %v9764_v1  ;;  %v9624_v41 = vadd.f32 %v19872_v38, %v9623_v44  ;;  %13449 = vmatmul.mubr.msk.f32.gmra.mrb[190].mxu0 %vm1495_vm3, %v9853_v31  ;;  %v9855_v39 = vmul.f32 %v9823_v17, %v9727_v36  ;;  %v9731_v36 = vmul.f32 0.5, %v19886_v42 }
0x1061   : > { %v15517_v26 = vpop.eup %15516  ;;  %v9854_v28 = vmul.f32 %v9822_v0, %v9726_v4  ;;  %v9767_v56 = vmul.f32 0.70710677, %v9629_v12  ;;  %v9730_v0 = vmul.f32 0.5, %v9604_v59  ;;  %v9733_v59 = vmul.f32 0.5, %v19891_v32 }
0x1062   : > { %v15519_v23 = vpop.eup %15518  ;;  %v9825_v55 = vadd.f32 1.0, %v15517_v26  ;;  %v9766_v2 = vmul.f32 0.70710677, %v9624_v41  ;;  %v13404_v21 = vpop.f32.mrb[174].mxu0 }
0x1063   : > { %v9824_v34 = vadd.f32 1.0, %v15519_v23  ;;  %15528 = verf.f32 %v9767_v56  ;;  %v9639_v57 = vadd.f32 %v13404_v21, %v19872_v38  ;;  %v9633_v51 = vpop.f32.mrb[175].mxu0  ;;  %13451 = vmatprep.mubr.msk.f32.mxu0 %vm1495_vm3, %v9854_v28 }
0x1064   : > { %15530 = verf.f32 %v9766_v2  ;;  %v9634_v16 = vadd.f32 %v19872_v38, %v9633_v51  ;;  %13452 = vmatmul.mubr.msk.f32.gmra.mrb[192].mxu0 %vm1495_vm3, %v9855_v39  ;;  %v9857_v48 = vmul.f32 %v9825_v55, %v9729_v49  ;;  %v9732_v39 = vmul.f32 0.5, %v9614_v40 }
0x1065   : > { %v15521_v9 = vpop.eup %15520  ;;  %v9856_v31 = vmul.f32 %v9824_v34, %v9728_v52  ;;  %v9769_v17 = vmul.f32 0.70710677, %v9639_v57  ;;  %v9734_v51 = vmul.f32 0.5, %v9624_v41 }
0x1066   : > { %v15523_v1 = vpop.eup %15522  ;;  %v9827_v37 = vadd.f32 1.0, %v15521_v9  ;;  %v9768_v4 = vmul.f32 0.70710677, %v9634_v16  ;;  %v9735_v9 = vmul.f32 0.5, %v9629_v12  ;;  %v9736_v32 = vmul.f32 0.5, %v9634_v16 }
0x1067   : > { %v9826_v44 = vadd.f32 1.0, %v15523_v1  ;;  %15532 = verf.f32 %v9769_v17  ;;  %13454 = vmatprep.mubr.msk.f32.mxu0 %vm1495_vm3, %v9856_v31 }
0x1068   : > { %15534 = verf.f32 %v9768_v4  ;;  %13455 = vmatmul.mubr.msk.f32.gmra.mrb[194].mxu0 %vm1495_vm3, %v9857_v48  ;;  %v9859_v56 = vmul.f32 %v9827_v37, %v9731_v36  ;;  %v9737_v4 = vmul.f32 0.5, %v9639_v57 }
0x1069   : > { %v15525_v10 = vpop.eup %15524  ;;  %v9858_v26 = vmul.f32 %v9826_v44, %v9730_v0 }
0x106a   : > { %v15527_v28 = vpop.eup %15526  ;;  %v9829_v23 = vadd.f32 1.0, %v15525_v10 }
0x106b   : > { %v9828_v2 = vadd.f32 1.0, %v15527_v28  ;;  %13457 = vmatprep.mubr.msk.f32.mxu0 %vm1495_vm3, %v9858_v26 }
0x106c   : > { %13458 = vmatmul.mubr.msk.f32.gmra.mrb[196].mxu0 %vm1495_vm3, %v9859_v56  ;;  %v9861_v42 = vmul.f32 %v9829_v23, %v9733_v59 }
0x106d   : > { %v15529_v55 = vpop.eup %15528  ;;  %v9860_v21 = vmul.f32 %v9828_v2, %v9732_v39 }
0x106e   : > { %v15531_v52 = vpop.eup %15530  ;;  %v9831_v34 = vadd.f32 1.0, %v15529_v55 }
0x106f   : > { %v9830_v49 = vadd.f32 1.0, %v15531_v52  ;;  %13460 = vmatprep.mubr.msk.f32.mxu0 %vm1495_vm3, %v9860_v21 }
0x1070   : > { %13461 = vmatmul.mubr.msk.f32.gmra.mrb[198].mxu0 %vm1495_vm3, %v9861_v42  ;;  %v9863_v1 = vmul.f32 %v9831_v34, %v9735_v9 }
0x1071   : > { %v15533_v40 = vpop.eup %15532  ;;  %v9862_v31 = vmul.f32 %v9830_v49, %v9734_v51 }
0x1072   : > { %v15535_v17 = vpop.eup %15534  ;;  %v9833_v48 = vadd.f32 1.0, %v15533_v40 }
0x1073   : > { %v9832_v37 = vadd.f32 1.0, %v15535_v17  ;;  %13463 = vmatprep.mubr.msk.f32.mxu0 %vm1495_vm3, %v9862_v31 }
0x1074   : > { %13464 = vmatmul.mubr.msk.f32.gmra.mrb[200].mxu0 %vm1495_vm3, %v9863_v1  ;;  %v9865_v41 = vmul.f32 %v9833_v48, %v9737_v4 }
0x1075   : > { %v9864_v0 = vmul.f32 %v9832_v37, %v9736_v32 }
0x1077   : > { %13466 = vmatprep.mubr.msk.f32.mxu0 %vm1495_vm3, %v9864_v0 }
0x1078   : > { %13467 = vmatmul.mubr.msk.f32.gmra.mrb[202].mxu0 %vm1495_vm3, %v9865_v41 }
0x10b5   : > { %v13407_v12 = vpop.f32.mrb[176].mxu0 }
0x10b6   : > { %v9649_v44 = vadd.f32 %v13407_v12, %v19872_v38  ;;  %v9643_v36 = vpop.f32.mrb[177].mxu0 }
0x10b7   : > { %v9644_v10 = vadd.f32 %v19872_v38, %v9643_v36 }
0x10b8   : > { %v9771_v26 = vmul.f32 0.70710677, %v9649_v44  ;;  %v9739_v31 = vmul.f32 0.5, %v9649_v44 }
0x10b9   : > { %v9770_v16 = vmul.f32 0.70710677, %v9644_v10  ;;  %v9738_v49 = vmul.f32 0.5, %v9644_v10 }
0x10ba   : > { %15536 = verf.f32 %v9771_v26 }
0x10bb   : > { %15538 = verf.f32 %v9770_v16 }
0x10bd   : > { %v13410_v28 = vpop.f32.mrb[178].mxu0 }
0x10be   : > { %v9659_v57 = vadd.f32 %v13410_v28, %v19872_v38  ;;  %v9653_v56 = vpop.f32.mrb[179].mxu0 }
0x10bf   : > { %v9654_v23 = vadd.f32 %v19872_v38, %v9653_v56 }
0x10c0   : > { %v9773_v39 = vmul.f32 0.70710677, %v9659_v57 }
0x10c1   : > { %v9772_v2 = vmul.f32 0.70710677, %v9654_v23 }
0x10c2   : > { %15540 = verf.f32 %v9773_v39  ;;  %v9740_v39 = vmul.f32 0.5, %v9654_v23 }
0x10c3   : > { %15542 = verf.f32 %v9772_v2  ;;  %v13413_v59 = vpop.f32.mrb[180].mxu0 }
0x10c4   : > { %v15537_v55 = vpop.eup %15536  ;;  %v9669_v21 = vadd.f32 %v13413_v59, %v19872_v38  ;;  %v9663_v52 = vpop.f32.mrb[181].mxu0 }
0x10c5   : > { %v15539_v42 = vpop.eup %15538  ;;  %v9835_v34 = vadd.f32 1.0, %v15537_v55  ;;  %v9664_v51 = vadd.f32 %v19872_v38, %v9663_v52  ;;  %v9741_v55 = vmul.f32 0.5, %v9659_v57 }
0x10c6   : > { %v9834_v9 = vadd.f32 1.0, %v15539_v42  ;;  %v9775_v40 = vmul.f32 0.70710677, %v9669_v21 }
0x10c7   : > { %v9774_v17 = vmul.f32 0.70710677, %v9664_v51  ;;  %v13416_v1 = vpop.f32.mrb[182].mxu0  ;;  %v9867_v4 = vmul.f32 %v9835_v34, %v9739_v31 }
0x10c8   : > { %v9866_v48 = vmul.f32 %v9834_v9, %v9738_v49  ;;  %15544 = verf.f32 %v9775_v40  ;;  %v9679_v32 = vadd.f32 %v13416_v1, %v19872_v38  ;;  %v9673_v37 = vpop.f32.mrb[183].mxu0 }
0x10c9   : > { %15546 = verf.f32 %v9774_v17  ;;  %v9674_v0 = vadd.f32 %v19872_v38, %v9673_v37 }
0x10ca   : > { %v9777_v41 = vmul.f32 0.70710677, %v9679_v32  ;;  %13469 = vmatprep.mubr.msk.f32.mxu0 %vm1495_vm3, %v9866_v48 }
0x10cb   : > { %v9776_v12 = vmul.f32 0.70710677, %v9674_v0  ;;  %13470 = vmatmul.mubr.msk.f32.gmra.mrb[204].mxu0 %vm1495_vm3, %v9867_v4  ;;  %v13419_v36 = vpop.f32.mrb[184].mxu0  ;;  %v9742_v4 = vmul.f32 0.5, %v9664_v51 }
0x10cc   : > { %v15541_v10 = vpop.eup %15540  ;;  %15548 = verf.f32 %v9777_v41  ;;  %v19929_v44 = vadd.f32 %v13419_v36, %v19872_v38  ;;  %v9683_v26 = vpop.f32.mrb[185].mxu0 }
0x10cd   : > { %v15543_v16 = vpop.eup %15542  ;;  %v9837_v28 = vadd.f32 1.0, %v15541_v10  ;;  %15550 = verf.f32 %v9776_v12  ;;  %v9684_v56 = vadd.f32 %v19872_v38, %v9683_v26  ;;  %v9743_v10 = vmul.f32 0.5, %v9669_v21 }
0x10ce   : > { %v9836_v2 = vadd.f32 1.0, %v15543_v16  ;;  %v9779_v59 = vmul.f32 0.70710677, %v19929_v44  ;;  %v9745_v21 = vmul.f32 0.5, %v9679_v32 }
0x10cf   : > { %v9778_v52 = vmul.f32 0.70710677, %v9684_v56  ;;  %v13422_v42 = vpop.f32.mrb[186].mxu0  ;;  %v9869_v40 = vmul.f32 %v9837_v28, %v9741_v55 }
0x10d0   : > { %v9868_v34 = vmul.f32 %v9836_v2, %v9740_v39  ;;  %15552 = verf.f32 %v9779_v59  ;;  %v9699_v49 = vadd.f32 %v13422_v42, %v19872_v38  ;;  %v9693_v9 = vpop.f32.mrb[187].mxu0 }
0x10d1   : > { %15554 = verf.f32 %v9778_v52  ;;  %v9694_v31 = vadd.f32 %v19872_v38, %v9693_v9 }
0x10d2   : > { %v15545_v17 = vpop.eup %15544  ;;  %v9781_v1 = vmul.f32 0.70710677, %v9699_v49  ;;  %13472 = vmatprep.mubr.msk.f32.mxu0 %vm1495_vm3, %v9868_v34  ;;  %v9744_v34 = vmul.f32 0.5, %v9674_v0 }
0x10d3   : > { %v15547_v23 = vpop.eup %15546  ;;  %v9839_v48 = vadd.f32 1.0, %v15545_v17  ;;  %v9780_v37 = vmul.f32 0.70710677, %v9694_v31  ;;  %13473 = vmatmul.mubr.msk.f32.gmra.mrb[206].mxu0 %vm1495_vm3, %v9869_v40  ;;  %v13425_v57 = vpop.f32.mrb[160].mxu1 }
0x10d4   : > { %v9838_v41 = vadd.f32 1.0, %v15547_v23  ;;  %15556 = verf.f32 %v9781_v1  ;;  %v9709_v12 = vadd.f32 %v13425_v57, %v19872_v38  ;;  %v9703_v36 = vpop.f32.mrb[161].mxu1 }
0x10d5   : > { %15558 = verf.f32 %v9780_v37  ;;  %v9704_v26 = vadd.f32 %v19872_v38, %v9703_v36  ;;  %v9871_v59 = vmul.f32 %v9839_v48, %v9743_v10  ;;  %v9747_v10 = vmul.f32 0.5, %v19929_v44 }
0x10d6   : > { %v15549_v16 = vpop.eup %15548  ;;  %v9870_v28 = vmul.f32 %v9838_v41, %v9742_v4  ;;  %v9783_v39 = vmul.f32 0.70710677, %v9709_v12  ;;  %v9746_v41 = vmul.f32 0.5, %v9684_v56 }
0x10d7   : > { %v15551_v2 = vpop.eup %15550  ;;  %v9841_v55 = vadd.f32 1.0, %v15549_v16  ;;  %v9782_v52 = vmul.f32 0.70710677, %v9704_v26  ;;  %v13428_v42 = vpop.f32.mrb[162].mxu1 }
0x10d8   : > { %v9840_v9 = vadd.f32 1.0, %v15551_v2  ;;  %15560 = verf.f32 %v9783_v39  ;;  %v9719_v51 = vadd.f32 %v13428_v42, %v19872_v38  ;;  %v9713_v40 = vpop.f32.mrb[163].mxu1  ;;  %13475 = vmatprep.mubr.msk.f32.mxu0 %vm1495_vm3, %v9870_v28  ;;  %v9748_v2 = vmul.f32 0.5, %v9694_v31 }
0x10d9   : > { %15562 = verf.f32 %v9782_v52  ;;  %v9714_v17 = vadd.f32 %v19872_v38, %v9713_v40  ;;  %13476 = vmatmul.mubr.msk.f32.gmra.mrb[208].mxu0 %vm1495_vm3, %v9871_v59  ;;  %v9873_v57 = vmul.f32 %v9841_v55, %v9745_v21  ;;  %v9749_v55 = vmul.f32 0.5, %v9699_v49 }
0x10da   : > { %v15553_v1 = vpop.eup %15552  ;;  %v9872_v23 = vmul.f32 %v9840_v9, %v9744_v34  ;;  %v9785_v48 = vmul.f32 0.70710677, %v9719_v51  ;;  %v9750_v9 = vmul.f32 0.5, %v9704_v26  ;;  %v9751_v21 = vmul.f32 0.5, %v9709_v12  ;;  %v19957_v12 = vld [vmem:[%s20533_s10] ss:$0 sm:$0xff] }
0x10db   : > { %v15555_v37 = vpop.eup %15554  ;;  %v9843_v4 = vadd.f32 1.0, %v15553_v1  ;;  %v9784_v0 = vmul.f32 0.70710677, %v9714_v17  ;;  %v9752_v49 = vmul.f32 0.5, %v9714_v17 }
0x10dc   : > { %v9842_v36 = vadd.f32 1.0, %v15555_v37  ;;  %15564 = verf.f32 %v9785_v48  ;;  %13478 = vmatprep.mubr.msk.f32.mxu0 %vm1495_vm3, %v9872_v23 }
0x10dd   : > { %15566 = verf.f32 %v9784_v0  ;;  %13479 = vmatmul.mubr.msk.f32.gmra.mrb[210].mxu0 %vm1495_vm3, %v9873_v57  ;;  %v9875_v28 = vmul.f32 %v9843_v4, %v9747_v10  ;;  %v9753_v4 = vmul.f32 0.5, %v9719_v51 }
0x10de   : > { %v15557_v38 = vpop.eup %15556  ;;  %v9874_v32 = vmul.f32 %v9842_v36, %v9746_v41 }
0x10df   : > { %v15559_v16 = vpop.eup %15558  ;;  %v9845_v39 = vadd.f32 1.0, %v15557_v38 }
0x10e0   : > { %v9844_v59 = vadd.f32 1.0, %v15559_v16  ;;  %13481 = vmatprep.mubr.msk.f32.mxu0 %vm1495_vm3, %v9874_v32 }
0x10e1   : > { %13482 = vmatmul.mubr.msk.f32.gmra.mrb[212].mxu0 %vm1495_vm3, %v9875_v28  ;;  %v9877_v34 = vmul.f32 %v9845_v39, %v9749_v55 }
0x10e2   : > { %v15561_v56 = vpop.eup %15560  ;;  %v9876_v52 = vmul.f32 %v9844_v59, %v9748_v2 }
0x10e3   : > { %v15563_v42 = vpop.eup %15562  ;;  %v9847_v44 = vadd.f32 1.0, %v15561_v56 }
0x10e4   : > { %v9846_v40 = vadd.f32 1.0, %v15563_v42  ;;  %13484 = vmatprep.mubr.msk.f32.mxu0 %vm1495_vm3, %v9876_v52 }
0x10e5   : > { %13485 = vmatmul.mubr.msk.f32.gmra.mrb[214].mxu0 %vm1495_vm3, %v9877_v34  ;;  %v9879_v48 = vmul.f32 %v9847_v44, %v9751_v21 }
0x10e6   : > { %v15565_v1 = vpop.eup %15564  ;;  %v9878_v31 = vmul.f32 %v9846_v40, %v9750_v9 }
0x10e7   : > { %v15567_v23 = vpop.eup %15566  ;;  %v9849_v37 = vadd.f32 1.0, %v15565_v1 }
0x10e8   : > { %v9848_v57 = vadd.f32 1.0, %v15567_v23  ;;  %13487 = vmatprep.mubr.msk.f32.mxu0 %vm1495_vm3, %v9878_v31 }
0x10e9   : > { %13488 = vmatmul.mubr.msk.f32.gmra.mrb[216].mxu0 %vm1495_vm3, %v9879_v48  ;;  %v9881_v26 = vmul.f32 %v9849_v37, %v9753_v4 }
0x10ea   : > { %v9880_v0 = vmul.f32 %v9848_v57, %v9752_v49 }
0x10ec   : > { %13490 = vmatprep.mubr.msk.f32.mxu0 %vm1495_vm3, %v9880_v0 }
0x10ed   : > { %13491 = vmatmul.mubr.msk.f32.gmra.mrb[218].mxu0 %vm1495_vm3, %v9881_v26 }
0x112f   : > { %v13447_v41 = vpop.f32.mrb[188].mxu0 }
0x1130   : > { %v10065_v17 = vadd.f32 %v13447_v41, %v19957_v12  ;;  %v10059_v36 = vpop.f32.mrb[189].mxu0 }
0x1131   : > { %v10060_v10 = vadd.f32 %v19957_v12, %v10059_v36 }
0x1132   : > { %v19962_v51 = vadd.f32 %v10065_v17, %v19631_v7 }
0x1133   : > { %v19965_v38 = vadd.f32 %v10060_v10, %v19627_v5  ;;  %v13450_v32 = vpop.f32.mrb[190].mxu0 }
0x1134   : > { %v10075_v16 = vadd.f32 %v13450_v32, %v19957_v12  ;;  %v10069_v28 = vpop.f32.mrb[191].mxu0  ;;  %v10255_v39 = vsel %vm492_vm0, %v19962_v51, 0.0 }
0x1135   : > { %v10070_v2 = vadd.f32 %v19957_v12, %v10069_v28  ;;  %10256 = vadd.xlane.f32.xlu0 %v10255_v39  ;;  %v10252_v59 = vsel %vm492_vm0, %v19965_v38, 0.0 }
0x1136   : > { %v19974_v55 = vadd.f32 %v10075_v16, %v19645_v25  ;;  %10253 = vadd.xlane.f32.xlu1 %v10252_v59 }
0x1137   : > { %v19977_v5 = vadd.f32 %v10070_v2, %v19641_v61  ;;  %v13453_v7 = vpop.f32.mrb[192].mxu0 }
0x1138   : > { %v10085_v56 = vadd.f32 %v13453_v7, %v19957_v12  ;;  %v10079_v52 = vpop.f32.mrb[193].mxu0  ;;  %v10261_v42 = vsel %vm492_vm0, %v19974_v55, 0.0 }
0x1139   : > { %v10080_v34 = vadd.f32 %v19957_v12, %v10079_v52  ;;  %10262 = vadd.xlane.f32.xlu0 %v10261_v42  ;;  %v10258_v44 = vsel %vm492_vm0, %v19977_v5, 0.0 }
0x113a   : > { %v19986_v25 = vadd.f32 %v10085_v56, %v19659_v60  ;;  %10259 = vadd.xlane.f32.xlu1 %v10258_v44 }
0x113b   : > { %v19989_v61 = vadd.f32 %v10080_v34, %v19655_v62  ;;  %v13456_v9 = vpop.f32.mrb[194].mxu0 }
0x113c   : > { %v10095_v40 = vadd.f32 %v13456_v9, %v19957_v12  ;;  %v10089_v21 = vpop.f32.mrb[195].mxu0  ;;  %v10267_v1 = vsel %vm492_vm0, %v19986_v25, 0.0 }
0x113d   : > { %v10090_v31 = vadd.f32 %v19957_v12, %v10089_v21  ;;  %10268 = vadd.xlane.f32.xlu0 %v10267_v1  ;;  %v10264_v23 = vsel %vm492_vm0, %v19989_v61, 0.0 }
0x113e   : > { %v19998_v60 = vadd.f32 %v10095_v40, %v19673_v50  ;;  %10265 = vadd.xlane.f32.xlu1 %v10264_v23 }
0x113f   : > { %v20001_v62 = vadd.f32 %v10090_v31, %v19669_v58  ;;  %v13459_v48 = vpop.f32.mrb[196].mxu0 }
0x1140   : > { %v10105_v37 = vadd.f32 %v13459_v48, %v19957_v12  ;;  %v10099_v49 = vpop.f32.mrb[197].mxu0  ;;  %v10273_v57 = vsel %vm492_vm0, %v19998_v60, 0.0 }
0x1141   : > { %v10100_v4 = vadd.f32 %v19957_v12, %v10099_v49  ;;  %10274 = vadd.xlane.f32.xlu0 %v10273_v57  ;;  %v10270_v0 = vsel %vm492_vm0, %v20001_v62, 0.0 }
0x1142   : > { %v20010_v50 = vadd.f32 %v10105_v37, %v19687_v43  ;;  %10271 = vadd.xlane.f32.xlu1 %v10270_v0 }
0x1143   : > { %v20013_v58 = vadd.f32 %v10100_v4, %v19683_v54  ;;  %v13462_v26 = vpop.f32.mrb[198].mxu0 }
0x1144   : > { %v10115_v41 = vadd.f32 %v13462_v26, %v19957_v12  ;;  %v10109_v17 = vpop.f32.mrb[199].mxu0  ;;  %v10279_v36 = vsel %vm492_vm0, %v20010_v50, 0.0 }
0x1145   : > { %v10110_v10 = vadd.f32 %v19957_v12, %v10109_v17  ;;  %10280 = vadd.xlane.f32.xlu0 %v10279_v36  ;;  %v10276_v32 = vsel %vm492_vm0, %v20013_v58, 0.0 }
0x1146   : > { %v20022_v43 = vadd.f32 %v10115_v41, %v19701_v45  ;;  %10277 = vadd.xlane.f32.xlu1 %v10276_v32 }
0x1147   : > { %v20025_v54 = vadd.f32 %v10110_v10, %v19697_v14  ;;  %v13465_v16 = vpop.f32.mrb[200].mxu0 }
0x1148   : > { %v10125_v28 = vadd.f32 %v13465_v16, %v19957_v12  ;;  %v10119_v39 = vpop.f32.mrb[201].mxu0  ;;  %v10285_v2 = vsel %vm492_vm0, %v20022_v43, 0.0 }
0x1149   : > { %v10120_v59 = vadd.f32 %v19957_v12, %v10119_v39  ;;  %10286 = vadd.xlane.f32.xlu0 %v10285_v2  ;;  %v10282_v7 = vsel %vm492_vm0, %v20025_v54, 0.0 }
0x114a   : > { %v20034_v45 = vadd.f32 %v10125_v28, %v19715_v18  ;;  %10283 = vadd.xlane.f32.xlu1 %v10282_v7 }
0x114b   : > { %v20037_v14 = vadd.f32 %v10120_v59, %v19711_v20  ;;  %v13468_v56 = vpop.f32.mrb[202].mxu0 }
0x114c   : > { %v10135_v52 = vadd.f32 %v13468_v56, %v19957_v12  ;;  %v10129_v42 = vpop.f32.mrb[203].mxu0  ;;  %v10291_v34 = vsel %vm492_vm0, %v20034_v45, 0.0 }
0x114d   : > { %v10130_v44 = vadd.f32 %v19957_v12, %v10129_v42  ;;  %10292 = vadd.xlane.f32.xlu0 %v10291_v34  ;;  %v10288_v9 = vsel %vm492_vm0, %v20037_v14, 0.0 }
0x114e   : > { %v20046_v18 = vadd.f32 %v10135_v52, %v19727_v35  ;;  %10289 = vadd.xlane.f32.xlu1 %v10288_v9 }
0x114f   : > { %v20049_v20 = vadd.f32 %v10130_v44, %v19724_v46 }
0x1150   : > { %v10297_v40 = vsel %vm492_vm0, %v20046_v18, 0.0 }
0x1151   : > { %10298 = vadd.xlane.f32.xlu0 %v10297_v40  ;;  %v10294_v21 = vsel %vm492_vm0, %v20049_v20, 0.0 }
0x1152   : > { %10295 = vadd.xlane.f32.xlu1 %v10294_v21 }
0x119e   : > { %v13471_v1 = vpop.f32.mrb[204].mxu0 }
0x119f   : > { %v10145_v31 = vadd.f32 %v13471_v1, %v19957_v12  ;;  %v10139_v23 = vpop.f32.mrb[205].mxu0 }
0x11a0   : > { %v10140_v48 = vadd.f32 %v19957_v12, %v10139_v23 }
0x11a1   : > { %v20058_v35 = vadd.f32 %v10145_v31, %v19747_v53 }
0x11a2   : > { %v20061_v46 = vadd.f32 %v10140_v48, %v19744_v24 }
0x11a3   : > { %v10303_v37 = vsel %vm492_vm0, %v20058_v35, 0.0 }
0x11a4   : > { %10304 = vadd.xlane.f32.xlu0 %v10303_v37  ;;  %v10300_v49 = vsel %vm492_vm0, %v20061_v46, 0.0 }
0x11a5   : > { %10301 = vadd.xlane.f32.xlu1 %v10300_v49 }
0x11a6   : > { %v13474_v57 = vpop.f32.mrb[206].mxu0 }
0x11a7   : > { %v10155_v4 = vadd.f32 %v13474_v57, %v19957_v12  ;;  %v10149_v0 = vpop.f32.mrb[207].mxu0 }
0x11a8   : > { %v10150_v26 = vadd.f32 %v19957_v12, %v10149_v0 }
0x11a9   : > { %v20070_v53 = vadd.f32 %v10155_v4, %v19773_v30 }
0x11aa   : > { %v20073_v24 = vadd.f32 %v10150_v26, %v19770_v27 }
0x11ab   : > { %v10309_v41 = vsel %vm492_vm0, %v20070_v53, 0.0 }
0x11ac   : > { %10310 = vadd.xlane.f32.xlu0 %v10309_v41  ;;  %v13477_v17 = vpop.f32.mrb[208].mxu0  ;;  %v10306_v36 = vsel %vm492_vm0, %v20073_v24, 0.0 }
0x11ad   : > { %v10165_v10 = vadd.f32 %v13477_v17, %v19957_v12  ;;  %10307 = vadd.xlane.f32.xlu1 %v10306_v36  ;;  %v10159_v32 = vpop.f32.mrb[209].mxu0 }
0x11ae   : > { %v10160_v16 = vadd.f32 %v19957_v12, %v10159_v32 }
0x11af   : > { %v20082_v30 = vadd.f32 %v10165_v10, %v19795_v33 }
0x11b0   : > { %v20085_v27 = vadd.f32 %v10160_v16, %v19791_v11  ;;  %v13480_v28 = vpop.f32.mrb[210].mxu0 }
0x11b1   : > { %v10175_v39 = vadd.f32 %v13480_v28, %v19957_v12  ;;  %v10169_v2 = vpop.f32.mrb[211].mxu0  ;;  %v10315_v59 = vsel %vm492_vm0, %v20082_v30, 0.0 }
0x11b2   : > { %v10170_v7 = vadd.f32 %v19957_v12, %v10169_v2  ;;  %10316 = vadd.xlane.f32.xlu0 %v10315_v59  ;;  %v10312_v56 = vsel %vm492_vm0, %v20085_v27, 0.0 }
0x11b3   : > { %v20094_v52 = vadd.f32 %v10175_v39, %v19809_v8  ;;  %10313 = vadd.xlane.f32.xlu1 %v10312_v56 }
0x11b4   : > { %v20097_v11 = vadd.f32 %v10170_v7, %v19805_v19  ;;  %v13483_v33 = vpop.f32.mrb[212].mxu0 }
0x11b5   : > { %v10185_v42 = vadd.f32 %v13483_v33, %v19957_v12  ;;  %v10179_v34 = vpop.f32.mrb[213].mxu0  ;;  %v10321_v44 = vsel %vm492_vm0, %v20094_v52, 0.0 }
0x11b6   : > { %v10180_v9 = vadd.f32 %v19957_v12, %v10179_v34  ;;  %10322 = vadd.xlane.f32.xlu0 %v10321_v44  ;;  %v10318_v40 = vsel %vm492_vm0, %v20097_v11, 0.0 }
0x11b7   : > { %v20106_v8 = vadd.f32 %v10185_v42, %v19823_v13  ;;  %10319 = vadd.xlane.f32.xlu1 %v10318_v40 }
0x11b8   : > { %v20109_v19 = vadd.f32 %v10180_v9, %v19819_v15  ;;  %v13486_v21 = vpop.f32.mrb[214].mxu0 }
0x11b9   : > { %v10195_v1 = vadd.f32 %v13486_v21, %v19957_v12  ;;  %v10189_v31 = vpop.f32.mrb[215].mxu0  ;;  %v10327_v23 = vsel %vm492_vm0, %v20106_v8, 0.0 }
0x11ba   : > { %v10190_v48 = vadd.f32 %v19957_v12, %v10189_v31  ;;  %10328 = vadd.xlane.f32.xlu0 %v10327_v23  ;;  %v10324_v37 = vsel %vm492_vm0, %v20109_v19, 0.0 }
0x11bb   : > { %v20118_v13 = vadd.f32 %v10195_v1, %v19838_v22  ;;  %10325 = vadd.xlane.f32.xlu1 %v10324_v37 }
0x11bc   : > { %v20121_v15 = vadd.f32 %v10190_v48, %v19833_v3  ;;  %v13489_v49 = vpop.f32.mrb[216].mxu0 }
0x11bd   : > { %v10205_v57 = vadd.f32 %v13489_v49, %v19957_v12  ;;  %v10199_v4 = vpop.f32.mrb[217].mxu0  ;;  %v10333_v0 = vsel %vm492_vm0, %v20118_v13, 0.0 }
0x11be   : > { %v10200_v26 = vadd.f32 %v19957_v12, %v10199_v4  ;;  %10334 = vadd.xlane.f32.xlu0 %v10333_v0  ;;  %v10330_v41 = vsel %vm492_vm0, %v20121_v15, 0.0 }
0x11bf   : > { %v20130_v22 = vadd.f32 %v10205_v57, %v19851_v6  ;;  %10331 = vadd.xlane.f32.xlu1 %v10330_v41 }
0x11c0   : > { %v20133_v3 = vadd.f32 %v10200_v26, %v19847_v63  ;;  %v13492_v17 = vpop.f32.mrb[218].mxu0 }
0x11c1   : > { %v10215_v36 = vadd.f32 %v13492_v17, %v19957_v12  ;;  %v10209_v10 = vpop.f32.mrb[219].mxu0  ;;  %v10339_v32 = vsel %vm492_vm0, %v20130_v22, 0.0 }
0x11c2   : > { %v10210_v16 = vadd.f32 %v19957_v12, %v10209_v10  ;;  %v10257_v28 = vpop.xlane.xlu0 %10256  ;;  %10340 = vadd.xlane.f32.xlu0 %v10339_v32  ;;  %v10336_v39 = vsel %vm492_vm0, %v20133_v3, 0.0 }
0x11c3   : > { %v20142_v6 = vadd.f32 %v10215_v36, %v19863_v29  ;;  %v10349_v2 = vmul.f32 0.03125, %v10257_v28  ;;  %10337 = vadd.xlane.f32.xlu1 %v10336_v39  ;;  %v10254_v63 = vpop.xlane.xlu1 %10253 }
0x11c4   : > { %v20145_v59 = vadd.f32 %v10210_v16, %v19860_v47  ;;  %v10348_v7 = vmul.f32 0.03125, %v10254_v63 }
0x11c5   : > { %v20148_v56 = vsub.f32 %v19962_v51, %v10349_v2  ;;  %v10345_v12 = vsel %vm492_vm0, %v20142_v6, 0.0 }
0x11c6   : > { %v20153_v33 = vsub.f32 %v19965_v38, %v10348_v7  ;;  %v10263_v42 = vpop.xlane.xlu0 %10262  ;;  %10346 = vadd.xlane.f32.xlu0 %v10345_v12  ;;  %v10342_v29 = vsel %vm492_vm0, %v20145_v59, 0.0 }
0x11c7   : > { %v10351_v34 = vmul.f32 0.03125, %v10263_v42  ;;  %10343 = vadd.xlane.f32.xlu1 %v10342_v29  ;;  %v10260_v44 = vpop.xlane.xlu1 %10259  ;;  %v10413_v47 = vmul.f32 %v20148_v56, %v20148_v56 }
0x11c8   : > { %v10350_v9 = vmul.f32 0.03125, %v10260_v44  ;;  %v10412_v51 = vmul.f32 %v20153_v33, %v20153_v33 }
0x11c9   : > { %v20162_v40 = vsub.f32 %v19974_v55, %v10351_v34  ;;  %v10447_v38 = vsel %vm492_vm0, %v10413_v47, 0.0 }
0x11ca   : > { %v20166_v21 = vsub.f32 %v19977_v5, %v10350_v9  ;;  %v10269_v1 = vpop.xlane.xlu0 %10268  ;;  %10448 = vadd.xlane.f32.xlu0 %v10447_v38  ;;  %v10444_v31 = vsel %vm492_vm0, %v10412_v51, 0.0 }
0x11cb   : > { %v10353_v23 = vmul.f32 0.03125, %v10269_v1  ;;  %10445 = vadd.xlane.f32.xlu1 %v10444_v31  ;;  %v10266_v48 = vpop.xlane.xlu1 %10265  ;;  %v10415_v37 = vmul.f32 %v20162_v40, %v20162_v40 }
0x11cc   : > { %v10352_v49 = vmul.f32 0.03125, %v10266_v48  ;;  %v10414_v55 = vmul.f32 %v20166_v21, %v20166_v21 }
0x11cd   : > { %v20174_v57 = vsub.f32 %v19986_v25, %v10353_v23  ;;  %v10453_v5 = vsel %vm492_vm0, %v10415_v37, 0.0 }
0x11ce   : > { %v20178_v4 = vsub.f32 %v19989_v61, %v10352_v49  ;;  %v10275_v0 = vpop.xlane.xlu0 %10274  ;;  %10454 = vadd.xlane.f32.xlu0 %v10453_v5  ;;  %v10450_v26 = vsel %vm492_vm0, %v10414_v55, 0.0 }
0x11cf   : > { %v10355_v41 = vmul.f32 0.03125, %v10275_v0  ;;  %10451 = vadd.xlane.f32.xlu1 %v10450_v26  ;;  %v10272_v17 = vpop.xlane.xlu1 %10271  ;;  %v10417_v36 = vmul.f32 %v20174_v57, %v20174_v57 }
0x11d0   : > { %v10354_v10 = vmul.f32 0.03125, %v10272_v17  ;;  %v10416_v25 = vmul.f32 %v20178_v4, %v20178_v4 }
0x11d1   : > { %v20186_v32 = vsub.f32 %v19998_v60, %v10355_v41  ;;  %v10459_v61 = vsel %vm492_vm0, %v10417_v36, 0.0 }
0x11d2   : > { %v20190_v16 = vsub.f32 %v20001_v62, %v10354_v10  ;;  %v10281_v28 = vpop.xlane.xlu0 %10280  ;;  %10460 = vadd.xlane.f32.xlu0 %v10459_v61  ;;  %v10456_v39 = vsel %vm492_vm0, %v10416_v25, 0.0 }
0x11d3   : > { %v10357_v2 = vmul.f32 0.03125, %v10281_v28  ;;  %10457 = vadd.xlane.f32.xlu1 %v10456_v39  ;;  %v10278_v63 = vpop.xlane.xlu1 %10277  ;;  %v10419_v7 = vmul.f32 %v20186_v32, %v20186_v32 }
0x11d4   : > { %v10356_v12 = vmul.f32 0.03125, %v10278_v63  ;;  %v10418_v60 = vmul.f32 %v20190_v16, %v20190_v16 }
0x11d5   : > { %v20198_v42 = vsub.f32 %v20010_v50, %v10357_v2  ;;  %v10465_v62 = vsel %vm492_vm0, %v10419_v7, 0.0 }
0x11d6   : > { %v20202_v29 = vsub.f32 %v20013_v58, %v10356_v12  ;;  %v10287_v34 = vpop.xlane.xlu0 %10286  ;;  %10466 = vadd.xlane.f32.xlu0 %v10465_v62  ;;  %v10462_v44 = vsel %vm492_vm0, %v10418_v60, 0.0 }
0x11d7   : > { %v10359_v47 = vmul.f32 0.03125, %v10287_v34  ;;  %10463 = vadd.xlane.f32.xlu1 %v10462_v44  ;;  %v10284_v9 = vpop.xlane.xlu1 %10283  ;;  %v10421_v51 = vmul.f32 %v20198_v42, %v20198_v42 }
0x11d8   : > { %v10358_v38 = vmul.f32 0.03125, %v10284_v9  ;;  %v10420_v50 = vmul.f32 %v20202_v29, %v20202_v29 }
0x11d9   : > { %v20210_v1 = vsub.f32 %v20022_v43, %v10359_v47  ;;  %v10471_v58 = vsel %vm492_vm0, %v10421_v51, 0.0 }
0x11da   : > { %v20214_v31 = vsub.f32 %v20025_v54, %v10358_v38  ;;  %v10293_v23 = vpop.xlane.xlu0 %10292  ;;  %10472 = vadd.xlane.f32.xlu0 %v10471_v58  ;;  %v10468_v48 = vsel %vm492_vm0, %v10420_v50, 0.0 }
0x11db   : > { %v10361_v37 = vmul.f32 0.03125, %v10293_v23  ;;  %10469 = vadd.xlane.f32.xlu1 %v10468_v48  ;;  %v10290_v49 = vpop.xlane.xlu1 %10289  ;;  %v10423_v55 = vmul.f32 %v20210_v1, %v20210_v1 }
0x11dc   : > { %v10360_v5 = vmul.f32 0.03125, %v10290_v49  ;;  %v10422_v43 = vmul.f32 %v20214_v31, %v20214_v31 }
0x11dd   : > { %v20222_v0 = vsub.f32 %v20034_v45, %v10361_v37  ;;  %v10477_v54 = vsel %vm492_vm0, %v10423_v55, 0.0 }
0x11de   : > { %v20226_v26 = vsub.f32 %v20037_v14, %v10360_v5  ;;  %v10299_v41 = vpop.xlane.xlu0 %10298  ;;  %10478 = vadd.xlane.f32.xlu0 %v10477_v54  ;;  %v10474_v17 = vsel %vm492_vm0, %v10422_v43, 0.0 }
0x11df   : > { %v10363_v36 = vmul.f32 0.03125, %v10299_v41  ;;  %10475 = vadd.xlane.f32.xlu1 %v10474_v17  ;;  %v10296_v10 = vpop.xlane.xlu1 %10295  ;;  %v10425_v25 = vmul.f32 %v20222_v0, %v20222_v0 }
0x11e0   : > { %v10362_v61 = vmul.f32 0.03125, %v10296_v10  ;;  %v10424_v45 = vmul.f32 %v20226_v26, %v20226_v26 }
0x11e1   : > { %v20234_v28 = vsub.f32 %v20046_v18, %v10363_v36  ;;  %v10483_v14 = vsel %vm492_vm0, %v10425_v25, 0.0 }
0x11e2   : > { %v20238_v39 = vsub.f32 %v20049_v20, %v10362_v61  ;;  %10484 = vadd.xlane.f32.xlu0 %v10483_v14  ;;  %v10480_v2 = vsel %vm492_vm0, %v10424_v45, 0.0 }
0x11e3   : > { %10481 = vadd.xlane.f32.xlu1 %v10480_v2  ;;  %v10427_v63 = vmul.f32 %v20234_v28, %v20234_v28 }
0x11e4   : > { %v10426_v7 = vmul.f32 %v20238_v39, %v20238_v39 }
0x11e5   : > { %v10489_v12 = vsel %vm492_vm0, %v10427_v63, 0.0 }
0x11e6   : > { %10490 = vadd.xlane.f32.xlu0 %v10489_v12  ;;  %v10486_v18 = vsel %vm492_vm0, %v10426_v7, 0.0 }
0x11e7   : > { %10487 = vadd.xlane.f32.xlu1 %v10486_v18 }
0x1231   : > { %v10305_v60 = vpop.xlane.xlu0 %10304 }
0x1232   : > { %v10365_v62 = vmul.f32 0.03125, %v10305_v60  ;;  %v10302_v20 = vpop.xlane.xlu1 %10301 }
0x1233   : > { %v10364_v34 = vmul.f32 0.03125, %v10302_v20 }
0x1234   : > { %v20248_v44 = vsub.f32 %v20058_v35, %v10365_v62 }
0x1235   : > { %v20251_v47 = vsub.f32 %v20061_v46, %v10364_v34 }
0x1236   : > { %v10429_v9 = vmul.f32 %v20248_v44, %v20248_v44 }
0x1237   : > { %v10428_v51 = vmul.f32 %v20251_v47, %v20251_v47 }
0x1238   : > { %v10495_v38 = vsel %vm492_vm0, %v10429_v9, 0.0 }
0x1239   : > { %v10311_v50 = vpop.xlane.xlu0 %10310  ;;  %10496 = vadd.xlane.f32.xlu0 %v10495_v38  ;;  %v10492_v58 = vsel %vm492_vm0, %v10428_v51, 0.0 }
0x123a   : > { %v10367_v23 = vmul.f32 0.03125, %v10311_v50  ;;  %10493 = vadd.xlane.f32.xlu1 %v10492_v58  ;;  %v10308_v48 = vpop.xlane.xlu1 %10307 }
0x123b   : > { %v10366_v35 = vmul.f32 0.03125, %v10308_v48 }
0x123c   : > { %v20260_v37 = vsub.f32 %v20070_v53, %v10367_v23 }
0x123d   : > { %v20263_v46 = vsub.f32 %v20073_v24, %v10366_v35 }
0x123e   : > { %v10431_v49 = vmul.f32 %v20260_v37, %v20260_v37 }
0x123f   : > { %v10317_v55 = vpop.xlane.xlu0 %10316  ;;  %v10430_v5 = vmul.f32 %v20263_v46, %v20263_v46 }
0x1240   : > { %v10369_v43 = vmul.f32 0.03125, %v10317_v55  ;;  %v10501_v54 = vsel %vm492_vm0, %v10431_v49, 0.0  ;;  %v10314_v41 = vpop.xlane.xlu1 %10313 }
0x1241   : > { %10502 = vadd.xlane.f32.xlu0 %v10501_v54  ;;  %v10368_v17 = vmul.f32 0.03125, %v10314_v41  ;;  %v10498_v36 = vsel %vm492_vm0, %v10430_v5, 0.0 }
0x1242   : > { %v20272_v53 = vsub.f32 %v20082_v30, %v10369_v43  ;;  %10499 = vadd.xlane.f32.xlu1 %v10498_v36 }
0x1243   : > { %v20275_v24 = vsub.f32 %v20085_v27, %v10368_v17  ;;  %v10323_v10 = vpop.xlane.xlu0 %10322 }
0x1244   : > { %v10371_v25 = vmul.f32 0.03125, %v10323_v10  ;;  %v10320_v61 = vpop.xlane.xlu1 %10319  ;;  %v10433_v45 = vmul.f32 %v20272_v53, %v20272_v53 }
0x1245   : > { %v10370_v14 = vmul.f32 0.03125, %v10320_v61  ;;  %v10432_v2 = vmul.f32 %v20275_v24, %v20275_v24 }
0x1246   : > { %v20282_v63 = vsub.f32 %v20094_v52, %v10371_v25  ;;  %v10507_v30 = vsel %vm492_vm0, %v10433_v45, 0.0 }
0x1247   : > { %v20286_v7 = vsub.f32 %v20097_v11, %v10370_v14  ;;  %v10329_v27 = vpop.xlane.xlu0 %10328  ;;  %10508 = vadd.xlane.f32.xlu0 %v10507_v30  ;;  %v10504_v12 = vsel %vm492_vm0, %v10432_v2, 0.0 }
0x1248   : > { %v10373_v18 = vmul.f32 0.03125, %v10329_v27  ;;  %10505 = vadd.xlane.f32.xlu1 %v10504_v12  ;;  %v10326_v60 = vpop.xlane.xlu1 %10325  ;;  %v10435_v62 = vmul.f32 %v20282_v63, %v20282_v63 }
0x1249   : > { %v10372_v20 = vmul.f32 0.03125, %v10326_v60  ;;  %v10434_v52 = vmul.f32 %v20286_v7, %v20286_v7 }
0x124a   : > { %v20294_v34 = vsub.f32 %v20106_v8, %v10373_v18  ;;  %v10513_v11 = vsel %vm492_vm0, %v10435_v62, 0.0 }
0x124b   : > { %v20298_v9 = vsub.f32 %v20109_v19, %v10372_v20  ;;  %v10335_v51 = vpop.xlane.xlu0 %10334  ;;  %10514 = vadd.xlane.f32.xlu0 %v10513_v11  ;;  %v10510_v38 = vsel %vm492_vm0, %v10434_v52, 0.0 }
0x124c   : > { %v10375_v50 = vmul.f32 0.03125, %v10335_v51  ;;  %10511 = vadd.xlane.f32.xlu1 %v10510_v38  ;;  %v10332_v58 = vpop.xlane.xlu1 %10331  ;;  %v10437_v23 = vmul.f32 %v20294_v34, %v20294_v34 }
0x124d   : > { %v10374_v48 = vmul.f32 0.03125, %v10332_v58  ;;  %v10436_v8 = vmul.f32 %v20298_v9, %v20298_v9 }
0x124e   : > { %v20306_v35 = vsub.f32 %v20118_v13, %v10375_v50  ;;  %v10519_v19 = vsel %vm492_vm0, %v10437_v23, 0.0 }
0x124f   : > { %v20310_v49 = vsub.f32 %v20121_v15, %v10374_v48  ;;  %v10341_v55 = vpop.xlane.xlu0 %10340  ;;  %10520 = vadd.xlane.f32.xlu0 %v10519_v19  ;;  %v10516_v5 = vsel %vm492_vm0, %v10436_v8, 0.0 }
0x1250   : > { %v10377_v43 = vmul.f32 0.03125, %v10341_v55  ;;  %10517 = vadd.xlane.f32.xlu1 %v10516_v5  ;;  %v10338_v54 = vpop.xlane.xlu1 %10337  ;;  %v10439_v41 = vmul.f32 %v20306_v35, %v20306_v35 }
0x1251   : > { %v10376_v17 = vmul.f32 0.03125, %v10338_v54  ;;  %v10438_v13 = vmul.f32 %v20310_v49, %v20310_v49 }
0x1252   : > { %v20318_v36 = vsub.f32 %v20130_v22, %v10377_v43  ;;  %v10525_v15 = vsel %vm492_vm0, %v10439_v41, 0.0 }
0x1253   : > { %v20322_v10 = vsub.f32 %v20133_v3, %v10376_v17  ;;  %10526 = vadd.xlane.f32.xlu0 %v10525_v15  ;;  %v10347_v25 = vpop.xlane.xlu0 %10346  ;;  %v10522_v61 = vsel %vm492_vm0, %v10438_v13, 0.0 }
0x1254   : > { %v10379_v45 = vmul.f32 0.03125, %v10347_v25  ;;  %10523 = vadd.xlane.f32.xlu1 %v10522_v61  ;;  %v10344_v14 = vpop.xlane.xlu1 %10343  ;;  %v10441_v2 = vmul.f32 %v20318_v36, %v20318_v36 }
0x1255   : > { %v10378_v30 = vmul.f32 0.03125, %v10344_v14  ;;  %v10440_v22 = vmul.f32 %v20322_v10, %v20322_v10 }
0x1256   : > { %v20330_v27 = vsub.f32 %v20142_v6, %v10379_v45  ;;  %v10531_v3 = vsel %vm492_vm0, %v10441_v2, 0.0  ;;  %v20346_v2 = vld [vmem:[%s20534_s11] ss:$0 sm:$0xff] }
0x1257   : > { %v20334_v12 = vsub.f32 %v20145_v59, %v10378_v30  ;;  %10532 = vadd.xlane.f32.xlu0 %v10531_v3  ;;  %v10449_v18 = vpop.xlane.xlu0 %10448  ;;  %v10528_v60 = vsel %vm492_vm0, %v10440_v22, 0.0 }
0x1258   : > { %v10541_v62 = vmul.f32 0.03125, %v10449_v18  ;;  %10529 = vadd.xlane.f32.xlu1 %v10528_v60  ;;  %v10446_v20 = vpop.xlane.xlu1 %10445  ;;  %v10443_v52 = vmul.f32 %v20330_v27, %v20330_v27 }
0x1259   : > { %v10540_v11 = vmul.f32 0.03125, %v10446_v20  ;;  %v10442_v6 = vmul.f32 %v20334_v12, %v20334_v12 }
0x125a   : > { %v10573_v51 = vadd.f32 1e-05, %v10541_v62  ;;  %v10537_v38 = vsel %vm492_vm0, %v10443_v52, 0.0  ;;  %v20352_v62 = vld [vmem:[%s20535_s12] ss:$0 sm:$0xff] }
0x125b   : > { %v10572_v50 = vadd.f32 1e-05, %v10540_v11  ;;  %10538 = vadd.xlane.f32.xlu0 %v10537_v38  ;;  %v10455_v59 = vpop.xlane.xlu0 %10454  ;;  %v10534_v58 = vsel %vm492_vm0, %v10442_v6, 0.0 }
0x125c   : > { %15568 = vrsqrt.f32 %v10573_v51  ;;  %v10543_v23 = vmul.f32 0.03125, %v10455_v59  ;;  %10535 = vadd.xlane.f32.xlu1 %v10534_v58  ;;  %v10452_v48 = vpop.xlane.xlu1 %10451 }
0x125d   : > { %15570 = vrsqrt.f32 %v10572_v50  ;;  %v10542_v8 = vmul.f32 0.03125, %v10452_v48 }
0x125e   : > { %v10575_v19 = vadd.f32 1e-05, %v10543_v23 }
0x125f   : > { %v10574_v55 = vadd.f32 1e-05, %v10542_v8  ;;  %v10461_v5 = vpop.xlane.xlu0 %10460 }
0x1260   : > { %15572 = vrsqrt.f32 %v10575_v19  ;;  %v10545_v43 = vmul.f32 0.03125, %v10461_v5  ;;  %v10458_v54 = vpop.xlane.xlu1 %10457 }
0x1261   : > { %15574 = vrsqrt.f32 %v10574_v55  ;;  %v10544_v41 = vmul.f32 0.03125, %v10458_v54 }
0x1262   : > { %v10577_v17 = vadd.f32 1e-05, %v10545_v43 }
0x1263   : > { %v10576_v13 = vadd.f32 1e-05, %v10544_v41  ;;  %v10467_v15 = vpop.xlane.xlu0 %10466 }
0x1264   : > { %15576 = vrsqrt.f32 %v10577_v17  ;;  %v10547_v25 = vmul.f32 0.03125, %v10467_v15  ;;  %v10464_v61 = vpop.xlane.xlu1 %10463 }
0x1265   : > { %15578 = vrsqrt.f32 %v10576_v13  ;;  %v10546_v45 = vmul.f32 0.03125, %v10464_v61 }
0x1266   : > { %v15569_v14 = vpop.eup %15568  ;;  %v10579_v30 = vadd.f32 1e-05, %v10547_v25 }
0x1267   : > { %v15571_v22 = vpop.eup %15570  ;;  %v10637_v3 = vmul.f32 %v15569_v14, %v20148_v56  ;;  %v10578_v18 = vadd.f32 1e-05, %v10546_v45  ;;  %v10473_v60 = vpop.xlane.xlu0 %10472 }
0x1268   : > { %v10636_v20 = vmul.f32 %v15571_v22, %v20153_v33  ;;  %15580 = vrsqrt.f32 %v10579_v30  ;;  %v10549_v52 = vmul.f32 0.03125, %v10473_v60  ;;  %v10470_v11 = vpop.xlane.xlu1 %10469 }
0x1269   : > { %v10675_v6 = vmul.f32 %v20346_v2, %v10637_v3  ;;  %15582 = vrsqrt.f32 %v10578_v18  ;;  %v10548_v51 = vmul.f32 0.03125, %v10470_v11 }
0x126a   : > { %v15573_v38 = vpop.eup %15572  ;;  %v10674_v56 = vmul.f32 %v20346_v2, %v10636_v20  ;;  %v10581_v50 = vadd.f32 1e-05, %v10549_v52 }
0x126b   : > { %v15575_v33 = vpop.eup %15574  ;;  %v10713_v59 = vadd.f32 %v20352_v62, %v10675_v6  ;;  %v10639_v58 = vmul.f32 %v15573_v38, %v20162_v40  ;;  %v10580_v23 = vadd.f32 1e-05, %v10548_v51  ;;  %v10479_v48 = vpop.xlane.xlu0 %10478 }
0x126c   : > { %v10712_v8 = vadd.f32 %v20352_v62, %v10674_v56  ;;  %v10638_v19 = vmul.f32 %v15575_v33, %v20166_v21  ;;  %15584 = vrsqrt.f32 %v10581_v50  ;;  %v10551_v55 = vmul.f32 0.03125, %v10479_v48  ;;  %v10476_v5 = vpop.xlane.xlu1 %10475 }
0x126d   : > { %10745 = vst.msk [vmem:[%s20361_s30 + $0x8] sm:$0xff] %vm492_vm0, %v10713_v59  ;;  %v10677_v43 = vmul.f32 %v20346_v2, %v10639_v58  ;;  %15586 = vrsqrt.f32 %v10580_v23  ;;  %v10550_v54 = vmul.f32 0.03125, %v10476_v5 }
0x126e   : > { %v15577_v41 = vpop.eup %15576  ;;  %10744 = vst.msk [vmem:[%s20361_s30] sm:$0xff] %vm492_vm0, %v10712_v8  ;;  %v10676_v40 = vmul.f32 %v20346_v2, %v10638_v19  ;;  %v10583_v17 = vadd.f32 1e-05, %v10551_v55 }
0x126f   : > { %v15579_v13 = vpop.eup %15578  ;;  %v10715_v21 = vadd.f32 %v20352_v62, %v10677_v43  ;;  %v10641_v15 = vmul.f32 %v15577_v41, %v20174_v57  ;;  %v10582_v25 = vadd.f32 1e-05, %v10550_v54  ;;  %v10485_v61 = vpop.xlane.xlu0 %10484 }
0x1270   : > { %v10714_v45 = vadd.f32 %v20352_v62, %v10676_v40  ;;  %v10640_v14 = vmul.f32 %v15579_v13, %v20178_v4  ;;  %15588 = vrsqrt.f32 %v10583_v17  ;;  %v10553_v30 = vmul.f32 0.03125, %v10485_v61  ;;  %v10482_v22 = vpop.xlane.xlu1 %10481 }
0x1271   : > { %10747 = vst.msk [vmem:[%s20361_s30 + $0x18] sm:$0xff] %vm492_vm0, %v10715_v21  ;;  %v10679_v3 = vmul.f32 %v20346_v2, %v10641_v15  ;;  %15590 = vrsqrt.f32 %v10582_v25  ;;  %v10552_v18 = vmul.f32 0.03125, %v10482_v22 }
0x1272   : > { %v15581_v60 = vpop.eup %15580  ;;  %10746 = vst.msk [vmem:[%s20361_s30 + $0x10] sm:$0xff] %vm492_vm0, %v10714_v45  ;;  %v10678_v57 = vmul.f32 %v20346_v2, %v10640_v14  ;;  %v10585_v20 = vadd.f32 1e-05, %v10553_v30 }
0x1273   : > { %v15583_v52 = vpop.eup %15582  ;;  %v10717_v4 = vadd.f32 %v20352_v62, %v10679_v3  ;;  %v10643_v11 = vmul.f32 %v15581_v60, %v20186_v32  ;;  %v10584_v6 = vadd.f32 1e-05, %v10552_v18  ;;  %v10491_v51 = vpop.xlane.xlu0 %10490 }
0x1274   : > { %v10716_v38 = vadd.f32 %v20352_v62, %v10678_v57  ;;  %v10642_v56 = vmul.f32 %v15583_v52, %v20190_v16  ;;  %15592 = vrsqrt.f32 %v10585_v20  ;;  %v10555_v50 = vmul.f32 0.03125, %v10491_v51  ;;  %v10488_v33 = vpop.xlane.xlu1 %10487 }
0x1275   : > { %10749 = vst.msk [vmem:[%s20361_s30 + $0x28] sm:$0xff] %vm492_vm0, %v10717_v4  ;;  %v10681_v59 = vmul.f32 %v20346_v2, %v10643_v11  ;;  %15594 = vrsqrt.f32 %v10584_v6  ;;  %v10554_v58 = vmul.f32 0.03125, %v10488_v33 }
0x1276   : > { %v15585_v23 = vpop.eup %15584  ;;  %10748 = vst.msk [vmem:[%s20361_s30 + $0x20] sm:$0xff] %vm492_vm0, %v10716_v38  ;;  %v10680_v32 = vmul.f32 %v20346_v2, %v10642_v56  ;;  %v10587_v48 = vadd.f32 1e-05, %v10555_v50 }
0x1277   : > { %v15587_v8 = vpop.eup %15586  ;;  %v10719_v16 = vadd.f32 %v20352_v62, %v10681_v59  ;;  %v10645_v19 = vmul.f32 %v15585_v23, %v20198_v42  ;;  %v10586_v55 = vadd.f32 1e-05, %v10554_v58 }
0x1278   : > { %v10718_v5 = vadd.f32 %v20352_v62, %v10680_v32  ;;  %v10644_v43 = vmul.f32 %v15587_v8, %v20202_v29  ;;  %15596 = vrsqrt.f32 %v10587_v48 }
0x1279   : > { %10751 = vst.msk [vmem:[%s20361_s30 + $0x38] sm:$0xff] %vm492_vm0, %v10719_v16  ;;  %v10683_v54 = vmul.f32 %v20346_v2, %v10645_v19  ;;  %15598 = vrsqrt.f32 %v10586_v55 }
0x127a   : > { %v15589_v41 = vpop.eup %15588  ;;  %10750 = vst.msk [vmem:[%s20361_s30 + $0x30] sm:$0xff] %vm492_vm0, %v10718_v5  ;;  %v10682_v40 = vmul.f32 %v20346_v2, %v10644_v43 }
0x127b   : > { %v15591_v42 = vpop.eup %15590  ;;  %v10721_v17 = vadd.f32 %v20352_v62, %v10683_v54  ;;  %v10647_v13 = vmul.f32 %v15589_v41, %v20210_v1 }
0x127c   : > { %v10720_v29 = vadd.f32 %v20352_v62, %v10682_v40  ;;  %v10646_v21 = vmul.f32 %v15591_v42, %v20214_v31 }
0x127d   : > { %10753 = vst.msk [vmem:[%s20361_s30 + $0x48] sm:$0xff] %vm492_vm0, %v10721_v17  ;;  %v10685_v15 = vmul.f32 %v20346_v2, %v10647_v13 }
0x127e   : > { %v15593_v25 = vpop.eup %15592  ;;  %10752 = vst.msk [vmem:[%s20361_s30 + $0x40] sm:$0xff] %vm492_vm0, %v10720_v29  ;;  %v10684_v61 = vmul.f32 %v20346_v2, %v10646_v21 }
0x127f   : > { %v15595_v45 = vpop.eup %15594  ;;  %v10723_v14 = vadd.f32 %v20352_v62, %v10685_v15  ;;  %v10649_v1 = vmul.f32 %v15593_v25, %v20222_v0 }
0x1280   : > { %v10722_v30 = vadd.f32 %v20352_v62, %v10684_v61  ;;  %v10648_v31 = vmul.f32 %v15595_v45, %v20226_v26 }
0x1281   : > { %10755 = vst.msk [vmem:[%s20361_s30 + $0x58] sm:$0xff] %vm492_vm0, %v10723_v14  ;;  %v10687_v22 = vmul.f32 %v20346_v2, %v10649_v1 }
0x1282   : > { %v15597_v3 = vpop.eup %15596  ;;  %10754 = vst.msk [vmem:[%s20361_s30 + $0x50] sm:$0xff] %vm492_vm0, %v10722_v30  ;;  %v10686_v18 = vmul.f32 %v20346_v2, %v10648_v31 }
0x1283   : > { %v15599_v60 = vpop.eup %15598  ;;  %v10725_v57 = vadd.f32 %v20352_v62, %v10687_v22  ;;  %v10651_v0 = vmul.f32 %v15597_v3, %v20234_v28 }
0x1284   : > { %v10724_v20 = vadd.f32 %v20352_v62, %v10686_v18  ;;  %v10650_v26 = vmul.f32 %v15599_v60, %v20238_v39 }
0x1285   : > { %10757 = vst.msk [vmem:[%s20361_s30 + $0x68] sm:$0xff] %vm492_vm0, %v10725_v57  ;;  %v10689_v52 = vmul.f32 %v20346_v2, %v10651_v0 }
0x1286   : > { %10756 = vst.msk [vmem:[%s20361_s30 + $0x60] sm:$0xff] %vm492_vm0, %v10724_v20  ;;  %v10688_v4 = vmul.f32 %v20346_v2, %v10650_v26 }
0x1287   : > { %v10727_v11 = vadd.f32 %v20352_v62, %v10689_v52 }
0x1288   : > { %v10726_v6 = vadd.f32 %v20352_v62, %v10688_v4 }
0x1289   : > { %10759 = vst.msk [vmem:[%s20361_s30 + $0x78] sm:$0xff] %vm492_vm0, %v10727_v11 }
0x128a   : > { %10758 = vst.msk [vmem:[%s20361_s30 + $0x70] sm:$0xff] %vm492_vm0, %v10726_v6 }
0x12c6   : > { %v10497_v28 = vpop.xlane.xlu0 %10496 }
0x12c7   : > { %v10557_v51 = vmul.f32 0.03125, %v10497_v28  ;;  %v10494_v38 = vpop.xlane.xlu1 %10493 }
0x12c8   : > { %v10556_v39 = vmul.f32 0.03125, %v10494_v38 }
0x12c9   : > { %v10589_v56 = vadd.f32 1e-05, %v10557_v51 }
0x12ca   : > { %v10588_v50 = vadd.f32 1e-05, %v10556_v39 }
0x12cb   : > { %15600 = vrsqrt.f32 %v10589_v56 }
0x12cc   : > { %15602 = vrsqrt.f32 %v10588_v50 }
0x12ce   : > { %v10503_v33 = vpop.xlane.xlu0 %10502 }
0x12cf   : > { %v10559_v59 = vmul.f32 0.03125, %v10503_v33  ;;  %v10500_v58 = vpop.xlane.xlu1 %10499 }
0x12d0   : > { %v10558_v23 = vmul.f32 0.03125, %v10500_v58 }
0x12d1   : > { %v10591_v32 = vadd.f32 1e-05, %v10559_v59 }
0x12d2   : > { %v10590_v48 = vadd.f32 1e-05, %v10558_v23 }
0x12d3   : > { %15604 = vrsqrt.f32 %v10591_v32 }
0x12d4   : > { %15606 = vrsqrt.f32 %v10590_v48  ;;  %v10509_v8 = vpop.xlane.xlu0 %10508 }
0x12d5   : > { %v15601_v16 = vpop.eup %15600  ;;  %v10561_v19 = vmul.f32 0.03125, %v10509_v8  ;;  %v10506_v55 = vpop.xlane.xlu1 %10505 }
0x12d6   : > { %v15603_v5 = vpop.eup %15602  ;;  %v10653_v43 = vmul.f32 %v15601_v16, %v20248_v44  ;;  %v10560_v54 = vmul.f32 0.03125, %v10506_v55 }
0x12d7   : > { %v10652_v41 = vmul.f32 %v15603_v5, %v20251_v47  ;;  %v10593_v40 = vadd.f32 1e-05, %v10561_v19 }
0x12d8   : > { %v10691_v42 = vmul.f32 %v20346_v2, %v10653_v43  ;;  %v10592_v17 = vadd.f32 1e-05, %v10560_v54  ;;  %v10515_v13 = vpop.xlane.xlu0 %10514 }
0x12d9   : > { %v10690_v29 = vmul.f32 %v20346_v2, %v10652_v41  ;;  %15608 = vrsqrt.f32 %v10593_v40  ;;  %v10563_v21 = vmul.f32 0.03125, %v10515_v13  ;;  %v10512_v15 = vpop.xlane.xlu1 %10511 }
0x12da   : > { %v10729_v25 = vadd.f32 %v20352_v62, %v10691_v42  ;;  %15610 = vrsqrt.f32 %v10592_v17  ;;  %v10562_v61 = vmul.f32 0.03125, %v10512_v15 }
0x12db   : > { %v10728_v44 = vadd.f32 %v20352_v62, %v10690_v29  ;;  %v10595_v45 = vadd.f32 1e-05, %v10563_v21 }
0x12dc   : > { %10761 = vst.msk [vmem:[%s20361_s30 + $0x88] sm:$0xff] %vm492_vm0, %v10729_v25  ;;  %v10594_v47 = vadd.f32 1e-05, %v10562_v61  ;;  %v10521_v14 = vpop.xlane.xlu0 %10520 }
0x12dd   : > { %v15605_v1 = vpop.eup %15604  ;;  %10760 = vst.msk [vmem:[%s20361_s30 + $0x80] sm:$0xff] %vm492_vm0, %v10728_v44  ;;  %15612 = vrsqrt.f32 %v10595_v45  ;;  %v10565_v30 = vmul.f32 0.03125, %v10521_v14  ;;  %v10518_v31 = vpop.xlane.xlu1 %10517 }
0x12de   : > { %v15607_v22 = vpop.eup %15606  ;;  %v10655_v3 = vmul.f32 %v15605_v1, %v20260_v37  ;;  %15614 = vrsqrt.f32 %v10594_v47  ;;  %v10564_v18 = vmul.f32 0.03125, %v10518_v31 }
0x12df   : > { %v10654_v60 = vmul.f32 %v15607_v22, %v20263_v46  ;;  %v10597_v57 = vadd.f32 1e-05, %v10565_v30 }
0x12e0   : > { %v10693_v0 = vmul.f32 %v20346_v2, %v10655_v3  ;;  %v10596_v20 = vadd.f32 1e-05, %v10564_v18  ;;  %v10527_v26 = vpop.xlane.xlu0 %10526 }
0x12e1   : > { %v10692_v52 = vmul.f32 %v20346_v2, %v10654_v60  ;;  %15616 = vrsqrt.f32 %v10597_v57  ;;  %v10567_v4 = vmul.f32 0.03125, %v10527_v26  ;;  %v10524_v11 = vpop.xlane.xlu1 %10523 }
0x12e2   : > { %v10731_v6 = vadd.f32 %v20352_v62, %v10693_v0  ;;  %15618 = vrsqrt.f32 %v10596_v20  ;;  %v10566_v37 = vmul.f32 0.03125, %v10524_v11 }
0x12e3   : > { %v15609_v28 = vpop.eup %15608  ;;  %v10730_v51 = vadd.f32 %v20352_v62, %v10692_v52  ;;  %v10599_v46 = vadd.f32 1e-05, %v10567_v4 }
0x12e4   : > { %v15611_v38 = vpop.eup %15610  ;;  %10763 = vst.msk [vmem:[%s20361_s30 + $0x98] sm:$0xff] %vm492_vm0, %v10731_v6  ;;  %v10657_v39 = vmul.f32 %v15609_v28, %v20272_v53  ;;  %v10598_v56 = vadd.f32 1e-05, %v10566_v37  ;;  %v10533_v50 = vpop.xlane.xlu0 %10532 }
0x12e5   : > { %10762 = vst.msk [vmem:[%s20361_s30 + $0x90] sm:$0xff] %vm492_vm0, %v10730_v51  ;;  %v10656_v33 = vmul.f32 %v15611_v38, %v20275_v24  ;;  %15620 = vrsqrt.f32 %v10599_v46  ;;  %v10569_v59 = vmul.f32 0.03125, %v10533_v50  ;;  %v10530_v58 = vpop.xlane.xlu1 %10529 }
0x12e6   : > { %v10695_v23 = vmul.f32 %v20346_v2, %v10657_v39  ;;  %15622 = vrsqrt.f32 %v10598_v56  ;;  %v10568_v32 = vmul.f32 0.03125, %v10530_v58 }
0x12e7   : > { %v15613_v48 = vpop.eup %15612  ;;  %v10694_v8 = vmul.f32 %v20346_v2, %v10656_v33  ;;  %v10601_v16 = vadd.f32 1e-05, %v10569_v59 }
0x12e8   : > { %v15615_v53 = vpop.eup %15614  ;;  %v10733_v19 = vadd.f32 %v20352_v62, %v10695_v23  ;;  %v10659_v55 = vmul.f32 %v15613_v48, %v20282_v63  ;;  %v10600_v5 = vadd.f32 1e-05, %v10568_v32  ;;  %v10539_v24 = vpop.xlane.xlu0 %10538 }
0x12e9   : > { %v10732_v43 = vadd.f32 %v20352_v62, %v10694_v8  ;;  %v10658_v54 = vmul.f32 %v15615_v53, %v20286_v7  ;;  %15624 = vrsqrt.f32 %v10601_v16  ;;  %v10571_v41 = vmul.f32 0.03125, %v10539_v24  ;;  %v10536_v40 = vpop.xlane.xlu1 %10535 }
0x12ea   : > { %10765 = vst.msk [vmem:[%s20361_s30 + $0xa8] sm:$0xff] %vm492_vm0, %v10733_v19  ;;  %v10697_v42 = vmul.f32 %v20346_v2, %v10659_v55  ;;  %15626 = vrsqrt.f32 %v10600_v5  ;;  %v10570_v17 = vmul.f32 0.03125, %v10536_v40 }
0x12eb   : > { %v15617_v13 = vpop.eup %15616  ;;  %10764 = vst.msk [vmem:[%s20361_s30 + $0xa0] sm:$0xff] %vm492_vm0, %v10732_v43  ;;  %v10696_v63 = vmul.f32 %v20346_v2, %v10658_v54  ;;  %v10603_v29 = vadd.f32 1e-05, %v10571_v41 }
0x12ec   : > { %v15619_v21 = vpop.eup %15618  ;;  %v10735_v7 = vadd.f32 %v20352_v62, %v10697_v42  ;;  %v10661_v15 = vmul.f32 %v15617_v13, %v20294_v34  ;;  %v10602_v25 = vadd.f32 1e-05, %v10570_v17 }
0x12ed   : > { %v10734_v61 = vadd.f32 %v20352_v62, %v10696_v63  ;;  %v10660_v44 = vmul.f32 %v15619_v21, %v20298_v9  ;;  %15628 = vrsqrt.f32 %v10603_v29 }
0x12ee   : > { %10767 = vst.msk [vmem:[%s20361_s30 + $0xb8] sm:$0xff] %vm492_vm0, %v10735_v7  ;;  %v10699_v45 = vmul.f32 %v20346_v2, %v10661_v15  ;;  %15630 = vrsqrt.f32 %v10602_v25 }
0x12ef   : > { %v15621_v47 = vpop.eup %15620  ;;  %10766 = vst.msk [vmem:[%s20361_s30 + $0xb0] sm:$0xff] %vm492_vm0, %v10734_v61  ;;  %v10698_v14 = vmul.f32 %v20346_v2, %v10660_v44 }
0x12f0   : > { %v15623_v34 = vpop.eup %15622  ;;  %v10737_v1 = vadd.f32 %v20352_v62, %v10699_v45  ;;  %v10663_v30 = vmul.f32 %v15621_v47, %v20306_v35 }
0x12f1   : > { %v10736_v9 = vadd.f32 %v20352_v62, %v10698_v14  ;;  %v10662_v31 = vmul.f32 %v15623_v34, %v20310_v49 }
0x12f2   : > { %10769 = vst.msk [vmem:[%s20361_s30 + $0xc8] sm:$0xff] %vm492_vm0, %v10737_v1  ;;  %v10701_v22 = vmul.f32 %v20346_v2, %v10663_v30 }
0x12f3   : > { %v15625_v3 = vpop.eup %15624  ;;  %10768 = vst.msk [vmem:[%s20361_s30 + $0xc0] sm:$0xff] %vm492_vm0, %v10736_v9  ;;  %v10700_v18 = vmul.f32 %v20346_v2, %v10662_v31 }
0x12f4   : > { %v15627_v60 = vpop.eup %15626  ;;  %v10739_v57 = vadd.f32 %v20352_v62, %v10701_v22  ;;  %v10665_v35 = vmul.f32 %v15625_v3, %v20318_v36 }
0x12f5   : > { %v10738_v0 = vadd.f32 %v20352_v62, %v10700_v18  ;;  %v10664_v49 = vmul.f32 %v15627_v60, %v20322_v10 }
0x12f6   : > { %10771 = vst.msk [vmem:[%s20361_s30 + $0xd8] sm:$0xff] %vm492_vm0, %v10739_v57  ;;  %v10703_v20 = vmul.f32 %v20346_v2, %v10665_v35 }
0x12f7   : > { %v15629_v26 = vpop.eup %15628  ;;  %10770 = vst.msk [vmem:[%s20361_s30 + $0xd0] sm:$0xff] %vm492_vm0, %v10738_v0  ;;  %v10702_v52 = vmul.f32 %v20346_v2, %v10664_v49 }
0x12f8   : > { %v15631_v4 = vpop.eup %15630  ;;  %v10741_v11 = vadd.f32 %v20352_v62, %v10703_v20  ;;  %v10667_v36 = vmul.f32 %v15629_v26, %v20330_v27 }
0x12f9   : > { %v10740_v6 = vadd.f32 %v20352_v62, %v10702_v52  ;;  %v10666_v10 = vmul.f32 %v15631_v4, %v20334_v12 }
0x12fa   : > { %10773 = vst.msk [vmem:[%s20361_s30 + $0xe8] sm:$0xff] %vm492_vm0, %v10741_v11  ;;  %v10705_v37 = vmul.f32 %v20346_v2, %v10667_v36 }
0x12fb   : > { %10772 = vst.msk [vmem:[%s20361_s30 + $0xe0] sm:$0xff] %vm492_vm0, %v10740_v6  ;;  %v10704_v28 = vmul.f32 %v20346_v2, %v10666_v10 }
0x12fc   : > { %v10743_v51 = vadd.f32 %v20352_v62, %v10705_v37 }
0x12fd   : > { %v10742_v46 = vadd.f32 %v20352_v62, %v10704_v28 }
0x12fe   : > { %10775 = vst.msk [vmem:[%s20361_s30 + $0xf8] sm:$0xff] %vm492_vm0, %v10743_v51 }
0x12ff   : > { %10774 = vst.msk [vmem:[%s20361_s30 + $0xf0] sm:$0xff] %vm492_vm0, %v10742_v46 }
0x1300 PF: > { %s23_s25 = sadd.s32 1, %s15670_s25  }
0x1301   : > { %p20_p4 = scmp.ge.s32.totalorder %s23_s25, 4  }
0x1303   :  { %22 = sbr.rel (!%p20_p4) target bundleno = 1 (0x1), region = 102 }

</bundles_post_ra>
